<compile_context>
chip_gen: v7x
topology: tpu7x:2x2x1
jax: 0.10.0
libtpu: 0.0.40
codegen_flags: <defaults>
</compile_context>

<pallas_src>
import jax
import jax.numpy as jnp
from jax.experimental import pallas as pl
from jax.experimental.pallas import tpu as pltpu

_VMEM_LIMIT = 32 * 1024 * 1024  # headroom; safe on v5e/v6e/v7x


# --------------------------------------------------------------------------
# Kernel 1: conv-as-GEMM (bf16 in, f32 accumulate) + LeakyReLU(0.2).
# --------------------------------------------------------------------------
def _gemm_leaky_kernel(x_ref, w_ref, o_ref):
    y = jnp.dot(x_ref[...], w_ref[...], preferred_element_type=jnp.float32)
    y = jnp.where(y > 0, y, 0.2 * y)
    o_ref[...] = y.astype(o_ref.dtype)


def gemm_leaky(patches, w2d, *, tm=512):
    """patches: (M, K) bf16, w2d: (K, C) bf16 -> (M, C) bf16."""
    M, K = patches.shape
    _, C = w2d.shape
    # Collapse to a single block when M is small (avoid per-step overhead)
    # or when M does not tile evenly.
    if M <= 1024 or M % tm != 0:
        tm = M
    return pl.pallas_call(
        _gemm_leaky_kernel,
        out_shape=jax.ShapeDtypeStruct((M, C), jnp.bfloat16),
        grid=(M // tm,),
        in_specs=[
            pl.BlockSpec((tm, K), lambda i: (i, 0)),
            pl.BlockSpec((K, C), lambda i: (0, 0)),
        ],
        out_specs=pl.BlockSpec((tm, C), lambda i: (i, 0)),
        compiler_params=pltpu.CompilerParams(
            dimension_semantics=("parallel",),
            vmem_limit_bytes=_VMEM_LIMIT,
        ),
    )(patches, w2d)


# --------------------------------------------------------------------------
# Kernel 2: conv-as-GEMM fused with BatchNorm (batch stats, biased var,
#           eps=1e-5) + LeakyReLU(0.2).  One block sees all M rows, so the
#           per-channel reduction is exact.  One-pass sum / sum-of-squares.
# --------------------------------------------------------------------------
def _gemm_bn_leaky_kernel(x_ref, w_ref, g_ref, b_ref, o_ref):
    y = jnp.dot(x_ref[...], w_ref[...], preferred_element_type=jnp.float32)
    m = y.shape[0]
    inv_m = 1.0 / float(m)
    s = jnp.sum(y, axis=0, keepdims=True)
    ss = jnp.sum(y * y, axis=0, keepdims=True)
    mean = s * inv_m
    var = ss * inv_m - mean * mean          # biased variance (PyTorch BN fwd)
    var = jnp.maximum(var, 0.0)             # guard against f32 cancellation
    scale = jax.lax.rsqrt(var + 1e-5) * g_ref[...]
    z = (y - mean) * scale + b_ref[...]
    z = jnp.where(z > 0, z, 0.2 * z)
    o_ref[...] = z.astype(o_ref.dtype)


def gemm_bn_leaky(patches, w2d, gamma, beta):
    M, K = patches.shape
    _, C = w2d.shape
    g = gamma.reshape(1, C).astype(jnp.float32)
    b = beta.reshape(1, C).astype(jnp.float32)
    return pl.pallas_call(
        _gemm_bn_leaky_kernel,
        out_shape=jax.ShapeDtypeStruct((M, C), jnp.bfloat16),
        grid=(1,),
        in_specs=[
            pl.BlockSpec((M, K), lambda i: (0, 0)),
            pl.BlockSpec((K, C), lambda i: (0, 0)),
            pl.BlockSpec((1, C), lambda i: (0, 0)),
            pl.BlockSpec((1, C), lambda i: (0, 0)),
        ],
        out_specs=pl.BlockSpec((M, C), lambda i: (0, 0)),
        compiler_params=pltpu.CompilerParams(
            dimension_semantics=("arbitrary",),
            vmem_limit_bytes=_VMEM_LIMIT,
        ),
    )(patches, w2d, g, b)


# --------------------------------------------------------------------------
# Kernel 3: final 1-output-channel conv as a lane-dense VPU reduction + sigmoid
#           (avoids a single-column MXU matmul with masked partial stores).
# --------------------------------------------------------------------------
def _dot_sigmoid_kernel(x_ref, w_ref, o_ref):
    x = x_ref[...].astype(jnp.float32)
    w = w_ref[...].astype(jnp.float32)
    s = jnp.sum(x * w, axis=-1, keepdims=True)   # (M, 1)
    o_ref[...] = 1.0 / (1.0 + jnp.exp(-s))


def dot_sigmoid(patches, w_row):
    """patches: (M, K) bf16, w_row: (1, K) bf16 -> (M, 1) f32."""
    M, K = patches.shape
    return pl.pallas_call(
        _dot_sigmoid_kernel,
        out_shape=jax.ShapeDtypeStruct((M, 1), jnp.float32),
        grid=(1,),
        in_specs=[
            pl.BlockSpec((M, K), lambda i: (0, 0)),
            pl.BlockSpec((1, K), lambda i: (0, 0)),
        ],
        out_specs=pl.BlockSpec((M, 1), lambda i: (0, 0)),
        compiler_params=pltpu.CompilerParams(
            dimension_semantics=("arbitrary",),
            vmem_limit_bytes=_VMEM_LIMIT,
        ),
    )(patches, w_row)


# --------------------------------------------------------------------------
# Plain-JAX glue: im2col patch extraction (NHWC internal layout).
# Patches are laid out (N*Ho*Wo, k*k*C) with (kh, kw, C) flattening so the
# weight only needs the cheap transpose w.transpose(2, 3, 1, 0).
# --------------------------------------------------------------------------
def im2col_nhwc(x, k, stride, pad):
    N, H, W, C = x.shape
    Ho = (H + 2 * pad - k) // stride + 1
    Wo = (W + 2 * pad - k) // stride + 1
    xp = jnp.pad(x, ((0, 0), (pad, pad), (pad, pad), (0, 0)))
    cols = []
    for i in range(k):
        for j in range(k):
            cols.append(xp[:, i:i + stride * Ho:stride, j:j + stride * Wo:stride, :])
    p = jnp.stack(cols, axis=3)                 # (N, Ho, Wo, k*k, C)
    return p.reshape(N * Ho * Wo, k * k * C), Ho, Wo


def _w2d(w):
    """(Cout, Cin, k, k) PyTorch weight -> (k*k*Cin, Cout) bf16 GEMM weight."""
    Cout, Cin, k, _ = w.shape
    return w.transpose(2, 3, 1, 0).reshape(k * k * Cin, Cout).astype(jnp.bfloat16)


# --------------------------------------------------------------------------
# Forward pass of the Discriminator.
# --------------------------------------------------------------------------
def discriminator_forward(x_nchw, params):
    x = jnp.transpose(x_nchw, (0, 2, 3, 1)).astype(jnp.bfloat16)  # NCHW -> NHWC
    N = x.shape[0]

    # ---- conv1: Conv(3->64, 4, 2, 1) + LeakyReLU (lane-dense via 128-ch pad)
    w1 = params["conv1"]                                   # (64, 3, 4, 4)
    c1 = w1.shape[0]
    patches, Ho, Wo = im2col_nhwc(x, 4, 2, 1)              # (N*32*32, 48)
    w1p = jnp.pad(w1, ((0, 128 - c1), (0, 0), (0, 0), (0, 0)))
    y = gemm_leaky(patches, _w2d(w1p), tm=512)             # (M, 128) bf16
    x = y[:, :c1].reshape(N, Ho, Wo, c1)

    # ---- conv2..conv4: Conv + BatchNorm + LeakyReLU fused (single block)
    for name, bn in (("conv2", "bn2"), ("conv3", "bn3"), ("conv4", "bn4")):
        w = params[name]                                   # (Cout, Cin, 4, 4)
        Cout = w.shape[0]
        patches, Ho, Wo = im2col_nhwc(x, 4, 2, 1)
        gamma, beta = params[bn]
        y = gemm_bn_leaky(patches, _w2d(w), gamma, beta)   # (M, Cout) bf16
        x = y.reshape(N, Ho, Wo, Cout)

    # ---- conv5: Conv(512->1, 4, 1, 0) + Sigmoid as a VPU dot-reduce
    w5 = params["conv5"]                                   # (1, 512, 4, 4)
    patches, Ho, Wo = im2col_nhwc(x, 4, 1, 0)              # (N, 8192)
    w5v = _w2d(w5).reshape(1, -1)                          # (1, 8192) bf16
    y = dot_sigmoid(patches, w5v)                          # (N, 1) f32
    return y.reshape(N, 1, Ho, Wo)                         # (N, 1, 1, 1) NCHW


# --------------------------------------------------------------------------
# Deterministic parameter init (DCGAN-style N(0, 0.02) conv weights,
# BN gamma=1 / beta=0).
# --------------------------------------------------------------------------
def init_params(key):
    ks = jax.random.split(key, 5)

    def conv_w(k, shape):
        return (0.02 * jax.random.normal(k, shape)).astype(jnp.float32)

    return {
        "conv1": conv_w(ks[0], (64, 3, 4, 4)),
        "conv2": conv_w(ks[1], (128, 64, 4, 4)),
        "conv3": conv_w(ks[2], (256, 128, 4, 4)),
        "conv4": conv_w(ks[3], (512, 256, 4, 4)),
        "conv5": conv_w(ks[4], (1, 512, 4, 4)),
        "bn2": (jnp.ones((128,), jnp.float32), jnp.zeros((128,), jnp.float32)),
        "bn3": (jnp.ones((256,), jnp.float32), jnp.zeros((256,), jnp.float32)),
        "bn4": (jnp.ones((512,), jnp.float32), jnp.zeros((512,), jnp.float32)),
    }


if __name__ == "__main__":
    root = jax.random.PRNGKey(0)
    k_param, k_input = jax.random.split(root)

    params = init_params(k_param)
    # DCGAN discriminator architecture requires 64x64 spatial input to reach
    # the 4x4 -> 1x1 final conv; batch kept small.
    x = jax.random.normal(k_input, (2, 3, 64, 64), dtype=jnp.float32)

    fwd = jax.jit(lambda inp: discriminator_forward(inp, params))
    out = fwd(x)
    out = jax.block_until_ready(out)

    assert out.shape == (2, 1, 1, 1), out.shape
    assert out.dtype == jnp.float32
    assert bool(jnp.all((out >= 0.0) & (out <= 1.0)))  # sigmoid output range
    print("KERNEL_OK")
</pallas_src>

<mosaic_0001>
module attributes {stable_mosaic.version = 11 : i64} {
  func.func @_gemm_leaky_kernel(%arg0: i32, %arg1: memref<512x48xbf16, #tpu.memory_space<vmem>>, %arg2: memref<48x128xbf16, #tpu.memory_space<vmem>>, %arg3: memref<512x128xbf16, #tpu.memory_space<vmem>>) attributes {dimension_semantics = [#tpu.dimension_semantics<parallel>], iteration_bounds = array<i64: 4>, scalar_prefetch = 0 : i64, scratch_operands = 0 : i64, tpu.core_type = #tpu.core_type<tc>, window_params = [{transform_indices = @transform_0, window_bounds = array<i64: 512, 48>}, {pipeline_mode = #tpu.pipeline_mode<synchronous>, transform_indices = @transform_1, window_bounds = array<i64: 48, 128>}, {transform_indices = @transform_2, window_bounds = array<i64: 512, 128>}]} {
    %c0 = arith.constant 0 : index
    %c0_0 = arith.constant 0 : index
    %0 = vector.load %arg1[%c0, %c0_0] : memref<512x48xbf16, #tpu.memory_space<vmem>>, vector<512x48xbf16>
    %c0_1 = arith.constant 0 : index
    %c0_2 = arith.constant 0 : index
    %1 = vector.load %arg2[%c0_1, %c0_2] : memref<48x128xbf16, #tpu.memory_space<vmem>>, vector<48x128xbf16>
    %cst = arith.constant dense<0.000000e+00> : vector<512x128xf32>
    %2 = tpu.matmul %0, %1, %cst {dimension_numbers = #tpu.dot_dimension_numbers<[1], [0], [0], [1], [0, 0, 1, 1], [], []>} : vector<512x48xbf16>, vector<48x128xbf16>, vector<512x128xf32> -> vector<512x128xf32>
    %cst_3 = arith.constant 0.000000e+00 : f32
    %3 = vector.broadcast %cst_3 : f32 to vector<512x128xf32>
    %4 = arith.cmpf ogt, %2, %3 : vector<512x128xf32>
    %cst_4 = arith.constant 2.000000e-01 : f32
    %5 = vector.broadcast %cst_4 : f32 to vector<512x128xf32>
    %6 = arith.mulf %5, %2 : vector<512x128xf32>
    %7 = arith.select %4, %2, %6 : vector<512x128xi1>, vector<512x128xf32>
    %8 = arith.truncf %7 : vector<512x128xf32> to vector<512x128xbf16>
    %c0_5 = arith.constant 0 : index
    %c0_6 = arith.constant 0 : index
    %9 = vector.load %arg3[%c0_5, %c0_6] : memref<512x128xbf16, #tpu.memory_space<vmem>>, vector<512x128xbf16>
    tpu.vector_store %arg3[%c0_5, %c0_6], %8 {strides = array<i32>} : memref<512x128xbf16, #tpu.memory_space<vmem>>, vector<512x128xbf16>,
    return
  }
  func.func @transform_0(%arg0: i32) -> (i32, i32) {
    %c0_i32 = arith.constant 0 : i32
    %c0_i32_0 = arith.constant 0 : i32
    return %arg0, %c0_i32 : i32, i32
  }
  func.func @transform_1(%arg0: i32) -> (i32, i32) {
    %c0_i32 = arith.constant 0 : i32
    %c0_i32_0 = arith.constant 0 : i32
    %c0_i32_1 = arith.constant 0 : i32
    return %c0_i32, %c0_i32_0 : i32, i32
  }
  func.func @transform_2(%arg0: i32) -> (i32, i32) {
    %c0_i32 = arith.constant 0 : i32
    %c0_i32_0 = arith.constant 0 : i32
    return %arg0, %c0_i32 : i32, i32
  }
}

module attributes {stable_mosaic.version = 11 : i64} {
  func.func @_gemm_bn_leaky_kernel(%arg0: i32, %arg1: memref<512x1024xbf16, #tpu.memory_space<vmem>>, %arg2: memref<1024x128xbf16, #tpu.memory_space<vmem>>, %arg3: memref<1x128xf32, #tpu.memory_space<vmem>>, %arg4: memref<1x128xf32, #tpu.memory_space<vmem>>, %arg5: memref<512x128xbf16, #tpu.memory_space<vmem>>) attributes {dimension_semantics = [#tpu.dimension_semantics<arbitrary>], iteration_bounds = array<i64: 1>, scalar_prefetch = 0 : i64, scratch_operands = 0 : i64, tpu.core_type = #tpu.core_type<tc>, window_params = [{pipeline_mode = #tpu.pipeline_mode<synchronous>, transform_indices = @transform_0, window_bounds = array<i64: 512, 1024>}, {pipeline_mode = #tpu.pipeline_mode<synchronous>, transform_indices = @transform_1, window_bounds = array<i64: 1024, 128>}, {pipeline_mode = #tpu.pipeline_mode<synchronous>, transform_indices = @transform_2, window_bounds = array<i64: 1, 128>}, {pipeline_mode = #tpu.pipeline_mode<synchronous>, transform_indices = @transform_3, window_bounds = array<i64: 1, 128>}, {pipeline_mode = #tpu.pipeline_mode<synchronous>, transform_indices = @transform_4, window_bounds = array<i64: 512, 128>}]} {
    %c0 = arith.constant 0 : index
    %c0_0 = arith.constant 0 : index
    %0 = vector.load %arg1[%c0, %c0_0] : memref<512x1024xbf16, #tpu.memory_space<vmem>>, vector<512x1024xbf16>
    %c0_1 = arith.constant 0 : index
    %c0_2 = arith.constant 0 : index
    %1 = vector.load %arg2[%c0_1, %c0_2] : memref<1024x128xbf16, #tpu.memory_space<vmem>>, vector<1024x128xbf16>
    %cst = arith.constant dense<0.000000e+00> : vector<512x128xf32>
    %2 = tpu.matmul %0, %1, %cst {dimension_numbers = #tpu.dot_dimension_numbers<[1], [0], [0], [1], [0, 0, 1, 1], [], []>} : vector<512x1024xbf16>, vector<1024x128xbf16>, vector<512x128xf32> -> vector<512x128xf32>
    %cst_3 = arith.constant dense<0.000000e+00> : vector<128xf32>
    %3 = vector.multi_reduction <add>, %2, %cst_3 [0] : vector<512x128xf32> to vector<128xf32>
    %4 = vector.shape_cast %3 : vector<128xf32> to vector<1x128xf32>
    %5 = arith.mulf %2, %2 : vector<512x128xf32>
    %cst_4 = arith.constant dense<0.000000e+00> : vector<128xf32>
    %6 = vector.multi_reduction <add>, %5, %cst_4 [0] : vector<512x128xf32> to vector<128xf32>
    %7 = vector.shape_cast %6 : vector<128xf32> to vector<1x128xf32>
    %cst_5 = arith.constant 0.001953125 : f32
    %8 = vector.broadcast %cst_5 : f32 to vector<1x128xf32>
    %9 = arith.mulf %4, %8 : vector<1x128xf32>
    %cst_6 = arith.constant 0.001953125 : f32
    %10 = vector.broadcast %cst_6 : f32 to vector<1x128xf32>
    %11 = arith.mulf %7, %10 : vector<1x128xf32>
    %12 = arith.mulf %9, %9 : vector<1x128xf32>
    %13 = arith.subf %11, %12 : vector<1x128xf32>
    %cst_7 = arith.constant 0.000000e+00 : f32
    %14 = vector.broadcast %cst_7 : f32 to vector<1x128xf32>
    %15 = arith.maximumf %13, %14 : vector<1x128xf32>
    %cst_8 = arith.constant 9.99999974E-6 : f32
    %16 = vector.broadcast %cst_8 : f32 to vector<1x128xf32>
    %17 = arith.addf %15, %16 : vector<1x128xf32>
    %18 = math.rsqrt %17 : vector<1x128xf32>
    %c0_9 = arith.constant 0 : index
    %c0_10 = arith.constant 0 : index
    %19 = vector.load %arg3[%c0_9, %c0_10] : memref<1x128xf32, #tpu.memory_space<vmem>>, vector<1x128xf32>
    %20 = arith.mulf %18, %19 : vector<1x128xf32>
    %21 = vector.broadcast %9 : vector<1x128xf32> to vector<512x128xf32>
    %22 = arith.subf %2, %21 : vector<512x128xf32>
    %23 = vector.broadcast %20 : vector<1x128xf32> to vector<512x128xf32>
    %24 = arith.mulf %22, %23 : vector<512x128xf32>
    %c0_11 = arith.constant 0 : index
    %c0_12 = arith.constant 0 : index
    %25 = vector.load %arg4[%c0_11, %c0_12] : memref<1x128xf32, #tpu.memory_space<vmem>>, vector<1x128xf32>
    %26 = vector.broadcast %25 : vector<1x128xf32> to vector<512x128xf32>
    %27 = arith.addf %24, %26 : vector<512x128xf32>
    %cst_13 = arith.constant 0.000000e+00 : f32
    %28 = vector.broadcast %cst_13 : f32 to vector<512x128xf32>
    %29 = arith.cmpf ogt, %27, %28 : vector<512x128xf32>
    %cst_14 = arith.constant 2.000000e-01 : f32
    %30 = vector.broadcast %cst_14 : f32 to vector<512x128xf32>
    %31 = arith.mulf %30, %27 : vector<512x128xf32>
    %32 = arith.select %29, %27, %31 : vector<512x128xi1>, vector<512x128xf32>
    %33 = arith.truncf %32 : vector<512x128xf32> to vector<512x128xbf16>
    %c0_15 = arith.constant 0 : index
    %c0_16 = arith.constant 0 : index
    %34 = vector.load %arg5[%c0_15, %c0_16] : memref<512x128xbf16, #tpu.memory_space<vmem>>, vector<512x128xbf16>
    tpu.vector_store %arg5[%c0_15, %c0_16], %33 {strides = array<i32>} : memref<512x128xbf16, #tpu.memory_space<vmem>>, vector<512x128xbf16>,
    return
  }
  func.func @transform_0(%arg0: i32) -> (i32, i32) {
    %c0_i32 = arith.constant 0 : i32
    %c0_i32_0 = arith.constant 0 : i32
    %c0_i32_1 = arith.constant 0 : i32
    return %c0_i32, %c0_i32_0 : i32, i32
  }
  func.func @transform_1(%arg0: i32) -> (i32, i32) {
    %c0_i32 = arith.constant 0 : i32
    %c0_i32_0 = arith.constant 0 : i32
    %c0_i32_1 = arith.constant 0 : i32
    return %c0_i32, %c0_i32_0 : i32, i32
  }
  func.func @transform_2(%arg0: i32) -> (i32, i32) {
    %c0_i32 = arith.constant 0 : i32
    %c0_i32_0 = arith.constant 0 : i32
    %c0_i32_1 = arith.constant 0 : i32
    return %c0_i32, %c0_i32_0 : i32, i32
  }
  func.func @transform_3(%arg0: i32) -> (i32, i32) {
    %c0_i32 = arith.constant 0 : i32
    %c0_i32_0 = arith.constant 0 : i32
    %c0_i32_1 = arith.constant 0 : i32
    return %c0_i32, %c0_i32_0 : i32, i32
  }
  func.func @transform_4(%arg0: i32) -> (i32, i32) {
    %c0_i32 = arith.constant 0 : i32
    %c0_i32_0 = arith.constant 0 : i32
    %c0_i32_1 = arith.constant 0 : i32
    return %c0_i32, %c0_i32_0 : i32, i32
  }
}

module attributes {stable_mosaic.version = 11 : i64} {
  func.func @_gemm_bn_leaky_kernel(%arg0: i32, %arg1: memref<128x2048xbf16, #tpu.memory_space<vmem>>, %arg2: memref<2048x256xbf16, #tpu.memory_space<vmem>>, %arg3: memref<1x256xf32, #tpu.memory_space<vmem>>, %arg4: memref<1x256xf32, #tpu.memory_space<vmem>>, %arg5: memref<128x256xbf16, #tpu.memory_space<vmem>>) attributes {dimension_semantics = [#tpu.dimension_semantics<arbitrary>], iteration_bounds = array<i64: 1>, scalar_prefetch = 0 : i64, scratch_operands = 0 : i64, tpu.core_type = #tpu.core_type<tc>, window_params = [{pipeline_mode = #tpu.pipeline_mode<synchronous>, transform_indices = @transform_0, window_bounds = array<i64: 128, 2048>}, {pipeline_mode = #tpu.pipeline_mode<synchronous>, transform_indices = @transform_1, window_bounds = array<i64: 2048, 256>}, {pipeline_mode = #tpu.pipeline_mode<synchronous>, transform_indices = @transform_2, window_bounds = array<i64: 1, 256>}, {pipeline_mode = #tpu.pipeline_mode<synchronous>, transform_indices = @transform_3, window_bounds = array<i64: 1, 256>}, {pipeline_mode = #tpu.pipeline_mode<synchronous>, transform_indices = @transform_4, window_bounds = array<i64: 128, 256>}]} {
    %c0 = arith.constant 0 : index
    %c0_0 = arith.constant 0 : index
    %0 = vector.load %arg1[%c0, %c0_0] : memref<128x2048xbf16, #tpu.memory_space<vmem>>, vector<128x2048xbf16>
    %c0_1 = arith.constant 0 : index
    %c0_2 = arith.constant 0 : index
    %1 = vector.load %arg2[%c0_1, %c0_2] : memref<2048x256xbf16, #tpu.memory_space<vmem>>, vector<2048x256xbf16>
    %cst = arith.constant dense<0.000000e+00> : vector<128x256xf32>
    %2 = tpu.matmul %0, %1, %cst {dimension_numbers = #tpu.dot_dimension_numbers<[1], [0], [0], [1], [0, 0, 1, 1], [], []>} : vector<128x2048xbf16>, vector<2048x256xbf16>, vector<128x256xf32> -> vector<128x256xf32>
    %cst_3 = arith.constant dense<0.000000e+00> : vector<256xf32>
    %3 = vector.multi_reduction <add>, %2, %cst_3 [0] : vector<128x256xf32> to vector<256xf32>
    %4 = vector.shape_cast %3 : vector<256xf32> to vector<1x256xf32>
    %5 = arith.mulf %2, %2 : vector<128x256xf32>
    %cst_4 = arith.constant dense<0.000000e+00> : vector<256xf32>
    %6 = vector.multi_reduction <add>, %5, %cst_4 [0] : vector<128x256xf32> to vector<256xf32>
    %7 = vector.shape_cast %6 : vector<256xf32> to vector<1x256xf32>
    %cst_5 = arith.constant 7.812500e-03 : f32
    %8 = vector.broadcast %cst_5 : f32 to vector<1x256xf32>
    %9 = arith.mulf %4, %8 : vector<1x256xf32>
    %cst_6 = arith.constant 7.812500e-03 : f32
    %10 = vector.broadcast %cst_6 : f32 to vector<1x256xf32>
    %11 = arith.mulf %7, %10 : vector<1x256xf32>
    %12 = arith.mulf %9, %9 : vector<1x256xf32>
    %13 = arith.subf %11, %12 : vector<1x256xf32>
    %cst_7 = arith.constant 0.000000e+00 : f32
    %14 = vector.broadcast %cst_7 : f32 to vector<1x256xf32>
    %15 = arith.maximumf %13, %14 : vector<1x256xf32>
    %cst_8 = arith.constant 9.99999974E-6 : f32
    %16 = vector.broadcast %cst_8 : f32 to vector<1x256xf32>
    %17 = arith.addf %15, %16 : vector<1x256xf32>
    %18 = math.rsqrt %17 : vector<1x256xf32>
    %c0_9 = arith.constant 0 : index
    %c0_10 = arith.constant 0 : index
    %19 = vector.load %arg3[%c0_9, %c0_10] : memref<1x256xf32, #tpu.memory_space<vmem>>, vector<1x256xf32>
    %20 = arith.mulf %18, %19 : vector<1x256xf32>
    %21 = vector.broadcast %9 : vector<1x256xf32> to vector<128x256xf32>
    %22 = arith.subf %2, %21 : vector<128x256xf32>
    %23 = vector.broadcast %20 : vector<1x256xf32> to vector<128x256xf32>
    %24 = arith.mulf %22, %23 : vector<128x256xf32>
    %c0_11 = arith.constant 0 : index
    %c0_12 = arith.constant 0 : index
    %25 = vector.load %arg4[%c0_11, %c0_12] : memref<1x256xf32, #tpu.memory_space<vmem>>, vector<1x256xf32>
    %26 = vector.broadcast %25 : vector<1x256xf32> to vector<128x256xf32>
    %27 = arith.addf %24, %26 : vector<128x256xf32>
    %cst_13 = arith.constant 0.000000e+00 : f32
    %28 = vector.broadcast %cst_13 : f32 to vector<128x256xf32>
    %29 = arith.cmpf ogt, %27, %28 : vector<128x256xf32>
    %cst_14 = arith.constant 2.000000e-01 : f32
    %30 = vector.broadcast %cst_14 : f32 to vector<128x256xf32>
    %31 = arith.mulf %30, %27 : vector<128x256xf32>
    %32 = arith.select %29, %27, %31 : vector<128x256xi1>, vector<128x256xf32>
    %33 = arith.truncf %32 : vector<128x256xf32> to vector<128x256xbf16>
    %c0_15 = arith.constant 0 : index
    %c0_16 = arith.constant 0 : index
    %34 = vector.load %arg5[%c0_15, %c0_16] : memref<128x256xbf16, #tpu.memory_space<vmem>>, vector<128x256xbf16>
    tpu.vector_store %arg5[%c0_15, %c0_16], %33 {strides = array<i32>} : memref<128x256xbf16, #tpu.memory_space<vmem>>, vector<128x256xbf16>,
    return
  }
  func.func @transform_0(%arg0: i32) -> (i32, i32) {
    %c0_i32 = arith.constant 0 : i32
    %c0_i32_0 = arith.constant 0 : i32
    %c0_i32_1 = arith.constant 0 : i32
    return %c0_i32, %c0_i32_0 : i32, i32
  }
  func.func @transform_1(%arg0: i32) -> (i32, i32) {
    %c0_i32 = arith.constant 0 : i32
    %c0_i32_0 = arith.constant 0 : i32
    %c0_i32_1 = arith.constant 0 : i32
    return %c0_i32, %c0_i32_0 : i32, i32
  }
  func.func @transform_2(%arg0: i32) -> (i32, i32) {
    %c0_i32 = arith.constant 0 : i32
    %c0_i32_0 = arith.constant 0 : i32
    %c0_i32_1 = arith.constant 0 : i32
    return %c0_i32, %c0_i32_0 : i32, i32
  }
  func.func @transform_3(%arg0: i32) -> (i32, i32) {
    %c0_i32 = arith.constant 0 : i32
    %c0_i32_0 = arith.constant 0 : i32
    %c0_i32_1 = arith.constant 0 : i32
    return %c0_i32, %c0_i32_0 : i32, i32
  }
  func.func @transform_4(%arg0: i32) -> (i32, i32) {
    %c0_i32 = arith.constant 0 : i32
    %c0_i32_0 = arith.constant 0 : i32
    %c0_i32_1 = arith.constant 0 : i32
    return %c0_i32, %c0_i32_0 : i32, i32
  }
}

module attributes {stable_mosaic.version = 11 : i64} {
  func.func @_gemm_bn_leaky_kernel(%arg0: i32, %arg1: memref<32x4096xbf16, #tpu.memory_space<vmem>>, %arg2: memref<4096x512xbf16, #tpu.memory_space<vmem>>, %arg3: memref<1x512xf32, #tpu.memory_space<vmem>>, %arg4: memref<1x512xf32, #tpu.memory_space<vmem>>, %arg5: memref<32x512xbf16, #tpu.memory_space<vmem>>) attributes {dimension_semantics = [#tpu.dimension_semantics<arbitrary>], iteration_bounds = array<i64: 1>, scalar_prefetch = 0 : i64, scratch_operands = 0 : i64, tpu.core_type = #tpu.core_type<tc>, window_params = [{pipeline_mode = #tpu.pipeline_mode<synchronous>, transform_indices = @transform_0, window_bounds = array<i64: 32, 4096>}, {pipeline_mode = #tpu.pipeline_mode<synchronous>, transform_indices = @transform_1, window_bounds = array<i64: 4096, 512>}, {pipeline_mode = #tpu.pipeline_mode<synchronous>, transform_indices = @transform_2, window_bounds = array<i64: 1, 512>}, {pipeline_mode = #tpu.pipeline_mode<synchronous>, transform_indices = @transform_3, window_bounds = array<i64: 1, 512>}, {pipeline_mode = #tpu.pipeline_mode<synchronous>, transform_indices = @transform_4, window_bounds = array<i64: 32, 512>}]} {
    %c0 = arith.constant 0 : index
    %c0_0 = arith.constant 0 : index
    %0 = vector.load %arg1[%c0, %c0_0] : memref<32x4096xbf16, #tpu.memory_space<vmem>>, vector<32x4096xbf16>
    %c0_1 = arith.constant 0 : index
    %c0_2 = arith.constant 0 : index
    %1 = vector.load %arg2[%c0_1, %c0_2] : memref<4096x512xbf16, #tpu.memory_space<vmem>>, vector<4096x512xbf16>
    %cst = arith.constant dense<0.000000e+00> : vector<32x512xf32>
    %2 = tpu.matmul %0, %1, %cst {dimension_numbers = #tpu.dot_dimension_numbers<[1], [0], [0], [1], [0, 0, 1, 1], [], []>} : vector<32x4096xbf16>, vector<4096x512xbf16>, vector<32x512xf32> -> vector<32x512xf32>
    %cst_3 = arith.constant dense<0.000000e+00> : vector<512xf32>
    %3 = vector.multi_reduction <add>, %2, %cst_3 [0] : vector<32x512xf32> to vector<512xf32>
    %4 = vector.shape_cast %3 : vector<512xf32> to vector<1x512xf32>
    %5 = arith.mulf %2, %2 : vector<32x512xf32>
    %cst_4 = arith.constant dense<0.000000e+00> : vector<512xf32>
    %6 = vector.multi_reduction <add>, %5, %cst_4 [0] : vector<32x512xf32> to vector<512xf32>
    %7 = vector.shape_cast %6 : vector<512xf32> to vector<1x512xf32>
    %cst_5 = arith.constant 3.125000e-02 : f32
    %8 = vector.broadcast %cst_5 : f32 to vector<1x512xf32>
    %9 = arith.mulf %4, %8 : vector<1x512xf32>
    %cst_6 = arith.constant 3.125000e-02 : f32
    %10 = vector.broadcast %cst_6 : f32 to vector<1x512xf32>
    %11 = arith.mulf %7, %10 : vector<1x512xf32>
    %12 = arith.mulf %9, %9 : vector<1x512xf32>
    %13 = arith.subf %11, %12 : vector<1x512xf32>
    %cst_7 = arith.constant 0.000000e+00 : f32
    %14 = vector.broadcast %cst_7 : f32 to vector<1x512xf32>
    %15 = arith.maximumf %13, %14 : vector<1x512xf32>
    %cst_8 = arith.constant 9.99999974E-6 : f32
    %16 = vector.broadcast %cst_8 : f32 to vector<1x512xf32>
    %17 = arith.addf %15, %16 : vector<1x512xf32>
    %18 = math.rsqrt %17 : vector<1x512xf32>
    %c0_9 = arith.constant 0 : index
    %c0_10 = arith.constant 0 : index
    %19 = vector.load %arg3[%c0_9, %c0_10] : memref<1x512xf32, #tpu.memory_space<vmem>>, vector<1x512xf32>
    %20 = arith.mulf %18, %19 : vector<1x512xf32>
    %21 = vector.broadcast %9 : vector<1x512xf32> to vector<32x512xf32>
    %22 = arith.subf %2, %21 : vector<32x512xf32>
    %23 = vector.broadcast %20 : vector<1x512xf32> to vector<32x512xf32>
    %24 = arith.mulf %22, %23 : vector<32x512xf32>
    %c0_11 = arith.constant 0 : index
    %c0_12 = arith.constant 0 : index
    %25 = vector.load %arg4[%c0_11, %c0_12] : memref<1x512xf32, #tpu.memory_space<vmem>>, vector<1x512xf32>
    %26 = vector.broadcast %25 : vector<1x512xf32> to vector<32x512xf32>
    %27 = arith.addf %24, %26 : vector<32x512xf32>
    %cst_13 = arith.constant 0.000000e+00 : f32
    %28 = vector.broadcast %cst_13 : f32 to vector<32x512xf32>
    %29 = arith.cmpf ogt, %27, %28 : vector<32x512xf32>
    %cst_14 = arith.constant 2.000000e-01 : f32
    %30 = vector.broadcast %cst_14 : f32 to vector<32x512xf32>
    %31 = arith.mulf %30, %27 : vector<32x512xf32>
    %32 = arith.select %29, %27, %31 : vector<32x512xi1>, vector<32x512xf32>
    %33 = arith.truncf %32 : vector<32x512xf32> to vector<32x512xbf16>
    %c0_15 = arith.constant 0 : index
    %c0_16 = arith.constant 0 : index
    %34 = vector.load %arg5[%c0_15, %c0_16] : memref<32x512xbf16, #tpu.memory_space<vmem>>, vector<32x512xbf16>
    tpu.vector_store %arg5[%c0_15, %c0_16], %33 {strides = array<i32>} : memref<32x512xbf16, #tpu.memory_space<vmem>>, vector<32x512xbf16>,
    return
  }
  func.func @transform_0(%arg0: i32) -> (i32, i32) {
    %c0_i32 = arith.constant 0 : i32
    %c0_i32_0 = arith.constant 0 : i32
    %c0_i32_1 = arith.constant 0 : i32
    return %c0_i32, %c0_i32_0 : i32, i32
  }
  func.func @transform_1(%arg0: i32) -> (i32, i32) {
    %c0_i32 = arith.constant 0 : i32
    %c0_i32_0 = arith.constant 0 : i32
    %c0_i32_1 = arith.constant 0 : i32
    return %c0_i32, %c0_i32_0 : i32, i32
  }
  func.func @transform_2(%arg0: i32) -> (i32, i32) {
    %c0_i32 = arith.constant 0 : i32
    %c0_i32_0 = arith.constant 0 : i32
    %c0_i32_1 = arith.constant 0 : i32
    return %c0_i32, %c0_i32_0 : i32, i32
  }
  func.func @transform_3(%arg0: i32) -> (i32, i32) {
    %c0_i32 = arith.constant 0 : i32
    %c0_i32_0 = arith.constant 0 : i32
    %c0_i32_1 = arith.constant 0 : i32
    return %c0_i32, %c0_i32_0 : i32, i32
  }
  func.func @transform_4(%arg0: i32) -> (i32, i32) {
    %c0_i32 = arith.constant 0 : i32
    %c0_i32_0 = arith.constant 0 : i32
    %c0_i32_1 = arith.constant 0 : i32
    return %c0_i32, %c0_i32_0 : i32, i32
  }
}

module attributes {stable_mosaic.version = 11 : i64} {
  func.func @_dot_sigmoid_kernel(%arg0: i32, %arg1: memref<2x8192xbf16, #tpu.memory_space<vmem>>, %arg2: memref<1x8192xbf16, #tpu.memory_space<vmem>>, %arg3: memref<2x1xf32, #tpu.memory_space<vmem>>) attributes {dimension_semantics = [#tpu.dimension_semantics<arbitrary>], iteration_bounds = array<i64: 1>, scalar_prefetch = 0 : i64, scratch_operands = 0 : i64, tpu.core_type = #tpu.core_type<tc>, window_params = [{pipeline_mode = #tpu.pipeline_mode<synchronous>, transform_indices = @transform_0, window_bounds = array<i64: 2, 8192>}, {pipeline_mode = #tpu.pipeline_mode<synchronous>, transform_indices = @transform_1, window_bounds = array<i64: 1, 8192>}, {pipeline_mode = #tpu.pipeline_mode<synchronous>, transform_indices = @transform_2, window_bounds = array<i64: 2, 1>}]} {
    %c0 = arith.constant 0 : index
    %c0_0 = arith.constant 0 : index
    %0 = vector.load %arg1[%c0, %c0_0] : memref<2x8192xbf16, #tpu.memory_space<vmem>>, vector<2x8192xbf16>
    %1 = arith.extf %0 : vector<2x8192xbf16> to vector<2x8192xf32>
    %c0_1 = arith.constant 0 : index
    %c0_2 = arith.constant 0 : index
    %2 = vector.load %arg2[%c0_1, %c0_2] : memref<1x8192xbf16, #tpu.memory_space<vmem>>, vector<1x8192xbf16>
    %3 = arith.extf %2 : vector<1x8192xbf16> to vector<1x8192xf32>
    %4 = vector.broadcast %3 : vector<1x8192xf32> to vector<2x8192xf32>
    %5 = arith.mulf %1, %4 : vector<2x8192xf32>
    %cst = arith.constant dense<0.000000e+00> : vector<2xf32>
    %6 = vector.multi_reduction <add>, %5, %cst [1] : vector<2x8192xf32> to vector<2xf32>
    %7 = vector.shape_cast %6 : vector<2xf32> to vector<2x1xf32>
    %cst_3 = arith.constant 0.000000e+00 : f32
    %8 = vector.broadcast %cst_3 : f32 to vector<2x1xf32>
    %9 = arith.subf %8, %7 : vector<2x1xf32>
    %10 = math.exp %9 : vector<2x1xf32>
    %cst_4 = arith.constant 1.000000e+00 : f32
    %11 = vector.broadcast %cst_4 : f32 to vector<2x1xf32>
    %12 = arith.addf %11, %10 : vector<2x1xf32>
    %cst_5 = arith.constant 1.000000e+00 : f32
    %13 = vector.broadcast %cst_5 : f32 to vector<2x1xf32>
    %14 = arith.divf %13, %12 : vector<2x1xf32>
    %c0_6 = arith.constant 0 : index
    %c0_7 = arith.constant 0 : index
    %15 = vector.load %arg3[%c0_6, %c0_7] : memref<2x1xf32, #tpu.memory_space<vmem>>, vector<2x1xf32>
    tpu.vector_store %arg3[%c0_6, %c0_7], %14 {strides = array<i32>} : memref<2x1xf32, #tpu.memory_space<vmem>>, vector<2x1xf32>,
    return
  }
  func.func @transform_0(%arg0: i32) -> (i32, i32) {
    %c0_i32 = arith.constant 0 : i32
    %c0_i32_0 = arith.constant 0 : i32
    %c0_i32_1 = arith.constant 0 : i32
    return %c0_i32, %c0_i32_0 : i32, i32
  }
  func.func @transform_1(%arg0: i32) -> (i32, i32) {
    %c0_i32 = arith.constant 0 : i32
    %c0_i32_0 = arith.constant 0 : i32
    %c0_i32_1 = arith.constant 0 : i32
    return %c0_i32, %c0_i32_0 : i32, i32
  }
  func.func @transform_2(%arg0: i32) -> (i32, i32) {
    %c0_i32 = arith.constant 0 : i32
    %c0_i32_0 = arith.constant 0 : i32
    %c0_i32_1 = arith.constant 0 : i32
    return %c0_i32, %c0_i32_0 : i32, i32
  }
}

</mosaic_0001>

<bundles_post_ra>
// kernel: _lambda_.5
= control target key start
LH: loop header
LB: loop body
LE: loop exit
PB: predicated region body
PF: predicated region fallthrough
CT: control target
= control target key end

     0   :  { %s1924_s9 = smov 0   ;;  %s2064_s0 = inlined_call_operand.vmem [shape: bf16[2048,48], index: 0, kind: input, shape index: {}]   ;;  %s2065_s1 = inlined_call_operand.vmem [shape: bf16[48,128], index: 1, kind: input, shape index: {}]   ;;  %s2066_s2 = inlined_call_operand.vmem [shape: bf16[2048,128], index: 2, kind: output, shape index: {}]  }
   0x1 LB: > { %s1350_s10 = sadd.s32 4294967295, %s1907_s9   ;;  %p1354_p0 = scmp.ge.s32.totalorder %s1907_s9, 1  ;;  %s1907_s9 = sphi %s1924_s9, %s12_s9  }
   0x2   : > { %p113_p1 = scmp.lt.s32.totalorder %s1907_s9, 5 }
   0x4   : > { %p114_p2 = pnand %p1354_p0, %p113_p1 }
   0x5   : > { %v1866_v0 = vld [vmem:[%s2065_s1] sm:$0xff] (!%p114_p2)   ;;  %s1355_s13 = sshll.u32 (!%p114_p2), %s1350_s10, 6  ;;  %v1867_v1 = vld [vmem:[%s2065_s1 + $0x8] sm:$0xff] (!%p114_p2)   ;;  %v1868_v2 = vld [vmem:[%s2065_s1 + $0x10] sm:$0xff] (!%p114_p2)   ;;  %vm396_vm0 = vcmask (!%p114_p2), 392192  }
   0x6   : > { %117 = sbr.rel (%p114_p2) target bundleno = 297 (0x129), region = 28  ;;  %p136_p3 = scmp.lt.s32.totalorder (!%p114_p2), %s1355_s13, 255  ;;  %1782 = vmatprep.subr.bf16.mxu0 (!%p114_p2), %v1866_v0  ;;  %1852 = vmatprep.subr.bf16.mxu1 (!%p114_p2), %v1866_v0 }
   0x7   : > { %1783 = vmatpush3.bf16.msra.mxu0 (!%p114_p2), %v1866_v0  ;;  %1855 = vmatpush3.bf16.msra.mxu1 (!%p114_p2), %v1866_v0 }
   0x8   : > { %1784 = vmatprep.subr.bf16.mxu0 (!%p114_p2), %v1867_v1  ;;  %1853 = vmatprep.subr.bf16.mxu1 (!%p114_p2), %v1867_v1 }
   0xb   : > { %1785 = vmatpush3.bf16.msra.mxu0 (!%p114_p2), %v1867_v1  ;;  %1856 = vmatpush3.bf16.msra.mxu1 (!%p114_p2), %v1867_v1 }
   0xc   : > { %1786 = vmatprep.subr.bf16.mxu0 (!%p114_p2), %v1868_v2  ;;  %1854 = vmatprep.subr.bf16.mxu1 (!%p114_p2), %v1868_v2 }
   0xd   : > { %s2068_s13 = smov (!%p136_p3, %s1355_s13), 255 }
   0xe   : > { %s1356_s18 = sshll.u32 %s2068_s13, 2 }
   0xf   : > { %s1949_s21 = scalar_lea.vmem %s2064_s0, %s1356_s18  ;;  %1787 = vmatpush3.bf16.msra.mxu0 %v1868_v2  ;;  %1857 = vmatpush3.bf16.msra.mxu1 %v1868_v2  ;;  %s2020_s24 = scalar_lea.vmem %s2066_s2, %s1356_s18 }
  0x10   : > { %v1869_v3 = vld [vmem:[%s1949_s21] sm:$0xff]   ;;  %v1871_v5 = vld [vmem:[%s1949_s21 + $0x8] sm:$0xff]   ;;  %v1873_v7 = vld [vmem:[%s1949_s21 + $0x10] sm:$0xff]  }
  0x11   : > { %v1870_v4 = vld [vmem:[%s1949_s21 + $0x80] sm:$0xff]   ;;  %1788 = vmatprep.mubr.msk.bf16.mxu0 %vm396_vm0, %v1869_v3  ;;  %v1872_v6 = vld [vmem:[%s1949_s21 + $0x88] sm:$0xff]   ;;  %v1874_v8 = vld [vmem:[%s1949_s21 + $0x90] sm:$0xff]  }
  0x12   : > { %1820 = vmatprep.mubr.msk.bf16.mxu1 %vm396_vm0, %v1870_v4  ;;  %1789 = vmatmul.mubr.msk.bf16.vlgmr.msra.gmra.mrb[0].mxu0 %vm396_vm0, %v1871_v5  ;;  %v1875_v9 = vld [vmem:[%s1949_s21 + $0x18] sm:$0xff]   ;;  %v1877_v11 = vld [vmem:[%s1949_s21 + $0x20] sm:$0xff]   ;;  %v1879_v13 = vld [vmem:[%s1949_s21 + $0x28] sm:$0xff]  }
  0x13   : > { %1821 = vmatmul.mubr.msk.bf16.vlgmr.msra.gmra.mrb[0].mxu1 %vm396_vm0, %v1872_v6  ;;  %1792 = vmatprep.mubr.msk.bf16.mxu0 %vm396_vm0, %v1873_v7  ;;  %v1876_v10 = vld [vmem:[%s1949_s21 + $0x98] sm:$0xff]   ;;  %v1878_v12 = vld [vmem:[%s1949_s21 + $0xa0] sm:$0xff]   ;;  %v1880_v14 = vld [vmem:[%s1949_s21 + $0xa8] sm:$0xff]  }
  0x14   : > { %1824 = vmatprep.mubr.msk.bf16.mxu1 %vm396_vm0, %v1874_v8  ;;  %v1881_v15 = vld [vmem:[%s1949_s21 + $0x30] sm:$0xff]   ;;  %v1883_v17 = vld [vmem:[%s1949_s21 + $0x38] sm:$0xff]   ;;  %v1885_v19 = vld [vmem:[%s1949_s21 + $0x40] sm:$0xff]  }
  0x15   : > { %v1882_v16 = vld [vmem:[%s1949_s21 + $0xb0] sm:$0xff]   ;;  %v1884_v18 = vld [vmem:[%s1949_s21 + $0xb8] sm:$0xff]   ;;  %v1886_v20 = vld [vmem:[%s1949_s21 + $0xc0] sm:$0xff]  }
  0x16   : > { %v1887_v21 = vld [vmem:[%s1949_s21 + $0x48] sm:$0xff]   ;;  %v1889_v23 = vld [vmem:[%s1949_s21 + $0x50] sm:$0xff]   ;;  %v1891_v25 = vld [vmem:[%s1949_s21 + $0x58] sm:$0xff]  }
  0x17   : > { %v1888_v22 = vld [vmem:[%s1949_s21 + $0xc8] sm:$0xff]   ;;  %v1890_v24 = vld [vmem:[%s1949_s21 + $0xd0] sm:$0xff]   ;;  %v1892_v26 = vld [vmem:[%s1949_s21 + $0xd8] sm:$0xff]  }
  0x18   : > { %v1893_v27 = vld [vmem:[%s1949_s21 + $0x60] sm:$0xff]   ;;  %v1895_v29 = vld [vmem:[%s1949_s21 + $0x68] sm:$0xff]   ;;  %v1897_v31 = vld [vmem:[%s1949_s21 + $0x70] sm:$0xff]  }
  0x19   : > { %v1894_v28 = vld [vmem:[%s1949_s21 + $0xe0] sm:$0xff]   ;;  %v1896_v30 = vld [vmem:[%s1949_s21 + $0xe8] sm:$0xff]   ;;  %v1898_v32 = vld [vmem:[%s1949_s21 + $0xf0] sm:$0xff]  }
  0x1a   : > { %1793 = vmatmul.mubr.msk.bf16.gmra.mrb[4].mxu0 %vm396_vm0, %v1875_v9  ;;  %v1899_v33 = vld [vmem:[%s1949_s21 + $0x78] sm:$0xff]  }
  0x1b   : > { %1825 = vmatmul.mubr.msk.bf16.gmra.mrb[4].mxu1 %vm396_vm0, %v1876_v10  ;;  %1796 = vmatprep.mubr.msk.bf16.mxu0 %vm396_vm0, %v1877_v11  ;;  %v1900_v34 = vld [vmem:[%s1949_s21 + $0xf8] sm:$0xff]  }
  0x1c   : > { %1828 = vmatprep.mubr.msk.bf16.mxu1 %vm396_vm0, %v1878_v12 }
  0x22   : > { %1797 = vmatmul.mubr.msk.bf16.gmra.mrb[8].mxu0 %vm396_vm0, %v1879_v13 }
  0x23   : > { %1829 = vmatmul.mubr.msk.bf16.gmra.mrb[8].mxu1 %vm396_vm0, %v1880_v14  ;;  %1800 = vmatprep.mubr.msk.bf16.mxu0 %vm396_vm0, %v1881_v15 }
  0x24   : > { %1832 = vmatprep.mubr.msk.bf16.mxu1 %vm396_vm0, %v1882_v16 }
  0x2a   : > { %1801 = vmatmul.mubr.msk.bf16.gmra.mrb[12].mxu0 %vm396_vm0, %v1883_v17 }
  0x2b   : > { %1833 = vmatmul.mubr.msk.bf16.gmra.mrb[12].mxu1 %vm396_vm0, %v1884_v18  ;;  %1804 = vmatprep.mubr.msk.bf16.mxu0 %vm396_vm0, %v1885_v19 }
  0x2c   : > { %1836 = vmatprep.mubr.msk.bf16.mxu1 %vm396_vm0, %v1886_v20 }
  0x32   : > { %1805 = vmatmul.mubr.msk.bf16.gmra.mrb[16].mxu0 %vm396_vm0, %v1887_v21 }
  0x33   : > { %1837 = vmatmul.mubr.msk.bf16.gmra.mrb[16].mxu1 %vm396_vm0, %v1888_v22  ;;  %1808 = vmatprep.mubr.msk.bf16.mxu0 %vm396_vm0, %v1889_v23 }
  0x34   : > { %1840 = vmatprep.mubr.msk.bf16.mxu1 %vm396_vm0, %v1890_v24 }
  0x3a   : > { %1809 = vmatmul.mubr.msk.bf16.gmra.mrb[20].mxu0 %vm396_vm0, %v1891_v25 }
  0x3b   : > { %1841 = vmatmul.mubr.msk.bf16.gmra.mrb[20].mxu1 %vm396_vm0, %v1892_v26  ;;  %1812 = vmatprep.mubr.msk.bf16.mxu0 %vm396_vm0, %v1893_v27 }
  0x3c   : > { %1844 = vmatprep.mubr.msk.bf16.mxu1 %vm396_vm0, %v1894_v28 }
  0x42   : > { %1813 = vmatmul.mubr.msk.bf16.gmra.mrb[24].mxu0 %vm396_vm0, %v1895_v29 }
  0x43   : > { %1845 = vmatmul.mubr.msk.bf16.gmra.mrb[24].mxu1 %vm396_vm0, %v1896_v30  ;;  %1816 = vmatprep.mubr.msk.bf16.mxu0 %vm396_vm0, %v1897_v31 }
  0x44   : > { %1848 = vmatprep.mubr.msk.bf16.mxu1 %vm396_vm0, %v1898_v32 }
  0x4a   : > { %1817 = vmatmul.mubr.msk.bf16.gmra.mrb[28].mxu0 %vm396_vm0, %v1899_v33 }
  0x4b   : > { %1849 = vmatmul.mubr.msk.bf16.gmra.mrb[28].mxu1 %vm396_vm0, %v1900_v34 }
  0xe5   : > { %v1790_v35 = vpop.f32.mrb[0].mxu0 }
  0xe6   : > { %v1822_v36 = vpop.f32.mrb[0].mxu1  ;;  %vm784_vm1 = vcmp.gt.f32.partialorder %v1790_v35, 0.0  ;;  %v848_v37 = vmul.f32 0.2, %v1790_v35  ;;  %v527_v39 = vpop.f32.mrb[1].mxu0 }
  0xe7   : > { %v880_v38 = vmul.f32 0.2, %v1822_v36  ;;  %vm816_vm2 = vcmp.gt.f32.partialorder %v1822_v36, 0.0  ;;  %v655_v40 = vpop.f32.mrb[1].mxu1  ;;  %v846_v41 = vmul.f32 0.2, %v527_v39 }
  0xe8   : > { %v1791_v42 = vpop.f32.mrb[2].mxu0  ;;  %v1823_v43 = vpop.f32.mrb[2].mxu1  ;;  %v912_v44 = vsel %vm784_vm1, %v1790_v35, %v848_v37  ;;  %v878_v45 = vmul.f32 0.2, %v655_v40  ;;  %vm782_vm4 = vcmp.gt.f32.partialorder %v527_v39, 0.0  ;;  %vm814_vm6 = vcmp.gt.f32.partialorder %v655_v40, 0.0 }
  0xe9   : > { %vm785_vm3 = vcmp.gt.f32.partialorder %v1791_v42, 0.0  ;;  %v849_v46 = vmul.f32 0.2, %v1791_v42  ;;  %v944_v47 = vsel %vm816_vm2, %v1822_v36, %v880_v38  ;;  %vm817_vm5 = vcmp.gt.f32.partialorder %v1823_v43, 0.0  ;;  %v530_v49 = vpop.f32.mrb[3].mxu0  ;;  %v658_v50 = vpop.f32.mrb[3].mxu1 }
  0xea   : > { %v881_v48 = vmul.f32 0.2, %v1823_v43  ;;  %vm783_vm7 = vcmp.gt.f32.partialorder %v530_v49, 0.0  ;;  %v847_v52 = vmul.f32 0.2, %v530_v49  ;;  %vm815_vm8 = vcmp.gt.f32.partialorder %v658_v50, 0.0 }
  0xeb   : > { %v913_v51 = vsel %vm785_vm3, %v1791_v42, %v849_v46  ;;  %v879_v55 = vmul.f32 0.2, %v658_v50  ;;  %v910_v56 = vsel %vm782_vm4, %v527_v39, %v846_v41  ;;  %v942_v61 = vsel %vm814_vm6, %v655_v40, %v878_v45 }
  0xec   : > { %v1564_v53 = vpack.c.bf16 %v913_v51, %v912_v44  ;;  %v945_v54 = vsel %vm817_vm5, %v1823_v43, %v881_v48  ;;  %v911_v58 = vsel %vm783_vm7, %v530_v49, %v847_v52 }
  0xed   : > { %v1644_v57 = vpack.c.bf16 %v945_v54, %v944_v47  ;;  %v1794_v59 = vpop.f32.mrb[4].mxu0  ;;  %v1559_v62 = vpack.c.bf16 %v911_v58, %v910_v56  ;;  %v943_v63 = vsel %vm815_vm8, %v658_v50, %v879_v55 }
  0xee   : > { %v1826_v60 = vpop.f32.mrb[4].mxu1  ;;  %1716 = vst [vmem:[%s2020_s24 + $0x8] sm:$0xff] %v1564_v53   ;;  %v852_v0 = vmul.f32 0.2, %v1794_v59  ;;  %v543_v1 = vpop.f32.mrb[5].mxu0  ;;  %v1639_v3 = vpack.c.bf16 %v943_v63, %v942_v61  ;;  %vm788_vm9 = vcmp.gt.f32.partialorder %v1794_v59, 0.0 }
  0xef   : > { %v671_v2 = vpop.f32.mrb[5].mxu1  ;;  %1732 = vst [vmem:[%s2020_s24 + $0x88] sm:$0xff] %v1644_v57   ;;  %v884_v4 = vmul.f32 0.2, %v1826_v60  ;;  %v1795_v5 = vpop.f32.mrb[6].mxu0  ;;  %1560 = vst [vmem:[%s2020_s24] sm:$0xff] %v1559_v62   ;;  %vm820_vm10 = vcmp.gt.f32.partialorder %v1826_v60, 0.0 }
  0xf0   : > { %v1827_v6 = vpop.f32.mrb[6].mxu1  ;;  %v850_v7 = vmul.f32 0.2, %v543_v1  ;;  %v882_v8 = vmul.f32 0.2, %v671_v2  ;;  %v546_v9 = vpop.f32.mrb[7].mxu0  ;;  %v916_v12 = vsel %vm788_vm9, %v1794_v59, %v852_v0 }
  0xf1   : > { %1731 = vst [vmem:[%s2020_s24 + $0x80] sm:$0xff] %v1639_v3   ;;  %vm786_vm11 = vcmp.gt.f32.partialorder %v543_v1, 0.0  ;;  %vm789_vm12 = vcmp.gt.f32.partialorder %v1795_v5, 0.0  ;;  %v853_v10 = vmul.f32 0.2, %v1795_v5  ;;  %vm821_vm13 = vcmp.gt.f32.partialorder %v1827_v6, 0.0 }
  0xf2   : > { %v674_v11 = vpop.f32.mrb[7].mxu1  ;;  %vm818_vm14 = vcmp.gt.f32.partialorder %v671_v2, 0.0  ;;  %v885_v13 = vmul.f32 0.2, %v1827_v6  ;;  %vm787_vm15 = vcmp.gt.f32.partialorder %v546_v9, 0.0  ;;  %v948_v17 = vsel %vm820_vm10, %v1826_v60, %v884_v4 }
  0xf3   : > { %v917_v14 = vsel %vm789_vm12, %v1795_v5, %v853_v10  ;;  %v851_v15 = vmul.f32 0.2, %v546_v9  ;;  %vm819_vm0 = vcmp.gt.f32.partialorder %v674_v11, 0.0  ;;  %v883_v16 = vmul.f32 0.2, %v674_v11 }
  0xf4   : > { %v914_v18 = vsel %vm786_vm11, %v543_v1, %v850_v7  ;;  %v1574_v19 = vpack.c.bf16 %v917_v14, %v916_v12  ;;  %v949_v20 = vsel %vm821_vm13, %v1827_v6, %v885_v13  ;;  %v946_v21 = vsel %vm818_vm14, %v671_v2, %v882_v8 }
  0xf5   : > { %v1654_v22 = vpack.c.bf16 %v949_v20, %v948_v17  ;;  %v915_v23 = vsel %vm787_vm15, %v546_v9, %v851_v15  ;;  %v947_v24 = vsel %vm819_vm0, %v674_v11, %v883_v16  ;;  %v1798_v25 = vpop.f32.mrb[8].mxu0 }
  0xf6   : > { %v1830_v26 = vpop.f32.mrb[8].mxu1  ;;  %1718 = vst [vmem:[%s2020_s24 + $0x18] sm:$0xff] %v1574_v19   ;;  %v1569_v27 = vpack.c.bf16 %v915_v23, %v914_v18  ;;  %v1649_v28 = vpack.c.bf16 %v947_v24, %v946_v21  ;;  %vm792_vm1 = vcmp.gt.f32.partialorder %v1798_v25, 0.0  ;;  %v856_v29 = vmul.f32 0.2, %v1798_v25  ;;  %v559_v30 = vpop.f32.mrb[9].mxu0 }
  0xf7   : > { %v687_v31 = vpop.f32.mrb[9].mxu1  ;;  %1734 = vst [vmem:[%s2020_s24 + $0x98] sm:$0xff] %v1654_v22   ;;  %vm824_vm2 = vcmp.gt.f32.partialorder %v1830_v26, 0.0  ;;  %v888_v32 = vmul.f32 0.2, %v1830_v26  ;;  %v1799_v35 = vpop.f32.mrb[10].mxu0 }
  0xf8   : > { %1717 = vst [vmem:[%s2020_s24 + $0x10] sm:$0xff] %v1569_v27   ;;  %1733 = vst [vmem:[%s2020_s24 + $0x90] sm:$0xff] %v1649_v28   ;;  %v854_v33 = vmul.f32 0.2, %v559_v30  ;;  %v886_v34 = vmul.f32 0.2, %v687_v31  ;;  %v920_v37 = vsel %vm792_vm1, %v1798_v25, %v856_v29 }
  0xf9   : > { %v1831_v36 = vpop.f32.mrb[10].mxu1  ;;  %vm790_vm3 = vcmp.gt.f32.partialorder %v559_v30, 0.0  ;;  %vm793_vm4 = vcmp.gt.f32.partialorder %v1799_v35, 0.0  ;;  %v857_v38 = vmul.f32 0.2, %v1799_v35  ;;  %v562_v39 = vpop.f32.mrb[11].mxu0  ;;  %v952_v45 = vsel %vm824_vm2, %v1830_v26, %v888_v32 }
  0xfa   : > { %v690_v40 = vpop.f32.mrb[11].mxu1  ;;  %vm822_vm5 = vcmp.gt.f32.partialorder %v687_v31, 0.0  ;;  %vm825_vm6 = vcmp.gt.f32.partialorder %v1831_v36, 0.0  ;;  %v889_v41 = vmul.f32 0.2, %v1831_v36  ;;  %vm791_vm7 = vcmp.gt.f32.partialorder %v562_v39, 0.0 }
  0xfb   : > { %v921_v42 = vsel %vm793_vm4, %v1799_v35, %v857_v38  ;;  %v855_v43 = vmul.f32 0.2, %v562_v39  ;;  %vm823_vm8 = vcmp.gt.f32.partialorder %v690_v40, 0.0  ;;  %v887_v44 = vmul.f32 0.2, %v690_v40 }
  0xfc   : > { %v918_v46 = vsel %vm790_vm3, %v559_v30, %v854_v33  ;;  %v1584_v47 = vpack.c.bf16 %v921_v42, %v920_v37  ;;  %v953_v48 = vsel %vm825_vm6, %v1831_v36, %v889_v41  ;;  %v950_v49 = vsel %vm822_vm5, %v687_v31, %v886_v34 }
  0xfd   : > { %v1664_v50 = vpack.c.bf16 %v953_v48, %v952_v45  ;;  %v919_v51 = vsel %vm791_vm7, %v562_v39, %v855_v43  ;;  %v951_v52 = vsel %vm823_vm8, %v690_v40, %v887_v44  ;;  %v1802_v53 = vpop.f32.mrb[12].mxu0 }
  0xfe   : > { %v1834_v54 = vpop.f32.mrb[12].mxu1  ;;  %1720 = vst [vmem:[%s2020_s24 + $0x28] sm:$0xff] %v1584_v47   ;;  %v1579_v55 = vpack.c.bf16 %v919_v51, %v918_v46  ;;  %v1659_v56 = vpack.c.bf16 %v951_v52, %v950_v49  ;;  %vm796_vm9 = vcmp.gt.f32.partialorder %v1802_v53, 0.0  ;;  %v860_v57 = vmul.f32 0.2, %v1802_v53  ;;  %v575_v58 = vpop.f32.mrb[13].mxu0 }
  0xff   : > { %v703_v59 = vpop.f32.mrb[13].mxu1  ;;  %1736 = vst [vmem:[%s2020_s24 + $0xa8] sm:$0xff] %v1664_v50   ;;  %vm828_vm10 = vcmp.gt.f32.partialorder %v1834_v54, 0.0  ;;  %v892_v60 = vmul.f32 0.2, %v1834_v54  ;;  %v1803_v63 = vpop.f32.mrb[14].mxu0 }
 0x100   : > { %1719 = vst [vmem:[%s2020_s24 + $0x20] sm:$0xff] %v1579_v55   ;;  %1735 = vst [vmem:[%s2020_s24 + $0xa0] sm:$0xff] %v1659_v56   ;;  %v858_v61 = vmul.f32 0.2, %v575_v58  ;;  %v890_v62 = vmul.f32 0.2, %v703_v59  ;;  %v924_v1 = vsel %vm796_vm9, %v1802_v53, %v860_v57 }
 0x101   : > { %v1835_v0 = vpop.f32.mrb[14].mxu1  ;;  %vm794_vm11 = vcmp.gt.f32.partialorder %v575_v58, 0.0  ;;  %vm797_vm12 = vcmp.gt.f32.partialorder %v1803_v63, 0.0  ;;  %v861_v2 = vmul.f32 0.2, %v1803_v63  ;;  %v578_v3 = vpop.f32.mrb[15].mxu0  ;;  %v956_v9 = vsel %vm828_vm10, %v1834_v54, %v892_v60 }
 0x102   : > { %v706_v4 = vpop.f32.mrb[15].mxu1  ;;  %vm826_vm13 = vcmp.gt.f32.partialorder %v703_v59, 0.0  ;;  %vm829_vm14 = vcmp.gt.f32.partialorder %v1835_v0, 0.0  ;;  %v893_v5 = vmul.f32 0.2, %v1835_v0  ;;  %vm795_vm15 = vcmp.gt.f32.partialorder %v578_v3, 0.0 }
 0x103   : > { %v925_v6 = vsel %vm797_vm12, %v1803_v63, %v861_v2  ;;  %v859_v7 = vmul.f32 0.2, %v578_v3  ;;  %vm827_vm0 = vcmp.gt.f32.partialorder %v706_v4, 0.0  ;;  %v891_v8 = vmul.f32 0.2, %v706_v4 }
 0x104   : > { %v922_v10 = vsel %vm794_vm11, %v575_v58, %v858_v61  ;;  %v1594_v11 = vpack.c.bf16 %v925_v6, %v924_v1  ;;  %v957_v12 = vsel %vm829_vm14, %v1835_v0, %v893_v5  ;;  %v954_v13 = vsel %vm826_vm13, %v703_v59, %v890_v62 }
 0x105   : > { %v1674_v14 = vpack.c.bf16 %v957_v12, %v956_v9  ;;  %v923_v15 = vsel %vm795_vm15, %v578_v3, %v859_v7  ;;  %v955_v16 = vsel %vm827_vm0, %v706_v4, %v891_v8  ;;  %v1806_v17 = vpop.f32.mrb[16].mxu0 }
 0x106   : > { %v1838_v18 = vpop.f32.mrb[16].mxu1  ;;  %1722 = vst [vmem:[%s2020_s24 + $0x38] sm:$0xff] %v1594_v11   ;;  %v1589_v19 = vpack.c.bf16 %v923_v15, %v922_v10  ;;  %v1669_v20 = vpack.c.bf16 %v955_v16, %v954_v13  ;;  %vm800_vm1 = vcmp.gt.f32.partialorder %v1806_v17, 0.0  ;;  %v864_v21 = vmul.f32 0.2, %v1806_v17  ;;  %v591_v22 = vpop.f32.mrb[17].mxu0 }
 0x107   : > { %v719_v23 = vpop.f32.mrb[17].mxu1  ;;  %1738 = vst [vmem:[%s2020_s24 + $0xb8] sm:$0xff] %v1674_v14   ;;  %vm832_vm2 = vcmp.gt.f32.partialorder %v1838_v18, 0.0  ;;  %v896_v24 = vmul.f32 0.2, %v1838_v18  ;;  %v1807_v27 = vpop.f32.mrb[18].mxu0 }
 0x108   : > { %1721 = vst [vmem:[%s2020_s24 + $0x30] sm:$0xff] %v1589_v19   ;;  %1737 = vst [vmem:[%s2020_s24 + $0xb0] sm:$0xff] %v1669_v20   ;;  %v862_v25 = vmul.f32 0.2, %v591_v22  ;;  %v894_v26 = vmul.f32 0.2, %v719_v23  ;;  %v928_v29 = vsel %vm800_vm1, %v1806_v17, %v864_v21 }
 0x109   : > { %v1839_v28 = vpop.f32.mrb[18].mxu1  ;;  %vm798_vm3 = vcmp.gt.f32.partialorder %v591_v22, 0.0  ;;  %vm801_vm4 = vcmp.gt.f32.partialorder %v1807_v27, 0.0  ;;  %v865_v30 = vmul.f32 0.2, %v1807_v27  ;;  %v594_v31 = vpop.f32.mrb[19].mxu0  ;;  %v960_v37 = vsel %vm832_vm2, %v1838_v18, %v896_v24 }
 0x10a   : > { %v722_v32 = vpop.f32.mrb[19].mxu1  ;;  %vm830_vm5 = vcmp.gt.f32.partialorder %v719_v23, 0.0  ;;  %vm833_vm6 = vcmp.gt.f32.partialorder %v1839_v28, 0.0  ;;  %v897_v33 = vmul.f32 0.2, %v1839_v28  ;;  %vm799_vm7 = vcmp.gt.f32.partialorder %v594_v31, 0.0 }
 0x10b   : > { %v929_v34 = vsel %vm801_vm4, %v1807_v27, %v865_v30  ;;  %v863_v35 = vmul.f32 0.2, %v594_v31  ;;  %vm831_vm8 = vcmp.gt.f32.partialorder %v722_v32, 0.0  ;;  %v895_v36 = vmul.f32 0.2, %v722_v32 }
 0x10c   : > { %v926_v38 = vsel %vm798_vm3, %v591_v22, %v862_v25  ;;  %v1604_v39 = vpack.c.bf16 %v929_v34, %v928_v29  ;;  %v961_v40 = vsel %vm833_vm6, %v1839_v28, %v897_v33  ;;  %v958_v41 = vsel %vm830_vm5, %v719_v23, %v894_v26 }
 0x10d   : > { %v1684_v42 = vpack.c.bf16 %v961_v40, %v960_v37  ;;  %v927_v43 = vsel %vm799_vm7, %v594_v31, %v863_v35  ;;  %v959_v44 = vsel %vm831_vm8, %v722_v32, %v895_v36  ;;  %v1810_v45 = vpop.f32.mrb[20].mxu0 }
 0x10e   : > { %v1842_v46 = vpop.f32.mrb[20].mxu1  ;;  %1724 = vst [vmem:[%s2020_s24 + $0x48] sm:$0xff] %v1604_v39   ;;  %v1599_v47 = vpack.c.bf16 %v927_v43, %v926_v38  ;;  %v1679_v48 = vpack.c.bf16 %v959_v44, %v958_v41  ;;  %vm804_vm9 = vcmp.gt.f32.partialorder %v1810_v45, 0.0  ;;  %v868_v49 = vmul.f32 0.2, %v1810_v45  ;;  %v607_v50 = vpop.f32.mrb[21].mxu0 }
 0x10f   : > { %v735_v51 = vpop.f32.mrb[21].mxu1  ;;  %1740 = vst [vmem:[%s2020_s24 + $0xc8] sm:$0xff] %v1684_v42   ;;  %vm836_vm10 = vcmp.gt.f32.partialorder %v1842_v46, 0.0  ;;  %v900_v52 = vmul.f32 0.2, %v1842_v46  ;;  %v1811_v55 = vpop.f32.mrb[22].mxu0 }
 0x110   : > { %1723 = vst [vmem:[%s2020_s24 + $0x40] sm:$0xff] %v1599_v47   ;;  %1739 = vst [vmem:[%s2020_s24 + $0xc0] sm:$0xff] %v1679_v48   ;;  %v866_v53 = vmul.f32 0.2, %v607_v50  ;;  %v898_v54 = vmul.f32 0.2, %v735_v51  ;;  %v932_v57 = vsel %vm804_vm9, %v1810_v45, %v868_v49 }
 0x111   : > { %v1843_v56 = vpop.f32.mrb[22].mxu1  ;;  %vm802_vm11 = vcmp.gt.f32.partialorder %v607_v50, 0.0  ;;  %vm805_vm12 = vcmp.gt.f32.partialorder %v1811_v55, 0.0  ;;  %v869_v58 = vmul.f32 0.2, %v1811_v55  ;;  %v610_v59 = vpop.f32.mrb[23].mxu0  ;;  %v964_v1 = vsel %vm836_vm10, %v1842_v46, %v900_v52 }
 0x112   : > { %v738_v60 = vpop.f32.mrb[23].mxu1  ;;  %vm834_vm13 = vcmp.gt.f32.partialorder %v735_v51, 0.0  ;;  %vm837_vm14 = vcmp.gt.f32.partialorder %v1843_v56, 0.0  ;;  %v901_v61 = vmul.f32 0.2, %v1843_v56  ;;  %vm803_vm15 = vcmp.gt.f32.partialorder %v610_v59, 0.0 }
 0x113   : > { %v933_v62 = vsel %vm805_vm12, %v1811_v55, %v869_v58  ;;  %v867_v63 = vmul.f32 0.2, %v610_v59  ;;  %vm835_vm0 = vcmp.gt.f32.partialorder %v738_v60, 0.0  ;;  %v899_v0 = vmul.f32 0.2, %v738_v60 }
 0x114   : > { %v930_v2 = vsel %vm802_vm11, %v607_v50, %v866_v53  ;;  %v1614_v3 = vpack.c.bf16 %v933_v62, %v932_v57  ;;  %v965_v4 = vsel %vm837_vm14, %v1843_v56, %v901_v61  ;;  %v962_v5 = vsel %vm834_vm13, %v735_v51, %v898_v54 }
 0x115   : > { %v1694_v6 = vpack.c.bf16 %v965_v4, %v964_v1  ;;  %v931_v7 = vsel %vm803_vm15, %v610_v59, %v867_v63  ;;  %v963_v8 = vsel %vm835_vm0, %v738_v60, %v899_v0  ;;  %v1814_v9 = vpop.f32.mrb[24].mxu0 }
 0x116   : > { %v1846_v10 = vpop.f32.mrb[24].mxu1  ;;  %1726 = vst [vmem:[%s2020_s24 + $0x58] sm:$0xff] %v1614_v3   ;;  %v1609_v11 = vpack.c.bf16 %v931_v7, %v930_v2  ;;  %v1689_v12 = vpack.c.bf16 %v963_v8, %v962_v5  ;;  %vm808_vm1 = vcmp.gt.f32.partialorder %v1814_v9, 0.0  ;;  %v872_v13 = vmul.f32 0.2, %v1814_v9  ;;  %v623_v14 = vpop.f32.mrb[25].mxu0 }
 0x117   : > { %v751_v15 = vpop.f32.mrb[25].mxu1  ;;  %1742 = vst [vmem:[%s2020_s24 + $0xd8] sm:$0xff] %v1694_v6   ;;  %vm840_vm2 = vcmp.gt.f32.partialorder %v1846_v10, 0.0  ;;  %v904_v16 = vmul.f32 0.2, %v1846_v10  ;;  %v1815_v19 = vpop.f32.mrb[26].mxu0 }
 0x118   : > { %1725 = vst [vmem:[%s2020_s24 + $0x50] sm:$0xff] %v1609_v11   ;;  %1741 = vst [vmem:[%s2020_s24 + $0xd0] sm:$0xff] %v1689_v12   ;;  %v870_v17 = vmul.f32 0.2, %v623_v14  ;;  %v902_v18 = vmul.f32 0.2, %v751_v15  ;;  %v936_v21 = vsel %vm808_vm1, %v1814_v9, %v872_v13 }
 0x119   : > { %v1847_v20 = vpop.f32.mrb[26].mxu1  ;;  %vm806_vm3 = vcmp.gt.f32.partialorder %v623_v14, 0.0  ;;  %vm809_vm4 = vcmp.gt.f32.partialorder %v1815_v19, 0.0  ;;  %v873_v22 = vmul.f32 0.2, %v1815_v19  ;;  %v626_v23 = vpop.f32.mrb[27].mxu0  ;;  %v968_v29 = vsel %vm840_vm2, %v1846_v10, %v904_v16 }
 0x11a   : > { %v754_v24 = vpop.f32.mrb[27].mxu1  ;;  %vm838_vm5 = vcmp.gt.f32.partialorder %v751_v15, 0.0  ;;  %vm841_vm6 = vcmp.gt.f32.partialorder %v1847_v20, 0.0  ;;  %v905_v25 = vmul.f32 0.2, %v1847_v20  ;;  %vm807_vm7 = vcmp.gt.f32.partialorder %v626_v23, 0.0 }
 0x11b   : > { %v937_v26 = vsel %vm809_vm4, %v1815_v19, %v873_v22  ;;  %v871_v27 = vmul.f32 0.2, %v626_v23  ;;  %vm839_vm8 = vcmp.gt.f32.partialorder %v754_v24, 0.0  ;;  %v903_v28 = vmul.f32 0.2, %v754_v24 }
 0x11c   : > { %v934_v30 = vsel %vm806_vm3, %v623_v14, %v870_v17  ;;  %v1624_v31 = vpack.c.bf16 %v937_v26, %v936_v21  ;;  %v969_v32 = vsel %vm841_vm6, %v1847_v20, %v905_v25  ;;  %v966_v33 = vsel %vm838_vm5, %v751_v15, %v902_v18 }
 0x11d   : > { %v1704_v34 = vpack.c.bf16 %v969_v32, %v968_v29  ;;  %v935_v35 = vsel %vm807_vm7, %v626_v23, %v871_v27  ;;  %v967_v36 = vsel %vm839_vm8, %v754_v24, %v903_v28  ;;  %v1818_v37 = vpop.f32.mrb[28].mxu0 }
 0x11e   : > { %v1850_v38 = vpop.f32.mrb[28].mxu1  ;;  %1728 = vst [vmem:[%s2020_s24 + $0x68] sm:$0xff] %v1624_v31   ;;  %v1619_v39 = vpack.c.bf16 %v935_v35, %v934_v30  ;;  %v1699_v40 = vpack.c.bf16 %v967_v36, %v966_v33  ;;  %vm812_vm9 = vcmp.gt.f32.partialorder %v1818_v37, 0.0  ;;  %v876_v41 = vmul.f32 0.2, %v1818_v37  ;;  %v639_v42 = vpop.f32.mrb[29].mxu0 }
 0x11f   : > { %v767_v43 = vpop.f32.mrb[29].mxu1  ;;  %1744 = vst [vmem:[%s2020_s24 + $0xe8] sm:$0xff] %v1704_v34   ;;  %vm844_vm10 = vcmp.gt.f32.partialorder %v1850_v38, 0.0  ;;  %v908_v44 = vmul.f32 0.2, %v1850_v38  ;;  %v1819_v47 = vpop.f32.mrb[30].mxu0 }
 0x120   : > { %1727 = vst [vmem:[%s2020_s24 + $0x60] sm:$0xff] %v1619_v39   ;;  %1743 = vst [vmem:[%s2020_s24 + $0xe0] sm:$0xff] %v1699_v40   ;;  %v874_v45 = vmul.f32 0.2, %v639_v42  ;;  %v906_v46 = vmul.f32 0.2, %v767_v43  ;;  %v940_v49 = vsel %vm812_vm9, %v1818_v37, %v876_v41 }
 0x121   : > { %v1851_v48 = vpop.f32.mrb[30].mxu1  ;;  %vm810_vm11 = vcmp.gt.f32.partialorder %v639_v42, 0.0  ;;  %vm813_vm12 = vcmp.gt.f32.partialorder %v1819_v47, 0.0  ;;  %v877_v50 = vmul.f32 0.2, %v1819_v47  ;;  %v642_v51 = vpop.f32.mrb[31].mxu0  ;;  %v972_v57 = vsel %vm844_vm10, %v1850_v38, %v908_v44 }
 0x122   : > { %v770_v52 = vpop.f32.mrb[31].mxu1  ;;  %vm842_vm13 = vcmp.gt.f32.partialorder %v767_v43, 0.0  ;;  %vm845_vm14 = vcmp.gt.f32.partialorder %v1851_v48, 0.0  ;;  %v909_v53 = vmul.f32 0.2, %v1851_v48  ;;  %vm811_vm15 = vcmp.gt.f32.partialorder %v642_v51, 0.0 }
 0x123   : > { %v941_v54 = vsel %vm813_vm12, %v1819_v47, %v877_v50  ;;  %v875_v55 = vmul.f32 0.2, %v642_v51  ;;  %vm843_vm0 = vcmp.gt.f32.partialorder %v770_v52, 0.0  ;;  %v907_v56 = vmul.f32 0.2, %v770_v52 }
 0x124   : > { %v938_v58 = vsel %vm810_vm11, %v639_v42, %v874_v45  ;;  %v1634_v59 = vpack.c.bf16 %v941_v54, %v940_v49  ;;  %v973_v60 = vsel %vm845_vm14, %v1851_v48, %v909_v53  ;;  %v970_v61 = vsel %vm842_vm13, %v767_v43, %v906_v46 }
 0x125   : > { %v1714_v62 = vpack.c.bf16 %v973_v60, %v972_v57  ;;  %v939_v63 = vsel %vm811_vm15, %v642_v51, %v875_v55  ;;  %v971_v0 = vsel %vm843_vm0, %v770_v52, %v907_v56 }
 0x126   : > { %1730 = vst [vmem:[%s2020_s24 + $0x78] sm:$0xff] %v1634_v59   ;;  %v1629_v1 = vpack.c.bf16 %v939_v63, %v938_v58  ;;  %v1709_v2 = vpack.c.bf16 %v971_v0, %v970_v61 }
 0x127   : > { %1746 = vst [vmem:[%s2020_s24 + $0xf8] sm:$0xff] %v1714_v62  }
 0x128   : > { %1729 = vst [vmem:[%s2020_s24 + $0x70] sm:$0xff] %v1629_v1   ;;  %1745 = vst [vmem:[%s2020_s24 + $0xf0] sm:$0xff] %v1709_v2  }
 0x129 PF: > { %s12_s9 = sadd.s32 1, %s1907_s9  }
 0x12a   : > { %p9_p4 = scmp.ge.s32.totalorder %s12_s9, 6  }
 0x12c   :  { %11 = sbr.rel (!%p9_p4) target bundleno = 1 (0x1), region = 58 }

// kernel: _lambda_.6
= control target key start
LH: loop header
LB: loop body
LE: loop exit
PB: predicated region body
PF: predicated region fallthrough
CT: control target
= control target key end

     0   :  { %v5179_v0 = vmov 0   ;;  %s8029_s1 = inlined_call_operand.vmem [shape: bf16[1024,128], index: 1, kind: input, shape index: {}]   ;;  %s8030_s0 = inlined_call_operand.vmem [shape: bf16[512,1024], index: 0, kind: input, shape index: {}]   ;;  %s8031_s2 = inlined_call_operand.vmem [shape: f32[1,128], index: 2, kind: input, shape index: {}]   ;;  %s8032_s3 = inlined_call_operand.vmem [shape: f32[1,128], index: 3, kind: input, shape index: {}]   ;;  %s8033_s4 = inlined_call_operand.vmem [shape: bf16[512,128], index: 4, kind: output, shape index: {}]  }
   0x1   :  { %2066 = vmatprep.subr.bf16.mxu1 %v5179_v0  ;;  %2644 = vmatprep.subr.bf16.mxu0 %v5179_v0  ;;  %v5113_v1 = vld [vmem:[%s8029_s1] sm:$0xff]   ;;  %v5115_v3 = vld [vmem:[%s8029_s1 + $0x8] sm:$0xff]   ;;  %v5117_v5 = vld [vmem:[%s8029_s1 + $0x10] sm:$0xff]  }
   0x2   :  { %v5114_v2 = vld [vmem:[%s8029_s1 + $0x100] sm:$0xff]   ;;  %2067 = vmatpush1.bf16.msra.mxu1 %v5113_v1  ;;  %v5116_v4 = vld [vmem:[%s8029_s1 + $0x108] sm:$0xff]   ;;  %v5118_v6 = vld [vmem:[%s8029_s1 + $0x110] sm:$0xff]  }
   0x3   :  { %2645 = vmatpush1.bf16.msra.mxu0 %v5114_v2  ;;  %2068 = vmatprep.subr.bf16.mxu1 %v5179_v0  ;;  %v5119_v7 = vld [vmem:[%s8029_s1 + $0x18] sm:$0xff]   ;;  %v5121_v9 = vld [vmem:[%s8029_s1 + $0x20] sm:$0xff]   ;;  %v5123_v11 = vld [vmem:[%s8029_s1 + $0x28] sm:$0xff]  }
   0x4   :  { %2646 = vmatprep.subr.bf16.mxu0 %v5179_v0  ;;  %v5120_v8 = vld [vmem:[%s8029_s1 + $0x118] sm:$0xff]   ;;  %v5122_v10 = vld [vmem:[%s8029_s1 + $0x120] sm:$0xff]   ;;  %v5124_v12 = vld [vmem:[%s8029_s1 + $0x128] sm:$0xff]  }
   0x5   :  { %v5125_v13 = vld [vmem:[%s8029_s1 + $0x30] sm:$0xff]   ;;  %v5127_v15 = vld [vmem:[%s8029_s1 + $0x38] sm:$0xff]   ;;  %v5129_v17 = vld [vmem:[%s8029_s1 + $0x40] sm:$0xff]  }
   0x6   :  { %2069 = vmatpush1.bf16.msra.mxu1 %v5115_v3  ;;  %v5126_v14 = vld [vmem:[%s8029_s1 + $0x130] sm:$0xff]   ;;  %v5128_v16 = vld [vmem:[%s8029_s1 + $0x138] sm:$0xff]   ;;  %v5130_v18 = vld [vmem:[%s8029_s1 + $0x140] sm:$0xff]  }
   0x7   :  { %2647 = vmatpush1.bf16.msra.mxu0 %v5116_v4  ;;  %2070 = vmatprep.subr.bf16.mxu1 %v5179_v0  ;;  %v5280_v19 = vld [vmem:[%s8030_s0] sm:$0xff]  ;;  %v5290_v21 = vld [vmem:[%s8030_s0 + $0x10] sm:$0xff]  ;;  %v5131_v24 = vld [vmem:[%s8029_s1 + $0x48] sm:$0xff]  }
   0x8   :  { %2648 = vmatprep.subr.bf16.mxu0 %v5179_v0  ;;  %v5285_v20 = vld [vmem:[%s8030_s0 + $0x20] sm:$0xff]  ;;  %v5297_v23 = vld [vmem:[%s8030_s0 + $0x30] sm:$0xff]  ;;  %v5132_v26 = vld [vmem:[%s8029_s1 + $0x148] sm:$0xff]  }
   0x9   :  { %v4153_v22 = vcombine.high %v5280_v19, %v5285_v20  ;;  %v4157_v25 = vcombine.high %v5290_v21, %v5297_v23  ;;  %v5133_v27 = vld [vmem:[%s8029_s1 + $0x50] sm:$0xff]   ;;  %v5135_v29 = vld [vmem:[%s8029_s1 + $0x58] sm:$0xff]   ;;  %v5137_v31 = vld [vmem:[%s8029_s1 + $0x60] sm:$0xff]   ;;  %v4152_v42 = vcombine.low %v5280_v19, %v5285_v20  ;;  %v4156_v44 = vcombine.low %v5290_v21, %v5297_v23 }
   0xa   :  { %2071 = vmatpush1.bf16.msra.mxu1 %v5117_v5  ;;  %v5134_v28 = vld [vmem:[%s8029_s1 + $0x150] sm:$0xff]   ;;  %v5136_v30 = vld [vmem:[%s8029_s1 + $0x158] sm:$0xff]   ;;  %v5138_v32 = vld [vmem:[%s8029_s1 + $0x160] sm:$0xff]  }
   0xb   :  { %2649 = vmatpush1.bf16.msra.mxu0 %v5118_v6  ;;  %2072 = vmatprep.subr.bf16.mxu1 %v5179_v0  ;;  %v5139_v33 = vld [vmem:[%s8029_s1 + $0x68] sm:$0xff]   ;;  %v5141_v35 = vld [vmem:[%s8029_s1 + $0x70] sm:$0xff]   ;;  %v5143_v37 = vld [vmem:[%s8029_s1 + $0x78] sm:$0xff]  }
   0xc   :  { %2650 = vmatprep.subr.bf16.mxu0 %v5179_v0  ;;  %2098 = vmatprep.mubr.bf16.mxu1 %v4153_v22  ;;  %v5140_v34 = vld [vmem:[%s8029_s1 + $0x168] sm:$0xff]   ;;  %v5142_v36 = vld [vmem:[%s8029_s1 + $0x170] sm:$0xff]   ;;  %v5144_v38 = vld [vmem:[%s8029_s1 + $0x178] sm:$0xff]  }
   0xd   :  { %2676 = vmatprep.mubr.bf16.mxu0 %v4157_v25  ;;  %v26_v39 = vld [vmem:[%s8030_s0 + $0x40] sm:$0xff]  ;;  %v28_v41 = vld [vmem:[%s8030_s0 + $0x50] sm:$0xff]  ;;  %v5147_v51 = vld [vmem:[%s8029_s1 + $0x88] sm:$0xff]  }
   0xe   :  { %2073 = vmatpush1.bf16.msra.mxu1 %v5119_v7  ;;  %v30_v40 = vld [vmem:[%s8030_s0 + $0x60] sm:$0xff]  ;;  %v32_v43 = vld [vmem:[%s8030_s0 + $0x70] sm:$0xff]  ;;  %v5148_v52 = vld [vmem:[%s8029_s1 + $0x188] sm:$0xff]  }
   0xf   :  { %2651 = vmatpush1.bf16.msra.mxu0 %v5120_v8  ;;  %2074 = vmatprep.subr.bf16.mxu1 %v5179_v0  ;;  %v5145_v45 = vld [vmem:[%s8029_s1 + $0x80] sm:$0xff]   ;;  %v4161_v47 = vcombine.high %v26_v39, %v30_v40  ;;  %v4165_v48 = vcombine.high %v28_v41, %v32_v43  ;;  %v36_v53 = vld [vmem:[%s8030_s0 + $0x90] sm:$0xff]  ;;  %v4160_v55 = vcombine.low %v26_v39, %v30_v40  ;;  %v5151_v2 = vld [vmem:[%s8029_s1 + $0x98] sm:$0xff]  }
  0x10   :  { %2652 = vmatprep.subr.bf16.mxu0 %v5179_v0  ;;  %v5146_v46 = vld [vmem:[%s8029_s1 + $0x180] sm:$0xff]   ;;  %v40_v54 = vld [vmem:[%s8030_s0 + $0xb0] sm:$0xff]  ;;  %v4164_v56 = vcombine.low %v28_v41, %v32_v43  ;;  %v5152_v3 = vld [vmem:[%s8029_s1 + $0x198] sm:$0xff]  }
  0x11   :  { %v34_v49 = vld [vmem:[%s8030_s0 + $0x80] sm:$0xff]  ;;  %v4173_v58 = vcombine.high %v36_v53, %v40_v54  ;;  %v5149_v59 = vld [vmem:[%s8029_s1 + $0x90] sm:$0xff]   ;;  %v4172_v6 = vcombine.low %v36_v53, %v40_v54  ;;  %v5164_v39 = vld [vmem:[%s8029_s1 + $0x1c8] sm:$0xff]  }
  0x12   :  { %2075 = vmatpush1.bf16.msra.mxu1 %v5121_v9  ;;  %v38_v50 = vld [vmem:[%s8030_s0 + $0xa0] sm:$0xff]  ;;  %v5150_v60 = vld [vmem:[%s8029_s1 + $0x190] sm:$0xff]   ;;  %v5167_v54 = vld [vmem:[%s8029_s1 + $0xd8] sm:$0xff]  }
  0x13   :  { %2653 = vmatpush1.bf16.msra.mxu0 %v5122_v10  ;;  %2076 = vmatprep.subr.bf16.mxu1 %v5179_v0  ;;  %v4169_v57 = vcombine.high %v34_v49, %v38_v50  ;;  %v42_v61 = vld [vmem:[%s8030_s0 + $0xc0] sm:$0xff]  ;;  %v44_v63 = vld [vmem:[%s8030_s0 + $0xd0] sm:$0xff]  ;;  %v4168_v4 = vcombine.low %v34_v49, %v38_v50 }
  0x14   :  { %2654 = vmatprep.subr.bf16.mxu0 %v5179_v0  ;;  %v46_v62 = vld [vmem:[%s8030_s0 + $0xe0] sm:$0xff]  ;;  %v48_v1 = vld [vmem:[%s8030_s0 + $0xf0] sm:$0xff] }
  0x15   :  { %v5153_v5 = vld [vmem:[%s8029_s1 + $0xa0] sm:$0xff]   ;;  %v4177_v7 = vcombine.high %v42_v61, %v46_v62  ;;  %v4181_v9 = vcombine.high %v44_v63, %v48_v1  ;;  %v5157_v20 = vld [vmem:[%s8029_s1 + $0xb0] sm:$0xff]  }
  0x16   :  { %2077 = vmatpush1.bf16.msra.mxu1 %v5123_v11  ;;  %v5154_v8 = vld [vmem:[%s8029_s1 + $0x1a0] sm:$0xff]   ;;  %v5158_v21 = vld [vmem:[%s8029_s1 + $0x1b0] sm:$0xff]  }
  0x17   :  { %2655 = vmatpush1.bf16.msra.mxu0 %v5124_v12  ;;  %2078 = vmatprep.subr.bf16.mxu1 %v5179_v0  ;;  %v50_v10 = vld [vmem:[%s8030_s0 + $0x100] sm:$0xff]  ;;  %v52_v12 = vld [vmem:[%s8030_s0 + $0x110] sm:$0xff] }
  0x18   :  { %2656 = vmatprep.subr.bf16.mxu0 %v5179_v0  ;;  %v54_v11 = vld [vmem:[%s8030_s0 + $0x120] sm:$0xff]  ;;  %v60_v25 = vld [vmem:[%s8030_s0 + $0x150] sm:$0xff] }
  0x19   :  { %v58_v22 = vld [vmem:[%s8030_s0 + $0x140] sm:$0xff]  ;;  %v80_v49 = vld [vmem:[%s8030_s0 + $0x1f0] sm:$0xff] }
  0x1a   :  { %2079 = vmatpush1.bf16.msra.mxu1 %v5125_v13  ;;  %v56_v13 = vld [vmem:[%s8030_s0 + $0x130] sm:$0xff]  ;;  %v62_v23 = vld [vmem:[%s8030_s0 + $0x160] sm:$0xff] }
  0x1b   :  { %2657 = vmatpush1.bf16.msra.mxu0 %v5126_v14  ;;  %2080 = vmatprep.subr.bf16.mxu1 %v5179_v0  ;;  %v5155_v14 = vld [vmem:[%s8029_s1 + $0xa8] sm:$0xff]   ;;  %v4189_v19 = vcombine.high %v52_v12, %v56_v13  ;;  %v4192_v40 = vcombine.low %v58_v22, %v62_v23 }
  0x1c   :  { %2658 = vmatprep.subr.bf16.mxu0 %v5179_v0 }
  0x1e   :  { %2081 = vmatpush1.bf16.msra.mxu1 %v5127_v15  ;;  %v5156_v15 = vld [vmem:[%s8029_s1 + $0x1a8] sm:$0xff]  }
  0x1f   :  { %2659 = vmatpush1.bf16.msra.mxu0 %v5128_v16  ;;  %2082 = vmatprep.subr.bf16.mxu1 %v5179_v0  ;;  %v4176_v16 = vcombine.low %v42_v61, %v46_v62 }
  0x20   :  { %2660 = vmatprep.subr.bf16.mxu0 %v5179_v0 }
  0x22   :  { %2083 = vmatpush1.bf16.msra.mxu1 %v5129_v17  ;;  %v4180_v17 = vcombine.low %v44_v63, %v48_v1  ;;  %v90_v1 = vld [vmem:[%s8030_s0 + $0x240] sm:$0xff] }
  0x23   :  { %2661 = vmatpush1.bf16.msra.mxu0 %v5130_v18  ;;  %2084 = vmatprep.subr.bf16.mxu1 %v5179_v0  ;;  %v4185_v18 = vcombine.high %v50_v10, %v54_v11 }
  0x24   :  { %2662 = vmatprep.subr.bf16.mxu0 %v5179_v0 }
  0x26   :  { %2085 = vmatpush1.bf16.msra.mxu1 %v5131_v24  ;;  %v5159_v24 = vld [vmem:[%s8029_s1 + $0xb8] sm:$0xff]  }
  0x27   :  { %2663 = vmatpush1.bf16.msra.mxu0 %v5132_v26  ;;  %2086 = vmatprep.subr.bf16.mxu1 %v5179_v0  ;;  %v64_v26 = vld [vmem:[%s8030_s0 + $0x170] sm:$0xff] }
  0x28   :  { %2664 = vmatprep.subr.bf16.mxu0 %v5179_v0  ;;  %v4196_v41 = vcombine.low %v60_v25, %v64_v26 }
  0x2a   :  { %2087 = vmatpush1.bf16.msra.mxu1 %v5133_v27  ;;  %v5160_v27 = vld [vmem:[%s8029_s1 + $0x1b8] sm:$0xff]  }
  0x2b   :  { %2665 = vmatpush1.bf16.msra.mxu0 %v5134_v28  ;;  %2088 = vmatprep.subr.bf16.mxu1 %v5179_v0  ;;  %v4184_v28 = vcombine.low %v50_v10, %v54_v11  ;;  %v5170_v10 = vld [vmem:[%s8029_s1 + $0x1e0] sm:$0xff]  }
  0x2c   :  { %2666 = vmatprep.subr.bf16.mxu0 %v5179_v0  ;;  %v98_v11 = vld [vmem:[%s8030_s0 + $0x280] sm:$0xff] }
  0x2e   :  { %2089 = vmatpush1.bf16.msra.mxu1 %v5135_v29  ;;  %v4188_v29 = vcombine.low %v52_v12, %v56_v13  ;;  %v102_v12 = vld [vmem:[%s8030_s0 + $0x2a0] sm:$0xff]  ;;  %v100_v13 = vld [vmem:[%s8030_s0 + $0x290] sm:$0xff] }
  0x2f   :  { %2667 = vmatpush1.bf16.msra.mxu0 %v5136_v30  ;;  %2090 = vmatprep.subr.bf16.mxu1 %v5179_v0  ;;  %v4193_v30 = vcombine.high %v58_v22, %v62_v23  ;;  %v112_v22 = vld [vmem:[%s8030_s0 + $0x2f0] sm:$0xff]  ;;  %v4232_v23 = vcombine.low %v98_v11, %v102_v12 }
  0x30   :  { %2668 = vmatprep.subr.bf16.mxu0 %v5179_v0 }
  0x32   :  { %2091 = vmatpush1.bf16.msra.mxu1 %v5137_v31  ;;  %v4197_v31 = vcombine.high %v60_v25, %v64_v26 }
  0x33   :  { %2669 = vmatpush1.bf16.msra.mxu0 %v5138_v32  ;;  %2092 = vmatprep.subr.bf16.mxu1 %v5179_v0  ;;  %v5161_v32 = vld [vmem:[%s8029_s1 + $0xc0] sm:$0xff]  }
  0x34   :  { %2670 = vmatprep.subr.bf16.mxu0 %v5179_v0 }
  0x36   :  { %2093 = vmatpush1.bf16.msra.mxu1 %v5139_v33  ;;  %v5162_v33 = vld [vmem:[%s8029_s1 + $0x1c0] sm:$0xff]  }
  0x37   :  { %2671 = vmatpush1.bf16.msra.mxu0 %v5140_v34  ;;  %2094 = vmatprep.subr.bf16.mxu1 %v5179_v0  ;;  %v66_v34 = vld [vmem:[%s8030_s0 + $0x180] sm:$0xff] }
  0x38   :  { %2672 = vmatprep.subr.bf16.mxu0 %v5179_v0 }
  0x3a   :  { %2095 = vmatpush1.bf16.msra.mxu1 %v5141_v35  ;;  %v70_v35 = vld [vmem:[%s8030_s0 + $0x1a0] sm:$0xff] }
  0x3b   :  { %2673 = vmatpush1.bf16.msra.mxu0 %v5142_v36  ;;  %2096 = vmatprep.subr.bf16.mxu1 %v5179_v0  ;;  %v5163_v36 = vld [vmem:[%s8029_s1 + $0xc8] sm:$0xff]   ;;  %v4200_v50 = vcombine.low %v66_v34, %v70_v35 }
  0x3c   :  { %2674 = vmatprep.subr.bf16.mxu0 %v5179_v0 }
  0x3e   :  { %2097 = vmatpush1.bf16.msra.mxu1 %v5143_v37  ;;  %v68_v37 = vld [vmem:[%s8030_s0 + $0x190] sm:$0xff] }
  0x3f   :  { %2675 = vmatpush1.bf16.msra.mxu0 %v5144_v38  ;;  %2355 = vmatprep.subr.bf16.mxu1 %v5179_v0  ;;  %v72_v38 = vld [vmem:[%s8030_s0 + $0x1b0] sm:$0xff] }
  0x40   :  { %2933 = vmatprep.subr.bf16.mxu0 %v5179_v0  ;;  %v4205_v43 = vcombine.high %v68_v37, %v72_v38 }
  0x41   :  { %2099 = vmatmul.mubr.bf16.vlgmr.msra.gmra.mrb[0].mxu1 %v4152_v42  ;;  %v4201_v42 = vcombine.high %v66_v34, %v70_v35 }
  0x42   :  { %2677 = vmatmul.mubr.bf16.vlgmr.msra.gmra.mrb[0].mxu0 %v4156_v44  ;;  %2356 = vmatpush1.bf16.msra.mxu1 %v5145_v45  ;;  %v5165_v44 = vld [vmem:[%s8029_s1 + $0xd0] sm:$0xff]  }
  0x43   :  { %2934 = vmatpush1.bf16.msra.mxu0 %v5146_v46  ;;  %2106 = vmatprep.mubr.bf16.mxu1 %v4161_v47  ;;  %v5166_v45 = vld [vmem:[%s8029_s1 + $0x1d0] sm:$0xff]   ;;  %v74_v46 = vld [vmem:[%s8030_s0 + $0x1c0] sm:$0xff] }
  0x44   :  { %2684 = vmatprep.mubr.bf16.mxu0 %v4165_v48  ;;  %2357 = vmatprep.subr.bf16.mxu1 %v5179_v0  ;;  %v78_v47 = vld [vmem:[%s8030_s0 + $0x1e0] sm:$0xff]  ;;  %v76_v48 = vld [vmem:[%s8030_s0 + $0x1d0] sm:$0xff] }
  0x45   :  { %2935 = vmatprep.subr.bf16.mxu0 %v5179_v0  ;;  %v4213_v53 = vcombine.high %v76_v48, %v80_v49  ;;  %v4212_v61 = vcombine.low %v76_v48, %v80_v49  ;;  %v134_v48 = vld [vmem:[%s8030_s0 + $0x3a0] sm:$0xff]  ;;  %v132_v49 = vld [vmem:[%s8030_s0 + $0x390] sm:$0xff] }
  0x46   :  { %2358 = vmatpush1.bf16.msra.mxu1 %v5147_v51  ;;  %v4204_v51 = vcombine.low %v68_v37, %v72_v38  ;;  %v122_v37 = vld [vmem:[%s8030_s0 + $0x340] sm:$0xff] }
  0x47   :  { %2936 = vmatpush1.bf16.msra.mxu0 %v5148_v52  ;;  %2359 = vmatprep.subr.bf16.mxu1 %v5179_v0  ;;  %v4209_v52 = vcombine.high %v74_v46, %v78_v47  ;;  %v126_v38 = vld [vmem:[%s8030_s0 + $0x360] sm:$0xff] }
  0x48   :  { %2937 = vmatprep.subr.bf16.mxu0 %v5179_v0 }
  0x49   :  { %2107 = vmatmul.mubr.bf16.gmra.mrb[4].mxu1 %v4160_v55  ;;  %v5168_v55 = vld [vmem:[%s8029_s1 + $0x1d8] sm:$0xff]  }
  0x4a   :  { %2685 = vmatmul.mubr.bf16.gmra.mrb[4].mxu0 %v4164_v56  ;;  %2114 = vmatprep.mubr.bf16.mxu1 %v4169_v57  ;;  %v82_v56 = vld [vmem:[%s8030_s0 + $0x200] sm:$0xff] }
  0x4b   :  { %2692 = vmatprep.mubr.bf16.mxu0 %v4173_v58  ;;  %2360 = vmatpush1.bf16.msra.mxu1 %v5149_v59  ;;  %v86_v57 = vld [vmem:[%s8030_s0 + $0x220] sm:$0xff]  ;;  %v84_v58 = vld [vmem:[%s8030_s0 + $0x210] sm:$0xff] }
  0x4c   :  { %2938 = vmatpush1.bf16.msra.mxu0 %v5150_v60  ;;  %2361 = vmatprep.subr.bf16.mxu1 %v5179_v0  ;;  %v88_v59 = vld [vmem:[%s8030_s0 + $0x230] sm:$0xff]  ;;  %v4208_v60 = vcombine.low %v74_v46, %v78_v47  ;;  %v4217_v62 = vcombine.high %v82_v56, %v86_v57  ;;  %v130_v47 = vld [vmem:[%s8030_s0 + $0x380] sm:$0xff] }
  0x4d   :  { %2939 = vmatprep.subr.bf16.mxu0 %v5179_v0  ;;  %v4221_v63 = vcombine.high %v84_v58, %v88_v59  ;;  %v5174_v46 = vld [vmem:[%s8029_s1 + $0x1f0] sm:$0xff]  }
  0x4f   :  { %2362 = vmatpush1.bf16.msra.mxu1 %v5151_v2  ;;  %v94_v2 = vld [vmem:[%s8030_s0 + $0x260] sm:$0xff] }
  0x50   :  { %2940 = vmatpush1.bf16.msra.mxu0 %v5152_v3  ;;  %2363 = vmatprep.subr.bf16.mxu1 %v5179_v0  ;;  %v92_v3 = vld [vmem:[%s8030_s0 + $0x250] sm:$0xff] }
  0x51   :  { %2115 = vmatmul.mubr.bf16.gmra.mrb[8].mxu1 %v4168_v4  ;;  %2941 = vmatprep.subr.bf16.mxu0 %v5179_v0  ;;  %v96_v4 = vld [vmem:[%s8030_s0 + $0x270] sm:$0xff] }
  0x52   :  { %2693 = vmatmul.mubr.bf16.gmra.mrb[8].mxu0 %v4172_v6  ;;  %2122 = vmatprep.mubr.bf16.mxu1 %v4177_v7  ;;  %v4220_v6 = vcombine.low %v84_v58, %v88_v59  ;;  %v4225_v7 = vcombine.high %v90_v1, %v94_v2  ;;  %v4264_v58 = vcombine.low %v130_v47, %v134_v48 }
  0x53   :  { %2700 = vmatprep.mubr.bf16.mxu0 %v4181_v9  ;;  %2364 = vmatpush1.bf16.msra.mxu1 %v5153_v5  ;;  %v4216_v5 = vcombine.low %v82_v56, %v86_v57  ;;  %v5169_v9 = vld [vmem:[%s8029_s1 + $0xe0] sm:$0xff]   ;;  %v140_v57 = vld [vmem:[%s8030_s0 + $0x3d0] sm:$0xff] }
  0x54   :  { %2942 = vmatpush1.bf16.msra.mxu0 %v5154_v8  ;;  %2365 = vmatprep.subr.bf16.mxu1 %v5179_v0  ;;  %v4229_v8 = vcombine.high %v92_v3, %v96_v4  ;;  %v142_v56 = vld [vmem:[%s8030_s0 + $0x3e0] sm:$0xff] }
  0x55   :  { %2943 = vmatprep.subr.bf16.mxu0 %v5179_v0 }
  0x57   :  { %2366 = vmatpush1.bf16.msra.mxu1 %v5155_v14  ;;  %v104_v14 = vld [vmem:[%s8030_s0 + $0x2b0] sm:$0xff] }
  0x58   :  { %2944 = vmatpush1.bf16.msra.mxu0 %v5156_v15  ;;  %2367 = vmatprep.subr.bf16.mxu1 %v5179_v0  ;;  %v4224_v15 = vcombine.low %v90_v1, %v94_v2  ;;  %v146_v1 = vld [vmem:[%s8030_s0 + $0x400] sm:$0xff] }
  0x59   :  { %2123 = vmatmul.mubr.bf16.gmra.mrb[12].mxu1 %v4176_v16  ;;  %2945 = vmatprep.subr.bf16.mxu0 %v5179_v0  ;;  %v4228_v16 = vcombine.low %v92_v3, %v96_v4  ;;  %v150_v2 = vld [vmem:[%s8030_s0 + $0x420] sm:$0xff]  ;;  %v148_v3 = vld [vmem:[%s8030_s0 + $0x410] sm:$0xff] }
  0x5a   :  { %2701 = vmatmul.mubr.bf16.gmra.mrb[12].mxu0 %v4180_v17  ;;  %2130 = vmatprep.mubr.bf16.mxu1 %v4185_v18  ;;  %v4233_v17 = vcombine.high %v98_v11, %v102_v12  ;;  %v4237_v18 = vcombine.high %v100_v13, %v104_v14  ;;  %v152_v4 = vld [vmem:[%s8030_s0 + $0x430] sm:$0xff] }
  0x5b   :  { %2708 = vmatprep.mubr.bf16.mxu0 %v4189_v19  ;;  %2368 = vmatpush1.bf16.msra.mxu1 %v5157_v20  ;;  %v106_v19 = vld [vmem:[%s8030_s0 + $0x2c0] sm:$0xff]  ;;  %v156_v11 = vld [vmem:[%s8030_s0 + $0x450] sm:$0xff] }
  0x5c   :  { %2946 = vmatpush1.bf16.msra.mxu0 %v5158_v21  ;;  %2369 = vmatprep.subr.bf16.mxu1 %v5179_v0  ;;  %v110_v20 = vld [vmem:[%s8030_s0 + $0x2e0] sm:$0xff]  ;;  %v108_v21 = vld [vmem:[%s8030_s0 + $0x2d0] sm:$0xff] }
  0x5d   :  { %2947 = vmatprep.subr.bf16.mxu0 %v5179_v0  ;;  %v4241_v25 = vcombine.high %v106_v19, %v110_v20  ;;  %v4245_v26 = vcombine.high %v108_v21, %v112_v22  ;;  %v4244_v34 = vcombine.low %v108_v21, %v112_v22  ;;  %v160_v12 = vld [vmem:[%s8030_s0 + $0x470] sm:$0xff] }
  0x5e   :  { %v4292_v22 = vcombine.low %v156_v11, %v160_v12 }
  0x5f   :  { %2370 = vmatpush1.bf16.msra.mxu1 %v5159_v24  ;;  %v4236_v24 = vcombine.low %v100_v13, %v104_v14  ;;  %v4280_v13 = vcombine.low %v146_v1, %v150_v2  ;;  %v4284_v14 = vcombine.low %v148_v3, %v152_v4 }
  0x60   :  { %2948 = vmatpush1.bf16.msra.mxu0 %v5160_v27  ;;  %2371 = vmatprep.subr.bf16.mxu1 %v5179_v0  ;;  %v5171_v27 = vld [vmem:[%s8029_s1 + $0xe8] sm:$0xff]  }
  0x61   :  { %2131 = vmatmul.mubr.bf16.gmra.mrb[16].mxu1 %v4184_v28  ;;  %2949 = vmatprep.subr.bf16.mxu0 %v5179_v0  ;;  %v5172_v28 = vld [vmem:[%s8029_s1 + $0x1e8] sm:$0xff]  }
  0x62   :  { %2709 = vmatmul.mubr.bf16.gmra.mrb[16].mxu0 %v4188_v29  ;;  %2138 = vmatprep.mubr.bf16.mxu1 %v4193_v30  ;;  %v114_v29 = vld [vmem:[%s8030_s0 + $0x300] sm:$0xff] }
  0x63   :  { %2716 = vmatprep.mubr.bf16.mxu0 %v4197_v31  ;;  %2372 = vmatpush1.bf16.msra.mxu1 %v5161_v32  ;;  %v118_v30 = vld [vmem:[%s8030_s0 + $0x320] sm:$0xff]  ;;  %v116_v31 = vld [vmem:[%s8030_s0 + $0x310] sm:$0xff] }
  0x64   :  { %2950 = vmatpush1.bf16.msra.mxu0 %v5162_v33  ;;  %2373 = vmatprep.subr.bf16.mxu1 %v5179_v0  ;;  %v120_v32 = vld [vmem:[%s8030_s0 + $0x330] sm:$0xff]  ;;  %v4240_v33 = vcombine.low %v106_v19, %v110_v20  ;;  %v4249_v35 = vcombine.high %v114_v29, %v118_v30 }
  0x65   :  { %2951 = vmatprep.subr.bf16.mxu0 %v5179_v0  ;;  %v164_v19 = vld [vmem:[%s8030_s0 + $0x490] sm:$0xff] }
  0x66   :  { %v168_v20 = vld [vmem:[%s8030_s0 + $0x4b0] sm:$0xff] }
  0x67   :  { %2374 = vmatpush1.bf16.msra.mxu1 %v5163_v36  ;;  %v4253_v36 = vcombine.high %v116_v31, %v120_v32 }
  0x68   :  { %2952 = vmatpush1.bf16.msra.mxu0 %v5164_v39  ;;  %2375 = vmatprep.subr.bf16.mxu1 %v5179_v0  ;;  %v124_v39 = vld [vmem:[%s8030_s0 + $0x350] sm:$0xff] }
  0x69   :  { %2139 = vmatmul.mubr.bf16.gmra.mrb[20].mxu1 %v4192_v40  ;;  %2953 = vmatprep.subr.bf16.mxu0 %v5179_v0  ;;  %v128_v40 = vld [vmem:[%s8030_s0 + $0x370] sm:$0xff] }
  0x6a   :  { %2717 = vmatmul.mubr.bf16.gmra.mrb[20].mxu0 %v4196_v41  ;;  %2146 = vmatprep.mubr.bf16.mxu1 %v4201_v42  ;;  %v4248_v41 = vcombine.low %v114_v29, %v118_v30  ;;  %v4252_v42 = vcombine.low %v116_v31, %v120_v32  ;;  %v4300_v30 = vcombine.low %v164_v19, %v168_v20 }
  0x6b   :  { %2724 = vmatprep.mubr.bf16.mxu0 %v4205_v43  ;;  %2376 = vmatpush1.bf16.msra.mxu1 %v5165_v44  ;;  %v4257_v43 = vcombine.high %v122_v37, %v126_v38  ;;  %v4261_v44 = vcombine.high %v124_v39, %v128_v40 }
  0x6c   :  { %2954 = vmatpush1.bf16.msra.mxu0 %v5166_v45  ;;  %2377 = vmatprep.subr.bf16.mxu1 %v5179_v0  ;;  %v5173_v45 = vld [vmem:[%s8029_s1 + $0xf0] sm:$0xff]  }
  0x6d   :  { %2955 = vmatprep.subr.bf16.mxu0 %v5179_v0 }
  0x6f   :  { %2378 = vmatpush1.bf16.msra.mxu1 %v5167_v54 }
  0x70   :  { %2956 = vmatpush1.bf16.msra.mxu0 %v5168_v55  ;;  %2379 = vmatprep.subr.bf16.mxu1 %v5179_v0  ;;  %v138_v55 = vld [vmem:[%s8030_s0 + $0x3c0] sm:$0xff] }
  0x71   :  { %2147 = vmatmul.mubr.bf16.gmra.mrb[24].mxu1 %v4200_v50  ;;  %2957 = vmatprep.subr.bf16.mxu0 %v5179_v0  ;;  %v136_v50 = vld [vmem:[%s8030_s0 + $0x3b0] sm:$0xff] }
  0x72   :  { %2725 = vmatmul.mubr.bf16.gmra.mrb[24].mxu0 %v4204_v51  ;;  %2154 = vmatprep.mubr.bf16.mxu1 %v4209_v52  ;;  %v4256_v51 = vcombine.low %v122_v37, %v126_v38  ;;  %v4260_v52 = vcombine.low %v124_v39, %v128_v40  ;;  %v4269_v54 = vcombine.high %v132_v49, %v136_v50 }
  0x73   :  { %2732 = vmatprep.mubr.bf16.mxu0 %v4213_v53  ;;  %2380 = vmatpush1.bf16.msra.mxu1 %v5169_v9  ;;  %v4265_v53 = vcombine.high %v130_v47, %v134_v48  ;;  %v4268_v59 = vcombine.low %v132_v49, %v136_v50  ;;  %v154_v9 = vld [vmem:[%s8030_s0 + $0x440] sm:$0xff] }
  0x74   :  { %2958 = vmatpush1.bf16.msra.mxu0 %v5170_v10  ;;  %2381 = vmatprep.subr.bf16.mxu1 %v5179_v0  ;;  %v158_v10 = vld [vmem:[%s8030_s0 + $0x460] sm:$0xff] }
  0x75   :  { %2959 = vmatprep.subr.bf16.mxu0 %v5179_v0  ;;  %v4288_v21 = vcombine.low %v154_v9, %v158_v10  ;;  %v194_v49 = vld [vmem:[%s8030_s0 + $0x580] sm:$0xff] }
  0x76   :  { %v198_v50 = vld [vmem:[%s8030_s0 + $0x5a0] sm:$0xff] }
  0x77   :  { %2382 = vmatpush1.bf16.msra.mxu1 %v5171_v27  ;;  %v172_v27 = vld [vmem:[%s8030_s0 + $0x4d0] sm:$0xff] }
  0x78   :  { %2960 = vmatpush1.bf16.msra.mxu0 %v5172_v28  ;;  %2383 = vmatprep.subr.bf16.mxu1 %v5179_v0  ;;  %v176_v28 = vld [vmem:[%s8030_s0 + $0x4f0] sm:$0xff] }
  0x79   :  { %2155 = vmatmul.mubr.bf16.gmra.mrb[28].mxu1 %v4208_v60  ;;  %2961 = vmatprep.subr.bf16.mxu0 %v5179_v0  ;;  %v4273_v60 = vcombine.high %v138_v55, %v142_v56  ;;  %v4309_v32 = vcombine.high %v172_v27, %v176_v28  ;;  %v4308_v38 = vcombine.low %v172_v27, %v176_v28  ;;  %v236_v27 = vld [vmem:[%s8030_s0 + $0x6d0] sm:$0xff] }
  0x7a   :  { %2733 = vmatmul.mubr.bf16.gmra.mrb[28].mxu0 %v4212_v61  ;;  %2162 = vmatprep.mubr.bf16.mxu1 %v4217_v62  ;;  %v5175_v62 = vld [vmem:[%s8029_s1 + $0xf8] sm:$0xff]   ;;  %v240_v28 = vld [vmem:[%s8030_s0 + $0x6f0] sm:$0xff] }
  0x7b   :  { %2740 = vmatprep.mubr.bf16.mxu0 %v4221_v63  ;;  %2384 = vmatpush1.bf16.msra.mxu1 %v5173_v45  ;;  %v5176_v63 = vld [vmem:[%s8029_s1 + $0x1f8] sm:$0xff]  }
  0x7c   :  { %2962 = vmatpush1.bf16.msra.mxu0 %v5174_v46  ;;  %2385 = vmatprep.subr.bf16.mxu1 %v5179_v0 }
  0x7d   :  { %2963 = vmatprep.subr.bf16.mxu0 %v5179_v0  ;;  %v144_v0 = vld [vmem:[%s8030_s0 + $0x3f0] sm:$0xff] }
  0x7e   :  { %v4277_v61 = vcombine.high %v140_v57, %v144_v0 }
  0x7f   :  { %2386 = vmatpush1.bf16.msra.mxu1 %v5175_v62 }
  0x80   :  { %2964 = vmatpush1.bf16.msra.mxu0 %v5176_v63 }
  0x81   :  { %2163 = vmatmul.mubr.bf16.gmra.mrb[32].mxu1 %v4216_v5  ;;  %v4272_v5 = vcombine.low %v138_v55, %v142_v56  ;;  %v4329_v55 = vcombine.high %v194_v49, %v198_v50 }
  0x82   :  { %2741 = vmatmul.mubr.bf16.gmra.mrb[32].mxu0 %v4220_v6  ;;  %2170 = vmatprep.mubr.bf16.mxu1 %v4225_v7  ;;  %v4276_v6 = vcombine.low %v140_v57, %v144_v0  ;;  %v4281_v7 = vcombine.high %v146_v1, %v150_v2  ;;  %v202_v57 = vld [vmem:[%s8030_s0 + $0x5c0] sm:$0xff] }
  0x83   :  { %2748 = vmatprep.mubr.bf16.mxu0 %v4229_v8  ;;  %v4285_v8 = vcombine.high %v148_v3, %v152_v4  ;;  %v206_v0 = vld [vmem:[%s8030_s0 + $0x5e0] sm:$0xff]  ;;  %v212_v3 = vld [vmem:[%s8030_s0 + $0x610] sm:$0xff] }
  0x84   :  { %v4337_v62 = vcombine.high %v202_v57, %v206_v0  ;;  %v210_v1 = vld [vmem:[%s8030_s0 + $0x600] sm:$0xff]  ;;  %v216_v4 = vld [vmem:[%s8030_s0 + $0x630] sm:$0xff] }
  0x85   :  { %v214_v2 = vld [vmem:[%s8030_s0 + $0x620] sm:$0xff] }
  0x89   :  { %2171 = vmatmul.mubr.bf16.gmra.mrb[36].mxu1 %v4224_v15  ;;  %v4289_v15 = vcombine.high %v154_v9, %v158_v10  ;;  %v218_v9 = vld [vmem:[%s8030_s0 + $0x640] sm:$0xff] }
  0x8a   :  { %2749 = vmatmul.mubr.bf16.gmra.mrb[36].mxu0 %v4228_v16  ;;  %2178 = vmatprep.mubr.bf16.mxu1 %v4233_v17  ;;  %v4293_v16 = vcombine.high %v156_v11, %v160_v12  ;;  %v162_v17 = vld [vmem:[%s8030_s0 + $0x480] sm:$0xff]  ;;  %v220_v11 = vld [vmem:[%s8030_s0 + $0x650] sm:$0xff] }
  0x8b   :  { %2756 = vmatprep.mubr.bf16.mxu0 %v4237_v18  ;;  %v166_v18 = vld [vmem:[%s8030_s0 + $0x4a0] sm:$0xff]  ;;  %v224_v12 = vld [vmem:[%s8030_s0 + $0x670] sm:$0xff] }
  0x8c   :  { %v4296_v29 = vcombine.low %v162_v17, %v166_v18  ;;  %v222_v10 = vld [vmem:[%s8030_s0 + $0x660] sm:$0xff] }
  0x91   :  { %2179 = vmatmul.mubr.bf16.gmra.mrb[40].mxu1 %v4232_v23  ;;  %v4297_v23 = vcombine.high %v162_v17, %v166_v18  ;;  %v226_v17 = vld [vmem:[%s8030_s0 + $0x680] sm:$0xff] }
  0x92   :  { %2757 = vmatmul.mubr.bf16.gmra.mrb[40].mxu0 %v4236_v24  ;;  %2186 = vmatprep.mubr.bf16.mxu1 %v4241_v25  ;;  %v4301_v24 = vcombine.high %v164_v19, %v168_v20  ;;  %v170_v25 = vld [vmem:[%s8030_s0 + $0x4c0] sm:$0xff]  ;;  %v228_v19 = vld [vmem:[%s8030_s0 + $0x690] sm:$0xff] }
  0x93   :  { %2764 = vmatprep.mubr.bf16.mxu0 %v4245_v26  ;;  %v174_v26 = vld [vmem:[%s8030_s0 + $0x4e0] sm:$0xff]  ;;  %v232_v20 = vld [vmem:[%s8030_s0 + $0x6b0] sm:$0xff] }
  0x94   :  { %v4305_v31 = vcombine.high %v170_v25, %v174_v26  ;;  %v4304_v37 = vcombine.low %v170_v25, %v174_v26  ;;  %v230_v18 = vld [vmem:[%s8030_s0 + $0x6a0] sm:$0xff] }
  0x95   :  { %v234_v25 = vld [vmem:[%s8030_s0 + $0x6c0] sm:$0xff] }
  0x96   :  { %v238_v26 = vld [vmem:[%s8030_s0 + $0x6e0] sm:$0xff] }
  0x99   :  { %2187 = vmatmul.mubr.bf16.gmra.mrb[44].mxu1 %v4240_v33  ;;  %v178_v33 = vld [vmem:[%s8030_s0 + $0x500] sm:$0xff] }
  0x9a   :  { %2765 = vmatmul.mubr.bf16.gmra.mrb[44].mxu0 %v4244_v34  ;;  %2194 = vmatprep.mubr.bf16.mxu1 %v4249_v35  ;;  %v182_v34 = vld [vmem:[%s8030_s0 + $0x520] sm:$0xff]  ;;  %v180_v35 = vld [vmem:[%s8030_s0 + $0x510] sm:$0xff] }
  0x9b   :  { %2772 = vmatprep.mubr.bf16.mxu0 %v4253_v36  ;;  %v184_v36 = vld [vmem:[%s8030_s0 + $0x530] sm:$0xff]  ;;  %v4313_v39 = vcombine.high %v178_v33, %v182_v34  ;;  %v4312_v45 = vcombine.low %v178_v33, %v182_v34  ;;  %v242_v33 = vld [vmem:[%s8030_s0 + $0x700] sm:$0xff] }
  0x9c   :  { %v4317_v40 = vcombine.high %v180_v35, %v184_v36  ;;  %v4316_v46 = vcombine.low %v180_v35, %v184_v36  ;;  %v246_v34 = vld [vmem:[%s8030_s0 + $0x720] sm:$0xff]  ;;  %v244_v35 = vld [vmem:[%s8030_s0 + $0x710] sm:$0xff] }
  0x9d   :  { %v248_v36 = vld [vmem:[%s8030_s0 + $0x730] sm:$0xff] }
  0xa1   :  { %2195 = vmatmul.mubr.bf16.gmra.mrb[48].mxu1 %v4248_v41  ;;  %v186_v41 = vld [vmem:[%s8030_s0 + $0x540] sm:$0xff] }
  0xa2   :  { %2773 = vmatmul.mubr.bf16.gmra.mrb[48].mxu0 %v4252_v42  ;;  %2202 = vmatprep.mubr.bf16.mxu1 %v4257_v43  ;;  %v190_v42 = vld [vmem:[%s8030_s0 + $0x560] sm:$0xff]  ;;  %v188_v43 = vld [vmem:[%s8030_s0 + $0x550] sm:$0xff] }
  0xa3   :  { %2780 = vmatprep.mubr.bf16.mxu0 %v4261_v44  ;;  %v192_v44 = vld [vmem:[%s8030_s0 + $0x570] sm:$0xff]  ;;  %v4321_v47 = vcombine.high %v186_v41, %v190_v42 }
  0xa4   :  { %v4325_v48 = vcombine.high %v188_v43, %v192_v44 }
  0xa9   :  { %2203 = vmatmul.mubr.bf16.gmra.mrb[52].mxu1 %v4256_v51  ;;  %v196_v51 = vld [vmem:[%s8030_s0 + $0x590] sm:$0xff] }
  0xaa   :  { %2781 = vmatmul.mubr.bf16.gmra.mrb[52].mxu0 %v4260_v52  ;;  %2210 = vmatprep.mubr.bf16.mxu1 %v4265_v53  ;;  %v200_v52 = vld [vmem:[%s8030_s0 + $0x5b0] sm:$0xff]  ;;  %v4320_v53 = vcombine.low %v186_v41, %v190_v42  ;;  %v250_v41 = vld [vmem:[%s8030_s0 + $0x740] sm:$0xff] }
  0xab   :  { %2788 = vmatprep.mubr.bf16.mxu0 %v4269_v54  ;;  %v4324_v54 = vcombine.low %v188_v43, %v192_v44  ;;  %v4333_v56 = vcombine.high %v196_v51, %v200_v52  ;;  %v254_v42 = vld [vmem:[%s8030_s0 + $0x760] sm:$0xff]  ;;  %v252_v43 = vld [vmem:[%s8030_s0 + $0x750] sm:$0xff] }
  0xac   :  { %v256_v44 = vld [vmem:[%s8030_s0 + $0x770] sm:$0xff] }
  0xb1   :  { %2211 = vmatmul.mubr.bf16.gmra.mrb[56].mxu1 %v4264_v58  ;;  %v204_v58 = vld [vmem:[%s8030_s0 + $0x5d0] sm:$0xff] }
  0xb2   :  { %2789 = vmatmul.mubr.bf16.gmra.mrb[56].mxu0 %v4268_v59  ;;  %2218 = vmatprep.mubr.bf16.mxu1 %v4273_v60  ;;  %v208_v59 = vld [vmem:[%s8030_s0 + $0x5f0] sm:$0xff]  ;;  %v4328_v60 = vcombine.low %v194_v49, %v198_v50  ;;  %v258_v49 = vld [vmem:[%s8030_s0 + $0x780] sm:$0xff] }
  0xb3   :  { %2796 = vmatprep.mubr.bf16.mxu0 %v4277_v61  ;;  %v4332_v61 = vcombine.low %v196_v51, %v200_v52  ;;  %v4341_v63 = vcombine.high %v204_v58, %v208_v59  ;;  %v262_v50 = vld [vmem:[%s8030_s0 + $0x7a0] sm:$0xff]  ;;  %v260_v51 = vld [vmem:[%s8030_s0 + $0x790] sm:$0xff] }
  0xb4   :  { %v264_v52 = vld [vmem:[%s8030_s0 + $0x7b0] sm:$0xff] }
  0xb9   :  { %2219 = vmatmul.mubr.bf16.gmra.mrb[60].mxu1 %v4272_v5  ;;  %v4336_v5 = vcombine.low %v202_v57, %v206_v0  ;;  %v266_v57 = vld [vmem:[%s8030_s0 + $0x7c0] sm:$0xff] }
  0xba   :  { %2797 = vmatmul.mubr.bf16.gmra.mrb[60].mxu0 %v4276_v6  ;;  %2226 = vmatprep.mubr.bf16.mxu1 %v4281_v7  ;;  %v4340_v6 = vcombine.low %v204_v58, %v208_v59  ;;  %v4345_v7 = vcombine.high %v210_v1, %v214_v2  ;;  %v270_v0 = vld [vmem:[%s8030_s0 + $0x7e0] sm:$0xff]  ;;  %v268_v58 = vld [vmem:[%s8030_s0 + $0x7d0] sm:$0xff] }
  0xbb   :  { %2804 = vmatprep.mubr.bf16.mxu0 %v4285_v8  ;;  %v4349_v8 = vcombine.high %v212_v3, %v216_v4  ;;  %v272_v59 = vld [vmem:[%s8030_s0 + $0x7f0] sm:$0xff] }
  0xc1   :  { %2227 = vmatmul.mubr.bf16.gmra.mrb[64].mxu1 %v4280_v13  ;;  %v4344_v13 = vcombine.low %v210_v1, %v214_v2  ;;  %v19_v1 = vld [vmem:[%s8030_s0 + $0x8] sm:$0xff] }
  0xc2   :  { %2805 = vmatmul.mubr.bf16.gmra.mrb[64].mxu0 %v4284_v14  ;;  %2234 = vmatprep.mubr.bf16.mxu1 %v4289_v15  ;;  %v4348_v14 = vcombine.low %v212_v3, %v216_v4  ;;  %v4353_v15 = vcombine.high %v218_v9, %v222_v10  ;;  %v23_v2 = vld [vmem:[%s8030_s0 + $0x28] sm:$0xff]  ;;  %v21_v3 = vld [vmem:[%s8030_s0 + $0x18] sm:$0xff] }
  0xc3   :  { %2812 = vmatprep.mubr.bf16.mxu0 %v4293_v16  ;;  %v4357_v16 = vcombine.high %v220_v11, %v224_v12  ;;  %v25_v4 = vld [vmem:[%s8030_s0 + $0x38] sm:$0xff] }
  0xc9   :  { %2235 = vmatmul.mubr.bf16.gmra.mrb[68].mxu1 %v4288_v21  ;;  %v4352_v21 = vcombine.low %v218_v9, %v222_v10  ;;  %v27_v9 = vld [vmem:[%s8030_s0 + $0x48] sm:$0xff] }
  0xca   :  { %2813 = vmatmul.mubr.bf16.gmra.mrb[68].mxu0 %v4292_v22  ;;  %2242 = vmatprep.mubr.bf16.mxu1 %v4297_v23  ;;  %v4356_v22 = vcombine.low %v220_v11, %v224_v12  ;;  %v4361_v23 = vcombine.high %v226_v17, %v230_v18  ;;  %v31_v10 = vld [vmem:[%s8030_s0 + $0x68] sm:$0xff]  ;;  %v29_v11 = vld [vmem:[%s8030_s0 + $0x58] sm:$0xff] }
  0xcb   :  { %2820 = vmatprep.mubr.bf16.mxu0 %v4301_v24  ;;  %v4365_v24 = vcombine.high %v228_v19, %v232_v20  ;;  %v33_v12 = vld [vmem:[%s8030_s0 + $0x78] sm:$0xff] }
  0xd1   :  { %2243 = vmatmul.mubr.bf16.gmra.mrb[72].mxu1 %v4296_v29  ;;  %v4360_v29 = vcombine.low %v226_v17, %v230_v18  ;;  %v35_v17 = vld [vmem:[%s8030_s0 + $0x88] sm:$0xff] }
  0xd2   :  { %2821 = vmatmul.mubr.bf16.gmra.mrb[72].mxu0 %v4300_v30  ;;  %2250 = vmatprep.mubr.bf16.mxu1 %v4305_v31  ;;  %v4364_v30 = vcombine.low %v228_v19, %v232_v20  ;;  %v4369_v31 = vcombine.high %v234_v25, %v238_v26  ;;  %v39_v18 = vld [vmem:[%s8030_s0 + $0xa8] sm:$0xff]  ;;  %v37_v19 = vld [vmem:[%s8030_s0 + $0x98] sm:$0xff] }
  0xd3   :  { %2828 = vmatprep.mubr.bf16.mxu0 %v4309_v32  ;;  %v4373_v32 = vcombine.high %v236_v27, %v240_v28  ;;  %v41_v20 = vld [vmem:[%s8030_s0 + $0xb8] sm:$0xff] }
  0xd9   :  { %2251 = vmatmul.mubr.bf16.gmra.mrb[76].mxu1 %v4304_v37  ;;  %v4368_v37 = vcombine.low %v234_v25, %v238_v26  ;;  %v43_v25 = vld [vmem:[%s8030_s0 + $0xc8] sm:$0xff] }
  0xda   :  { %2829 = vmatmul.mubr.bf16.gmra.mrb[76].mxu0 %v4308_v38  ;;  %2258 = vmatprep.mubr.bf16.mxu1 %v4313_v39  ;;  %v4372_v38 = vcombine.low %v236_v27, %v240_v28  ;;  %v4377_v39 = vcombine.high %v242_v33, %v246_v34  ;;  %v47_v26 = vld [vmem:[%s8030_s0 + $0xe8] sm:$0xff]  ;;  %v45_v27 = vld [vmem:[%s8030_s0 + $0xd8] sm:$0xff] }
  0xdb   :  { %2836 = vmatprep.mubr.bf16.mxu0 %v4317_v40  ;;  %v4381_v40 = vcombine.high %v244_v35, %v248_v36  ;;  %v49_v28 = vld [vmem:[%s8030_s0 + $0xf8] sm:$0xff] }
  0xe1   :  { %2259 = vmatmul.mubr.bf16.gmra.mrb[80].mxu1 %v4312_v45  ;;  %v4376_v45 = vcombine.low %v242_v33, %v246_v34  ;;  %v51_v33 = vld [vmem:[%s8030_s0 + $0x108] sm:$0xff] }
  0xe2   :  { %2837 = vmatmul.mubr.bf16.gmra.mrb[80].mxu0 %v4316_v46  ;;  %2266 = vmatprep.mubr.bf16.mxu1 %v4321_v47  ;;  %v4380_v46 = vcombine.low %v244_v35, %v248_v36  ;;  %v4385_v47 = vcombine.high %v250_v41, %v254_v42  ;;  %v55_v34 = vld [vmem:[%s8030_s0 + $0x128] sm:$0xff]  ;;  %v53_v35 = vld [vmem:[%s8030_s0 + $0x118] sm:$0xff] }
  0xe3   :  { %2844 = vmatprep.mubr.bf16.mxu0 %v4325_v48  ;;  %v4389_v48 = vcombine.high %v252_v43, %v256_v44  ;;  %v57_v36 = vld [vmem:[%s8030_s0 + $0x138] sm:$0xff] }
  0xe9   :  { %2267 = vmatmul.mubr.bf16.gmra.mrb[84].mxu1 %v4320_v53  ;;  %v4384_v53 = vcombine.low %v250_v41, %v254_v42  ;;  %v59_v41 = vld [vmem:[%s8030_s0 + $0x148] sm:$0xff] }
  0xea   :  { %2845 = vmatmul.mubr.bf16.gmra.mrb[84].mxu0 %v4324_v54  ;;  %2274 = vmatprep.mubr.bf16.mxu1 %v4329_v55  ;;  %v4388_v54 = vcombine.low %v252_v43, %v256_v44  ;;  %v4393_v55 = vcombine.high %v258_v49, %v262_v50  ;;  %v63_v42 = vld [vmem:[%s8030_s0 + $0x168] sm:$0xff]  ;;  %v61_v43 = vld [vmem:[%s8030_s0 + $0x158] sm:$0xff] }
  0xeb   :  { %2852 = vmatprep.mubr.bf16.mxu0 %v4333_v56  ;;  %v4397_v56 = vcombine.high %v260_v51, %v264_v52  ;;  %v65_v44 = vld [vmem:[%s8030_s0 + $0x178] sm:$0xff] }
  0xf1   :  { %2275 = vmatmul.mubr.bf16.gmra.mrb[88].mxu1 %v4328_v60  ;;  %v4392_v60 = vcombine.low %v258_v49, %v262_v50  ;;  %v67_v49 = vld [vmem:[%s8030_s0 + $0x188] sm:$0xff] }
  0xf2   :  { %2853 = vmatmul.mubr.bf16.gmra.mrb[88].mxu0 %v4332_v61  ;;  %2282 = vmatprep.mubr.bf16.mxu1 %v4337_v62  ;;  %v4396_v61 = vcombine.low %v260_v51, %v264_v52  ;;  %v4401_v62 = vcombine.high %v266_v57, %v270_v0  ;;  %v71_v50 = vld [vmem:[%s8030_s0 + $0x1a8] sm:$0xff]  ;;  %v69_v51 = vld [vmem:[%s8030_s0 + $0x198] sm:$0xff] }
  0xf3   :  { %2860 = vmatprep.mubr.bf16.mxu0 %v4341_v63  ;;  %v4405_v63 = vcombine.high %v268_v58, %v272_v59  ;;  %v73_v52 = vld [vmem:[%s8030_s0 + $0x1b8] sm:$0xff] }
  0xf9   :  { %2283 = vmatmul.mubr.bf16.gmra.mrb[92].mxu1 %v4336_v5  ;;  %v4400_v5 = vcombine.low %v266_v57, %v270_v0  ;;  %v75_v57 = vld [vmem:[%s8030_s0 + $0x1c8] sm:$0xff] }
  0xfa   :  { %2861 = vmatmul.mubr.bf16.gmra.mrb[92].mxu0 %v4340_v6  ;;  %2290 = vmatprep.mubr.bf16.mxu1 %v4345_v7  ;;  %v4404_v6 = vcombine.low %v268_v58, %v272_v59  ;;  %v4155_v7 = vcombine.high %v19_v1, %v23_v2  ;;  %v79_v0 = vld [vmem:[%s8030_s0 + $0x1e8] sm:$0xff]  ;;  %v77_v58 = vld [vmem:[%s8030_s0 + $0x1d8] sm:$0xff] }
  0xfb   :  { %2868 = vmatprep.mubr.bf16.mxu0 %v4349_v8  ;;  %v4159_v8 = vcombine.high %v21_v3, %v25_v4  ;;  %v81_v59 = vld [vmem:[%s8030_s0 + $0x1f8] sm:$0xff] }
 0x101   :  { %2291 = vmatmul.mubr.bf16.gmra.mrb[96].mxu1 %v4344_v13  ;;  %v4154_v13 = vcombine.low %v19_v1, %v23_v2  ;;  %v83_v1 = vld [vmem:[%s8030_s0 + $0x208] sm:$0xff] }
 0x102   :  { %2869 = vmatmul.mubr.bf16.gmra.mrb[96].mxu0 %v4348_v14  ;;  %2298 = vmatprep.mubr.bf16.mxu1 %v4353_v15  ;;  %v4158_v14 = vcombine.low %v21_v3, %v25_v4  ;;  %v4163_v15 = vcombine.high %v27_v9, %v31_v10  ;;  %v87_v2 = vld [vmem:[%s8030_s0 + $0x228] sm:$0xff]  ;;  %v85_v3 = vld [vmem:[%s8030_s0 + $0x218] sm:$0xff] }
 0x103   :  { %2876 = vmatprep.mubr.bf16.mxu0 %v4357_v16  ;;  %v4167_v16 = vcombine.high %v29_v11, %v33_v12  ;;  %v89_v4 = vld [vmem:[%s8030_s0 + $0x238] sm:$0xff] }
 0x109   :  { %2299 = vmatmul.mubr.bf16.gmra.mrb[100].mxu1 %v4352_v21  ;;  %v4162_v21 = vcombine.low %v27_v9, %v31_v10  ;;  %v91_v9 = vld [vmem:[%s8030_s0 + $0x248] sm:$0xff] }
 0x10a   :  { %2877 = vmatmul.mubr.bf16.gmra.mrb[100].mxu0 %v4356_v22  ;;  %2306 = vmatprep.mubr.bf16.mxu1 %v4361_v23  ;;  %v4166_v22 = vcombine.low %v29_v11, %v33_v12  ;;  %v4171_v23 = vcombine.high %v35_v17, %v39_v18  ;;  %v95_v10 = vld [vmem:[%s8030_s0 + $0x268] sm:$0xff]  ;;  %v93_v11 = vld [vmem:[%s8030_s0 + $0x258] sm:$0xff] }
 0x10b   :  { %2884 = vmatprep.mubr.bf16.mxu0 %v4365_v24  ;;  %v4175_v24 = vcombine.high %v37_v19, %v41_v20  ;;  %v97_v12 = vld [vmem:[%s8030_s0 + $0x278] sm:$0xff] }
 0x111   :  { %2307 = vmatmul.mubr.bf16.gmra.mrb[104].mxu1 %v4360_v29  ;;  %v4170_v29 = vcombine.low %v35_v17, %v39_v18  ;;  %v99_v17 = vld [vmem:[%s8030_s0 + $0x288] sm:$0xff] }
 0x112   :  { %2885 = vmatmul.mubr.bf16.gmra.mrb[104].mxu0 %v4364_v30  ;;  %2314 = vmatprep.mubr.bf16.mxu1 %v4369_v31  ;;  %v4174_v30 = vcombine.low %v37_v19, %v41_v20  ;;  %v4179_v31 = vcombine.high %v43_v25, %v47_v26  ;;  %v103_v18 = vld [vmem:[%s8030_s0 + $0x2a8] sm:$0xff]  ;;  %v101_v19 = vld [vmem:[%s8030_s0 + $0x298] sm:$0xff] }
 0x113   :  { %2892 = vmatprep.mubr.bf16.mxu0 %v4373_v32  ;;  %v4183_v32 = vcombine.high %v45_v27, %v49_v28  ;;  %v105_v20 = vld [vmem:[%s8030_s0 + $0x2b8] sm:$0xff] }
 0x119   :  { %2315 = vmatmul.mubr.bf16.gmra.mrb[108].mxu1 %v4368_v37  ;;  %v4178_v37 = vcombine.low %v43_v25, %v47_v26  ;;  %v107_v25 = vld [vmem:[%s8030_s0 + $0x2c8] sm:$0xff] }
 0x11a   :  { %2893 = vmatmul.mubr.bf16.gmra.mrb[108].mxu0 %v4372_v38  ;;  %2322 = vmatprep.mubr.bf16.mxu1 %v4377_v39  ;;  %v4182_v38 = vcombine.low %v45_v27, %v49_v28  ;;  %v4187_v39 = vcombine.high %v51_v33, %v55_v34  ;;  %v111_v26 = vld [vmem:[%s8030_s0 + $0x2e8] sm:$0xff]  ;;  %v109_v27 = vld [vmem:[%s8030_s0 + $0x2d8] sm:$0xff] }
 0x11b   :  { %2900 = vmatprep.mubr.bf16.mxu0 %v4381_v40  ;;  %v4191_v40 = vcombine.high %v53_v35, %v57_v36  ;;  %v113_v28 = vld [vmem:[%s8030_s0 + $0x2f8] sm:$0xff] }
 0x121   :  { %2323 = vmatmul.mubr.bf16.gmra.mrb[112].mxu1 %v4376_v45  ;;  %v4186_v45 = vcombine.low %v51_v33, %v55_v34  ;;  %v115_v33 = vld [vmem:[%s8030_s0 + $0x308] sm:$0xff] }
 0x122   :  { %2901 = vmatmul.mubr.bf16.gmra.mrb[112].mxu0 %v4380_v46  ;;  %2330 = vmatprep.mubr.bf16.mxu1 %v4385_v47  ;;  %v4190_v46 = vcombine.low %v53_v35, %v57_v36  ;;  %v4195_v47 = vcombine.high %v59_v41, %v63_v42  ;;  %v119_v34 = vld [vmem:[%s8030_s0 + $0x328] sm:$0xff]  ;;  %v117_v35 = vld [vmem:[%s8030_s0 + $0x318] sm:$0xff] }
 0x123   :  { %2908 = vmatprep.mubr.bf16.mxu0 %v4389_v48  ;;  %v4199_v48 = vcombine.high %v61_v43, %v65_v44  ;;  %v121_v36 = vld [vmem:[%s8030_s0 + $0x338] sm:$0xff] }
 0x129   :  { %2331 = vmatmul.mubr.bf16.gmra.mrb[116].mxu1 %v4384_v53  ;;  %v4194_v53 = vcombine.low %v59_v41, %v63_v42  ;;  %v123_v41 = vld [vmem:[%s8030_s0 + $0x348] sm:$0xff] }
 0x12a   :  { %2909 = vmatmul.mubr.bf16.gmra.mrb[116].mxu0 %v4388_v54  ;;  %2338 = vmatprep.mubr.bf16.mxu1 %v4393_v55  ;;  %v4198_v54 = vcombine.low %v61_v43, %v65_v44  ;;  %v4203_v55 = vcombine.high %v67_v49, %v71_v50  ;;  %v127_v42 = vld [vmem:[%s8030_s0 + $0x368] sm:$0xff]  ;;  %v125_v43 = vld [vmem:[%s8030_s0 + $0x358] sm:$0xff] }
 0x12b   :  { %2916 = vmatprep.mubr.bf16.mxu0 %v4397_v56  ;;  %v4207_v56 = vcombine.high %v69_v51, %v73_v52  ;;  %v129_v44 = vld [vmem:[%s8030_s0 + $0x378] sm:$0xff] }
 0x131   :  { %2339 = vmatmul.mubr.bf16.gmra.mrb[120].mxu1 %v4392_v60  ;;  %v4202_v60 = vcombine.low %v67_v49, %v71_v50  ;;  %v131_v49 = vld [vmem:[%s8030_s0 + $0x388] sm:$0xff] }
 0x132   :  { %2917 = vmatmul.mubr.bf16.gmra.mrb[120].mxu0 %v4396_v61  ;;  %2346 = vmatprep.mubr.bf16.mxu1 %v4401_v62  ;;  %v4206_v61 = vcombine.low %v69_v51, %v73_v52  ;;  %v4211_v62 = vcombine.high %v75_v57, %v79_v0  ;;  %v135_v50 = vld [vmem:[%s8030_s0 + $0x3a8] sm:$0xff]  ;;  %v133_v51 = vld [vmem:[%s8030_s0 + $0x398] sm:$0xff] }
 0x133   :  { %2924 = vmatprep.mubr.bf16.mxu0 %v4405_v63  ;;  %v4215_v63 = vcombine.high %v77_v58, %v81_v59  ;;  %v137_v52 = vld [vmem:[%s8030_s0 + $0x3b8] sm:$0xff] }
 0x139   :  { %2347 = vmatmul.mubr.bf16.gmra.mrb[124].mxu1 %v4400_v5  ;;  %v4210_v5 = vcombine.low %v75_v57, %v79_v0  ;;  %v139_v57 = vld [vmem:[%s8030_s0 + $0x3c8] sm:$0xff] }
 0x13a   :  { %2925 = vmatmul.mubr.bf16.gmra.mrb[124].mxu0 %v4404_v6  ;;  %2387 = vmatprep.mubr.bf16.mxu1 %v4155_v7  ;;  %v4214_v6 = vcombine.low %v77_v58, %v81_v59  ;;  %v4219_v7 = vcombine.high %v83_v1, %v87_v2  ;;  %v143_v0 = vld [vmem:[%s8030_s0 + $0x3e8] sm:$0xff]  ;;  %v141_v58 = vld [vmem:[%s8030_s0 + $0x3d8] sm:$0xff] }
 0x13b   :  { %2965 = vmatprep.mubr.bf16.mxu0 %v4159_v8  ;;  %v4223_v8 = vcombine.high %v85_v3, %v89_v4  ;;  %v145_v59 = vld [vmem:[%s8030_s0 + $0x3f8] sm:$0xff] }
 0x141   :  { %2388 = vmatmul.mubr.bf16.vlgmr.msra.gmra.mrb[0].mxu1 %v4154_v13  ;;  %v4218_v13 = vcombine.low %v83_v1, %v87_v2  ;;  %v147_v1 = vld [vmem:[%s8030_s0 + $0x408] sm:$0xff] }
 0x142   :  { %2966 = vmatmul.mubr.bf16.vlgmr.msra.gmra.mrb[0].mxu0 %v4158_v14  ;;  %2395 = vmatprep.mubr.bf16.mxu1 %v4163_v15  ;;  %v4222_v14 = vcombine.low %v85_v3, %v89_v4  ;;  %v4227_v15 = vcombine.high %v91_v9, %v95_v10  ;;  %v151_v2 = vld [vmem:[%s8030_s0 + $0x428] sm:$0xff]  ;;  %v149_v3 = vld [vmem:[%s8030_s0 + $0x418] sm:$0xff] }
 0x143   :  { %2973 = vmatprep.mubr.bf16.mxu0 %v4167_v16  ;;  %v4231_v16 = vcombine.high %v93_v11, %v97_v12  ;;  %v153_v4 = vld [vmem:[%s8030_s0 + $0x438] sm:$0xff] }
 0x149   :  { %2396 = vmatmul.mubr.bf16.gmra.mrb[4].mxu1 %v4162_v21  ;;  %v4226_v21 = vcombine.low %v91_v9, %v95_v10  ;;  %v155_v9 = vld [vmem:[%s8030_s0 + $0x448] sm:$0xff] }
 0x14a   :  { %2974 = vmatmul.mubr.bf16.gmra.mrb[4].mxu0 %v4166_v22  ;;  %2403 = vmatprep.mubr.bf16.mxu1 %v4171_v23  ;;  %v4230_v22 = vcombine.low %v93_v11, %v97_v12  ;;  %v4235_v23 = vcombine.high %v99_v17, %v103_v18  ;;  %v159_v10 = vld [vmem:[%s8030_s0 + $0x468] sm:$0xff]  ;;  %v157_v11 = vld [vmem:[%s8030_s0 + $0x458] sm:$0xff] }
 0x14b   :  { %2981 = vmatprep.mubr.bf16.mxu0 %v4175_v24  ;;  %v4239_v24 = vcombine.high %v101_v19, %v105_v20  ;;  %v161_v12 = vld [vmem:[%s8030_s0 + $0x478] sm:$0xff] }
 0x151   :  { %2404 = vmatmul.mubr.bf16.gmra.mrb[8].mxu1 %v4170_v29  ;;  %v4234_v29 = vcombine.low %v99_v17, %v103_v18  ;;  %v163_v17 = vld [vmem:[%s8030_s0 + $0x488] sm:$0xff] }
 0x152   :  { %2982 = vmatmul.mubr.bf16.gmra.mrb[8].mxu0 %v4174_v30  ;;  %2411 = vmatprep.mubr.bf16.mxu1 %v4179_v31  ;;  %v4238_v30 = vcombine.low %v101_v19, %v105_v20  ;;  %v4243_v31 = vcombine.high %v107_v25, %v111_v26  ;;  %v167_v18 = vld [vmem:[%s8030_s0 + $0x4a8] sm:$0xff]  ;;  %v165_v19 = vld [vmem:[%s8030_s0 + $0x498] sm:$0xff] }
 0x153   :  { %2989 = vmatprep.mubr.bf16.mxu0 %v4183_v32  ;;  %v4247_v32 = vcombine.high %v109_v27, %v113_v28  ;;  %v169_v20 = vld [vmem:[%s8030_s0 + $0x4b8] sm:$0xff] }
 0x159   :  { %2412 = vmatmul.mubr.bf16.gmra.mrb[12].mxu1 %v4178_v37  ;;  %v4242_v37 = vcombine.low %v107_v25, %v111_v26  ;;  %v171_v25 = vld [vmem:[%s8030_s0 + $0x4c8] sm:$0xff] }
 0x15a   :  { %2990 = vmatmul.mubr.bf16.gmra.mrb[12].mxu0 %v4182_v38  ;;  %2419 = vmatprep.mubr.bf16.mxu1 %v4187_v39  ;;  %v4246_v38 = vcombine.low %v109_v27, %v113_v28  ;;  %v4251_v39 = vcombine.high %v115_v33, %v119_v34  ;;  %v175_v26 = vld [vmem:[%s8030_s0 + $0x4e8] sm:$0xff]  ;;  %v173_v27 = vld [vmem:[%s8030_s0 + $0x4d8] sm:$0xff] }
 0x15b   :  { %2997 = vmatprep.mubr.bf16.mxu0 %v4191_v40  ;;  %v4255_v40 = vcombine.high %v117_v35, %v121_v36  ;;  %v177_v28 = vld [vmem:[%s8030_s0 + $0x4f8] sm:$0xff] }
 0x161   :  { %2420 = vmatmul.mubr.bf16.gmra.mrb[16].mxu1 %v4186_v45  ;;  %v4250_v45 = vcombine.low %v115_v33, %v119_v34  ;;  %v179_v33 = vld [vmem:[%s8030_s0 + $0x508] sm:$0xff] }
 0x162   :  { %2998 = vmatmul.mubr.bf16.gmra.mrb[16].mxu0 %v4190_v46  ;;  %2427 = vmatprep.mubr.bf16.mxu1 %v4195_v47  ;;  %v4254_v46 = vcombine.low %v117_v35, %v121_v36  ;;  %v4259_v47 = vcombine.high %v123_v41, %v127_v42  ;;  %v183_v34 = vld [vmem:[%s8030_s0 + $0x528] sm:$0xff]  ;;  %v181_v35 = vld [vmem:[%s8030_s0 + $0x518] sm:$0xff] }
 0x163   :  { %3005 = vmatprep.mubr.bf16.mxu0 %v4199_v48  ;;  %v4263_v48 = vcombine.high %v125_v43, %v129_v44  ;;  %v185_v36 = vld [vmem:[%s8030_s0 + $0x538] sm:$0xff] }
 0x169   :  { %2428 = vmatmul.mubr.bf16.gmra.mrb[20].mxu1 %v4194_v53  ;;  %v4258_v53 = vcombine.low %v123_v41, %v127_v42  ;;  %v187_v41 = vld [vmem:[%s8030_s0 + $0x548] sm:$0xff] }
 0x16a   :  { %3006 = vmatmul.mubr.bf16.gmra.mrb[20].mxu0 %v4198_v54  ;;  %2435 = vmatprep.mubr.bf16.mxu1 %v4203_v55  ;;  %v4262_v54 = vcombine.low %v125_v43, %v129_v44  ;;  %v4267_v55 = vcombine.high %v131_v49, %v135_v50  ;;  %v191_v42 = vld [vmem:[%s8030_s0 + $0x568] sm:$0xff]  ;;  %v189_v43 = vld [vmem:[%s8030_s0 + $0x558] sm:$0xff] }
 0x16b   :  { %3013 = vmatprep.mubr.bf16.mxu0 %v4207_v56  ;;  %v4271_v56 = vcombine.high %v133_v51, %v137_v52  ;;  %v193_v44 = vld [vmem:[%s8030_s0 + $0x578] sm:$0xff] }
 0x171   :  { %2436 = vmatmul.mubr.bf16.gmra.mrb[24].mxu1 %v4202_v60  ;;  %v4266_v60 = vcombine.low %v131_v49, %v135_v50  ;;  %v195_v49 = vld [vmem:[%s8030_s0 + $0x588] sm:$0xff] }
 0x172   :  { %3014 = vmatmul.mubr.bf16.gmra.mrb[24].mxu0 %v4206_v61  ;;  %2443 = vmatprep.mubr.bf16.mxu1 %v4211_v62  ;;  %v4270_v61 = vcombine.low %v133_v51, %v137_v52  ;;  %v4275_v62 = vcombine.high %v139_v57, %v143_v0  ;;  %v199_v50 = vld [vmem:[%s8030_s0 + $0x5a8] sm:$0xff]  ;;  %v197_v51 = vld [vmem:[%s8030_s0 + $0x598] sm:$0xff] }
 0x173   :  { %3021 = vmatprep.mubr.bf16.mxu0 %v4215_v63  ;;  %v4279_v63 = vcombine.high %v141_v58, %v145_v59  ;;  %v201_v52 = vld [vmem:[%s8030_s0 + $0x5b8] sm:$0xff] }
 0x179   :  { %2444 = vmatmul.mubr.bf16.gmra.mrb[28].mxu1 %v4210_v5  ;;  %v4274_v5 = vcombine.low %v139_v57, %v143_v0  ;;  %v203_v57 = vld [vmem:[%s8030_s0 + $0x5c8] sm:$0xff] }
 0x17a   :  { %3022 = vmatmul.mubr.bf16.gmra.mrb[28].mxu0 %v4214_v6  ;;  %2451 = vmatprep.mubr.bf16.mxu1 %v4219_v7  ;;  %v4278_v6 = vcombine.low %v141_v58, %v145_v59  ;;  %v4283_v7 = vcombine.high %v147_v1, %v151_v2  ;;  %v207_v0 = vld [vmem:[%s8030_s0 + $0x5e8] sm:$0xff]  ;;  %v205_v58 = vld [vmem:[%s8030_s0 + $0x5d8] sm:$0xff] }
 0x17b   :  { %3029 = vmatprep.mubr.bf16.mxu0 %v4223_v8  ;;  %v4287_v8 = vcombine.high %v149_v3, %v153_v4  ;;  %v209_v59 = vld [vmem:[%s8030_s0 + $0x5f8] sm:$0xff] }
 0x181   :  { %2452 = vmatmul.mubr.bf16.gmra.mrb[32].mxu1 %v4218_v13  ;;  %v4282_v13 = vcombine.low %v147_v1, %v151_v2  ;;  %v211_v1 = vld [vmem:[%s8030_s0 + $0x608] sm:$0xff] }
 0x182   :  { %3030 = vmatmul.mubr.bf16.gmra.mrb[32].mxu0 %v4222_v14  ;;  %2459 = vmatprep.mubr.bf16.mxu1 %v4227_v15  ;;  %v4286_v14 = vcombine.low %v149_v3, %v153_v4  ;;  %v4291_v15 = vcombine.high %v155_v9, %v159_v10  ;;  %v215_v2 = vld [vmem:[%s8030_s0 + $0x628] sm:$0xff]  ;;  %v213_v3 = vld [vmem:[%s8030_s0 + $0x618] sm:$0xff] }
 0x183   :  { %3037 = vmatprep.mubr.bf16.mxu0 %v4231_v16  ;;  %v4295_v16 = vcombine.high %v157_v11, %v161_v12  ;;  %v217_v4 = vld [vmem:[%s8030_s0 + $0x638] sm:$0xff] }
 0x189   :  { %2460 = vmatmul.mubr.bf16.gmra.mrb[36].mxu1 %v4226_v21  ;;  %v4290_v21 = vcombine.low %v155_v9, %v159_v10  ;;  %v219_v9 = vld [vmem:[%s8030_s0 + $0x648] sm:$0xff] }
 0x18a   :  { %3038 = vmatmul.mubr.bf16.gmra.mrb[36].mxu0 %v4230_v22  ;;  %2467 = vmatprep.mubr.bf16.mxu1 %v4235_v23  ;;  %v4294_v22 = vcombine.low %v157_v11, %v161_v12  ;;  %v4299_v23 = vcombine.high %v163_v17, %v167_v18  ;;  %v223_v10 = vld [vmem:[%s8030_s0 + $0x668] sm:$0xff]  ;;  %v221_v11 = vld [vmem:[%s8030_s0 + $0x658] sm:$0xff] }
 0x18b   :  { %3045 = vmatprep.mubr.bf16.mxu0 %v4239_v24  ;;  %v4303_v24 = vcombine.high %v165_v19, %v169_v20  ;;  %v225_v12 = vld [vmem:[%s8030_s0 + $0x678] sm:$0xff] }
 0x191   :  { %2468 = vmatmul.mubr.bf16.gmra.mrb[40].mxu1 %v4234_v29  ;;  %v4298_v29 = vcombine.low %v163_v17, %v167_v18  ;;  %v227_v17 = vld [vmem:[%s8030_s0 + $0x688] sm:$0xff] }
 0x192   :  { %3046 = vmatmul.mubr.bf16.gmra.mrb[40].mxu0 %v4238_v30  ;;  %2475 = vmatprep.mubr.bf16.mxu1 %v4243_v31  ;;  %v4302_v30 = vcombine.low %v165_v19, %v169_v20  ;;  %v4307_v31 = vcombine.high %v171_v25, %v175_v26  ;;  %v231_v18 = vld [vmem:[%s8030_s0 + $0x6a8] sm:$0xff]  ;;  %v229_v19 = vld [vmem:[%s8030_s0 + $0x698] sm:$0xff] }
 0x193   :  { %3053 = vmatprep.mubr.bf16.mxu0 %v4247_v32  ;;  %v4311_v32 = vcombine.high %v173_v27, %v177_v28  ;;  %v233_v20 = vld [vmem:[%s8030_s0 + $0x6b8] sm:$0xff] }
 0x199   :  { %2476 = vmatmul.mubr.bf16.gmra.mrb[44].mxu1 %v4242_v37  ;;  %v4306_v37 = vcombine.low %v171_v25, %v175_v26  ;;  %v235_v25 = vld [vmem:[%s8030_s0 + $0x6c8] sm:$0xff] }
 0x19a   :  { %3054 = vmatmul.mubr.bf16.gmra.mrb[44].mxu0 %v4246_v38  ;;  %2483 = vmatprep.mubr.bf16.mxu1 %v4251_v39  ;;  %v4310_v38 = vcombine.low %v173_v27, %v177_v28  ;;  %v4315_v39 = vcombine.high %v179_v33, %v183_v34  ;;  %v239_v26 = vld [vmem:[%s8030_s0 + $0x6e8] sm:$0xff]  ;;  %v237_v27 = vld [vmem:[%s8030_s0 + $0x6d8] sm:$0xff] }
 0x19b   :  { %3061 = vmatprep.mubr.bf16.mxu0 %v4255_v40  ;;  %v4319_v40 = vcombine.high %v181_v35, %v185_v36  ;;  %v241_v28 = vld [vmem:[%s8030_s0 + $0x6f8] sm:$0xff] }
 0x1a1   :  { %2484 = vmatmul.mubr.bf16.gmra.mrb[48].mxu1 %v4250_v45  ;;  %v4314_v45 = vcombine.low %v179_v33, %v183_v34  ;;  %v243_v33 = vld [vmem:[%s8030_s0 + $0x708] sm:$0xff] }
 0x1a2   :  { %3062 = vmatmul.mubr.bf16.gmra.mrb[48].mxu0 %v4254_v46  ;;  %2491 = vmatprep.mubr.bf16.mxu1 %v4259_v47  ;;  %v4318_v46 = vcombine.low %v181_v35, %v185_v36  ;;  %v4323_v47 = vcombine.high %v187_v41, %v191_v42  ;;  %v247_v34 = vld [vmem:[%s8030_s0 + $0x728] sm:$0xff]  ;;  %v245_v36 = vld [vmem:[%s8030_s0 + $0x718] sm:$0xff] }
 0x1a3   :  { %3069 = vmatprep.mubr.bf16.mxu0 %v4263_v48  ;;  %v4327_v48 = vcombine.high %v189_v43, %v193_v44 }
 0x1a9   :  { %2492 = vmatmul.mubr.bf16.gmra.mrb[52].mxu1 %v4258_v53  ;;  %v4322_v53 = vcombine.low %v187_v41, %v191_v42 }
 0x1aa   :  { %3070 = vmatmul.mubr.bf16.gmra.mrb[52].mxu0 %v4262_v54  ;;  %2499 = vmatprep.mubr.bf16.mxu1 %v4267_v55  ;;  %v4326_v54 = vcombine.low %v189_v43, %v193_v44  ;;  %v4331_v55 = vcombine.high %v195_v49, %v199_v50  ;;  %v4374_v44 = vcombine.low %v237_v27, %v241_v28 }
 0x1ab   :  { %3077 = vmatprep.mubr.bf16.mxu0 %v4271_v56  ;;  %v4335_v56 = vcombine.high %v197_v51, %v201_v52 }
 0x1b1   :  { %2500 = vmatmul.mubr.bf16.gmra.mrb[56].mxu1 %v4266_v60  ;;  %v4330_v60 = vcombine.low %v195_v49, %v199_v50 }
 0x1b2   :  { %3078 = vmatmul.mubr.bf16.gmra.mrb[56].mxu0 %v4270_v61  ;;  %2507 = vmatprep.mubr.bf16.mxu1 %v4275_v62  ;;  %v4334_v61 = vcombine.low %v197_v51, %v201_v52  ;;  %v4339_v62 = vcombine.high %v203_v57, %v207_v0  ;;  %v251_v51 = vld [vmem:[%s8030_s0 + $0x748] sm:$0xff] }
 0x1b3   :  { %3085 = vmatprep.mubr.bf16.mxu0 %v4279_v63  ;;  %v4343_v63 = vcombine.high %v205_v58, %v209_v59  ;;  %v255_v52 = vld [vmem:[%s8030_s0 + $0x768] sm:$0xff] }
 0x1b9   :  { %2508 = vmatmul.mubr.bf16.gmra.mrb[60].mxu1 %v4274_v5  ;;  %v4338_v5 = vcombine.low %v203_v57, %v207_v0  ;;  %v4378_v0 = vcombine.low %v243_v33, %v247_v34 }
 0x1ba   :  { %3086 = vmatmul.mubr.bf16.gmra.mrb[60].mxu0 %v4278_v6  ;;  %2515 = vmatprep.mubr.bf16.mxu1 %v4283_v7  ;;  %v4342_v6 = vcombine.low %v205_v58, %v209_v59  ;;  %v4347_v7 = vcombine.high %v211_v1, %v215_v2 }
 0x1bb   :  { %3093 = vmatprep.mubr.bf16.mxu0 %v4287_v8  ;;  %v4351_v8 = vcombine.high %v213_v3, %v217_v4 }
 0x1c1   :  { %2516 = vmatmul.mubr.bf16.gmra.mrb[64].mxu1 %v4282_v13  ;;  %v4346_v13 = vcombine.low %v211_v1, %v215_v2 }
 0x1c2   :  { %3094 = vmatmul.mubr.bf16.gmra.mrb[64].mxu0 %v4286_v14  ;;  %2523 = vmatprep.mubr.bf16.mxu1 %v4291_v15  ;;  %v4350_v14 = vcombine.low %v213_v3, %v217_v4  ;;  %v4355_v15 = vcombine.high %v219_v9, %v223_v10 }
 0x1c3   :  { %3101 = vmatprep.mubr.bf16.mxu0 %v4295_v16  ;;  %v4359_v16 = vcombine.high %v221_v11, %v225_v12 }
 0x1c9   :  { %2524 = vmatmul.mubr.bf16.gmra.mrb[68].mxu1 %v4290_v21  ;;  %v4354_v21 = vcombine.low %v219_v9, %v223_v10  ;;  %v265_v9 = vld [vmem:[%s8030_s0 + $0x7b8] sm:$0xff] }
 0x1ca   :  { %3102 = vmatmul.mubr.bf16.gmra.mrb[68].mxu0 %v4294_v22  ;;  %2531 = vmatprep.mubr.bf16.mxu1 %v4299_v23  ;;  %v4358_v22 = vcombine.low %v221_v11, %v225_v12  ;;  %v4363_v23 = vcombine.high %v227_v17, %v231_v18  ;;  %v4386_v12 = vcombine.low %v251_v51, %v255_v52 }
 0x1cb   :  { %3109 = vmatprep.mubr.bf16.mxu0 %v4303_v24  ;;  %v4367_v24 = vcombine.high %v229_v19, %v233_v20 }
 0x1d1   :  { %2532 = vmatmul.mubr.bf16.gmra.mrb[72].mxu1 %v4298_v29  ;;  %v4362_v29 = vcombine.low %v227_v17, %v231_v18 }
 0x1d2   :  { %3110 = vmatmul.mubr.bf16.gmra.mrb[72].mxu0 %v4302_v30  ;;  %2539 = vmatprep.mubr.bf16.mxu1 %v4307_v31  ;;  %v4366_v30 = vcombine.low %v229_v19, %v233_v20  ;;  %v4371_v31 = vcombine.high %v235_v25, %v239_v26 }
 0x1d3   :  { %3117 = vmatprep.mubr.bf16.mxu0 %v4311_v32  ;;  %v4375_v32 = vcombine.high %v237_v27, %v241_v28  ;;  %v273_v27 = vld [vmem:[%s8030_s0 + $0x7f8] sm:$0xff] }
 0x1d9   :  { %2540 = vmatmul.mubr.bf16.gmra.mrb[76].mxu1 %v4306_v37  ;;  %v249_v37 = vld [vmem:[%s8030_s0 + $0x738] sm:$0xff] }
 0x1da   :  { %3118 = vmatmul.mubr.bf16.gmra.mrb[76].mxu0 %v4310_v38  ;;  %2547 = vmatprep.mubr.bf16.mxu1 %v4315_v39 }
 0x1db   :  { %3125 = vmatprep.mubr.bf16.mxu0 %v4319_v40  ;;  %v4370_v40 = vcombine.low %v235_v25, %v239_v26  ;;  %v269_v26 = vld [vmem:[%s8030_s0 + $0x7d8] sm:$0xff] }
 0x1e1   :  { %2548 = vmatmul.mubr.bf16.gmra.mrb[80].mxu1 %v4314_v45  ;;  %v4379_v45 = vcombine.high %v243_v33, %v247_v34 }
 0x1e2   :  { %3126 = vmatmul.mubr.bf16.gmra.mrb[80].mxu0 %v4318_v46  ;;  %2555 = vmatprep.mubr.bf16.mxu1 %v4323_v47 }
 0x1e3   :  { %3133 = vmatprep.mubr.bf16.mxu0 %v4327_v48  ;;  %v4383_v48 = vcombine.high %v245_v36, %v249_v37 }
 0x1e9   :  { %2556 = vmatmul.mubr.bf16.gmra.mrb[84].mxu1 %v4322_v53 }
 0x1ea   :  { %3134 = vmatmul.mubr.bf16.gmra.mrb[84].mxu0 %v4326_v54  ;;  %2563 = vmatprep.mubr.bf16.mxu1 %v4331_v55  ;;  %v253_v54 = vld [vmem:[%s8030_s0 + $0x758] sm:$0xff] }
 0x1eb   :  { %3141 = vmatprep.mubr.bf16.mxu0 %v4335_v56  ;;  %v257_v55 = vld [vmem:[%s8030_s0 + $0x778] sm:$0xff] }
 0x1ec   :  { %v4391_v2 = vcombine.high %v253_v54, %v257_v55 }
 0x1f1   :  { %2564 = vmatmul.mubr.bf16.gmra.mrb[88].mxu1 %v4330_v60 }
 0x1f2   :  { %3142 = vmatmul.mubr.bf16.gmra.mrb[88].mxu0 %v4334_v61  ;;  %2571 = vmatprep.mubr.bf16.mxu1 %v4339_v62  ;;  %v4382_v61 = vcombine.low %v245_v36, %v249_v37  ;;  %v4387_v62 = vcombine.high %v251_v51, %v255_v52 }
 0x1f3   :  { %3149 = vmatprep.mubr.bf16.mxu0 %v4343_v63 }
 0x1f9   :  { %2572 = vmatmul.mubr.bf16.gmra.mrb[92].mxu1 %v4338_v5  ;;  %v259_v5 = vld [vmem:[%s8030_s0 + $0x788] sm:$0xff] }
 0x1fa   :  { %3150 = vmatmul.mubr.bf16.gmra.mrb[92].mxu0 %v4342_v6  ;;  %2579 = vmatprep.mubr.bf16.mxu1 %v4347_v7  ;;  %v263_v6 = vld [vmem:[%s8030_s0 + $0x7a8] sm:$0xff] }
 0x1fb   :  { %3157 = vmatprep.mubr.bf16.mxu0 %v4351_v8  ;;  %v261_v8 = vld [vmem:[%s8030_s0 + $0x798] sm:$0xff]  ;;  %v4395_v17 = vcombine.high %v259_v5, %v263_v6 }
 0x1fc   :  { %v4399_v20 = vcombine.high %v261_v8, %v265_v9  ;;  %v4398_v34 = vcombine.low %v261_v8, %v265_v9 }
 0x201   :  { %2580 = vmatmul.mubr.bf16.gmra.mrb[96].mxu1 %v4346_v13 }
 0x202   :  { %3158 = vmatmul.mubr.bf16.gmra.mrb[96].mxu0 %v4350_v14  ;;  %2587 = vmatprep.mubr.bf16.mxu1 %v4355_v15 }
 0x203   :  { %3165 = vmatprep.mubr.bf16.mxu0 %v4359_v16  ;;  %v4390_v16 = vcombine.low %v253_v54, %v257_v55 }
 0x209   :  { %2588 = vmatmul.mubr.bf16.gmra.mrb[100].mxu1 %v4354_v21 }
 0x20a   :  { %3166 = vmatmul.mubr.bf16.gmra.mrb[100].mxu0 %v4358_v22  ;;  %2595 = vmatprep.mubr.bf16.mxu1 %v4363_v23  ;;  %v267_v23 = vld [vmem:[%s8030_s0 + $0x7c8] sm:$0xff] }
 0x20b   :  { %3173 = vmatprep.mubr.bf16.mxu0 %v4367_v24  ;;  %v271_v24 = vld [vmem:[%s8030_s0 + $0x7e8] sm:$0xff] }
 0x211   :  { %2596 = vmatmul.mubr.bf16.gmra.mrb[104].mxu1 %v4362_v29 }
 0x212   :  { %3174 = vmatmul.mubr.bf16.gmra.mrb[104].mxu0 %v4366_v30  ;;  %2603 = vmatprep.mubr.bf16.mxu1 %v4371_v31  ;;  %v4394_v30 = vcombine.low %v259_v5, %v263_v6 }
 0x213   :  { %3181 = vmatprep.mubr.bf16.mxu0 %v4375_v32 }
 0x214   :  { %v2389_v35 = vpop.f32.mrb[0].mxu1 }
 0x215   :  { %v2967_v38 = vpop.f32.mrb[0].mxu0  ;;  %v2391_v39 = vpop.f32.mrb[1].mxu1 }
 0x216   :  { %v6209_v41 = vadd.f32 %v2967_v38, %v2389_v35  ;;  %v2969_v42 = vpop.f32.mrb[1].mxu0  ;;  %v2392_v43 = vpop.f32.mrb[2].mxu1  ;;  %v4403_v35 = vcombine.high %v267_v23, %v271_v24  ;;  %v4407_v38 = vcombine.high %v269_v26, %v273_v27 }
 0x217   :  { %v2970_v46 = vpop.f32.mrb[2].mxu0  ;;  %v2394_v47 = vpop.f32.mrb[3].mxu1 }
 0x218   :  { %v6211_v49 = vadd.f32 %v2970_v46, %v2392_v43  ;;  %v2972_v50 = vpop.f32.mrb[3].mxu0 }
 0x219   :  { %2604 = vmatmul.mubr.bf16.gmra.mrb[108].mxu1 %v4370_v40  ;;  %v4406_v50 = vcombine.low %v269_v26, %v273_v27  ;;  %v3291_v26 = vmul.f32 %v6209_v41, %v6209_v41 }
 0x21a   :  { %3182 = vmatmul.mubr.bf16.gmra.mrb[108].mxu0 %v4374_v44  ;;  %2611 = vmatprep.mubr.bf16.mxu1 %v4379_v45  ;;  %v4402_v45 = vcombine.low %v267_v23, %v271_v24  ;;  %v3292_v23 = vmul.f32 %v6211_v49, %v6211_v49  ;;  %v3222_v27 = vadd.f32 %v6211_v49, %v6209_v41 }
 0x21b   :  { %3189 = vmatprep.mubr.bf16.mxu0 %v4383_v48 }
 0x21c   :  { %v2397_v53 = vpop.f32.mrb[4].mxu1 }
 0x21d   :  { %v2975_v56 = vpop.f32.mrb[4].mxu0  ;;  %v2399_v57 = vpop.f32.mrb[5].mxu1 }
 0x21e   :  { %v6225_v58 = vadd.f32 %v2975_v56, %v2397_v53  ;;  %v2977_v59 = vpop.f32.mrb[5].mxu0  ;;  %v2400_v60 = vpop.f32.mrb[6].mxu1 }
 0x21f   :  { %v2978_v63 = vpop.f32.mrb[6].mxu0  ;;  %v2402_v1 = vpop.f32.mrb[7].mxu1 }
 0x220   :  { %v6227_v3 = vadd.f32 %v2978_v63, %v2400_v60  ;;  %v2980_v4 = vpop.f32.mrb[7].mxu0 }
 0x221   :  { %2612 = vmatmul.mubr.bf16.gmra.mrb[112].mxu1 %v4378_v0 }
 0x222   :  { %3190 = vmatmul.mubr.bf16.gmra.mrb[112].mxu0 %v4382_v61  ;;  %2619 = vmatprep.mubr.bf16.mxu1 %v4387_v62 }
 0x223   :  { %3197 = vmatprep.mubr.bf16.mxu0 %v4391_v2 }
 0x224   :  { %v2405_v7 = vpop.f32.mrb[8].mxu1 }
 0x225   :  { %v2983_v10 = vpop.f32.mrb[8].mxu0  ;;  %v2407_v11 = vpop.f32.mrb[9].mxu1 }
 0x226   :  { %v6241_v13 = vadd.f32 %v2983_v10, %v2405_v7  ;;  %v2985_v14 = vpop.f32.mrb[9].mxu0  ;;  %v2408_v15 = vpop.f32.mrb[10].mxu1 }
 0x227   :  { %v2986_v18 = vpop.f32.mrb[10].mxu0  ;;  %v2410_v19 = vpop.f32.mrb[11].mxu1 }
 0x228   :  { %v6243_v21 = vadd.f32 %v2986_v18, %v2408_v15  ;;  %v2988_v22 = vpop.f32.mrb[11].mxu0 }
 0x229   :  { %2620 = vmatmul.mubr.bf16.gmra.mrb[116].mxu1 %v4386_v12 }
 0x22a   :  { %3198 = vmatmul.mubr.bf16.gmra.mrb[116].mxu0 %v4390_v16  ;;  %2627 = vmatprep.mubr.bf16.mxu1 %v4395_v17 }
 0x22b   :  { %3205 = vmatprep.mubr.bf16.mxu0 %v4399_v20 }
 0x22c   :  { %v2413_v25 = vpop.f32.mrb[12].mxu1 }
 0x22d   :  { %v2991_v28 = vpop.f32.mrb[12].mxu0  ;;  %v2415_v29 = vpop.f32.mrb[13].mxu1 }
 0x22e   :  { %v6257_v31 = vadd.f32 %v2991_v28, %v2413_v25  ;;  %v2993_v32 = vpop.f32.mrb[13].mxu0  ;;  %v2416_v33 = vpop.f32.mrb[14].mxu1  ;;  %v3293_v28 = vmul.f32 %v6225_v58, %v6225_v58  ;;  %v3355_v29 = vadd.f32 %v3292_v23, %v3291_v26 }
 0x22f   :  { %v2994_v36 = vpop.f32.mrb[14].mxu0  ;;  %v2418_v37 = vpop.f32.mrb[15].mxu1 }
 0x230   :  { %v6259_v39 = vadd.f32 %v2994_v36, %v2416_v33  ;;  %v2996_v40 = vpop.f32.mrb[15].mxu0  ;;  %v3294_v36 = vmul.f32 %v6227_v3, %v6227_v3 }
 0x231   :  { %2628 = vmatmul.mubr.bf16.gmra.mrb[120].mxu1 %v4394_v30  ;;  %v3223_v30 = vadd.f32 %v6225_v58, %v3222_v27 }
 0x232   :  { %3206 = vmatmul.mubr.bf16.gmra.mrb[120].mxu0 %v4398_v34  ;;  %2635 = vmatprep.mubr.bf16.mxu1 %v4403_v35  ;;  %v3356_v35 = vadd.f32 %v3355_v29, %v3293_v28 }
 0x233   :  { %3213 = vmatprep.mubr.bf16.mxu0 %v4407_v38 }
 0x234   :  { %v2421_v42 = vpop.f32.mrb[16].mxu1 }
 0x235   :  { %v2999_v43 = vpop.f32.mrb[16].mxu0  ;;  %v2423_v44 = vpop.f32.mrb[17].mxu1 }
 0x236   :  { %v6261_v46 = vadd.f32 %v2999_v43, %v2421_v42  ;;  %v3001_v47 = vpop.f32.mrb[17].mxu0  ;;  %v2424_v48 = vpop.f32.mrb[18].mxu1  ;;  %v3224_v44 = vadd.f32 %v6227_v3, %v3223_v30 }
 0x237   :  { %v3002_v51 = vpop.f32.mrb[18].mxu0  ;;  %v2426_v52 = vpop.f32.mrb[19].mxu1 }
 0x238   :  { %v6263_v53 = vadd.f32 %v3002_v51, %v2424_v48  ;;  %v3004_v54 = vpop.f32.mrb[19].mxu0  ;;  %v3225_v51 = vadd.f32 %v6241_v13, %v3224_v44 }
 0x239   :  { %2636 = vmatmul.mubr.bf16.gmra.mrb[124].mxu1 %v4402_v45  ;;  %v3295_v45 = vmul.f32 %v6241_v13, %v6241_v13  ;;  %v3296_v54 = vmul.f32 %v6243_v21, %v6243_v21 }
 0x23a   :  { %3214 = vmatmul.mubr.bf16.gmra.mrb[124].mxu0 %v4406_v50  ;;  %v3357_v50 = vadd.f32 %v3356_v35, %v3294_v36  ;;  %v3300_v30 = vmul.f32 %v6263_v53, %v6263_v53 }
 0x23c   :  { %v2429_v55 = vpop.f32.mrb[20].mxu1  ;;  %v3358_v52 = vadd.f32 %v3357_v50, %v3295_v45 }
 0x23d   :  { %v3007_v56 = vpop.f32.mrb[20].mxu0  ;;  %v2431_v57 = vpop.f32.mrb[21].mxu1 }
 0x23e   :  { %v6265_v0 = vadd.f32 %v3007_v56, %v2429_v55  ;;  %v3009_v59 = vpop.f32.mrb[21].mxu0  ;;  %v2432_v60 = vpop.f32.mrb[22].mxu1 }
 0x23f   :  { %v3010_v61 = vpop.f32.mrb[22].mxu0  ;;  %v2434_v62 = vpop.f32.mrb[23].mxu1  ;;  %v3226_v59 = vadd.f32 %v6243_v21, %v3225_v51 }
 0x240   :  { %v6267_v63 = vadd.f32 %v3010_v61, %v2432_v60  ;;  %v3012_v1 = vpop.f32.mrb[23].mxu0  ;;  %v3297_v60 = vmul.f32 %v6257_v31, %v6257_v31  ;;  %v3301_v35 = vmul.f32 %v6265_v0, %v6265_v0 }
 0x242   :  { %v3302_v45 = vmul.f32 %v6267_v63, %v6267_v63 }
 0x244   :  { %v2437_v2 = vpop.f32.mrb[24].mxu1 }
 0x245   :  { %v3015_v4 = vpop.f32.mrb[24].mxu0  ;;  %v2439_v5 = vpop.f32.mrb[25].mxu1 }
 0x246   :  { %v6269_v6 = vadd.f32 %v3015_v4, %v2437_v2  ;;  %v3017_v7 = vpop.f32.mrb[25].mxu0  ;;  %v2440_v8 = vpop.f32.mrb[26].mxu1  ;;  %v3359_v5 = vadd.f32 %v3358_v52, %v3296_v54 }
 0x247   :  { %v3018_v9 = vpop.f32.mrb[26].mxu0  ;;  %v2442_v10 = vpop.f32.mrb[27].mxu1  ;;  %v3227_v7 = vadd.f32 %v6257_v31, %v3226_v59 }
 0x248   :  { %v6271_v11 = vadd.f32 %v3018_v9, %v2440_v8  ;;  %v3020_v12 = vpop.f32.mrb[27].mxu0  ;;  %v3360_v10 = vadd.f32 %v3359_v5, %v3297_v60 }
 0x249   :  { %v3298_v12 = vmul.f32 %v6259_v39, %v6259_v39 }
 0x24c   :  { %v2445_v14 = vpop.f32.mrb[28].mxu1 }
 0x24d   :  { %v3023_v15 = vpop.f32.mrb[28].mxu0  ;;  %v2447_v16 = vpop.f32.mrb[29].mxu1 }
 0x24e   :  { %v6273_v17 = vadd.f32 %v3023_v15, %v2445_v14  ;;  %v3025_v18 = vpop.f32.mrb[29].mxu0  ;;  %v2448_v19 = vpop.f32.mrb[30].mxu1  ;;  %v3228_v14 = vadd.f32 %v6259_v39, %v3227_v7  ;;  %v3299_v15 = vmul.f32 %v6261_v46, %v6261_v46 }
 0x24f   :  { %v3026_v20 = vpop.f32.mrb[30].mxu0  ;;  %v2450_v22 = vpop.f32.mrb[31].mxu1 }
 0x250   :  { %v6277_v24 = vadd.f32 %v3026_v20, %v2448_v19  ;;  %v3028_v25 = vpop.f32.mrb[31].mxu0  ;;  %v3361_v20 = vadd.f32 %v3360_v10, %v3298_v12  ;;  %v3229_v22 = vadd.f32 %v6261_v46, %v3228_v14  ;;  %v3305_v10 = vmul.f32 %v6273_v17, %v6273_v17 }
 0x252   :  { %v3362_v29 = vadd.f32 %v3361_v20, %v3299_v15 }
 0x254   :  { %v2453_v32 = vpop.f32.mrb[32].mxu1  ;;  %v3363_v36 = vadd.f32 %v3362_v29, %v3300_v30 }
 0x255   :  { %v3031_v33 = vpop.f32.mrb[32].mxu0  ;;  %v2455_v34 = vpop.f32.mrb[33].mxu1 }
 0x256   :  { %v6288_v37 = vadd.f32 %v3031_v33, %v2453_v32  ;;  %v3033_v38 = vpop.f32.mrb[33].mxu0  ;;  %v2456_v40 = vpop.f32.mrb[34].mxu1  ;;  %v3230_v34 = vadd.f32 %v6263_v53, %v3229_v22  ;;  %v3364_v44 = vadd.f32 %v3363_v36, %v3301_v35 }
 0x257   :  { %v3034_v42 = vpop.f32.mrb[34].mxu0  ;;  %v2458_v43 = vpop.f32.mrb[35].mxu1 }
 0x258   :  { %v6293_v47 = vadd.f32 %v3034_v42, %v2456_v40  ;;  %v3036_v48 = vpop.f32.mrb[35].mxu0  ;;  %v3231_v38 = vadd.f32 %v6265_v0, %v3230_v34  ;;  %v3365_v60 = vadd.f32 %v3364_v44, %v3302_v45  ;;  %v3307_v29 = vmul.f32 %v6288_v37, %v6288_v37 }
 0x25c   :  { %v2461_v55 = vpop.f32.mrb[36].mxu1 }
 0x25d   :  { %v3039_v56 = vpop.f32.mrb[36].mxu0  ;;  %v2463_v57 = vpop.f32.mrb[37].mxu1 }
 0x25e   :  { %v6301_v61 = vadd.f32 %v3039_v56, %v2461_v55  ;;  %v3041_v62 = vpop.f32.mrb[37].mxu0  ;;  %v2464_v1 = vpop.f32.mrb[38].mxu1  ;;  %v3232_v55 = vadd.f32 %v6267_v63, %v3231_v38  ;;  %v3303_v56 = vmul.f32 %v6269_v6, %v6269_v6 }
 0x25f   :  { %v3042_v2 = vpop.f32.mrb[38].mxu0  ;;  %v2466_v4 = vpop.f32.mrb[39].mxu1 }
 0x260   :  { %v6304_v8 = vadd.f32 %v3042_v2, %v2464_v1  ;;  %v3044_v9 = vpop.f32.mrb[39].mxu0  ;;  %v3233_v62 = vadd.f32 %v6269_v6, %v3232_v55  ;;  %v3366_v1 = vadd.f32 %v3365_v60, %v3303_v56  ;;  %v3304_v2 = vmul.f32 %v6271_v11, %v6271_v11 }
 0x261   :  { %v3309_v55 = vmul.f32 %v6301_v61, %v6301_v61 }
 0x262   :  { %v3234_v9 = vadd.f32 %v6271_v11, %v3233_v62 }
 0x264   :  { %v2469_v16 = vpop.f32.mrb[40].mxu1  ;;  %v3235_v20 = vadd.f32 %v6273_v17, %v3234_v9 }
 0x265   :  { %v3047_v18 = vpop.f32.mrb[40].mxu0  ;;  %v2471_v19 = vpop.f32.mrb[41].mxu1 }
 0x266   :  { %v6312_v23 = vadd.f32 %v3047_v18, %v2469_v16  ;;  %v3049_v25 = vpop.f32.mrb[41].mxu0  ;;  %v2472_v26 = vpop.f32.mrb[42].mxu1  ;;  %v3367_v19 = vadd.f32 %v3366_v1, %v3304_v2 }
 0x267   :  { %v3050_v27 = vpop.f32.mrb[42].mxu0  ;;  %v2474_v28 = vpop.f32.mrb[43].mxu1 }
 0x268   :  { %v6316_v32 = vadd.f32 %v3050_v27, %v2472_v26  ;;  %v3052_v33 = vpop.f32.mrb[43].mxu0  ;;  %v3368_v26 = vadd.f32 %v3367_v19, %v3305_v10  ;;  %v3306_v27 = vmul.f32 %v6277_v24, %v6277_v24  ;;  %v3236_v28 = vadd.f32 %v6277_v24, %v3235_v20 }
 0x26a   :  { %v3369_v35 = vadd.f32 %v3368_v26, %v3306_v27  ;;  %v3237_v36 = vadd.f32 %v6288_v37, %v3236_v28  ;;  %v3312_v27 = vmul.f32 %v6316_v32, %v6316_v32 }
 0x26c   :  { %v2477_v40 = vpop.f32.mrb[44].mxu1  ;;  %v3370_v45 = vadd.f32 %v3369_v35, %v3307_v29 }
 0x26d   :  { %v3055_v42 = vpop.f32.mrb[44].mxu0  ;;  %v2479_v43 = vpop.f32.mrb[45].mxu1 }
 0x26e   :  { %v6324_v48 = vadd.f32 %v3055_v42, %v2477_v40  ;;  %v3057_v50 = vpop.f32.mrb[45].mxu0  ;;  %v2480_v51 = vpop.f32.mrb[46].mxu1 }
 0x26f   :  { %v3058_v52 = vpop.f32.mrb[46].mxu0  ;;  %v2482_v54 = vpop.f32.mrb[47].mxu1  ;;  %v3308_v50 = vmul.f32 %v6293_v47, %v6293_v47 }
 0x270   :  { %v6329_v57 = vadd.f32 %v3058_v52, %v2480_v51  ;;  %v3060_v59 = vpop.f32.mrb[47].mxu0  ;;  %v3238_v54 = vadd.f32 %v6293_v47, %v3237_v36 }
 0x271   :  { %v3371_v56 = vadd.f32 %v3370_v45, %v3308_v50 }
 0x272   :  { %v3239_v59 = vadd.f32 %v6301_v61, %v3238_v54 }
 0x273   :  { %v3372_v2 = vadd.f32 %v3371_v56, %v3309_v55  ;;  %v3314_v55 = vmul.f32 %v6329_v57, %v6329_v57 }
 0x274   :  { %v2485_v4 = vpop.f32.mrb[48].mxu1 }
 0x275   :  { %v3063_v5 = vpop.f32.mrb[48].mxu0  ;;  %v2487_v7 = vpop.f32.mrb[49].mxu1 }
 0x276   :  { %v6337_v12 = vadd.f32 %v3063_v5, %v2485_v4  ;;  %v3065_v14 = vpop.f32.mrb[49].mxu0  ;;  %v2488_v15 = vpop.f32.mrb[50].mxu1  ;;  %v3310_v4 = vmul.f32 %v6304_v8, %v6304_v8 }
 0x277   :  { %v3066_v16 = vpop.f32.mrb[50].mxu0  ;;  %v2490_v18 = vpop.f32.mrb[51].mxu1 }
 0x278   :  { %v6340_v22 = vadd.f32 %v3066_v16, %v2488_v15  ;;  %v3068_v25 = vpop.f32.mrb[51].mxu0  ;;  %v3240_v15 = vadd.f32 %v6304_v8, %v3239_v59  ;;  %v3311_v16 = vmul.f32 %v6312_v23, %v6312_v23  ;;  %v3373_v20 = vadd.f32 %v3372_v2, %v3310_v4 }
 0x279   :  { %v3315_v59 = vmul.f32 %v6337_v12, %v6337_v12 }
 0x27a   :  { %v3241_v25 = vadd.f32 %v6312_v23, %v3240_v15  ;;  %v3374_v26 = vadd.f32 %v3373_v20, %v3311_v16 }
 0x27c   :  { %v2493_v30 = vpop.f32.mrb[52].mxu1 }
 0x27d   :  { %v3071_v33 = vpop.f32.mrb[52].mxu0  ;;  %v2495_v34 = vpop.f32.mrb[53].mxu1 }
 0x27e   :  { %v6348_v38 = vadd.f32 %v3071_v33, %v2493_v30  ;;  %v3073_v40 = vpop.f32.mrb[53].mxu0  ;;  %v2496_v42 = vpop.f32.mrb[54].mxu1  ;;  %v3242_v33 = vadd.f32 %v6316_v32, %v3241_v25  ;;  %v3313_v34 = vmul.f32 %v6324_v48, %v6324_v48 }
 0x27f   :  { %v3074_v43 = vpop.f32.mrb[54].mxu0  ;;  %v2498_v44 = vpop.f32.mrb[55].mxu1 }
 0x280   :  { %v6352_v51 = vadd.f32 %v3074_v43, %v2496_v42  ;;  %v3076_v52 = vpop.f32.mrb[55].mxu0  ;;  %v3375_v44 = vadd.f32 %v3374_v26, %v3312_v27  ;;  %v3243_v45 = vadd.f32 %v6324_v48, %v3242_v33  ;;  %v3317_v27 = vmul.f32 %v6348_v38, %v6348_v38 }
 0x282   :  { %v3376_v54 = vadd.f32 %v3375_v44, %v3313_v34  ;;  %v3244_v56 = vadd.f32 %v6329_v57, %v3243_v45 }
 0x284   :  { %v2501_v60 = vpop.f32.mrb[56].mxu1  ;;  %v3377_v2 = vadd.f32 %v3376_v54, %v3314_v55  ;;  %v3245_v4 = vadd.f32 %v6337_v12, %v3244_v56 }
 0x285   :  { %v3079_v62 = vpop.f32.mrb[56].mxu0  ;;  %v2503_v1 = vpop.f32.mrb[57].mxu1 }
 0x286   :  { %v6360_v5 = vadd.f32 %v3079_v62, %v2501_v60  ;;  %v3081_v7 = vpop.f32.mrb[57].mxu0  ;;  %v2504_v9 = vpop.f32.mrb[58].mxu1  ;;  %v3378_v16 = vadd.f32 %v3377_v2, %v3315_v59  ;;  %v3246_v26 = vadd.f32 %v6340_v22, %v3245_v4 }
 0x287   :  { %v3082_v10 = vpop.f32.mrb[58].mxu0  ;;  %v2506_v14 = vpop.f32.mrb[59].mxu1 }
 0x288   :  { %v6365_v18 = vadd.f32 %v3082_v10, %v2504_v9  ;;  %v3084_v19 = vpop.f32.mrb[59].mxu0  ;;  %v3319_v55 = vmul.f32 %v6360_v5, %v6360_v5 }
 0x289   :  { %v3316_v19 = vmul.f32 %v6340_v22, %v6340_v22 }
 0x28a   :  { %v3320_v2 = vmul.f32 %v6365_v18, %v6365_v18 }
 0x28c   :  { %v2509_v28 = vpop.f32.mrb[60].mxu1 }
 0x28d   :  { %v3087_v29 = vpop.f32.mrb[60].mxu0  ;;  %v2511_v30 = vpop.f32.mrb[61].mxu1 }
 0x28e   :  { %v6373_v35 = vadd.f32 %v3087_v29, %v2509_v28  ;;  %v3089_v36 = vpop.f32.mrb[61].mxu0  ;;  %v2512_v40 = vpop.f32.mrb[62].mxu1  ;;  %v3379_v28 = vadd.f32 %v3378_v16, %v3316_v19  ;;  %v3247_v29 = vadd.f32 %v6348_v38, %v3246_v26 }
 0x28f   :  { %v3090_v42 = vpop.f32.mrb[62].mxu0  ;;  %v2514_v43 = vpop.f32.mrb[63].mxu1 }
 0x290   :  { %v6376_v50 = vadd.f32 %v3090_v42, %v2512_v40  ;;  %v3092_v52 = vpop.f32.mrb[63].mxu0  ;;  %v3380_v36 = vadd.f32 %v3379_v28, %v3317_v27  ;;  %v3318_v40 = vmul.f32 %v6352_v51, %v6352_v51  ;;  %v3248_v54 = vadd.f32 %v6352_v51, %v3247_v29 }
 0x294   :  { %v2517_v60 = vpop.f32.mrb[64].mxu1 }
 0x295   :  { %v3095_v62 = vpop.f32.mrb[64].mxu0  ;;  %v2519_v1 = vpop.f32.mrb[65].mxu1 }
 0x296   :  { %v6384_v7 = vadd.f32 %v3095_v62, %v2517_v60  ;;  %v3097_v9 = vpop.f32.mrb[65].mxu0  ;;  %v2520_v10 = vpop.f32.mrb[66].mxu1  ;;  %v3381_v60 = vadd.f32 %v3380_v36, %v3318_v40  ;;  %v3249_v62 = vadd.f32 %v6360_v5, %v3248_v54  ;;  %v3322_v36 = vmul.f32 %v6376_v50, %v6376_v50 }
 0x297   :  { %v3098_v14 = vpop.f32.mrb[66].mxu0  ;;  %v2522_v15 = vpop.f32.mrb[67].mxu1 }
 0x298   :  { %v6388_v20 = vadd.f32 %v3098_v14, %v2520_v10  ;;  %v3100_v25 = vpop.f32.mrb[67].mxu0  ;;  %v3382_v1 = vadd.f32 %v3381_v60, %v3319_v55  ;;  %v3250_v14 = vadd.f32 %v6365_v18, %v3249_v62  ;;  %v3321_v15 = vmul.f32 %v6373_v35, %v6373_v35 }
 0x29a   :  { %v3383_v28 = vadd.f32 %v3382_v1, %v3320_v2  ;;  %v3251_v29 = vadd.f32 %v6373_v35, %v3250_v14 }
 0x29c   :  { %v2525_v30 = vpop.f32.mrb[68].mxu1  ;;  %v3252_v40 = vadd.f32 %v6376_v50, %v3251_v29 }
 0x29d   :  { %v3103_v33 = vpop.f32.mrb[68].mxu0  ;;  %v2527_v34 = vpop.f32.mrb[69].mxu1 }
 0x29e   :  { %v6396_v42 = vadd.f32 %v3103_v33, %v2525_v30  ;;  %v3105_v43 = vpop.f32.mrb[69].mxu0  ;;  %v2528_v44 = vpop.f32.mrb[70].mxu1  ;;  %v3384_v34 = vadd.f32 %v3383_v28, %v3321_v15  ;;  %v3253_v55 = vadd.f32 %v6384_v7, %v3252_v40 }
 0x29f   :  { %v3106_v45 = vpop.f32.mrb[70].mxu0  ;;  %v2530_v52 = vpop.f32.mrb[71].mxu1  ;;  %v3323_v43 = vmul.f32 %v6384_v7, %v6384_v7 }
 0x2a0   :  { %8097 = vst [vmem:[#allocation2_spill] sm:$0xff] %v6396_v42  ;;  %v6401_v56 = vadd.f32 %v3106_v45, %v2528_v44  ;;  %v3108_v59 = vpop.f32.mrb[71].mxu0  ;;  %v3385_v54 = vadd.f32 %v3384_v34, %v3322_v36  ;;  %v3254_v15 = vadd.f32 %v6388_v20, %v3253_v55 }
 0x2a2   :  { %8098 = vst [vmem:[#allocation3_spill] sm:$0xff] %v6401_v56  ;;  %v3326_v34 = vmul.f32 %v6401_v56, %v6401_v56 }
 0x2a4   :  { %v2533_v4 = vpop.f32.mrb[72].mxu1 }
 0x2a5   :  { %v3111_v9 = vpop.f32.mrb[72].mxu0  ;;  %v2535_v10 = vpop.f32.mrb[73].mxu1 }
 0x2a6   :  { %v6409_v16 = vadd.f32 %v3111_v9, %v2533_v4  ;;  %v3113_v19 = vpop.f32.mrb[73].mxu0  ;;  %v2536_v25 = vpop.f32.mrb[74].mxu1  ;;  %v3386_v4 = vadd.f32 %v3385_v54, %v3323_v43  ;;  %v3324_v9 = vmul.f32 %v6388_v20, %v6388_v20 }
 0x2a7   :  { %v3114_v26 = vpop.f32.mrb[74].mxu0  ;;  %v2538_v27 = vpop.f32.mrb[75].mxu1  ;;  %v3325_v19 = vmul.f32 %v6396_v42, %v6396_v42 }
 0x2a8   :  { %8099 = vst [vmem:[#allocation4_spill] sm:$0xff] %v6409_v16  ;;  %v6412_v30 = vadd.f32 %v3114_v26, %v2536_v25  ;;  %v3116_v33 = vpop.f32.mrb[75].mxu0  ;;  %v3387_v25 = vadd.f32 %v3386_v4, %v3324_v9  ;;  %v3255_v26 = vadd.f32 %v6396_v42, %v3254_v15  ;;  %v3327_v54 = vmul.f32 %v6409_v16, %v6409_v16 }
 0x2aa   :  { %8100 = vst [vmem:[#allocation5_spill] sm:$0xff] %v6412_v30  ;;  %v3388_v33 = vadd.f32 %v3387_v25, %v3325_v19  ;;  %v3328_v4 = vmul.f32 %v6412_v30, %v6412_v30 }
 0x2ac   :  { %v2541_v44 = vpop.f32.mrb[76].mxu1 }
 0x2ad   :  { %v3119_v45 = vpop.f32.mrb[76].mxu0  ;;  %v2543_v52 = vpop.f32.mrb[77].mxu1 }
 0x2ae   :  { %v6420_v59 = vadd.f32 %v3119_v45, %v2541_v44  ;;  %v3121_v60 = vpop.f32.mrb[77].mxu0  ;;  %v2544_v62 = vpop.f32.mrb[78].mxu1  ;;  %v3256_v52 = vadd.f32 %v6401_v56, %v3255_v26 }
 0x2af   :  { %v3122_v1 = vpop.f32.mrb[78].mxu0  ;;  %v2546_v2 = vpop.f32.mrb[79].mxu1 }
 0x2b0   :  { %8101 = vst [vmem:[#allocation6_spill] sm:$0xff] %v6420_v59  ;;  %v6424_v10 = vadd.f32 %v3122_v1, %v2544_v62  ;;  %v3124_v14 = vpop.f32.mrb[79].mxu0  ;;  %v3389_v62 = vadd.f32 %v3388_v33, %v3326_v34  ;;  %v3257_v1 = vadd.f32 %v6409_v16, %v3256_v52  ;;  %v3329_v25 = vmul.f32 %v6420_v59, %v6420_v59 }
 0x2b2   :  { %8102 = vst [vmem:[#allocation7_spill] sm:$0xff] %v6424_v10  ;;  %v3390_v2 = vadd.f32 %v3389_v62, %v3327_v54  ;;  %v3258_v19 = vadd.f32 %v6412_v30, %v3257_v1  ;;  %v3330_v52 = vmul.f32 %v6424_v10, %v6424_v10 }
 0x2b4   :  { %v2549_v27 = vpop.f32.mrb[80].mxu1  ;;  %v3391_v34 = vadd.f32 %v3390_v2, %v3328_v4 }
 0x2b5   :  { %v3127_v28 = vpop.f32.mrb[80].mxu0  ;;  %v2551_v29 = vpop.f32.mrb[81].mxu1 }
 0x2b6   :  { %v6432_v36 = vadd.f32 %v3127_v28, %v2549_v27  ;;  %v3129_v40 = vpop.f32.mrb[81].mxu0  ;;  %v2552_v43 = vpop.f32.mrb[82].mxu1 }
 0x2b7   :  { %v3130_v44 = vpop.f32.mrb[82].mxu0  ;;  %v2554_v45 = vpop.f32.mrb[83].mxu1  ;;  %v3259_v40 = vadd.f32 %v6420_v59, %v3258_v19 }
 0x2b8   :  { %8103 = vst [vmem:[#allocation8_spill] sm:$0xff] %v6432_v36  ;;  %v6437_v55 = vadd.f32 %v3130_v44, %v2552_v43  ;;  %v3132_v60 = vpop.f32.mrb[83].mxu0  ;;  %v3392_v45 = vadd.f32 %v3391_v34, %v3329_v25 }
 0x2b9   :  { %v3260_v54 = vadd.f32 %v6424_v10, %v3259_v40  ;;  %v3331_v60 = vmul.f32 %v6432_v36, %v6432_v36 }
 0x2ba   :  { %8104 = vst [vmem:[#allocation9_spill] sm:$0xff] %v6437_v55 }
 0x2bb   :  { %v3261_v2 = vadd.f32 %v6432_v36, %v3260_v54 }
 0x2bc   :  { %v2557_v9 = vpop.f32.mrb[84].mxu1 }
 0x2bd   :  { %v3135_v14 = vpop.f32.mrb[84].mxu0  ;;  %v2559_v15 = vpop.f32.mrb[85].mxu1  ;;  %v3262_v40 = vadd.f32 %v6437_v55, %v3261_v2 }
 0x2be   :  { %v6445_v26 = vadd.f32 %v3135_v14, %v2557_v9  ;;  %v3137_v27 = vpop.f32.mrb[85].mxu0  ;;  %v2560_v28 = vpop.f32.mrb[86].mxu1  ;;  %v3393_v14 = vadd.f32 %v3392_v45, %v3330_v52 }
 0x2bf   :  { %v3138_v29 = vpop.f32.mrb[86].mxu0  ;;  %v2562_v33 = vpop.f32.mrb[87].mxu1 }
 0x2c0   :  { %8105 = vst [vmem:[#allocation10_spill] sm:$0xff] %v6445_v26  ;;  %v6448_v43 = vadd.f32 %v3138_v29, %v2560_v28  ;;  %v3140_v44 = vpop.f32.mrb[87].mxu0  ;;  %v3394_v28 = vadd.f32 %v3393_v14, %v3331_v60  ;;  %v3332_v29 = vmul.f32 %v6437_v55, %v6437_v55  ;;  %v3263_v52 = vadd.f32 %v6445_v26, %v3262_v40 }
 0x2c1   :  { %v3333_v44 = vmul.f32 %v6445_v26, %v6445_v26 }
 0x2c2   :  { %8106 = vst [vmem:[#allocation11_spill] sm:$0xff] %v6448_v43  ;;  %v3395_v45 = vadd.f32 %v3394_v28, %v3332_v29  ;;  %v3334_v60 = vmul.f32 %v6448_v43, %v6448_v43  ;;  %v3264_v2 = vadd.f32 %v6448_v43, %v3263_v52 }
 0x2c4   :  { %v2565_v62 = vpop.f32.mrb[88].mxu1 }
 0x2c5   :  { %v3143_v1 = vpop.f32.mrb[88].mxu0  ;;  %v2567_v9 = vpop.f32.mrb[89].mxu1 }
 0x2c6   :  { %v6456_v4 = vadd.f32 %v3143_v1, %v2565_v62  ;;  %v3145_v15 = vpop.f32.mrb[89].mxu0  ;;  %v2568_v19 = vpop.f32.mrb[90].mxu1  ;;  %v3396_v9 = vadd.f32 %v3395_v45, %v3333_v44 }
 0x2c7   :  { %v3146_v27 = vpop.f32.mrb[90].mxu0  ;;  %v2570_v25 = vpop.f32.mrb[91].mxu1 }
 0x2c8   :  { %8107 = vst [vmem:[#allocation12_spill] sm:$0xff] %v6456_v4  ;;  %v6460_v33 = vadd.f32 %v3146_v27, %v2568_v19  ;;  %v3148_v34 = vpop.f32.mrb[91].mxu0  ;;  %v3335_v28 = vmul.f32 %v6456_v4, %v6456_v4  ;;  %v3397_v40 = vadd.f32 %v3396_v9, %v3334_v60  ;;  %v3265_v44 = vadd.f32 %v6456_v4, %v3264_v2 }
 0x2ca   :  { %8108 = vst [vmem:[#allocation13_spill] sm:$0xff] %v6460_v33  ;;  %v3398_v45 = vadd.f32 %v3397_v40, %v3335_v28 }
 0x2cc   :  { %v2573_v54 = vpop.f32.mrb[92].mxu1 }
 0x2cd   :  { %v3151_v62 = vpop.f32.mrb[92].mxu0  ;;  %v2575_v1 = vpop.f32.mrb[93].mxu1 }
 0x2ce   :  { %v6468_v14 = vadd.f32 %v3151_v62, %v2573_v54  ;;  %v3153_v15 = vpop.f32.mrb[93].mxu0  ;;  %v2576_v19 = vpop.f32.mrb[94].mxu1  ;;  %v3336_v54 = vmul.f32 %v6460_v33, %v6460_v33 }
 0x2cf   :  { %v3154_v27 = vpop.f32.mrb[94].mxu0  ;;  %v2578_v25 = vpop.f32.mrb[95].mxu1 }
 0x2d0   :  { %8109 = vst [vmem:[#allocation14_spill] sm:$0xff] %v6468_v14  ;;  %v6473_v29 = vadd.f32 %v3154_v27, %v2576_v19  ;;  %v3156_v34 = vpop.f32.mrb[95].mxu0  ;;  %v3266_v25 = vadd.f32 %v6460_v33, %v3265_v44  ;;  %v3337_v52 = vmul.f32 %v6468_v14, %v6468_v14  ;;  %v3399_v60 = vadd.f32 %v3398_v45, %v3336_v54 }
 0x2d2   :  { %8110 = vst [vmem:[#allocation15_spill] sm:$0xff] %v6473_v29  ;;  %v3267_v2 = vadd.f32 %v6468_v14, %v3266_v25  ;;  %v3400_v4 = vadd.f32 %v3399_v60, %v3337_v52 }
 0x2d4   :  { %v2581_v62 = vpop.f32.mrb[96].mxu1  ;;  %v3268_v44 = vadd.f32 %v6473_v29, %v3267_v2 }
 0x2d5   :  { %v3159_v1 = vpop.f32.mrb[96].mxu0  ;;  %v2583_v15 = vpop.f32.mrb[97].mxu1 }
 0x2d6   :  { %v6481_v43 = vadd.f32 %v3159_v1, %v2581_v62  ;;  %v3161_v19 = vpop.f32.mrb[97].mxu0  ;;  %v2584_v27 = vpop.f32.mrb[98].mxu1  ;;  %v3338_v15 = vmul.f32 %v6473_v29, %v6473_v29 }
 0x2d7   :  { %v3162_v34 = vpop.f32.mrb[98].mxu0  ;;  %v2586_v9 = vpop.f32.mrb[99].mxu1 }
 0x2d8   :  { %8111 = vst [vmem:[#allocation16_spill] sm:$0xff] %v6481_v43  ;;  %v6484_v28 = vadd.f32 %v3162_v34, %v2584_v27  ;;  %v3164_v40 = vpop.f32.mrb[99].mxu0  ;;  %v3339_v62 = vmul.f32 %v6481_v43, %v6481_v43  ;;  %v3401_v26 = vadd.f32 %v3400_v4, %v3338_v15  ;;  %v3269_v45 = vadd.f32 %v6481_v43, %v3268_v44 }
 0x2da   :  { %8112 = vst [vmem:[#allocation17_spill] sm:$0xff] %v6484_v28  ;;  %v3402_v9 = vadd.f32 %v3401_v26, %v3339_v62  ;;  %v3340_v60 = vmul.f32 %v6484_v28, %v6484_v28  ;;  %v3270_v29 = vadd.f32 %v6484_v28, %v3269_v45 }
 0x2dc   :  { %v2589_v1 = vpop.f32.mrb[100].mxu1 }
 0x2dd   :  { %v3167_v19 = vpop.f32.mrb[100].mxu0  ;;  %v2591_v33 = vpop.f32.mrb[101].mxu1 }
 0x2de   :  { %v6492_v54 = vadd.f32 %v3167_v19, %v2589_v1  ;;  %v3169_v25 = vpop.f32.mrb[101].mxu0  ;;  %v2592_v27 = vpop.f32.mrb[102].mxu1  ;;  %v3403_v33 = vadd.f32 %v3402_v9, %v3340_v60 }
 0x2df   :  { %v3170_v34 = vpop.f32.mrb[102].mxu0  ;;  %v2594_v52 = vpop.f32.mrb[103].mxu1 }
 0x2e0   :  { %8113 = vst [vmem:[#allocation18_spill] sm:$0xff] %v6492_v54  ;;  %v6496_v2 = vadd.f32 %v3170_v34, %v2592_v27  ;;  %v3172_v40 = vpop.f32.mrb[103].mxu0  ;;  %v3341_v4 = vmul.f32 %v6492_v54, %v6492_v54  ;;  %v3271_v15 = vadd.f32 %v6492_v54, %v3270_v29 }
 0x2e2   :  { %8114 = vst [vmem:[#allocation19_spill] sm:$0xff] %v6496_v2  ;;  %v3404_v25 = vadd.f32 %v3403_v33, %v3341_v4  ;;  %v3342_v26 = vmul.f32 %v6496_v2, %v6496_v2  ;;  %v3272_v45 = vadd.f32 %v6496_v2, %v3271_v15 }
 0x2e4   :  { %v2597_v44 = vpop.f32.mrb[104].mxu1  ;;  %v3405_v54 = vadd.f32 %v3404_v25, %v3342_v26 }
 0x2e5   :  { %v3175_v1 = vpop.f32.mrb[104].mxu0  ;;  %v2599_v19 = vpop.f32.mrb[105].mxu1 }
 0x2e6   :  { %v6504_v62 = vadd.f32 %v3175_v1, %v2597_v44  ;;  %v3177_v27 = vpop.f32.mrb[105].mxu0  ;;  %v2600_v34 = vpop.f32.mrb[106].mxu1 }
 0x2e7   :  { %v3178_v52 = vpop.f32.mrb[106].mxu0  ;;  %v2602_v40 = vpop.f32.mrb[107].mxu1 }
 0x2e8   :  { %8115 = vst [vmem:[#allocation20_spill] sm:$0xff] %v6504_v62  ;;  %v3343_v9 = vmul.f32 %v6504_v62, %v6504_v62  ;;  %v6509_v60 = vadd.f32 %v3178_v52, %v2600_v34  ;;  %v3180_v29 = vpop.f32.mrb[107].mxu0  ;;  %v3273_v4 = vadd.f32 %v6504_v62, %v3272_v45 }
 0x2ea   :  { %8116 = vst [vmem:[#allocation21_spill] sm:$0xff] %v6509_v60  ;;  %v3406_v33 = vadd.f32 %v3405_v54, %v3343_v9  ;;  %v3344_v44 = vmul.f32 %v6509_v60, %v6509_v60  ;;  %v3274_v40 = vadd.f32 %v6509_v60, %v3273_v4 }
 0x2ec   :  { %v2605_v1 = vpop.f32.mrb[108].mxu1  ;;  %v3407_v52 = vadd.f32 %v3406_v33, %v3344_v44 }
 0x2ed   :  { %v3183_v19 = vpop.f32.mrb[108].mxu0  ;;  %v2607_v27 = vpop.f32.mrb[109].mxu1 }
 0x2ee   :  { %v6515_v28 = vadd.f32 %v3183_v19, %v2605_v1  ;;  %v3185_v15 = vpop.f32.mrb[109].mxu0  ;;  %v2608_v2 = vpop.f32.mrb[110].mxu1 }
 0x2ef   :  { %v3186_v43 = vpop.f32.mrb[110].mxu0  ;;  %v2610_v34 = vpop.f32.mrb[111].mxu1 }
 0x2f0   :  { %8117 = vst [vmem:[#allocation22_spill] sm:$0xff] %v6515_v28  ;;  %v3275_v25 = vadd.f32 %v6515_v28, %v3274_v40  ;;  %v3345_v54 = vmul.f32 %v6515_v28, %v6515_v28  ;;  %v6520_v26 = vadd.f32 %v3186_v43, %v2608_v2  ;;  %v3188_v45 = vpop.f32.mrb[111].mxu0 }
 0x2f2   :  { %8118 = vst [vmem:[#allocation23_spill] sm:$0xff] %v6520_v26  ;;  %v3408_v9 = vadd.f32 %v3407_v52, %v3345_v54  ;;  %v3276_v29 = vadd.f32 %v6520_v26, %v3275_v25  ;;  %v3346_v4 = vmul.f32 %v6520_v26, %v6520_v26 }
 0x2f4   :  { %v3409_v1 = vadd.f32 %v3408_v9, %v3346_v4  ;;  %v2613_v19 = vpop.f32.mrb[112].mxu1 }
 0x2f5   :  { %v3191_v27 = vpop.f32.mrb[112].mxu0  ;;  %v2615_v15 = vpop.f32.mrb[113].mxu1 }
 0x2f6   :  { %v6525_v34 = vadd.f32 %v3191_v27, %v2613_v19  ;;  %v3193_v33 = vpop.f32.mrb[113].mxu0  ;;  %v2616_v44 = vpop.f32.mrb[114].mxu1 }
 0x2f7   :  { %v3194_v40 = vpop.f32.mrb[114].mxu0  ;;  %v2618_v62 = vpop.f32.mrb[115].mxu1 }
 0x2f8   :  { %8119 = vst [vmem:[#allocation24_spill] sm:$0xff] %v6525_v34  ;;  %v3277_v43 = vadd.f32 %v6525_v34, %v3276_v29  ;;  %v3347_v2 = vmul.f32 %v6525_v34, %v6525_v34  ;;  %v6530_v52 = vadd.f32 %v3194_v40, %v2616_v44  ;;  %v3196_v25 = vpop.f32.mrb[115].mxu0 }
 0x2fa   :  { %8120 = vst [vmem:[#allocation25_spill] sm:$0xff] %v6530_v52  ;;  %v3410_v54 = vadd.f32 %v3409_v1, %v3347_v2  ;;  %v3278_v45 = vadd.f32 %v6530_v52, %v3277_v43  ;;  %v3348_v9 = vmul.f32 %v6530_v52, %v6530_v52 }
 0x2fc   :  { %v3411_v4 = vadd.f32 %v3410_v54, %v3348_v9  ;;  %v2621_v19 = vpop.f32.mrb[116].mxu1 }
 0x2fd   :  { %v3199_v27 = vpop.f32.mrb[116].mxu0  ;;  %v2623_v15 = vpop.f32.mrb[117].mxu1 }
 0x2fe   :  { %v6535_v33 = vadd.f32 %v3199_v27, %v2621_v19  ;;  %v3201_v62 = vpop.f32.mrb[117].mxu0  ;;  %v2624_v29 = vpop.f32.mrb[118].mxu1 }
 0x2ff   :  { %v3202_v14 = vpop.f32.mrb[118].mxu0  ;;  %v2626_v55 = vpop.f32.mrb[119].mxu1 }
 0x300   :  { %8121 = vst [vmem:[#allocation26_spill] sm:$0xff] %v6535_v33  ;;  %v3279_v44 = vadd.f32 %v6535_v33, %v3278_v45  ;;  %v3349_v1 = vmul.f32 %v6535_v33, %v6535_v33  ;;  %v6540_v40 = vadd.f32 %v3202_v14, %v2624_v29  ;;  %v3204_v43 = vpop.f32.mrb[119].mxu0 }
 0x302   :  { %8122 = vst [vmem:[#allocation27_spill] sm:$0xff] %v6540_v40  ;;  %v3412_v2 = vadd.f32 %v3411_v4, %v3349_v1  ;;  %v3280_v25 = vadd.f32 %v6540_v40, %v3279_v44  ;;  %v3350_v54 = vmul.f32 %v6540_v40, %v6540_v40 }
 0x304   :  { %v3413_v9 = vadd.f32 %v3412_v2, %v3350_v54  ;;  %v2629_v19 = vpop.f32.mrb[120].mxu1 }
 0x305   :  { %v3207_v27 = vpop.f32.mrb[120].mxu0  ;;  %v2631_v15 = vpop.f32.mrb[121].mxu1 }
 0x306   :  { %v6545_v62 = vadd.f32 %v3207_v27, %v2629_v19  ;;  %v3209_v55 = vpop.f32.mrb[121].mxu0  ;;  %v2632_v45 = vpop.f32.mrb[122].mxu1 }
 0x307   :  { %v3210_v36 = vpop.f32.mrb[122].mxu0  ;;  %v2634_v10 = vpop.f32.mrb[123].mxu1 }
 0x308   :  { %8123 = vst [vmem:[#allocation28_spill] sm:$0xff] %v6545_v62  ;;  %v3281_v14 = vadd.f32 %v6545_v62, %v3280_v25  ;;  %v3351_v4 = vmul.f32 %v6545_v62, %v6545_v62  ;;  %v6550_v29 = vadd.f32 %v3210_v36, %v2632_v45  ;;  %v3212_v44 = vpop.f32.mrb[123].mxu0 }
 0x30a   :  { %8124 = vst [vmem:[#allocation29_spill] sm:$0xff] %v6550_v29  ;;  %v3414_v1 = vadd.f32 %v3413_v9, %v3351_v4  ;;  %v3282_v43 = vadd.f32 %v6550_v29, %v3281_v14  ;;  %v3352_v2 = vmul.f32 %v6550_v29, %v6550_v29 }
 0x30c   :  { %v3415_v54 = vadd.f32 %v3414_v1, %v3352_v2  ;;  %v2637_v19 = vpop.f32.mrb[124].mxu1 }
 0x30d   :  { %v3215_v27 = vpop.f32.mrb[124].mxu0  ;;  %v2639_v15 = vpop.f32.mrb[125].mxu1 }
 0x30e   :  { %v6555_v55 = vadd.f32 %v3215_v27, %v2637_v19  ;;  %v3217_v10 = vpop.f32.mrb[125].mxu0  ;;  %v2640_v25 = vpop.f32.mrb[126].mxu1 }
 0x30f   :  { %v3218_v59 = vpop.f32.mrb[126].mxu0  ;;  %v2642_v30 = vpop.f32.mrb[127].mxu1 }
 0x310   :  { %8125 = vst [vmem:[#allocation30_spill] sm:$0xff] %v6555_v55  ;;  %v3283_v36 = vadd.f32 %v6555_v55, %v3282_v43  ;;  %v3353_v9 = vmul.f32 %v6555_v55, %v6555_v55  ;;  %v6560_v45 = vadd.f32 %v3218_v59, %v2640_v25  ;;  %v3220_v14 = vpop.f32.mrb[127].mxu0  ;;  %v3497_v25 = vlaneseq }
 0x312   :  { %8126 = vst [vmem:[#allocation31_spill] sm:$0xff] %v6560_v45  ;;  %v3416_v4 = vadd.f32 %v3415_v54, %v3353_v9  ;;  %v3284_v44 = vadd.f32 %v6560_v45, %v3283_v36  ;;  %v3354_v1 = vmul.f32 %v6560_v45, %v6560_v45  ;;  %v6569_v45 = vshrl.u32 %v3497_v25, 7 }
 0x314   :  { %v3285_v2 = vrot.slane %v3284_v44, 4  ;;  %v3417_v19 = vadd.f32 %v3416_v4, %v3354_v1  ;;  %v8136_v1 = vld [vmem:[#allocation9_spill] sm:$0xff] }
 0x316   :  { %v3286_v27 = vadd.f32 %v3285_v2, %v3284_v44  ;;  %v3418_v15 = vrot.slane %v3417_v19, 4 }
 0x318   :  { %v3287_v10 = vrot.slane %v3286_v27, 2  ;;  %v3419_v30 = vadd.f32 %v3418_v15, %v3417_v19  ;;  %v8135_v19 = vld [vmem:[#allocation8_spill] sm:$0xff] }
 0x31a   :  { %v3288_v16 = vadd.f32 %v3287_v10, %v3286_v27  ;;  %v3420_v43 = vrot.slane %v3419_v30, 2 }
 0x31c   :  { %v3289_v56 = vrot.slane %v3288_v16, 1  ;;  %v3421_v42 = vadd.f32 %v3420_v43, %v3419_v30 }
 0x31e   :  { %v3290_v55 = vadd.f32 %v3289_v56, %v3288_v16  ;;  %v3422_v59 = vrot.slane %v3421_v42, 1  ;;  %v8134_v56 = vld [vmem:[#allocation7_spill] sm:$0xff] }
 0x320   :  { %v3423_v14 = vadd.f32 %v3422_v59, %v3421_v42  ;;  %v6565_v54 = vmul.f32 0.001953125, %v3290_v55 }
 0x322   :  { %v3425_v36 = vmul.f32 0.001953125, %v3423_v14  ;;  %v3426_v9 = vmul.f32 %v6565_v54, %v6565_v54  ;;  %v8130_v14 = vld [vmem:[#allocation3_spill] sm:$0xff]  ;;  %v3472_v30 = vsub.f32 %v8134_v56, %v6565_v54  ;;  %v3473_v10 = vsub.f32 %v8135_v19, %v6565_v54  ;;  %v8141_v56 = vld [vmem:[#allocation14_spill] sm:$0xff] }
 0x323   :  { %v3468_v27 = vsub.f32 %v8130_v14, %v6565_v54  ;;  %v3474_v25 = vsub.f32 %v8136_v1, %v6565_v54  ;;  %v8137_v14 = vld [vmem:[#allocation10_spill] sm:$0xff]  ;;  %v8142_v19 = vld [vmem:[#allocation15_spill] sm:$0xff]  ;;  %v8143_v1 = vld [vmem:[#allocation16_spill] sm:$0xff] }
 0x324   :  { %v3427_v4 = vsub.f32 %v3425_v36, %v3426_v9  ;;  %v8131_v36 = vld [vmem:[#allocation4_spill] sm:$0xff]  ;;  %v8132_v9 = vld [vmem:[#allocation5_spill] sm:$0xff]  ;;  %v3475_v43 = vsub.f32 %v8137_v14, %v6565_v54  ;;  %v3480_v40 = vsub.f32 %v8142_v19, %v6565_v54  ;;  %v3481_v33 = vsub.f32 %v8143_v1, %v6565_v54 }
 0x325   :  { %v3469_v55 = vsub.f32 %v8131_v36, %v6565_v54  ;;  %v3470_v16 = vsub.f32 %v8132_v9, %v6565_v54  ;;  %v8138_v36 = vld [vmem:[#allocation11_spill] sm:$0xff]  ;;  %v8139_v9 = vld [vmem:[#allocation12_spill] sm:$0xff]  ;;  %v8144_v14 = vsub.s32 0, %v6569_v45  ;;  %v8149_v19 = vsub.f32 %v6209_v41, %v6565_v54 }
 0x326   :  { %v3428_v44 = vmax.f32 %v3427_v4, 0.0  ;;  %v3466_v4 = vsub.f32 %v6388_v20, %v6565_v54  ;;  %v8133_v20 = vld [vmem:[#allocation6_spill] sm:$0xff]  ;;  %v3476_v29 = vsub.f32 %v8138_v36, %v6565_v54  ;;  %v3477_v62 = vsub.f32 %v8139_v9, %v6565_v54  ;;  %v8145_v36 = vld [vmem:[#allocation17_spill] sm:$0xff] }
 0x327   :  { %v3471_v42 = vsub.f32 %v8133_v20, %v6565_v54  ;;  %v3479_v20 = vsub.f32 %v8141_v56, %v6565_v54  ;;  %v3482_v34 = vsub.f32 %v8145_v36, %v6565_v54  ;;  %v8146_v9 = vld [vmem:[#allocation18_spill] sm:$0xff]  ;;  %v8148_v56 = vld [vmem:[#allocation20_spill] sm:$0xff]  ;;  %v8150_v45 = vsub.f32 %v6211_v49, %v6565_v54 }
 0x328   :  { %v3429_v2 = vadd.f32 1e-05, %v3428_v44  ;;  %v8127_v44 = vld [vmem:[#allocation2_spill] sm:$0xff]  ;;  %v3483_v26 = vsub.f32 %v8146_v9, %v6565_v54  ;;  %v3485_v60 = vsub.f32 %v8148_v56, %v6565_v54  ;;  %v8152_v9 = vsub.f32 %v6227_v3, %v6565_v54 }
 0x329   :  { %v3467_v59 = vsub.f32 %v8127_v44, %v6565_v54  ;;  %v8154_v56 = vsub.f32 %v6243_v21, %v6565_v54 }
 0x32a   :  { %5177 = vrsqrt.f32 %v3429_v2  ;;  %v3431_v2 = vld [vmem:[%s8031_s2] sm:$0x1] }
 0x334   :  { %v5178_v15 = vpop.eup %5177 }
 0x335   :  { %v3432_v44 = vmul.f32 %v5178_v15, %v3431_v2  ;;  %v8140_v15 = vld [vmem:[#allocation13_spill] sm:$0xff] }
 0x336   :  { %v3478_v2 = vsub.f32 %v8140_v15, %v6565_v54  ;;  %v8147_v15 = vld [vmem:[#allocation19_spill] sm:$0xff] }
 0x337   :  { %v6697_v52 = vrot.slane %v3432_v44, %v8144_v14  ;;  %v3484_v28 = vsub.f32 %v8147_v15, %v6565_v54  ;;  %v8151_v14 = vsub.f32 %v6225_v58, %v6565_v54  ;;  %v8153_v15 = vsub.f32 %v6241_v13, %v6565_v54 }
 0x339   :  { %v6711_v1 = vmul.f32 %v6697_v52, %v8149_v19  ;;  %v6717_v44 = vmul.f32 %v6697_v52, %v8150_v45  ;;  %v6723_v36 = vmul.f32 %v6697_v52, %v8151_v14  ;;  %v6729_v41 = vmul.f32 %v6697_v52, %v8152_v9 }
 0x33a   :  { %v6735_v49 = vmul.f32 %v6697_v52, %v8153_v15  ;;  %v6741_v58 = vmul.f32 %v6697_v52, %v8154_v56  ;;  %v8155_v19 = vsub.f32 %v6257_v31, %v6565_v54  ;;  %v8156_v45 = vsub.f32 %v6259_v39, %v6565_v54 }
 0x33b   :  { %v8157_v14 = vsub.f32 %v6261_v46, %v6565_v54  ;;  %v8158_v9 = vsub.f32 %v6263_v53, %v6565_v54  ;;  %v8159_v15 = vsub.f32 %v6265_v0, %v6565_v54  ;;  %v8160_v56 = vsub.f32 %v6267_v63, %v6565_v54 }
 0x33c   :  { %v6747_v3 = vmul.f32 %v6697_v52, %v8155_v19  ;;  %v6753_v13 = vmul.f32 %v6697_v52, %v8156_v45  ;;  %v8161_v19 = vsub.f32 %v6269_v6, %v6565_v54  ;;  %v8162_v45 = vsub.f32 %v6271_v11, %v6565_v54 }
 0x33d   :  { %v6759_v21 = vmul.f32 %v6697_v52, %v8157_v14  ;;  %v6765_v31 = vmul.f32 %v6697_v52, %v8158_v9  ;;  %v6771_v39 = vmul.f32 %v6697_v52, %v8159_v15  ;;  %v6777_v46 = vmul.f32 %v6697_v52, %v8160_v56 }
 0x33e   :  { %v6783_v53 = vmul.f32 %v6697_v52, %v8161_v19  ;;  %v6789_v0 = vmul.f32 %v6697_v52, %v8162_v45  ;;  %v8163_v14 = vsub.f32 %v6273_v17, %v6565_v54  ;;  %v8164_v9 = vsub.f32 %v6277_v24, %v6565_v54 }
 0x33f   :  { %v8165_v15 = vsub.f32 %v6288_v37, %v6565_v54  ;;  %v8166_v56 = vsub.f32 %v6293_v47, %v6565_v54  ;;  %v8167_v19 = vsub.f32 %v6301_v61, %v6565_v54  ;;  %v8168_v45 = vsub.f32 %v6304_v8, %v6565_v54 }
 0x340   :  { %v6795_v63 = vmul.f32 %v6697_v52, %v8163_v14  ;;  %v6801_v6 = vmul.f32 %v6697_v52, %v8164_v9  ;;  %v8169_v14 = vsub.f32 %v6312_v23, %v6565_v54  ;;  %v8170_v9 = vsub.f32 %v6316_v32, %v6565_v54 }
 0x341   :  { %v6807_v11 = vmul.f32 %v6697_v52, %v8165_v15  ;;  %v6813_v17 = vmul.f32 %v6697_v52, %v8166_v56  ;;  %v6819_v24 = vmul.f32 %v6697_v52, %v8167_v19  ;;  %v6825_v37 = vmul.f32 %v6697_v52, %v8168_v45 }
 0x342   :  { %v6831_v47 = vmul.f32 %v6697_v52, %v8169_v14  ;;  %v6837_v61 = vmul.f32 %v6697_v52, %v8170_v9  ;;  %v8171_v15 = vsub.f32 %v6324_v48, %v6565_v54  ;;  %v8172_v56 = vsub.f32 %v6329_v57, %v6565_v54 }
 0x343   :  { %v8173_v19 = vsub.f32 %v6337_v12, %v6565_v54  ;;  %v8174_v45 = vsub.f32 %v6340_v22, %v6565_v54  ;;  %v8175_v14 = vsub.f32 %v6348_v38, %v6565_v54  ;;  %v8176_v9 = vsub.f32 %v6352_v51, %v6565_v54 }
 0x344   :  { %v6843_v8 = vmul.f32 %v6697_v52, %v8171_v15  ;;  %v6849_v23 = vmul.f32 %v6697_v52, %v8172_v56  ;;  %v8177_v15 = vsub.f32 %v6360_v5, %v6565_v54  ;;  %v8178_v56 = vsub.f32 %v6365_v18, %v6565_v54 }
 0x345   :  { %v6855_v32 = vmul.f32 %v6697_v52, %v8173_v19  ;;  %v6861_v48 = vmul.f32 %v6697_v52, %v8174_v45  ;;  %v6867_v57 = vmul.f32 %v6697_v52, %v8175_v14  ;;  %v6873_v12 = vmul.f32 %v6697_v52, %v8176_v9 }
 0x346   :  { %v6879_v22 = vmul.f32 %v6697_v52, %v8177_v15  ;;  %v6885_v38 = vmul.f32 %v6697_v52, %v8178_v56  ;;  %v8179_v19 = vsub.f32 %v6373_v35, %v6565_v54  ;;  %v8180_v45 = vsub.f32 %v6376_v50, %v6565_v54 }
 0x347   :  { %v8181_v14 = vsub.f32 %v6384_v7, %v6565_v54  ;;  %v6906_v9 = vmul.f32 %v6697_v52, %v3466_v4  ;;  %v6909_v35 = vmul.f32 %v6697_v52, %v3467_v59  ;;  %v6912_v15 = vmul.f32 %v6697_v52, %v3468_v27 }
 0x348   :  { %v6891_v51 = vmul.f32 %v6697_v52, %v8179_v19  ;;  %v6897_v5 = vmul.f32 %v6697_v52, %v8180_v45  ;;  %v6915_v50 = vmul.f32 %v6697_v52, %v3469_v55  ;;  %v6918_v56 = vmul.f32 %v6697_v52, %v3470_v16 }
 0x349   :  { %v6903_v18 = vmul.f32 %v6697_v52, %v8181_v14  ;;  %v6921_v7 = vmul.f32 %v6697_v52, %v3471_v42  ;;  %v6924_v19 = vmul.f32 %v6697_v52, %v3472_v30  ;;  %v6927_v4 = vmul.f32 %v6697_v52, %v3473_v10 }
 0x34a   :  { %v6930_v59 = vmul.f32 %v6697_v52, %v3474_v25  ;;  %v6933_v27 = vmul.f32 %v6697_v52, %v3475_v43  ;;  %v6936_v55 = vmul.f32 %v6697_v52, %v3476_v29  ;;  %v6939_v16 = vmul.f32 %v6697_v52, %v3477_v62 }
 0x34b   :  { %v6942_v42 = vmul.f32 %v6697_v52, %v3478_v2  ;;  %v6945_v30 = vmul.f32 %v6697_v52, %v3479_v20  ;;  %v6948_v10 = vmul.f32 %v6697_v52, %v3480_v40  ;;  %v6951_v25 = vmul.f32 %v6697_v52, %v3481_v33  ;;  %v8184_v20 = vld [vmem:[#allocation21_spill] sm:$0xff]  ;;  %v8187_v33 = vld [vmem:[#allocation22_spill] sm:$0xff] }
 0x34c   :  { %v6954_v43 = vmul.f32 %v6697_v52, %v3482_v34  ;;  %v6957_v29 = vmul.f32 %v6697_v52, %v3483_v26  ;;  %v6960_v62 = vmul.f32 %v6697_v52, %v3484_v28  ;;  %v6963_v2 = vmul.f32 %v6697_v52, %v3485_v60  ;;  %v8190_v26 = vld [vmem:[#allocation23_spill] sm:$0xff]  ;;  %v8193_v60 = vld [vmem:[#allocation24_spill] sm:$0xff] }
 0x34d   :  { %v8185_v45 = vsub.f32 %v8184_v20, %v6565_v54  ;;  %v8188_v14 = vsub.f32 %v8187_v33, %v6565_v54 }
 0x34e   :  { %8182 = vst [vmem:[#allocation2_spill] sm:$0xff] %v6957_v29  ;;  %8183 = vst [vmem:[#allocation3_spill] sm:$0xff] %v6963_v2  ;;  %v8191_v29 = vsub.f32 %v8190_v26, %v6565_v54  ;;  %v8194_v2 = vsub.f32 %v8193_v60, %v6565_v54 }
 0x34f   :  { %v6969_v40 = vmul.f32 %v6697_v52, %v8185_v45  ;;  %v6975_v34 = vmul.f32 %v6697_v52, %v8188_v14  ;;  %v8196_v45 = vld [vmem:[#allocation25_spill] sm:$0xff]  ;;  %v8199_v14 = vld [vmem:[#allocation26_spill] sm:$0xff] }
 0x350   :  { %v6981_v28 = vmul.f32 %v6697_v52, %v8191_v29  ;;  %v6987_v20 = vmul.f32 %v6697_v52, %v8194_v2  ;;  %v8202_v29 = vld [vmem:[#allocation27_spill] sm:$0xff]  ;;  %v8205_v2 = vld [vmem:[#allocation28_spill] sm:$0xff] }
 0x351   :  { %8186 = vst [vmem:[#allocation4_spill] sm:$0xff] %v6969_v40  ;;  %8189 = vst [vmem:[#allocation5_spill] sm:$0xff] %v6975_v34  ;;  %v8197_v40 = vsub.f32 %v8196_v45, %v6565_v54  ;;  %v8200_v34 = vsub.f32 %v8199_v14, %v6565_v54 }
 0x352   :  { %8192 = vst [vmem:[#allocation6_spill] sm:$0xff] %v6981_v28  ;;  %8195 = vst [vmem:[#allocation7_spill] sm:$0xff] %v6987_v20  ;;  %v8203_v28 = vsub.f32 %v8202_v29, %v6565_v54  ;;  %v8206_v20 = vsub.f32 %v8205_v2, %v6565_v54 }
 0x353   :  { %v6993_v33 = vmul.f32 %v6697_v52, %v8197_v40  ;;  %v6999_v26 = vmul.f32 %v6697_v52, %v8200_v34  ;;  %v8207_v40 = vld [vmem:[#allocation29_spill] sm:$0xff]  ;;  %v8209_v34 = vld [vmem:[#allocation30_spill] sm:$0xff] }
 0x354   :  { %v7005_v60 = vmul.f32 %v6697_v52, %v8203_v28  ;;  %v7011_v45 = vmul.f32 %v6697_v52, %v8206_v20  ;;  %v8211_v28 = vld [vmem:[#allocation31_spill] sm:$0xff]  ;;  %v7034_v20 = vld [vmem:[%s8032_s3] ss:$0 sm:$0xff] }
 0x355   :  { %8198 = vst [vmem:[#allocation8_spill] sm:$0xff] %v6993_v33  ;;  %8201 = vst [vmem:[#allocation9_spill] sm:$0xff] %v6999_v26  ;;  %v8208_v33 = vsub.f32 %v8207_v40, %v6565_v54  ;;  %v8210_v26 = vsub.f32 %v8209_v34, %v6565_v54  ;;  %v7042_v40 = vadd.f32 %v7034_v20, %v6717_v44  ;;  %v8219_v34 = vld [vmem:[#allocation3_spill] sm:$0xff] }
 0x356   :  { %8204 = vst [vmem:[#allocation10_spill] sm:$0xff] %v7005_v60  ;;  %v8212_v60 = vsub.f32 %v8211_v28, %v6565_v54  ;;  %v7054_v54 = vadd.f32 %v7034_v20, %v6735_v49  ;;  %v7062_v44 = vadd.f32 %v7034_v20, %v6747_v3  ;;  %v7074_v49 = vadd.f32 %v7034_v20, %v6765_v31 }
 0x357   :  { %v7017_v14 = vmul.f32 %v6697_v52, %v8208_v33  ;;  %v7023_v29 = vmul.f32 %v6697_v52, %v8210_v26  ;;  %v7038_v33 = vadd.f32 %v7034_v20, %v6711_v1  ;;  %v7046_v26 = vadd.f32 %v7034_v20, %v6723_v36 }
 0x358   :  { %v7029_v2 = vmul.f32 %v6697_v52, %v8212_v60  ;;  %v7050_v52 = vadd.f32 %v7034_v20, %v6729_v41  ;;  %v7058_v1 = vadd.f32 %v7034_v20, %v6741_v58  ;;  %v7066_v36 = vadd.f32 %v7034_v20, %v6753_v13  ;;  %v8216_v60 = vld [vmem:[#allocation2_spill] sm:$0xff]  ;;  %v8221_v28 = vld [vmem:[#allocation4_spill] sm:$0xff] }
 0x359   :  { %v7070_v41 = vadd.f32 %v7034_v20, %v6759_v21  ;;  %v7078_v58 = vadd.f32 %v7034_v20, %v6771_v39  ;;  %v7082_v3 = vadd.f32 %v7034_v20, %v6777_v46  ;;  %v7086_v13 = vadd.f32 %v7034_v20, %v6783_v53 }
 0x35a   :  { %v7090_v21 = vadd.f32 %v7034_v20, %v6789_v0  ;;  %v7094_v31 = vadd.f32 %v7034_v20, %v6795_v63  ;;  %v7098_v39 = vadd.f32 %v7034_v20, %v6801_v6  ;;  %v7102_v46 = vadd.f32 %v7034_v20, %v6807_v11 }
 0x35b   :  { %v7106_v53 = vadd.f32 %v7034_v20, %v6813_v17  ;;  %v7110_v0 = vadd.f32 %v7034_v20, %v6819_v24  ;;  %v7114_v63 = vadd.f32 %v7034_v20, %v6825_v37  ;;  %v7118_v6 = vadd.f32 %v7034_v20, %v6831_v47 }
 0x35c   :  { %v7122_v11 = vadd.f32 %v7034_v20, %v6837_v61  ;;  %v7126_v17 = vadd.f32 %v7034_v20, %v6843_v8  ;;  %v7130_v24 = vadd.f32 %v7034_v20, %v6849_v23  ;;  %v7134_v37 = vadd.f32 %v7034_v20, %v6855_v32 }
 0x35d   :  { %v7138_v47 = vadd.f32 %v7034_v20, %v6861_v48  ;;  %v7142_v61 = vadd.f32 %v7034_v20, %v6867_v57  ;;  %v7146_v8 = vadd.f32 %v7034_v20, %v6873_v12  ;;  %v7150_v23 = vadd.f32 %v7034_v20, %v6879_v22 }
 0x35e   :  { %v7154_v32 = vadd.f32 %v7034_v20, %v6885_v38  ;;  %v7158_v48 = vadd.f32 %v7034_v20, %v6891_v51  ;;  %v7162_v57 = vadd.f32 %v7034_v20, %v6897_v5  ;;  %v7166_v12 = vadd.f32 %v7034_v20, %v6903_v18 }
 0x35f   :  { %v7170_v22 = vadd.f32 %v7034_v20, %v6906_v9  ;;  %v7174_v38 = vadd.f32 %v7034_v20, %v6909_v35  ;;  %v7178_v51 = vadd.f32 %v7034_v20, %v6912_v15  ;;  %v7182_v5 = vadd.f32 %v7034_v20, %v6915_v50 }
 0x360   :  { %v7186_v18 = vadd.f32 %v7034_v20, %v6918_v56  ;;  %v7190_v9 = vadd.f32 %v7034_v20, %v6921_v7  ;;  %v7194_v35 = vadd.f32 %v7034_v20, %v6924_v19  ;;  %v7198_v15 = vadd.f32 %v7034_v20, %v6927_v4 }
 0x361   :  { %v7202_v50 = vadd.f32 %v7034_v20, %v6930_v59  ;;  %v7206_v56 = vadd.f32 %v7034_v20, %v6933_v27  ;;  %v7210_v7 = vadd.f32 %v7034_v20, %v6936_v55  ;;  %v7214_v19 = vadd.f32 %v7034_v20, %v6939_v16 }
 0x362   :  { %v7218_v4 = vadd.f32 %v7034_v20, %v6942_v42  ;;  %v7222_v59 = vadd.f32 %v7034_v20, %v6945_v30  ;;  %v7226_v27 = vadd.f32 %v7034_v20, %v6948_v10  ;;  %v7230_v55 = vadd.f32 %v7034_v20, %v6951_v25 }
 0x363   :  { %v7234_v16 = vadd.f32 %v7034_v20, %v6954_v43  ;;  %v7238_v42 = vadd.f32 %v7034_v20, %v8216_v60  ;;  %v7242_v30 = vadd.f32 %v7034_v20, %v6960_v62  ;;  %v7246_v10 = vadd.f32 %v7034_v20, %v8219_v34 }
 0x364   :  { %8213 = vst [vmem:[#allocation11_spill] sm:$0xff] %v7218_v4  ;;  %8214 = vst [vmem:[#allocation12_spill] sm:$0xff] %v7230_v55  ;;  %v7250_v25 = vadd.f32 %v7034_v20, %v8221_v28  ;;  %v8223_v55 = vld [vmem:[#allocation5_spill] sm:$0xff]  ;;  %vm3636_vm0 = vcmp.gt.f32.partialorder %v7038_v33, 0.0  ;;  %vm3637_vm1 = vcmp.gt.f32.partialorder %v7042_v40, 0.0  ;;  %vm3638_vm2 = vcmp.gt.f32.partialorder %v7046_v26, 0.0 }
 0x365   :  { %8215 = vst [vmem:[#allocation13_spill] sm:$0xff] %v7234_v16  ;;  %8217 = vst [vmem:[#allocation14_spill] sm:$0xff] %v7238_v42  ;;  %v7254_v43 = vadd.f32 %v7034_v20, %v8223_v55  ;;  %v8225_v16 = vld [vmem:[#allocation6_spill] sm:$0xff]  ;;  %v8227_v42 = vld [vmem:[#allocation7_spill] sm:$0xff]  ;;  %vm3639_vm3 = vcmp.gt.f32.partialorder %v7050_v52, 0.0  ;;  %vm3640_vm4 = vcmp.gt.f32.partialorder %v7054_v54, 0.0 }
 0x366   :  { %8218 = vst [vmem:[#allocation15_spill] sm:$0xff] %v7242_v30  ;;  %8220 = vst [vmem:[#allocation16_spill] sm:$0xff] %v7246_v10  ;;  %v7258_v60 = vadd.f32 %v7034_v20, %v8225_v16  ;;  %v7262_v62 = vadd.f32 %v7034_v20, %v8227_v42  ;;  %v8229_v30 = vld [vmem:[#allocation8_spill] sm:$0xff]  ;;  %v8231_v10 = vld [vmem:[#allocation9_spill] sm:$0xff]  ;;  %v7278_v16 = vadd.f32 %v7034_v20, %v7011_v45  ;;  %vm3641_vm5 = vcmp.gt.f32.partialorder %v7058_v1, 0.0 }
 0x367   :  { %8222 = vst [vmem:[#allocation17_spill] sm:$0xff] %v7250_v25  ;;  %8224 = vst [vmem:[#allocation18_spill] sm:$0xff] %v7254_v43  ;;  %v7266_v34 = vadd.f32 %v7034_v20, %v8229_v30  ;;  %v7270_v28 = vadd.f32 %v7034_v20, %v8231_v10  ;;  %v8233_v25 = vld [vmem:[#allocation10_spill] sm:$0xff]  ;;  %v7282_v42 = vadd.f32 %v7034_v20, %v7017_v14  ;;  %vm3642_vm6 = vcmp.gt.f32.partialorder %v7062_v44, 0.0 }
 0x368   :  { %8226 = vst [vmem:[#allocation19_spill] sm:$0xff] %v7258_v60  ;;  %8228 = vst [vmem:[#allocation20_spill] sm:$0xff] %v7262_v62  ;;  %v7274_v55 = vadd.f32 %v7034_v20, %v8233_v25  ;;  %vm3643_vm7 = vcmp.gt.f32.partialorder %v7066_v36, 0.0  ;;  %vm3644_vm8 = vcmp.gt.f32.partialorder %v7070_v41, 0.0  ;;  %v7295_v45 = vadd.f32 %v7034_v20, %v7023_v29 }
 0x369   :  { %8230 = vst [vmem:[#allocation21_spill] sm:$0xff] %v7266_v34  ;;  %8232 = vst [vmem:[#allocation22_spill] sm:$0xff] %v7270_v28  ;;  %vm3645_vm9 = vcmp.gt.f32.partialorder %v7074_v49, 0.0  ;;  %v3700_v14 = vmul.f32 0.2, %v7038_v33  ;;  %v7303_v25 = vadd.f32 %v7034_v20, %v7029_v2  ;;  %vm3646_vm10 = vcmp.gt.f32.partialorder %v7078_v58, 0.0 }
 0x36a   :  { %8234 = vst [vmem:[#allocation23_spill] sm:$0xff] %v7274_v55  ;;  %8235 = vst [vmem:[#allocation24_spill] sm:$0xff] %v7278_v16  ;;  %v3701_v30 = vmul.f32 0.2, %v7042_v40  ;;  %v3702_v10 = vmul.f32 0.2, %v7046_v26 }
 0x36b   :  { %8236 = vst [vmem:[#allocation25_spill] sm:$0xff] %v7282_v42  ;;  %8237 = vst [vmem:[#allocation26_spill] sm:$0xff] %v7295_v45  ;;  %v3703_v42 = vmul.f32 0.2, %v7050_v52  ;;  %v3704_v16 = vmul.f32 0.2, %v7054_v54  ;;  %v7316_v2 = vsel %vm3636_vm0, %v7038_v33, %v3700_v14 }
 0x36c   :  { %8238 = vst [vmem:[#allocation27_spill] sm:$0xff] %v7303_v25  ;;  %v3705_v29 = vmul.f32 0.2, %v7058_v1  ;;  %vm3647_vm11 = vcmp.gt.f32.partialorder %v7082_v3, 0.0  ;;  %v3706_v45 = vmul.f32 0.2, %v7062_v44  ;;  %v7327_v62 = vsel %vm3637_vm1, %v7042_v40, %v3701_v30 }
 0x36d   :  { %v3707_v55 = vmul.f32 0.2, %v7066_v36  ;;  %v3708_v28 = vmul.f32 0.2, %v7070_v41  ;;  %8239 = vst [vmem:[#allocation28_spill] sm:$0xff] %v7316_v2  ;;  %vm3648_vm12 = vcmp.gt.f32.partialorder %v7086_v13, 0.0  ;;  %v7342_v2 = vsel %vm3638_vm2, %v7046_v26, %v3702_v10 }
 0x36e   :  { %v3709_v20 = vmul.f32 0.2, %v7074_v49  ;;  %v3710_v25 = vmul.f32 0.2, %v7078_v58  ;;  %v7322_v34 = vmul.f32 0.2, %v7082_v3  ;;  %v7357_v43 = vsel %vm3639_vm3, %v7050_v52, %v3703_v42 }
 0x36f   :  { %8240 = vst [vmem:[#allocation29_spill] sm:$0xff] %v7327_v62  ;;  %vm3649_vm13 = vcmp.gt.f32.partialorder %v7090_v21, 0.0  ;;  %v7331_v60 = vmul.f32 0.2, %v7086_v13  ;;  %v7334_v33 = vmul.f32 0.2, %v7090_v21 }
 0x370   :  { %v7337_v14 = vmul.f32 0.2, %v7094_v31  ;;  %8241 = vst [vmem:[#allocation30_spill] sm:$0xff] %v7342_v2  ;;  %vm3650_vm14 = vcmp.gt.f32.partialorder %v7094_v31, 0.0  ;;  %v7346_v40 = vmul.f32 0.2, %v7098_v39 }
 0x371   :  { %v7349_v30 = vmul.f32 0.2, %v7102_v46  ;;  %v7352_v62 = vmul.f32 0.2, %v7106_v53  ;;  %8243 = vst [vmem:[#allocation2_spill] sm:$0xff] %v7357_v43  ;;  %vm3651_vm15 = vcmp.gt.f32.partialorder %v7098_v39, 0.0 }
 0x372   :  { %v7361_v26 = vmul.f32 0.2, %v7110_v0  ;;  %v7364_v10 = vmul.f32 0.2, %v7114_v63  ;;  %v7367_v2 = vmul.f32 0.2, %v7118_v6 }
 0x373   :  { %8242 = vst [vmem:[#allocation31_spill] sm:$0xff] %v7352_v62  ;;  %v7372_v62 = vsel %vm3640_vm4, %v7054_v54, %v3704_v16  ;;  %vm3652_vm0 = vcmp.gt.f32.partialorder %v7102_v46, 0.0  ;;  %v7376_v52 = vmul.f32 0.2, %v7122_v11  ;;  %v7379_v42 = vmul.f32 0.2, %v7126_v17 }
 0x374   :  { %8244 = vst [vmem:[#allocation3_spill] sm:$0xff] %v7367_v2  ;;  %8245 = vst [vmem:[#allocation4_spill] sm:$0xff] %v7372_v62  ;;  %v7382_v43 = vmul.f32 0.2, %v7130_v24  ;;  %v7387_v2 = vsel %vm3641_vm5, %v7058_v1, %v3705_v29  ;;  %vm3653_vm1 = vcmp.gt.f32.partialorder %v7106_v53, 0.0  ;;  %vm3654_vm2 = vcmp.gt.f32.partialorder %v7110_v0, 0.0 }
 0x375   :  { %8247 = vst [vmem:[#allocation6_spill] sm:$0xff] %v7387_v2  ;;  %v7391_v54 = vmul.f32 0.2, %v7134_v37  ;;  %v7394_v16 = vmul.f32 0.2, %v7138_v47  ;;  %vm3655_vm3 = vcmp.gt.f32.partialorder %v7114_v63, 0.0 }
 0x376   :  { %8246 = vst [vmem:[#allocation5_spill] sm:$0xff] %v7382_v43  ;;  %v7397_v62 = vmul.f32 0.2, %v7142_v61  ;;  %v7402_v43 = vsel %vm3642_vm6, %v7062_v44, %v3706_v45  ;;  %v7406_v1 = vmul.f32 0.2, %v7146_v8  ;;  %vm3658_vm6 = vcmp.gt.f32.partialorder %v7126_v17, 0.0 }
 0x377   :  { %8249 = vst [vmem:[#allocation8_spill] sm:$0xff] %v7402_v43  ;;  %v7409_v29 = vmul.f32 0.2, %v7150_v23  ;;  %v7412_v2 = vmul.f32 0.2, %v7154_v32 }
 0x378   :  { %8248 = vst [vmem:[#allocation7_spill] sm:$0xff] %v7397_v62  ;;  %v7417_v62 = vsel %vm3643_vm7, %v7066_v36, %v3707_v55  ;;  %v7423_v44 = vmul.f32 0.2, %v7158_v48  ;;  %v7426_v45 = vmul.f32 0.2, %v7162_v57  ;;  %v7434_v36 = vsel %vm3644_vm8, %v7070_v41, %v3708_v28 }
 0x379   :  { %8250 = vst [vmem:[#allocation9_spill] sm:$0xff] %v7417_v62  ;;  %v7429_v43 = vmul.f32 0.2, %v7166_v12  ;;  %8252 = vst [vmem:[#allocation32_spill] sm:$0xff] %v7434_v36  ;;  %v7441_v55 = vmul.f32 0.2, %v7170_v22  ;;  %v7452_v41 = vsel %vm3645_vm9, %v7074_v49, %v3709_v20  ;;  %v7470_v49 = vsel %vm3646_vm10, %v7078_v58, %v3710_v25 }
 0x37a   :  { %v7444_v62 = vmul.f32 0.2, %v7174_v38  ;;  %8254 = vst [vmem:[#allocation34_spill] sm:$0xff] %v7452_v41  ;;  %vm3662_vm8 = vcmp.gt.f32.partialorder %v7142_v61, 0.0  ;;  %v7459_v28 = vmul.f32 0.2, %v7182_v5  ;;  %v7489_v58 = vsel %vm3647_vm11, %v7082_v3, %v7322_v34 }
 0x37b   :  { %8251 = vst [vmem:[#allocation10_spill] sm:$0xff] %v7429_v43  ;;  %v7447_v43 = vmul.f32 0.2, %v7178_v51  ;;  %v7462_v36 = vmul.f32 0.2, %v7186_v18  ;;  %8256 = vst [vmem:[#allocation36_spill] sm:$0xff] %v7470_v49  ;;  %v7508_v3 = vsel %vm3648_vm12, %v7086_v13, %v7331_v60  ;;  %v7527_v13 = vsel %vm3649_vm13, %v7090_v21, %v7334_v33 }
 0x37c   :  { %vm3666_vm9 = vcmp.gt.f32.partialorder %v7158_v48, 0.0  ;;  %v7477_v20 = vmul.f32 0.2, %v7194_v35  ;;  %v7480_v41 = vmul.f32 0.2, %v7198_v15  ;;  %8258 = vst [vmem:[#allocation38_spill] sm:$0xff] %v7489_v58  ;;  %v7546_v21 = vsel %vm3650_vm14, %v7094_v31, %v7337_v14 }
 0x37d   :  { %8253 = vst [vmem:[#allocation33_spill] sm:$0xff] %v7447_v43  ;;  %v7465_v43 = vmul.f32 0.2, %v7190_v9  ;;  %vm3670_vm10 = vcmp.gt.f32.partialorder %v7174_v38, 0.0  ;;  %v7496_v25 = vmul.f32 0.2, %v7206_v56  ;;  %v7565_v31 = vsel %vm3651_vm15, %v7098_v39, %v7346_v40 }
 0x37e   :  { %v7499_v49 = vmul.f32 0.2, %v7210_v7  ;;  %8261 = vst [vmem:[#allocation41_spill] sm:$0xff] %v7508_v3  ;;  %vm3674_vm11 = vcmp.gt.f32.partialorder %v7190_v9, 0.0  ;;  %v7515_v34 = vmul.f32 0.2, %v7218_v4  ;;  %v7578_v39 = vsel %vm3652_vm0, %v7102_v46, %v7349_v30 }
 0x37f   :  { %8255 = vst [vmem:[#allocation35_spill] sm:$0xff] %v7465_v43  ;;  %v7483_v43 = vmul.f32 0.2, %v7202_v50  ;;  %v7518_v58 = vmul.f32 0.2, %v7222_v59  ;;  %8265 = vst [vmem:[#allocation45_spill] sm:$0xff] %v7527_v13 }
 0x380   :  { %8259 = vst [vmem:[#allocation39_spill] sm:$0xff] %v7499_v49  ;;  %8262 = vst [vmem:[#allocation42_spill] sm:$0xff] %v7515_v34  ;;  %vm3678_vm12 = vcmp.gt.f32.partialorder %v7206_v56, 0.0  ;;  %v8266_v60 = vld [vmem:[#allocation12_spill] sm:$0xff]  ;;  %vm3682_vm13 = vcmp.gt.f32.partialorder %v7222_v59, 0.0  ;;  %v8273_v33 = vld [vmem:[#allocation15_spill] sm:$0xff] }
 0x381   :  { %8257 = vst [vmem:[#allocation37_spill] sm:$0xff] %v7483_v43  ;;  %v7502_v43 = vmul.f32 0.2, %v7214_v19  ;;  %8263 = vst [vmem:[#allocation43_spill] sm:$0xff] %v7518_v58  ;;  %v7534_v3 = vmul.f32 0.2, %v8266_v60 }
 0x382   :  { %v8268_v58 = vld [vmem:[#allocation13_spill] sm:$0xff]  ;;  %8272 = vst [vmem:[#allocation49_spill] sm:$0xff] %v7546_v21  ;;  %v7553_v13 = vmul.f32 0.2, %v8273_v33  ;;  %8279 = vst [vmem:[#allocation53_spill] sm:$0xff] %v7565_v31  ;;  %v8280_v14 = vld [vmem:[#allocation18_spill] sm:$0xff] }
 0x383   :  { %8260 = vst [vmem:[#allocation40_spill] sm:$0xff] %v7502_v43  ;;  %v7521_v43 = vmul.f32 0.2, %v7226_v27  ;;  %8267 = vst [vmem:[#allocation46_spill] sm:$0xff] %v7534_v3  ;;  %v7537_v34 = vmul.f32 0.2, %v8268_v58 }
 0x384   :  { %8274 = vst [vmem:[#allocation50_spill] sm:$0xff] %v7553_v13  ;;  %v3754_v21 = vmul.f32 0.2, %v8280_v14  ;;  %v8282_v58 = vld [vmem:[#allocation20_spill] sm:$0xff]  ;;  %8283 = vst [vmem:[#allocation54_spill] sm:$0xff] %v7578_v39  ;;  %vm3690_vm15 = vcmp.gt.f32.partialorder %v8280_v14, 0.0 }
 0x385   :  { %8264 = vst [vmem:[#allocation44_spill] sm:$0xff] %v7521_v43  ;;  %8269 = vst [vmem:[#allocation47_spill] sm:$0xff] %v7537_v34  ;;  %v8270_v43 = vld [vmem:[#allocation14_spill] sm:$0xff]  ;;  %v8275_v34 = vld [vmem:[#allocation16_spill] sm:$0xff]  ;;  %vm8294_vm7 = vcmp.gt.f32.partialorder %v7118_v6, 0.0 }
 0x386   :  { %v7540_v49 = vmul.f32 0.2, %v8270_v43  ;;  %v7556_v3 = vmul.f32 0.2, %v8275_v34  ;;  %vm3686_vm14 = vcmp.gt.f32.partialorder %v8270_v43, 0.0  ;;  %v8284_v40 = vld [vmem:[#allocation21_spill] sm:$0xff] }
 0x387   :  { %v3757_v31 = vmul.f32 0.2, %v8284_v40  ;;  %v8286_v33 = vld [vmem:[#allocation23_spill] sm:$0xff]  ;;  %v8289_v30 = vld [vmem:[#allocation24_spill] sm:$0xff]  ;;  %v8290_v39 = vld [vmem:[#allocation25_spill] sm:$0xff] }
 0x388   :  { %8271 = vst [vmem:[#allocation48_spill] sm:$0xff] %v7540_v49  ;;  %8276 = vst [vmem:[#allocation51_spill] sm:$0xff] %v7556_v3  ;;  %v8277_v49 = vld [vmem:[#allocation17_spill] sm:$0xff]  ;;  %v8281_v3 = vld [vmem:[#allocation19_spill] sm:$0xff]  ;;  %v3759_v43 = vmul.f32 0.2, %v8286_v33 }
 0x389   :  { %v7559_v4 = vmul.f32 0.2, %v8277_v49  ;;  %v3755_v13 = vmul.f32 0.2, %v8281_v3  ;;  %v8285_v49 = vld [vmem:[#allocation22_spill] sm:$0xff]  ;;  %v8287_v60 = vld [vmem:[#allocation31_spill] sm:$0xff] }
 0x38a   :  { %v3758_v34 = vmul.f32 0.2, %v8285_v49  ;;  %v7591_v46 = vsel %vm3653_vm1, %v7106_v53, %v8287_v60  ;;  %vm3694_vm0 = vcmp.gt.f32.partialorder %v8285_v49, 0.0  ;;  %vm3696_vm4 = vcmp.gt.f32.partialorder %v8289_v30, 0.0  ;;  %v8291_v3 = vld [vmem:[#allocation26_spill] sm:$0xff]  ;;  %v8292_v60 = vld [vmem:[#allocation27_spill] sm:$0xff] }
 0x38b   :  { %8278 = vst [vmem:[#allocation52_spill] sm:$0xff] %v7559_v4  ;;  %v3756_v4 = vmul.f32 0.2, %v8282_v58  ;;  %8288 = vst [vmem:[#allocation22_spill] sm:$0xff] %v7591_v46  ;;  %v3760_v40 = vmul.f32 0.2, %v8289_v30  ;;  %v7604_v53 = vsel %vm3654_vm2, %v7110_v0, %v7361_v26  ;;  %v7613_v30 = vsel %vm3655_vm3, %v7114_v63, %v7364_v10 }
 0x38c   :  { %v3761_v58 = vmul.f32 0.2, %v8290_v39  ;;  %v3762_v14 = vmul.f32 0.2, %v8291_v3  ;;  %vm3698_vm1 = vcmp.gt.f32.partialorder %v8291_v3, 0.0  ;;  %vm3699_vm5 = vcmp.gt.f32.partialorder %v8292_v60, 0.0 }
 0x38d   :  { %v3763_v46 = vmul.f32 0.2, %v8292_v60  ;;  %v8293_v39 = vld [vmem:[#allocation3_spill] sm:$0xff]  ;;  %vm8295_vm2 = vcmp.gt.f32.partialorder %v7122_v11, 0.0  ;;  %v7631_v26 = vsel %vm3658_vm6, %v7126_v17, %v7379_v42  ;;  %v8296_v63 = vld [vmem:[#allocation5_spill] sm:$0xff]  ;;  %vm8297_vm3 = vcmp.gt.f32.partialorder %v7130_v24, 0.0 }
 0x38e   :  { %v7619_v33 = vsel %vm8294_vm7, %v7118_v6, %v8293_v39  ;;  %v7625_v0 = vsel %vm8295_vm2, %v7122_v11, %v7376_v52  ;;  %v7637_v10 = vsel %vm8297_vm3, %v7130_v24, %v8296_v63  ;;  %vm8298_vm7 = vcmp.gt.f32.partialorder %v7134_v37, 0.0  ;;  %v8300_v17 = vld [vmem:[#allocation7_spill] sm:$0xff]  ;;  %v8334_v39 = vld [vmem:[#allocation14_spill] sm:$0xff] }
 0x38f   :  { %v7643_v6 = vsel %vm8298_vm7, %v7134_v37, %v7391_v54  ;;  %vm8299_vm2 = vcmp.gt.f32.partialorder %v7138_v47, 0.0  ;;  %v7655_v52 = vsel %vm3662_vm8, %v7142_v61, %v8300_v17  ;;  %vm8301_vm6 = vcmp.gt.f32.partialorder %v7146_v8, 0.0  ;;  %v8336_v17 = vld [vmem:[#allocation15_spill] sm:$0xff] }
 0x390   :  { %v7649_v11 = vsel %vm8299_vm2, %v7138_v47, %v7394_v16  ;;  %v7661_v24 = vsel %vm8301_vm6, %v7146_v8, %v7406_v1  ;;  %vm8302_vm3 = vcmp.gt.f32.partialorder %v7150_v23, 0.0  ;;  %vm8303_vm7 = vcmp.gt.f32.partialorder %v7154_v32, 0.0 }
 0x391   :  { %v7667_v37 = vsel %vm8302_vm3, %v7150_v23, %v7409_v29  ;;  %v7673_v47 = vsel %vm8303_vm7, %v7154_v32, %v7412_v2  ;;  %v7679_v61 = vsel %vm3666_vm9, %v7158_v48, %v7423_v44  ;;  %vm8304_vm8 = vcmp.gt.f32.partialorder %v7162_v57, 0.0  ;;  %v8305_v23 = vld [vmem:[#allocation10_spill] sm:$0xff]  ;;  %v8322_v29 = vld [vmem:[#allocation11_spill] sm:$0xff] }
 0x392   :  { %v7685_v8 = vsel %vm8304_vm8, %v7162_v57, %v7426_v45  ;;  %vm8306_vm2 = vcmp.gt.f32.partialorder %v7166_v12, 0.0  ;;  %vm8307_vm6 = vcmp.gt.f32.partialorder %v7170_v22, 0.0  ;;  %v7703_v48 = vsel %vm3670_vm10, %v7174_v38, %v7444_v62  ;;  %v8308_v57 = vld [vmem:[#allocation33_spill] sm:$0xff]  ;;  %v8312_v38 = vld [vmem:[#allocation35_spill] sm:$0xff] }
 0x393   :  { %v7691_v42 = vsel %vm8306_vm2, %v7166_v12, %v8305_v23  ;;  %v7697_v32 = vsel %vm8307_vm6, %v7170_v22, %v7441_v55  ;;  %vm8309_vm9 = vcmp.gt.f32.partialorder %v7178_v51, 0.0  ;;  %vm8310_vm3 = vcmp.gt.f32.partialorder %v7182_v5, 0.0  ;;  %v8328_v55 = vld [vmem:[#allocation12_spill] sm:$0xff] }
 0x394   :  { %v7709_v2 = vsel %vm8309_vm9, %v7178_v51, %v8308_v57  ;;  %v7715_v12 = vsel %vm8310_vm3, %v7182_v5, %v7459_v28  ;;  %vm8311_vm7 = vcmp.gt.f32.partialorder %v7186_v18, 0.0  ;;  %v7727_v62 = vsel %vm3674_vm11, %v7190_v9, %v8312_v38  ;;  %v8330_v28 = vld [vmem:[#allocation47_spill] sm:$0xff]  ;;  %v8339_v38 = vld [vmem:[#allocation16_spill] sm:$0xff] }
 0x395   :  { %v7721_v22 = vsel %vm8311_vm7, %v7186_v18, %v7462_v36  ;;  %vm8313_vm10 = vcmp.gt.f32.partialorder %v7194_v35, 0.0  ;;  %vm8314_vm8 = vcmp.gt.f32.partialorder %v7198_v15, 0.0  ;;  %v8315_v18 = vld [vmem:[#allocation37_spill] sm:$0xff]  ;;  %vm8316_vm2 = vcmp.gt.f32.partialorder %v7202_v50, 0.0  ;;  %v8338_v57 = vld [vmem:[#allocation51_spill] sm:$0xff] }
 0x396   :  { %v7733_v51 = vsel %vm8313_vm10, %v7194_v35, %v7477_v20  ;;  %v7739_v5 = vsel %vm8314_vm8, %v7198_v15, %v7480_v41  ;;  %v7745_v54 = vsel %vm8316_vm2, %v7202_v50, %v8315_v18  ;;  %v7751_v9 = vsel %vm3678_vm12, %v7206_v56, %v7496_v25  ;;  %v8317_v35 = vld [vmem:[#allocation39_spill] sm:$0xff]  ;;  %v8319_v15 = vld [vmem:[#allocation40_spill] sm:$0xff]  ;;  %v8321_v50 = vld [vmem:[#allocation42_spill] sm:$0xff] }
 0x397   :  { %vm8318_vm11 = vcmp.gt.f32.partialorder %v7210_v7, 0.0  ;;  %vm8320_vm6 = vcmp.gt.f32.partialorder %v7214_v19, 0.0  ;;  %vm8323_vm9 = vcmp.gt.f32.partialorder %v8322_v29, 0.0  ;;  %v8324_v56 = vld [vmem:[#allocation43_spill] sm:$0xff]  ;;  %vm8326_vm12 = vcmp.gt.f32.partialorder %v7226_v27, 0.0  ;;  %v8331_v20 = vld [vmem:[#allocation13_spill] sm:$0xff] }
 0x398   :  { %v7757_v16 = vsel %vm8318_vm11, %v7210_v7, %v8317_v35  ;;  %v7763_v1 = vsel %vm8320_vm6, %v7214_v19, %v8319_v15  ;;  %v7769_v44 = vsel %vm8323_vm9, %v8322_v29, %v8321_v50  ;;  %v7775_v45 = vsel %vm3682_vm13, %v7222_v59, %v8324_v56  ;;  %v8325_v7 = vld [vmem:[#allocation44_spill] sm:$0xff]  ;;  %v8327_v19 = vld [vmem:[#allocation46_spill] sm:$0xff]  ;;  %v8342_v15 = vld [vmem:[#allocation17_spill] sm:$0xff] }
 0x399   :  { %v7781_v36 = vsel %vm8326_vm12, %v7226_v27, %v8325_v7  ;;  %vm8329_vm3 = vcmp.gt.f32.partialorder %v8328_v55, 0.0  ;;  %vm8332_vm7 = vcmp.gt.f32.partialorder %v8331_v20, 0.0  ;;  %v8333_v59 = vld [vmem:[#allocation48_spill] sm:$0xff]  ;;  %v8335_v27 = vld [vmem:[#allocation50_spill] sm:$0xff]  ;;  %vm8337_vm13 = vcmp.gt.f32.partialorder %v8336_v17, 0.0  ;;  %v8345_v7 = vld [vmem:[#allocation19_spill] sm:$0xff] }
 0x39a   :  { %v7787_v41 = vsel %vm8329_vm3, %v8328_v55, %v8327_v19  ;;  %v7793_v25 = vsel %vm8332_vm7, %v8331_v20, %v8330_v28  ;;  %v7799_v63 = vsel %vm3686_vm14, %v8334_v39, %v8333_v59  ;;  %v7805_v23 = vsel %vm8337_vm13, %v8336_v17, %v8335_v27  ;;  %v8341_v35 = vld [vmem:[#allocation52_spill] sm:$0xff]  ;;  %v8344_v29 = vld [vmem:[#allocation18_spill] sm:$0xff]  ;;  %v8349_v20 = vld [vmem:[#allocation21_spill] sm:$0xff] }
 0x39b   :  { %vm8340_vm10 = vcmp.gt.f32.partialorder %v8339_v38, 0.0  ;;  %vm8343_vm8 = vcmp.gt.f32.partialorder %v8342_v15, 0.0  ;;  %v7822_v56 = vsel %vm3690_vm15, %v8344_v29, %v3754_v21  ;;  %vm8346_vm14 = vcmp.gt.f32.partialorder %v8345_v7, 0.0  ;;  %v8347_v55 = vld [vmem:[#allocation20_spill] sm:$0xff]  ;;  %v8351_v39 = vld [vmem:[#allocation23_spill] sm:$0xff]  ;;  %v8354_v17 = vld [vmem:[#allocation25_spill] sm:$0xff] }
 0x39c   :  { %v7811_v18 = vsel %vm8340_vm10, %v8339_v38, %v8338_v57  ;;  %v7817_v50 = vsel %vm8343_vm8, %v8342_v15, %v8341_v35  ;;  %v7827_v19 = vsel %vm8346_vm14, %v8345_v7, %v3755_v13  ;;  %vm8348_vm2 = vcmp.gt.f32.partialorder %v8347_v55, 0.0  ;;  %v8353_v27 = vld [vmem:[#allocation24_spill] sm:$0xff]  ;;  %v8359_v57 = vld [vmem:[#allocation29_spill] sm:$0xff]  ;;  %v8361_v35 = vld [vmem:[#allocation2_spill] sm:$0xff] }
 0x39d   :  { %v7832_v28 = vsel %vm8348_vm2, %v8347_v55, %v3756_v4  ;;  %vm8350_vm11 = vcmp.gt.f32.partialorder %v8349_v20, 0.0  ;;  %v7842_v21 = vsel %vm3694_vm0, %v8285_v49, %v3758_v34  ;;  %vm8352_vm15 = vcmp.gt.f32.partialorder %v8351_v39, 0.0  ;;  %v8358_v34 = vld [vmem:[#allocation28_spill] sm:$0xff]  ;;  %v8363_v7 = vld [vmem:[#allocation6_spill] sm:$0xff] }
 0x39e   :  { %v7837_v59 = vsel %vm8350_vm11, %v8349_v20, %v3757_v31  ;;  %v7847_v13 = vsel %vm8352_vm15, %v8351_v39, %v3759_v43  ;;  %v7852_v4 = vsel %vm3696_vm4, %v8353_v27, %v3760_v40  ;;  %vm8355_vm6 = vcmp.gt.f32.partialorder %v8354_v17, 0.0  ;;  %v8360_v40 = vld [vmem:[#allocation30_spill] sm:$0xff]  ;;  %v8362_v29 = vld [vmem:[#allocation4_spill] sm:$0xff]  ;;  %v8365_v20 = vld [vmem:[#allocation9_spill] sm:$0xff] }
 0x39f   :  { %v7857_v31 = vsel %vm8355_vm6, %v8354_v17, %v3761_v58  ;;  %v7862_v49 = vsel %vm3698_vm1, %v8291_v3, %v3762_v14  ;;  %v7867_v43 = vsel %vm3699_vm5, %v8292_v60, %v3763_v46  ;;  %v4604_v38 = vpack.c.bf16 %v8359_v57, %v8358_v34  ;;  %v8364_v55 = vld [vmem:[#allocation8_spill] sm:$0xff]  ;;  %v8367_v3 = vld [vmem:[#allocation34_spill] sm:$0xff]  ;;  %v8370_v46 = vld [vmem:[#allocation41_spill] sm:$0xff] }
 0x3a0   :  { %8356 = vst [vmem:[#allocation31_spill] sm:$0xff] %v7857_v31  ;;  %8357 = vst [vmem:[#allocation26_spill] sm:$0xff] %v7862_v49  ;;  %v4609_v15 = vpack.c.bf16 %v8361_v35, %v8360_v40  ;;  %v4614_v58 = vpack.c.bf16 %v8363_v7, %v8362_v29  ;;  %v4619_v39 = vpack.c.bf16 %v8365_v20, %v8364_v55  ;;  %v8366_v27 = vld [vmem:[#allocation32_spill] sm:$0xff]  ;;  %v8369_v49 = vld [vmem:[#allocation38_spill] sm:$0xff] }
 0x3a1   :  { %v4624_v14 = vpack.c.bf16 %v8367_v3, %v8366_v27  ;;  %v8368_v17 = vld [vmem:[#allocation36_spill] sm:$0xff]  ;;  %4605 = vst [vmem:[%s8033_s4] sm:$0xff] %v4604_v38   ;;  %v8371_v60 = vld [vmem:[#allocation45_spill] sm:$0xff]  ;;  %v8374_v29 = vld [vmem:[#allocation54_spill] sm:$0xff]  ;;  %v4654_v38 = vpack.c.bf16 %v7625_v0, %v7619_v33  ;;  %v4674_v33 = vpack.c.bf16 %v7673_v47, %v7667_v37  ;;  %v4679_v0 = vpack.c.bf16 %v7685_v8, %v7679_v61 }
 0x3a2   :  { %v4629_v31 = vpack.c.bf16 %v8369_v49, %v8368_v17  ;;  %4761 = vst [vmem:[%s8033_s4 + $0x8] sm:$0xff] %v4609_v15   ;;  %v4634_v34 = vpack.c.bf16 %v8371_v60, %v8370_v46  ;;  %v8372_v57 = vld [vmem:[#allocation49_spill] sm:$0xff]  ;;  %v8375_v7 = vld [vmem:[#allocation22_spill] sm:$0xff]  ;;  %v4649_v49 = vpack.c.bf16 %v7613_v30, %v7604_v53  ;;  %4762 = vst [vmem:[%s8033_s4 + $0x10] sm:$0xff] %v4614_v58  }
 0x3a3   :  { %v8373_v40 = vld [vmem:[#allocation53_spill] sm:$0xff]  ;;  %v4644_v55 = vpack.c.bf16 %v8375_v7, %v8374_v29  ;;  %4763 = vst [vmem:[%s8033_s4 + $0x18] sm:$0xff] %v4619_v39   ;;  %4764 = vst [vmem:[%s8033_s4 + $0x20] sm:$0xff] %v4624_v14   ;;  %v4659_v30 = vpack.c.bf16 %v7637_v10, %v7631_v26  ;;  %v4664_v53 = vpack.c.bf16 %v7649_v11, %v7643_v6 }
 0x3a4   :  { %v4639_v35 = vpack.c.bf16 %v8373_v40, %v8372_v57  ;;  %4765 = vst [vmem:[%s8033_s4 + $0x28] sm:$0xff] %v4629_v31   ;;  %v4669_v15 = vpack.c.bf16 %v7661_v24, %v7655_v52  ;;  %4766 = vst [vmem:[%s8033_s4 + $0x30] sm:$0xff] %v4634_v34   ;;  %v4684_v26 = vpack.c.bf16 %v7697_v32, %v7691_v42 }
 0x3a5   :  { %4768 = vst [vmem:[%s8033_s4 + $0x40] sm:$0xff] %v4644_v55   ;;  %4769 = vst [vmem:[%s8033_s4 + $0x48] sm:$0xff] %v4649_v49   ;;  %v4689_v10 = vpack.c.bf16 %v7709_v2, %v7703_v48  ;;  %v4694_v6 = vpack.c.bf16 %v7721_v22, %v7715_v12  ;;  %v4699_v11 = vpack.c.bf16 %v7733_v51, %v7727_v62 }
 0x3a6   :  { %4767 = vst [vmem:[%s8033_s4 + $0x38] sm:$0xff] %v4639_v35   ;;  %4770 = vst [vmem:[%s8033_s4 + $0x50] sm:$0xff] %v4654_v38   ;;  %v4704_v52 = vpack.c.bf16 %v7745_v54, %v7739_v5  ;;  %v4709_v24 = vpack.c.bf16 %v7757_v16, %v7751_v9  ;;  %v4714_v37 = vpack.c.bf16 %v7769_v44, %v7763_v1 }
 0x3a7   :  { %4771 = vst [vmem:[%s8033_s4 + $0x58] sm:$0xff] %v4659_v30   ;;  %4772 = vst [vmem:[%s8033_s4 + $0x60] sm:$0xff] %v4664_v53   ;;  %v4719_v47 = vpack.c.bf16 %v7781_v36, %v7775_v45  ;;  %v4724_v61 = vpack.c.bf16 %v7793_v25, %v7787_v41  ;;  %v4729_v8 = vpack.c.bf16 %v7805_v23, %v7799_v63  ;;  %v8376_v12 = vld [vmem:[#allocation31_spill] sm:$0xff]  ;;  %v8377_v62 = vld [vmem:[#allocation26_spill] sm:$0xff] }
 0x3a8   :  { %4773 = vst [vmem:[%s8033_s4 + $0x68] sm:$0xff] %v4669_v15   ;;  %4774 = vst [vmem:[%s8033_s4 + $0x70] sm:$0xff] %v4674_v33   ;;  %v4734_v42 = vpack.c.bf16 %v7817_v50, %v7811_v18  ;;  %v4739_v32 = vpack.c.bf16 %v7827_v19, %v7822_v56  ;;  %v4744_v48 = vpack.c.bf16 %v7837_v59, %v7832_v28 }
 0x3a9   :  { %4775 = vst [vmem:[%s8033_s4 + $0x78] sm:$0xff] %v4679_v0   ;;  %4776 = vst [vmem:[%s8033_s4 + $0x80] sm:$0xff] %v4684_v26   ;;  %v4749_v2 = vpack.c.bf16 %v7847_v13, %v7842_v21  ;;  %v4754_v22 = vpack.c.bf16 %v8376_v12, %v7852_v4  ;;  %v4759_v51 = vpack.c.bf16 %v7867_v43, %v8377_v62 }
 0x3aa   :  { %4777 = vst [vmem:[%s8033_s4 + $0x88] sm:$0xff] %v4689_v10   ;;  %4778 = vst [vmem:[%s8033_s4 + $0x90] sm:$0xff] %v4694_v6  }
 0x3ab   :  { %4779 = vst [vmem:[%s8033_s4 + $0x98] sm:$0xff] %v4699_v11   ;;  %4780 = vst [vmem:[%s8033_s4 + $0xa0] sm:$0xff] %v4704_v52  }
 0x3ac   :  { %4781 = vst [vmem:[%s8033_s4 + $0xa8] sm:$0xff] %v4709_v24   ;;  %4782 = vst [vmem:[%s8033_s4 + $0xb0] sm:$0xff] %v4714_v37  }
 0x3ad   :  { %4783 = vst [vmem:[%s8033_s4 + $0xb8] sm:$0xff] %v4719_v47   ;;  %4784 = vst [vmem:[%s8033_s4 + $0xc0] sm:$0xff] %v4724_v61  }
 0x3ae   :  { %4785 = vst [vmem:[%s8033_s4 + $0xc8] sm:$0xff] %v4729_v8   ;;  %4786 = vst [vmem:[%s8033_s4 + $0xd0] sm:$0xff] %v4734_v42  }
 0x3af   :  { %4787 = vst [vmem:[%s8033_s4 + $0xd8] sm:$0xff] %v4739_v32   ;;  %4788 = vst [vmem:[%s8033_s4 + $0xe0] sm:$0xff] %v4744_v48  }
 0x3b0   :  { %4789 = vst [vmem:[%s8033_s4 + $0xe8] sm:$0xff] %v4749_v2   ;;  %4790 = vst [vmem:[%s8033_s4 + $0xf0] sm:$0xff] %v4754_v22  }
 0x3b1   :  { %4791 = vst [vmem:[%s8033_s4 + $0xf8] sm:$0xff] %v4759_v51  }

// kernel: _lambda_.7
= control target key start
LH: loop header
LB: loop body
LE: loop exit
PB: predicated region body
PF: predicated region fallthrough
CT: control target
= control target key end

     0   :  { %s6430_s1 = inlined_call_operand.vmem [shape: bf16[2048,256], index: 1, kind: input, shape index: {}]   ;;  %s6431_s0 = inlined_call_operand.vmem [shape: bf16[128,2048], index: 0, kind: input, shape index: {}]   ;;  %s6432_s2 = inlined_call_operand.vmem [shape: f32[1,256], index: 2, kind: input, shape index: {}]   ;;  %s6433_s3 = inlined_call_operand.vmem [shape: f32[1,256], index: 3, kind: input, shape index: {}]   ;;  %s6434_s4 = inlined_call_operand.vmem [shape: bf16[128,256], index: 4, kind: output, shape index: {}]  }
   0x1   :  { %v4337_v0 = vld [vmem:[%s6430_s1 + $0x4] ss:$8 sps:$4 sm:$0xff]   ;;  %v4341_v2 = vld [vmem:[%s6430_s1] ss:$8 sps:$4 sm:$0xff]   ;;  %v4343_v4 = vld [vmem:[%s6430_s1 + $0x14] ss:$8 sps:$4 sm:$0xff]  }
   0x2   :  { %v4339_v1 = vld [vmem:[%s6430_s1 + $0x404] ss:$8 sps:$4 sm:$0xff]   ;;  %2321 = vmatprep.subr.bf16.mxu1 %v4337_v0  ;;  %v4342_v3 = vld [vmem:[%s6430_s1 + $0x400] ss:$8 sps:$4 sm:$0xff]   ;;  %v4345_v5 = vld [vmem:[%s6430_s1 + $0x414] ss:$8 sps:$4 sm:$0xff]  }
   0x3   :  { %2773 = vmatprep.subr.bf16.mxu0 %v4339_v1  ;;  %2322 = vmatpush1.bf16.msra.mxu1 %v4341_v2  ;;  %v4347_v6 = vld [vmem:[%s6430_s1 + $0x10] ss:$8 sps:$4 sm:$0xff]   ;;  %v4349_v8 = vld [vmem:[%s6430_s1 + $0x24] ss:$8 sps:$4 sm:$0xff]   ;;  %v4353_v10 = vld [vmem:[%s6430_s1 + $0x20] ss:$8 sps:$4 sm:$0xff]  }
   0x4   :  { %2774 = vmatpush1.bf16.msra.mxu0 %v4342_v3  ;;  %2323 = vmatprep.subr.bf16.mxu1 %v4343_v4  ;;  %v4348_v7 = vld [vmem:[%s6430_s1 + $0x410] ss:$8 sps:$4 sm:$0xff]   ;;  %v4351_v9 = vld [vmem:[%s6430_s1 + $0x424] ss:$8 sps:$4 sm:$0xff]   ;;  %v4354_v11 = vld [vmem:[%s6430_s1 + $0x420] ss:$8 sps:$4 sm:$0xff]  }
   0x5   :  { %2775 = vmatprep.subr.bf16.mxu0 %v4345_v5  ;;  %v4355_v12 = vld [vmem:[%s6430_s1 + $0x34] ss:$8 sps:$4 sm:$0xff]   ;;  %v4359_v14 = vld [vmem:[%s6430_s1 + $0x30] ss:$8 sps:$4 sm:$0xff]   ;;  %v4361_v16 = vld [vmem:[%s6430_s1 + $0x44] ss:$8 sps:$4 sm:$0xff]  }
   0x6   :  { %v4357_v13 = vld [vmem:[%s6430_s1 + $0x434] ss:$8 sps:$4 sm:$0xff]   ;;  %v4360_v15 = vld [vmem:[%s6430_s1 + $0x430] ss:$8 sps:$4 sm:$0xff]   ;;  %v4363_v17 = vld [vmem:[%s6430_s1 + $0x444] ss:$8 sps:$4 sm:$0xff]  }
   0x7   :  { %2324 = vmatpush1.bf16.msra.mxu1 %v4347_v6  ;;  %v4365_v18 = vld [vmem:[%s6430_s1 + $0x40] ss:$8 sps:$4 sm:$0xff]   ;;  %v4367_v20 = vld [vmem:[%s6430_s1 + $0x54] ss:$8 sps:$4 sm:$0xff]   ;;  %v4371_v22 = vld [vmem:[%s6430_s1 + $0x50] ss:$8 sps:$4 sm:$0xff]  }
   0x8   :  { %2776 = vmatpush1.bf16.msra.mxu0 %v4348_v7  ;;  %2325 = vmatprep.subr.bf16.mxu1 %v4349_v8  ;;  %v4366_v19 = vld [vmem:[%s6430_s1 + $0x440] ss:$8 sps:$4 sm:$0xff]   ;;  %v4369_v21 = vld [vmem:[%s6430_s1 + $0x454] ss:$8 sps:$4 sm:$0xff]   ;;  %v4372_v23 = vld [vmem:[%s6430_s1 + $0x450] ss:$8 sps:$4 sm:$0xff]  }
   0x9   :  { %2777 = vmatprep.subr.bf16.mxu0 %v4351_v9  ;;  %v4373_v24 = vld [vmem:[%s6430_s1 + $0x64] ss:$8 sps:$4 sm:$0xff]   ;;  %v4377_v26 = vld [vmem:[%s6430_s1 + $0x60] ss:$8 sps:$4 sm:$0xff]   ;;  %v4379_v28 = vld [vmem:[%s6430_s1 + $0x74] ss:$8 sps:$4 sm:$0xff]  }
   0xa   :  { %v4375_v25 = vld [vmem:[%s6430_s1 + $0x464] ss:$8 sps:$4 sm:$0xff]   ;;  %v4378_v27 = vld [vmem:[%s6430_s1 + $0x460] ss:$8 sps:$4 sm:$0xff]   ;;  %v4381_v29 = vld [vmem:[%s6430_s1 + $0x474] ss:$8 sps:$4 sm:$0xff]  }
   0xb   :  { %2326 = vmatpush1.bf16.msra.mxu1 %v4353_v10  ;;  %v4383_v30 = vld [vmem:[%s6430_s1 + $0x70] ss:$8 sps:$4 sm:$0xff]   ;;  %v4385_v32 = vld [vmem:[%s6430_s1 + $0x84] ss:$8 sps:$4 sm:$0xff]   ;;  %v4389_v34 = vld [vmem:[%s6430_s1 + $0x80] ss:$8 sps:$4 sm:$0xff]  }
   0xc   :  { %2778 = vmatpush1.bf16.msra.mxu0 %v4354_v11  ;;  %2327 = vmatprep.subr.bf16.mxu1 %v4355_v12  ;;  %v4384_v31 = vld [vmem:[%s6430_s1 + $0x470] ss:$8 sps:$4 sm:$0xff]   ;;  %v4387_v33 = vld [vmem:[%s6430_s1 + $0x484] ss:$8 sps:$4 sm:$0xff]   ;;  %v4390_v35 = vld [vmem:[%s6430_s1 + $0x480] ss:$8 sps:$4 sm:$0xff]  }
   0xd   :  { %2779 = vmatprep.subr.bf16.mxu0 %v4357_v13  ;;  %v4391_v36 = vld [vmem:[%s6430_s1 + $0x94] ss:$8 sps:$4 sm:$0xff]   ;;  %v4395_v38 = vld [vmem:[%s6430_s1 + $0x90] ss:$8 sps:$4 sm:$0xff]   ;;  %v4397_v40 = vld [vmem:[%s6430_s1 + $0xa4] ss:$8 sps:$4 sm:$0xff]  }
   0xe   :  { %v4393_v37 = vld [vmem:[%s6430_s1 + $0x494] ss:$8 sps:$4 sm:$0xff]   ;;  %v4396_v39 = vld [vmem:[%s6430_s1 + $0x490] ss:$8 sps:$4 sm:$0xff]   ;;  %v4399_v41 = vld [vmem:[%s6430_s1 + $0x4a4] ss:$8 sps:$4 sm:$0xff]  }
   0xf   :  { %2328 = vmatpush1.bf16.msra.mxu1 %v4359_v14  ;;  %v4401_v42 = vld [vmem:[%s6430_s1 + $0xa0] ss:$8 sps:$4 sm:$0xff]   ;;  %v4403_v44 = vld [vmem:[%s6430_s1 + $0xb4] ss:$8 sps:$4 sm:$0xff]   ;;  %v4407_v46 = vld [vmem:[%s6430_s1 + $0xb0] ss:$8 sps:$4 sm:$0xff]  }
  0x10   :  { %2780 = vmatpush1.bf16.msra.mxu0 %v4360_v15  ;;  %2329 = vmatprep.subr.bf16.mxu1 %v4361_v16  ;;  %v4402_v43 = vld [vmem:[%s6430_s1 + $0x4a0] ss:$8 sps:$4 sm:$0xff]   ;;  %v4405_v45 = vld [vmem:[%s6430_s1 + $0x4b4] ss:$8 sps:$4 sm:$0xff]   ;;  %v4408_v47 = vld [vmem:[%s6430_s1 + $0x4b0] ss:$8 sps:$4 sm:$0xff]  }
  0x11   :  { %2781 = vmatprep.subr.bf16.mxu0 %v4363_v17  ;;  %v17_v48 = vld [vmem:[%s6431_s0] sm:$0xff]  ;;  %v4415_v58 = vld [vmem:[%s6430_s1 + $0xd4] ss:$8 sps:$4 sm:$0xff]   ;;  %v4419_v60 = vld [vmem:[%s6430_s1 + $0xd0] ss:$8 sps:$4 sm:$0xff]  }
  0x12   :  { %v25_v49 = vld [vmem:[%s6431_s0 + $0x40] sm:$0xff]  ;;  %v4417_v59 = vld [vmem:[%s6430_s1 + $0x4d4] ss:$8 sps:$4 sm:$0xff]   ;;  %v4420_v61 = vld [vmem:[%s6430_s1 + $0x4d0] ss:$8 sps:$4 sm:$0xff]  }
  0x13   :  { %2330 = vmatpush1.bf16.msra.mxu1 %v4365_v18  ;;  %v21_v50 = vld [vmem:[%s6431_s0 + $0x20] sm:$0xff]  ;;  %v3698_v53 = vcombine.high %v17_v48, %v25_v49  ;;  %v4427_v2 = vld [vmem:[%s6430_s1 + $0xf4] ss:$8 sps:$4 sm:$0xff]   ;;  %v4431_v4 = vld [vmem:[%s6430_s1 + $0xf0] ss:$8 sps:$4 sm:$0xff]   ;;  %v3697_v11 = vcombine.low %v17_v48, %v25_v49 }
  0x14   :  { %2782 = vmatpush1.bf16.msra.mxu0 %v4366_v19  ;;  %2331 = vmatprep.subr.bf16.mxu1 %v4367_v20  ;;  %v29_v51 = vld [vmem:[%s6431_s0 + $0x60] sm:$0xff]  ;;  %v4429_v3 = vld [vmem:[%s6430_s1 + $0x4f4] ss:$8 sps:$4 sm:$0xff]   ;;  %v4432_v5 = vld [vmem:[%s6430_s1 + $0x4f0] ss:$8 sps:$4 sm:$0xff]  }
  0x15   :  { %2783 = vmatprep.subr.bf16.mxu0 %v4369_v21  ;;  %v4409_v52 = vld [vmem:[%s6430_s1 + $0xc4] ss:$8 sps:$4 sm:$0xff]   ;;  %v3706_v55 = vcombine.high %v21_v50, %v29_v51  ;;  %2353 = vmatprep.mubr.bf16.mxu1 %v3698_v53  ;;  %v4413_v56 = vld [vmem:[%s6430_s1 + $0xc0] ss:$8 sps:$4 sm:$0xff]   ;;  %v3705_v12 = vcombine.low %v21_v50, %v29_v51  ;;  %v4441_v16 = vld [vmem:[%s6430_s1 + $0x114] ss:$8 sps:$4 sm:$0xff]  }
  0x16   :  { %v4411_v54 = vld [vmem:[%s6430_s1 + $0x4c4] ss:$8 sps:$4 sm:$0xff]   ;;  %v4414_v57 = vld [vmem:[%s6430_s1 + $0x4c0] ss:$8 sps:$4 sm:$0xff]   ;;  %v4444_v17 = vld [vmem:[%s6430_s1 + $0x514] ss:$8 sps:$4 sm:$0xff]  }
  0x17   :  { %2332 = vmatpush1.bf16.msra.mxu1 %v4371_v22  ;;  %2805 = vmatprep.mubr.bf16.mxu0 %v3706_v55  ;;  %v4421_v62 = vld [vmem:[%s6430_s1 + $0xe4] ss:$8 sps:$4 sm:$0xff]   ;;  %v4425_v0 = vld [vmem:[%s6430_s1 + $0xe0] ss:$8 sps:$4 sm:$0xff]   ;;  %v4439_v20 = vld [vmem:[%s6430_s1 + $0x110] ss:$8 sps:$4 sm:$0xff]  }
  0x18   :  { %2784 = vmatpush1.bf16.msra.mxu0 %v4372_v23  ;;  %2333 = vmatprep.subr.bf16.mxu1 %v4373_v24  ;;  %v4423_v63 = vld [vmem:[%s6430_s1 + $0x4e4] ss:$8 sps:$4 sm:$0xff]   ;;  %v4426_v1 = vld [vmem:[%s6430_s1 + $0x4e0] ss:$8 sps:$4 sm:$0xff]   ;;  %v4442_v21 = vld [vmem:[%s6430_s1 + $0x510] ss:$8 sps:$4 sm:$0xff]  }
  0x19   :  { %2785 = vmatprep.subr.bf16.mxu0 %v4375_v25  ;;  %v4435_v6 = vld [vmem:[%s6430_s1 + $0x104] ss:$8 sps:$4 sm:$0xff]   ;;  %v4433_v8 = vld [vmem:[%s6430_s1 + $0x100] ss:$8 sps:$4 sm:$0xff]   ;;  %v4465_v48 = vld [vmem:[%s6430_s1 + $0x154] ss:$8 sps:$4 sm:$0xff]  }
  0x1a   :  { %v4438_v7 = vld [vmem:[%s6430_s1 + $0x504] ss:$8 sps:$4 sm:$0xff]   ;;  %v4436_v9 = vld [vmem:[%s6430_s1 + $0x500] ss:$8 sps:$4 sm:$0xff]   ;;  %v4468_v49 = vld [vmem:[%s6430_s1 + $0x554] ss:$8 sps:$4 sm:$0xff]  }
  0x1b   :  { %2334 = vmatpush1.bf16.msra.mxu1 %v4377_v26  ;;  %v33_v10 = vld [vmem:[%s6431_s0 + $0x80] sm:$0xff]  ;;  %v4466_v53 = vld [vmem:[%s6430_s1 + $0x550] ss:$8 sps:$4 sm:$0xff]  }
  0x1c   :  { %2786 = vmatpush1.bf16.msra.mxu0 %v4378_v27  ;;  %2335 = vmatprep.subr.bf16.mxu1 %v4379_v28  ;;  %v41_v13 = vld [vmem:[%s6431_s0 + $0xc0] sm:$0xff] }
  0x1d   :  { %2787 = vmatprep.subr.bf16.mxu0 %v4381_v29  ;;  %v37_v14 = vld [vmem:[%s6431_s0 + $0xa0] sm:$0xff]  ;;  %v3714_v18 = vcombine.high %v33_v10, %v41_v13  ;;  %v3713_v28 = vcombine.low %v33_v10, %v41_v13 }
  0x1e   :  { %v45_v15 = vld [vmem:[%s6431_s0 + $0xe0] sm:$0xff] }
  0x1f   :  { %2336 = vmatpush1.bf16.msra.mxu1 %v4383_v30  ;;  %v3722_v19 = vcombine.high %v37_v14, %v45_v15  ;;  %v4447_v22 = vld [vmem:[%s6430_s1 + $0x124] ss:$8 sps:$4 sm:$0xff]   ;;  %v4445_v24 = vld [vmem:[%s6430_s1 + $0x120] ss:$8 sps:$4 sm:$0xff]   ;;  %v3721_v29 = vcombine.low %v37_v14, %v45_v15 }
  0x20   :  { %2788 = vmatpush1.bf16.msra.mxu0 %v4384_v31  ;;  %2337 = vmatprep.subr.bf16.mxu1 %v4385_v32  ;;  %v4450_v23 = vld [vmem:[%s6430_s1 + $0x524] ss:$8 sps:$4 sm:$0xff]   ;;  %v4448_v25 = vld [vmem:[%s6430_s1 + $0x520] ss:$8 sps:$4 sm:$0xff]   ;;  %v4453_v32 = vld [vmem:[%s6430_s1 + $0x134] ss:$8 sps:$4 sm:$0xff]  }
  0x21   :  { %2789 = vmatprep.subr.bf16.mxu0 %v4387_v33  ;;  %v49_v26 = vld [vmem:[%s6431_s0 + $0x100] sm:$0xff]  ;;  %v4456_v33 = vld [vmem:[%s6430_s1 + $0x534] ss:$8 sps:$4 sm:$0xff]  }
  0x22   :  { %v57_v27 = vld [vmem:[%s6431_s0 + $0x140] sm:$0xff] }
  0x23   :  { %2338 = vmatpush1.bf16.msra.mxu1 %v4389_v34  ;;  %v53_v30 = vld [vmem:[%s6431_s0 + $0x120] sm:$0xff]  ;;  %v3730_v34 = vcombine.high %v49_v26, %v57_v27 }
  0x24   :  { %2790 = vmatpush1.bf16.msra.mxu0 %v4390_v35  ;;  %2339 = vmatprep.subr.bf16.mxu1 %v4391_v36  ;;  %v61_v31 = vld [vmem:[%s6431_s0 + $0x160] sm:$0xff]  ;;  %v4451_v36 = vld [vmem:[%s6430_s1 + $0x130] ss:$8 sps:$4 sm:$0xff]  }
  0x25   :  { %2791 = vmatprep.subr.bf16.mxu0 %v4393_v37  ;;  %v3738_v35 = vcombine.high %v53_v30, %v61_v31  ;;  %v4454_v37 = vld [vmem:[%s6430_s1 + $0x530] ss:$8 sps:$4 sm:$0xff]   ;;  %v4474_v55 = vld [vmem:[%s6430_s1 + $0x564] ss:$8 sps:$4 sm:$0xff]   ;;  %v4481_v14 = vld [vmem:[%s6430_s1 + $0x180] ss:$8 sps:$4 sm:$0xff]  }
  0x26   :  { %v109_v13 = vld [vmem:[%s6431_s0 + $0x2e0] sm:$0xff] }
  0x27   :  { %2340 = vmatpush1.bf16.msra.mxu1 %v4395_v38  ;;  %v4459_v38 = vld [vmem:[%s6430_s1 + $0x144] ss:$8 sps:$4 sm:$0xff]   ;;  %v4484_v15 = vld [vmem:[%s6430_s1 + $0x580] ss:$8 sps:$4 sm:$0xff]  }
  0x28   :  { %2792 = vmatpush1.bf16.msra.mxu0 %v4396_v39  ;;  %2341 = vmatprep.subr.bf16.mxu1 %v4397_v40  ;;  %v4462_v39 = vld [vmem:[%s6430_s1 + $0x544] ss:$8 sps:$4 sm:$0xff]   ;;  %v4457_v40 = vld [vmem:[%s6430_s1 + $0x140] ss:$8 sps:$4 sm:$0xff]  }
  0x29   :  { %2793 = vmatprep.subr.bf16.mxu0 %v4399_v41  ;;  %v4460_v41 = vld [vmem:[%s6430_s1 + $0x540] ss:$8 sps:$4 sm:$0xff]  }
  0x2b   :  { %2342 = vmatpush1.bf16.msra.mxu1 %v4401_v42  ;;  %v65_v42 = vld [vmem:[%s6431_s0 + $0x180] sm:$0xff] }
  0x2c   :  { %2794 = vmatpush1.bf16.msra.mxu0 %v4402_v43  ;;  %2343 = vmatprep.subr.bf16.mxu1 %v4403_v44  ;;  %v73_v43 = vld [vmem:[%s6431_s0 + $0x1c0] sm:$0xff]  ;;  %v3729_v44 = vcombine.low %v49_v26, %v57_v27 }
  0x2d   :  { %2795 = vmatprep.subr.bf16.mxu0 %v4405_v45  ;;  %v3737_v45 = vcombine.low %v53_v30, %v61_v31  ;;  %v3746_v50 = vcombine.high %v65_v42, %v73_v43  ;;  %v113_v26 = vld [vmem:[%s6431_s0 + $0x300] sm:$0xff] }
  0x2e   :  { %v117_v30 = vld [vmem:[%s6431_s0 + $0x320] sm:$0xff] }
  0x2f   :  { %2344 = vmatpush1.bf16.msra.mxu1 %v4407_v46  ;;  %v69_v46 = vld [vmem:[%s6431_s0 + $0x1a0] sm:$0xff] }
  0x30   :  { %2796 = vmatpush1.bf16.msra.mxu0 %v4408_v47  ;;  %2345 = vmatprep.subr.bf16.mxu1 %v4409_v52  ;;  %v77_v47 = vld [vmem:[%s6431_s0 + $0x1e0] sm:$0xff]  ;;  %v4463_v52 = vld [vmem:[%s6430_s1 + $0x150] ss:$8 sps:$4 sm:$0xff]  }
  0x31   :  { %2797 = vmatprep.subr.bf16.mxu0 %v4411_v54  ;;  %v3754_v51 = vcombine.high %v69_v46, %v77_v47  ;;  %v4471_v54 = vld [vmem:[%s6430_s1 + $0x164] ss:$8 sps:$4 sm:$0xff]  }
  0x32   :  { %v125_v31 = vld [vmem:[%s6431_s0 + $0x360] sm:$0xff] }
  0x33   :  { %2346 = vmatpush1.bf16.msra.mxu1 %v4413_v56  ;;  %v4469_v56 = vld [vmem:[%s6430_s1 + $0x160] ss:$8 sps:$4 sm:$0xff]  }
  0x34   :  { %2798 = vmatpush1.bf16.msra.mxu0 %v4414_v57  ;;  %2347 = vmatprep.subr.bf16.mxu1 %v4415_v58  ;;  %v81_v57 = vld [vmem:[%s6431_s0 + $0x200] sm:$0xff] }
  0x35   :  { %2799 = vmatprep.subr.bf16.mxu0 %v4417_v59  ;;  %v89_v58 = vld [vmem:[%s6431_s0 + $0x240] sm:$0xff]  ;;  %v3745_v59 = vcombine.low %v65_v42, %v73_v43 }
  0x36   :  { %v3761_v10 = vcombine.low %v81_v57, %v89_v58  ;;  %v129_v42 = vld [vmem:[%s6431_s0 + $0x380] sm:$0xff] }
  0x37   :  { %2348 = vmatpush1.bf16.msra.mxu1 %v4419_v60  ;;  %v3753_v60 = vcombine.low %v69_v46, %v77_v47  ;;  %v137_v43 = vld [vmem:[%s6431_s0 + $0x3c0] sm:$0xff] }
  0x38   :  { %2800 = vmatpush1.bf16.msra.mxu0 %v4420_v61  ;;  %2349 = vmatprep.subr.bf16.mxu1 %v4421_v62  ;;  %v85_v61 = vld [vmem:[%s6431_s0 + $0x220] sm:$0xff] }
  0x39   :  { %2801 = vmatprep.subr.bf16.mxu0 %v4423_v63  ;;  %v93_v62 = vld [vmem:[%s6431_s0 + $0x260] sm:$0xff] }
  0x3a   :  { %v4472_v63 = vld [vmem:[%s6430_s1 + $0x560] ss:$8 sps:$4 sm:$0xff]  }
  0x3b   :  { %2350 = vmatpush1.bf16.msra.mxu1 %v4425_v0  ;;  %v4477_v0 = vld [vmem:[%s6430_s1 + $0x174] ss:$8 sps:$4 sm:$0xff]   ;;  %v133_v46 = vld [vmem:[%s6431_s0 + $0x3a0] sm:$0xff] }
  0x3c   :  { %2802 = vmatpush1.bf16.msra.mxu0 %v4426_v1  ;;  %2351 = vmatprep.subr.bf16.mxu1 %v4427_v2  ;;  %v4480_v1 = vld [vmem:[%s6430_s1 + $0x574] ss:$8 sps:$4 sm:$0xff]   ;;  %v3762_v2 = vcombine.high %v81_v57, %v89_v58  ;;  %v141_v47 = vld [vmem:[%s6431_s0 + $0x3e0] sm:$0xff]  ;;  %v18_v58 = vld [vmem:[%s6431_s0 + $0x8] sm:$0xff] }
  0x3d   :  { %2803 = vmatprep.subr.bf16.mxu0 %v4429_v3  ;;  %v3770_v3 = vcombine.high %v85_v61, %v93_v62  ;;  %v4520_v57 = vld [vmem:[%s6430_s1 + $0x5e0] ss:$8 sps:$4 sm:$0xff]  }
  0x3f   :  { %2352 = vmatpush1.bf16.msra.mxu1 %v4431_v4  ;;  %v4475_v4 = vld [vmem:[%s6430_s1 + $0x170] ss:$8 sps:$4 sm:$0xff]  }
  0x40   :  { %2804 = vmatpush1.bf16.msra.mxu0 %v4432_v5  ;;  %2434 = vmatprep.subr.bf16.mxu1 %v4435_v6  ;;  %v4478_v5 = vld [vmem:[%s6430_s1 + $0x570] ss:$8 sps:$4 sm:$0xff]   ;;  %v4483_v6 = vld [vmem:[%s6430_s1 + $0x184] ss:$8 sps:$4 sm:$0xff]  }
  0x41   :  { %2886 = vmatprep.subr.bf16.mxu0 %v4438_v7  ;;  %v4486_v7 = vld [vmem:[%s6430_s1 + $0x584] ss:$8 sps:$4 sm:$0xff]  }
  0x42   :  { %2354 = vmatmul.mubr.bf16.vlgmr.msra.gmra.mrb[0].mxu1 %v3697_v11  ;;  %v3769_v11 = vcombine.low %v85_v61, %v93_v62  ;;  %v3817_v61 = vcombine.low %v133_v46, %v141_v47  ;;  %v22_v62 = vld [vmem:[%s6431_s0 + $0x28] sm:$0xff] }
  0x43   :  { %2806 = vmatmul.mubr.bf16.vlgmr.msra.gmra.mrb[0].mxu0 %v3705_v12  ;;  %2435 = vmatpush1.bf16.msra.mxu1 %v4433_v8  ;;  %v97_v8 = vld [vmem:[%s6431_s0 + $0x280] sm:$0xff] }
  0x44   :  { %2887 = vmatpush1.bf16.msra.mxu0 %v4436_v9  ;;  %2436 = vmatprep.subr.bf16.mxu1 %v4441_v16  ;;  %v105_v9 = vld [vmem:[%s6431_s0 + $0x2c0] sm:$0xff]  ;;  %v4489_v16 = vld [vmem:[%s6430_s1 + $0x194] ss:$8 sps:$4 sm:$0xff]  }
  0x45   :  { %2888 = vmatprep.subr.bf16.mxu0 %v4444_v17  ;;  %2363 = vmatprep.mubr.bf16.mxu1 %v3714_v18  ;;  %v101_v12 = vld [vmem:[%s6431_s0 + $0x2a0] sm:$0xff]  ;;  %v4492_v17 = vld [vmem:[%s6430_s1 + $0x594] ss:$8 sps:$4 sm:$0xff]   ;;  %v3778_v18 = vcombine.high %v97_v8, %v105_v9  ;;  %v3777_v27 = vcombine.low %v97_v8, %v105_v9  ;;  %v34_v9 = vld [vmem:[%s6431_s0 + $0x88] sm:$0xff] }
  0x46   :  { %2815 = vmatprep.mubr.bf16.mxu0 %v3722_v19  ;;  %v3786_v19 = vcombine.high %v101_v12, %v109_v13  ;;  %v4529_v8 = vld [vmem:[%s6430_s1 + $0x200] ss:$8 sps:$4 sm:$0xff]  }
  0x47   :  { %2437 = vmatpush1.bf16.msra.mxu1 %v4439_v20  ;;  %v4487_v20 = vld [vmem:[%s6430_s1 + $0x190] ss:$8 sps:$4 sm:$0xff]  }
  0x48   :  { %2889 = vmatpush1.bf16.msra.mxu0 %v4442_v21  ;;  %2438 = vmatprep.subr.bf16.mxu1 %v4447_v22  ;;  %v4490_v21 = vld [vmem:[%s6430_s1 + $0x590] ss:$8 sps:$4 sm:$0xff]   ;;  %v4495_v22 = vld [vmem:[%s6430_s1 + $0x1a4] ss:$8 sps:$4 sm:$0xff]  }
  0x49   :  { %2890 = vmatprep.subr.bf16.mxu0 %v4450_v23  ;;  %v4498_v23 = vld [vmem:[%s6430_s1 + $0x5a4] ss:$8 sps:$4 sm:$0xff]  }
  0x4a   :  { %2364 = vmatmul.mubr.bf16.gmra.mrb[4].mxu1 %v3713_v28  ;;  %v3785_v28 = vcombine.low %v101_v12, %v109_v13  ;;  %v38_v13 = vld [vmem:[%s6431_s0 + $0xa8] sm:$0xff] }
  0x4b   :  { %2816 = vmatmul.mubr.bf16.gmra.mrb[4].mxu0 %v3721_v29  ;;  %2439 = vmatpush1.bf16.msra.mxu1 %v4445_v24  ;;  %v4493_v24 = vld [vmem:[%s6430_s1 + $0x1a0] ss:$8 sps:$4 sm:$0xff]  }
  0x4c   :  { %2891 = vmatpush1.bf16.msra.mxu0 %v4448_v25  ;;  %2440 = vmatprep.subr.bf16.mxu1 %v4453_v32  ;;  %v4496_v25 = vld [vmem:[%s6430_s1 + $0x5a0] ss:$8 sps:$4 sm:$0xff]   ;;  %v4501_v32 = vld [vmem:[%s6430_s1 + $0x1b4] ss:$8 sps:$4 sm:$0xff]  }
  0x4d   :  { %2892 = vmatprep.subr.bf16.mxu0 %v4456_v33  ;;  %2373 = vmatprep.mubr.bf16.mxu1 %v3730_v34  ;;  %v121_v29 = vld [vmem:[%s6431_s0 + $0x340] sm:$0xff]  ;;  %v4504_v33 = vld [vmem:[%s6430_s1 + $0x5b4] ss:$8 sps:$4 sm:$0xff]  }
  0x4e   :  { %2825 = vmatprep.mubr.bf16.mxu0 %v3738_v35  ;;  %v3794_v34 = vcombine.high %v113_v26, %v121_v29  ;;  %v3802_v35 = vcombine.high %v117_v30, %v125_v31 }
  0x4f   :  { %2441 = vmatpush1.bf16.msra.mxu1 %v4451_v36  ;;  %v4499_v36 = vld [vmem:[%s6430_s1 + $0x1b0] ss:$8 sps:$4 sm:$0xff]  }
  0x50   :  { %2893 = vmatpush1.bf16.msra.mxu0 %v4454_v37  ;;  %2442 = vmatprep.subr.bf16.mxu1 %v4459_v38  ;;  %v4502_v37 = vld [vmem:[%s6430_s1 + $0x5b0] ss:$8 sps:$4 sm:$0xff]   ;;  %v4507_v38 = vld [vmem:[%s6430_s1 + $0x1c4] ss:$8 sps:$4 sm:$0xff]  }
  0x51   :  { %2894 = vmatprep.subr.bf16.mxu0 %v4462_v39  ;;  %v4510_v39 = vld [vmem:[%s6430_s1 + $0x5c4] ss:$8 sps:$4 sm:$0xff]  }
  0x52   :  { %2374 = vmatmul.mubr.bf16.gmra.mrb[8].mxu1 %v3729_v44  ;;  %v3793_v44 = vcombine.low %v113_v26, %v121_v29  ;;  %v62_v29 = vld [vmem:[%s6431_s0 + $0x168] sm:$0xff] }
  0x53   :  { %2826 = vmatmul.mubr.bf16.gmra.mrb[8].mxu0 %v3737_v45  ;;  %2443 = vmatpush1.bf16.msra.mxu1 %v4457_v40  ;;  %v4505_v40 = vld [vmem:[%s6430_s1 + $0x1c0] ss:$8 sps:$4 sm:$0xff]   ;;  %v3801_v45 = vcombine.low %v117_v30, %v125_v31 }
  0x54   :  { %2895 = vmatpush1.bf16.msra.mxu0 %v4460_v41  ;;  %2444 = vmatprep.subr.bf16.mxu1 %v4465_v48  ;;  %v4508_v41 = vld [vmem:[%s6430_s1 + $0x5c0] ss:$8 sps:$4 sm:$0xff]   ;;  %v4513_v48 = vld [vmem:[%s6430_s1 + $0x1d4] ss:$8 sps:$4 sm:$0xff]  }
  0x55   :  { %2896 = vmatprep.subr.bf16.mxu0 %v4468_v49  ;;  %2383 = vmatprep.mubr.bf16.mxu1 %v3746_v50  ;;  %v4516_v49 = vld [vmem:[%s6430_s1 + $0x5d4] ss:$8 sps:$4 sm:$0xff]   ;;  %v3810_v50 = vcombine.high %v129_v42, %v137_v43  ;;  %v4541_v30 = vld [vmem:[%s6430_s1 + $0x220] ss:$8 sps:$4 sm:$0xff]  }
  0x56   :  { %2835 = vmatprep.mubr.bf16.mxu0 %v3754_v51  ;;  %v3818_v51 = vcombine.high %v133_v46, %v141_v47  ;;  %v4544_v31 = vld [vmem:[%s6430_s1 + $0x620] ss:$8 sps:$4 sm:$0xff]  }
  0x57   :  { %2445 = vmatpush1.bf16.msra.mxu1 %v4463_v52  ;;  %v4511_v52 = vld [vmem:[%s6430_s1 + $0x1d0] ss:$8 sps:$4 sm:$0xff]   ;;  %v70_v46 = vld [vmem:[%s6431_s0 + $0x1a8] sm:$0xff] }
  0x58   :  { %2897 = vmatpush1.bf16.msra.mxu0 %v4466_v53  ;;  %2446 = vmatprep.subr.bf16.mxu1 %v4471_v54  ;;  %v4514_v53 = vld [vmem:[%s6430_s1 + $0x5d0] ss:$8 sps:$4 sm:$0xff]   ;;  %v4519_v54 = vld [vmem:[%s6430_s1 + $0x1e4] ss:$8 sps:$4 sm:$0xff]  }
  0x59   :  { %2898 = vmatprep.subr.bf16.mxu0 %v4474_v55  ;;  %v4522_v55 = vld [vmem:[%s6430_s1 + $0x5e4] ss:$8 sps:$4 sm:$0xff]  }
  0x5a   :  { %2384 = vmatmul.mubr.bf16.gmra.mrb[12].mxu1 %v3745_v59  ;;  %v26_v59 = vld [vmem:[%s6431_s0 + $0x48] sm:$0xff] }
  0x5b   :  { %2836 = vmatmul.mubr.bf16.gmra.mrb[12].mxu0 %v3753_v60  ;;  %2447 = vmatpush1.bf16.msra.mxu1 %v4469_v56  ;;  %v4517_v56 = vld [vmem:[%s6430_s1 + $0x1e0] ss:$8 sps:$4 sm:$0xff]   ;;  %v3809_v60 = vcombine.low %v129_v42, %v137_v43 }
  0x5c   :  { %2899 = vmatpush1.bf16.msra.mxu0 %v4472_v63  ;;  %2448 = vmatprep.subr.bf16.mxu1 %v4477_v0  ;;  %v30_v63 = vld [vmem:[%s6431_s0 + $0x68] sm:$0xff]  ;;  %v4525_v0 = vld [vmem:[%s6430_s1 + $0x1f4] ss:$8 sps:$4 sm:$0xff]  }
  0x5d   :  { %2900 = vmatprep.subr.bf16.mxu0 %v4480_v1  ;;  %2393 = vmatprep.mubr.bf16.mxu1 %v3762_v2  ;;  %v4528_v1 = vld [vmem:[%s6430_s1 + $0x5f4] ss:$8 sps:$4 sm:$0xff]   ;;  %v3700_v2 = vcombine.high %v18_v58, %v26_v59  ;;  %v3707_v12 = vcombine.low %v22_v62, %v30_v63  ;;  %v66_v42 = vld [vmem:[%s6431_s0 + $0x188] sm:$0xff] }
  0x5e   :  { %2845 = vmatprep.mubr.bf16.mxu0 %v3770_v3  ;;  %v3708_v3 = vcombine.high %v22_v62, %v30_v63  ;;  %v78_v47 = vld [vmem:[%s6431_s0 + $0x1e8] sm:$0xff] }
  0x5f   :  { %2449 = vmatpush1.bf16.msra.mxu1 %v4475_v4  ;;  %v4523_v4 = vld [vmem:[%s6430_s1 + $0x1f0] ss:$8 sps:$4 sm:$0xff]   ;;  %v86_v62 = vld [vmem:[%s6431_s0 + $0x228] sm:$0xff] }
  0x60   :  { %2901 = vmatpush1.bf16.msra.mxu0 %v4478_v5  ;;  %2450 = vmatprep.subr.bf16.mxu1 %v4483_v6  ;;  %v4526_v5 = vld [vmem:[%s6430_s1 + $0x5f0] ss:$8 sps:$4 sm:$0xff]   ;;  %v4531_v6 = vld [vmem:[%s6430_s1 + $0x204] ss:$8 sps:$4 sm:$0xff]  }
  0x61   :  { %2902 = vmatprep.subr.bf16.mxu0 %v4486_v7  ;;  %v4534_v7 = vld [vmem:[%s6430_s1 + $0x604] ss:$8 sps:$4 sm:$0xff]  }
  0x62   :  { %2394 = vmatmul.mubr.bf16.gmra.mrb[16].mxu1 %v3761_v10  ;;  %v42_v10 = vld [vmem:[%s6431_s0 + $0xc8] sm:$0xff] }
  0x63   :  { %2846 = vmatmul.mubr.bf16.gmra.mrb[16].mxu0 %v3769_v11  ;;  %2451 = vmatpush1.bf16.msra.mxu1 %v4481_v14  ;;  %v3699_v11 = vcombine.low %v18_v58, %v26_v59  ;;  %v46_v14 = vld [vmem:[%s6431_s0 + $0xe8] sm:$0xff]  ;;  %v3715_v26 = vcombine.low %v34_v9, %v42_v10 }
  0x64   :  { %2903 = vmatpush1.bf16.msra.mxu0 %v4484_v15  ;;  %2452 = vmatprep.subr.bf16.mxu1 %v4489_v16  ;;  %v4532_v15 = vld [vmem:[%s6430_s1 + $0x600] ss:$8 sps:$4 sm:$0xff]   ;;  %v4537_v16 = vld [vmem:[%s6430_s1 + $0x214] ss:$8 sps:$4 sm:$0xff]  }
  0x65   :  { %2904 = vmatprep.subr.bf16.mxu0 %v4492_v17  ;;  %2403 = vmatprep.mubr.bf16.mxu1 %v3778_v18  ;;  %v4540_v17 = vld [vmem:[%s6430_s1 + $0x614] ss:$8 sps:$4 sm:$0xff]   ;;  %v3716_v18 = vcombine.high %v34_v9, %v42_v10  ;;  %v82_v58 = vld [vmem:[%s6431_s0 + $0x208] sm:$0xff] }
  0x66   :  { %2855 = vmatprep.mubr.bf16.mxu0 %v3786_v19  ;;  %v3724_v19 = vcombine.high %v38_v13, %v46_v14  ;;  %v90_v59 = vld [vmem:[%s6431_s0 + $0x248] sm:$0xff] }
  0x67   :  { %2453 = vmatpush1.bf16.msra.mxu1 %v4487_v20  ;;  %v4535_v20 = vld [vmem:[%s6430_s1 + $0x210] ss:$8 sps:$4 sm:$0xff]   ;;  %v94_v63 = vld [vmem:[%s6431_s0 + $0x268] sm:$0xff] }
  0x68   :  { %2905 = vmatpush1.bf16.msra.mxu0 %v4490_v21  ;;  %2454 = vmatprep.subr.bf16.mxu1 %v4495_v22  ;;  %v4538_v21 = vld [vmem:[%s6430_s1 + $0x610] ss:$8 sps:$4 sm:$0xff]   ;;  %v4543_v22 = vld [vmem:[%s6430_s1 + $0x224] ss:$8 sps:$4 sm:$0xff]   ;;  %v4580_v9 = vld [vmem:[%s6430_s1 + $0x680] ss:$8 sps:$4 sm:$0xff]  }
  0x69   :  { %2906 = vmatprep.subr.bf16.mxu0 %v4498_v23  ;;  %v4546_v23 = vld [vmem:[%s6430_s1 + $0x624] ss:$8 sps:$4 sm:$0xff]  }
  0x6a   :  { %2404 = vmatmul.mubr.bf16.gmra.mrb[20].mxu1 %v3777_v27  ;;  %v3723_v27 = vcombine.low %v38_v13, %v46_v14  ;;  %v98_v10 = vld [vmem:[%s6431_s0 + $0x288] sm:$0xff]  ;;  %v3771_v13 = vcombine.low %v86_v62, %v94_v63 }
  0x6b   :  { %2856 = vmatmul.mubr.bf16.gmra.mrb[20].mxu0 %v3785_v28  ;;  %2455 = vmatpush1.bf16.msra.mxu1 %v4493_v24  ;;  %v50_v24 = vld [vmem:[%s6431_s0 + $0x108] sm:$0xff] }
  0x6c   :  { %2907 = vmatpush1.bf16.msra.mxu0 %v4496_v25  ;;  %2456 = vmatprep.subr.bf16.mxu1 %v4501_v32  ;;  %v58_v25 = vld [vmem:[%s6431_s0 + $0x148] sm:$0xff]  ;;  %v4549_v32 = vld [vmem:[%s6430_s1 + $0x234] ss:$8 sps:$4 sm:$0xff]  }
  0x6d   :  { %2908 = vmatprep.subr.bf16.mxu0 %v4504_v33  ;;  %2413 = vmatprep.mubr.bf16.mxu1 %v3794_v34  ;;  %v54_v28 = vld [vmem:[%s6431_s0 + $0x128] sm:$0xff]  ;;  %v4552_v33 = vld [vmem:[%s6430_s1 + $0x634] ss:$8 sps:$4 sm:$0xff]   ;;  %v3732_v34 = vcombine.high %v50_v24, %v58_v25  ;;  %v3731_v43 = vcombine.low %v50_v24, %v58_v25 }
  0x6e   :  { %2865 = vmatprep.mubr.bf16.mxu0 %v3802_v35  ;;  %v3740_v35 = vcombine.high %v54_v28, %v62_v29  ;;  %v102_v14 = vld [vmem:[%s6431_s0 + $0x2a8] sm:$0xff] }
  0x6f   :  { %2457 = vmatpush1.bf16.msra.mxu1 %v4499_v36  ;;  %v4547_v36 = vld [vmem:[%s6430_s1 + $0x230] ss:$8 sps:$4 sm:$0xff]   ;;  %v4589_v24 = vld [vmem:[%s6430_s1 + $0x2a0] ss:$8 sps:$4 sm:$0xff]  }
  0x70   :  { %2909 = vmatpush1.bf16.msra.mxu0 %v4502_v37  ;;  %2458 = vmatprep.subr.bf16.mxu1 %v4507_v38  ;;  %v4550_v37 = vld [vmem:[%s6430_s1 + $0x630] ss:$8 sps:$4 sm:$0xff]   ;;  %v4555_v38 = vld [vmem:[%s6430_s1 + $0x244] ss:$8 sps:$4 sm:$0xff]  }
  0x71   :  { %2910 = vmatprep.subr.bf16.mxu0 %v4510_v39  ;;  %v4558_v39 = vld [vmem:[%s6430_s1 + $0x644] ss:$8 sps:$4 sm:$0xff]  }
  0x72   :  { %2414 = vmatmul.mubr.bf16.gmra.mrb[24].mxu1 %v3793_v44  ;;  %v3739_v44 = vcombine.low %v54_v28, %v62_v29  ;;  %v114_v25 = vld [vmem:[%s6431_s0 + $0x308] sm:$0xff] }
  0x73   :  { %2866 = vmatmul.mubr.bf16.gmra.mrb[24].mxu0 %v3801_v45  ;;  %2459 = vmatpush1.bf16.msra.mxu1 %v4505_v40  ;;  %v4553_v40 = vld [vmem:[%s6430_s1 + $0x240] ss:$8 sps:$4 sm:$0xff]  }
  0x74   :  { %2911 = vmatpush1.bf16.msra.mxu0 %v4508_v41  ;;  %2460 = vmatprep.subr.bf16.mxu1 %v4513_v48  ;;  %v4556_v41 = vld [vmem:[%s6430_s1 + $0x640] ss:$8 sps:$4 sm:$0xff]   ;;  %v4561_v48 = vld [vmem:[%s6430_s1 + $0x254] ss:$8 sps:$4 sm:$0xff]  }
  0x75   :  { %2912 = vmatprep.subr.bf16.mxu0 %v4516_v49  ;;  %2423 = vmatprep.mubr.bf16.mxu1 %v3810_v50  ;;  %v74_v45 = vld [vmem:[%s6431_s0 + $0x1c8] sm:$0xff]  ;;  %v4564_v49 = vld [vmem:[%s6430_s1 + $0x654] ss:$8 sps:$4 sm:$0xff]  }
  0x76   :  { %2875 = vmatprep.mubr.bf16.mxu0 %v3818_v51  ;;  %v3748_v50 = vcombine.high %v66_v42, %v74_v45  ;;  %v3756_v51 = vcombine.high %v70_v46, %v78_v47  ;;  %v118_v29 = vld [vmem:[%s6431_s0 + $0x328] sm:$0xff] }
  0x77   :  { %2461 = vmatpush1.bf16.msra.mxu1 %v4511_v52  ;;  %v4559_v52 = vld [vmem:[%s6430_s1 + $0x250] ss:$8 sps:$4 sm:$0xff]  }
  0x78   :  { %2913 = vmatpush1.bf16.msra.mxu0 %v4514_v53  ;;  %2462 = vmatprep.subr.bf16.mxu1 %v4519_v54  ;;  %v4562_v53 = vld [vmem:[%s6430_s1 + $0x650] ss:$8 sps:$4 sm:$0xff]   ;;  %v4567_v54 = vld [vmem:[%s6430_s1 + $0x264] ss:$8 sps:$4 sm:$0xff]  }
  0x79   :  { %2914 = vmatprep.subr.bf16.mxu0 %v4522_v55  ;;  %v4570_v55 = vld [vmem:[%s6430_s1 + $0x664] ss:$8 sps:$4 sm:$0xff]  }
  0x7a   :  { %2424 = vmatmul.mubr.bf16.gmra.mrb[28].mxu1 %v3809_v60  ;;  %v3747_v60 = vcombine.low %v66_v42, %v74_v45  ;;  %v142_v45 = vld [vmem:[%s6431_s0 + $0x3e8] sm:$0xff] }
  0x7b   :  { %2876 = vmatmul.mubr.bf16.gmra.mrb[28].mxu0 %v3817_v61  ;;  %2463 = vmatpush1.bf16.msra.mxu1 %v4517_v56  ;;  %v4565_v56 = vld [vmem:[%s6430_s1 + $0x260] ss:$8 sps:$4 sm:$0xff]   ;;  %v3755_v61 = vcombine.low %v70_v46, %v78_v47 }
  0x7c   :  { %2915 = vmatpush1.bf16.msra.mxu0 %v4520_v57  ;;  %2464 = vmatprep.subr.bf16.mxu1 %v4525_v0  ;;  %v4568_v57 = vld [vmem:[%s6430_s1 + $0x660] ss:$8 sps:$4 sm:$0xff]   ;;  %v4573_v0 = vld [vmem:[%s6430_s1 + $0x274] ss:$8 sps:$4 sm:$0xff]  }
  0x7d   :  { %2916 = vmatprep.subr.bf16.mxu0 %v4528_v1  ;;  %2466 = vmatprep.mubr.bf16.mxu1 %v3700_v2  ;;  %v4576_v1 = vld [vmem:[%s6430_s1 + $0x674] ss:$8 sps:$4 sm:$0xff]   ;;  %v3764_v2 = vcombine.high %v82_v58, %v90_v59  ;;  %v4601_v46 = vld [vmem:[%s6430_s1 + $0x2c0] ss:$8 sps:$4 sm:$0xff]  }
  0x7e   :  { %2918 = vmatprep.mubr.bf16.mxu0 %v3708_v3  ;;  %v3772_v3 = vcombine.high %v86_v62, %v94_v63  ;;  %v4604_v47 = vld [vmem:[%s6430_s1 + $0x6c0] ss:$8 sps:$4 sm:$0xff]   ;;  %v23_v62 = vld [vmem:[%s6431_s0 + $0x30] sm:$0xff] }
  0x7f   :  { %2465 = vmatpush1.bf16.msra.mxu1 %v4523_v4  ;;  %v4571_v4 = vld [vmem:[%s6430_s1 + $0x270] ss:$8 sps:$4 sm:$0xff]  }
  0x80   :  { %2917 = vmatpush1.bf16.msra.mxu0 %v4526_v5  ;;  %2547 = vmatprep.subr.bf16.mxu1 %v4531_v6  ;;  %v4574_v5 = vld [vmem:[%s6430_s1 + $0x670] ss:$8 sps:$4 sm:$0xff]   ;;  %v4579_v6 = vld [vmem:[%s6430_s1 + $0x284] ss:$8 sps:$4 sm:$0xff]  }
  0x81   :  { %2999 = vmatprep.subr.bf16.mxu0 %v4534_v7  ;;  %v4582_v7 = vld [vmem:[%s6430_s1 + $0x684] ss:$8 sps:$4 sm:$0xff]   ;;  %v31_v63 = vld [vmem:[%s6431_s0 + $0x70] sm:$0xff] }
  0x82   :  { %2467 = vmatmul.mubr.bf16.vlgmr.msra.gmra.mrb[0].mxu1 %v3699_v11  ;;  %v106_v11 = vld [vmem:[%s6431_s0 + $0x2c8] sm:$0xff] }
  0x83   :  { %2919 = vmatmul.mubr.bf16.vlgmr.msra.gmra.mrb[0].mxu0 %v3707_v12  ;;  %2548 = vmatpush1.bf16.msra.mxu1 %v4529_v8  ;;  %v4577_v8 = vld [vmem:[%s6430_s1 + $0x280] ss:$8 sps:$4 sm:$0xff]   ;;  %v3763_v12 = vcombine.low %v82_v58, %v90_v59  ;;  %v19_v58 = vld [vmem:[%s6431_s0 + $0x10] sm:$0xff] }
  0x84   :  { %3000 = vmatpush1.bf16.msra.mxu0 %v4532_v15  ;;  %2549 = vmatprep.subr.bf16.mxu1 %v4537_v16  ;;  %v110_v15 = vld [vmem:[%s6431_s0 + $0x2e8] sm:$0xff]  ;;  %v4585_v16 = vld [vmem:[%s6430_s1 + $0x294] ss:$8 sps:$4 sm:$0xff]  }
  0x85   :  { %3001 = vmatprep.subr.bf16.mxu0 %v4540_v17  ;;  %2476 = vmatprep.mubr.bf16.mxu1 %v3716_v18  ;;  %v4588_v17 = vld [vmem:[%s6430_s1 + $0x694] ss:$8 sps:$4 sm:$0xff]   ;;  %v3780_v18 = vcombine.high %v98_v10, %v106_v11  ;;  %v3787_v28 = vcombine.low %v102_v14, %v110_v15 }
  0x86   :  { %2928 = vmatprep.mubr.bf16.mxu0 %v3724_v19  ;;  %v3788_v19 = vcombine.high %v102_v14, %v110_v15  ;;  %v39_v14 = vld [vmem:[%s6431_s0 + $0xb0] sm:$0xff] }
  0x87   :  { %2550 = vmatpush1.bf16.msra.mxu1 %v4535_v20  ;;  %v4583_v20 = vld [vmem:[%s6430_s1 + $0x290] ss:$8 sps:$4 sm:$0xff]  }
  0x88   :  { %3002 = vmatpush1.bf16.msra.mxu0 %v4538_v21  ;;  %2551 = vmatprep.subr.bf16.mxu1 %v4543_v22  ;;  %v4586_v21 = vld [vmem:[%s6430_s1 + $0x690] ss:$8 sps:$4 sm:$0xff]   ;;  %v4591_v22 = vld [vmem:[%s6430_s1 + $0x2a4] ss:$8 sps:$4 sm:$0xff]  }
  0x89   :  { %3003 = vmatprep.subr.bf16.mxu0 %v4546_v23  ;;  %v4594_v23 = vld [vmem:[%s6430_s1 + $0x6a4] ss:$8 sps:$4 sm:$0xff]   ;;  %v47_v15 = vld [vmem:[%s6431_s0 + $0xf0] sm:$0xff] }
  0x8a   :  { %2477 = vmatmul.mubr.bf16.gmra.mrb[4].mxu1 %v3715_v26  ;;  %v122_v26 = vld [vmem:[%s6431_s0 + $0x348] sm:$0xff] }
  0x8b   :  { %2929 = vmatmul.mubr.bf16.gmra.mrb[4].mxu0 %v3723_v27  ;;  %2552 = vmatpush1.bf16.msra.mxu1 %v4541_v30  ;;  %v3779_v27 = vcombine.low %v98_v10, %v106_v11  ;;  %v126_v30 = vld [vmem:[%s6431_s0 + $0x368] sm:$0xff]  ;;  %v3795_v42 = vcombine.low %v114_v25, %v122_v26  ;;  %v35_v10 = vld [vmem:[%s6431_s0 + $0x90] sm:$0xff] }
  0x8c   :  { %3004 = vmatpush1.bf16.msra.mxu0 %v4544_v31  ;;  %2553 = vmatprep.subr.bf16.mxu1 %v4549_v32  ;;  %v4592_v31 = vld [vmem:[%s6430_s1 + $0x6a0] ss:$8 sps:$4 sm:$0xff]   ;;  %v4597_v32 = vld [vmem:[%s6430_s1 + $0x2b4] ss:$8 sps:$4 sm:$0xff]  }
  0x8d   :  { %3005 = vmatprep.subr.bf16.mxu0 %v4552_v33  ;;  %2486 = vmatprep.mubr.bf16.mxu1 %v3732_v34  ;;  %v4600_v33 = vld [vmem:[%s6430_s1 + $0x6b4] ss:$8 sps:$4 sm:$0xff]   ;;  %v3796_v34 = vcombine.high %v114_v25, %v122_v26  ;;  %v4640_v25 = vld [vmem:[%s6430_s1 + $0x720] ss:$8 sps:$4 sm:$0xff]  }
  0x8e   :  { %2938 = vmatprep.mubr.bf16.mxu0 %v3740_v35  ;;  %v3804_v35 = vcombine.high %v118_v29, %v126_v30  ;;  %v43_v11 = vld [vmem:[%s6431_s0 + $0xd0] sm:$0xff] }
  0x8f   :  { %2554 = vmatpush1.bf16.msra.mxu1 %v4547_v36  ;;  %v4595_v36 = vld [vmem:[%s6430_s1 + $0x2b0] ss:$8 sps:$4 sm:$0xff]  }
  0x90   :  { %3006 = vmatpush1.bf16.msra.mxu0 %v4550_v37  ;;  %2555 = vmatprep.subr.bf16.mxu1 %v4555_v38  ;;  %v4598_v37 = vld [vmem:[%s6430_s1 + $0x6b0] ss:$8 sps:$4 sm:$0xff]   ;;  %v4603_v38 = vld [vmem:[%s6430_s1 + $0x2c4] ss:$8 sps:$4 sm:$0xff]  }
  0x91   :  { %3007 = vmatprep.subr.bf16.mxu0 %v4558_v39  ;;  %v4606_v39 = vld [vmem:[%s6430_s1 + $0x6c4] ss:$8 sps:$4 sm:$0xff]   ;;  %v51_v26 = vld [vmem:[%s6431_s0 + $0x110] sm:$0xff] }
  0x92   :  { %2487 = vmatmul.mubr.bf16.gmra.mrb[8].mxu1 %v3731_v43  ;;  %v3803_v43 = vcombine.low %v118_v29, %v126_v30  ;;  %v3725_v29 = vcombine.low %v39_v14, %v47_v15  ;;  %v55_v30 = vld [vmem:[%s6431_s0 + $0x130] sm:$0xff] }
  0x93   :  { %2939 = vmatmul.mubr.bf16.gmra.mrb[8].mxu0 %v3739_v44  ;;  %2556 = vmatpush1.bf16.msra.mxu1 %v4553_v40  ;;  %v130_v40 = vld [vmem:[%s6431_s0 + $0x388] sm:$0xff] }
  0x94   :  { %3008 = vmatpush1.bf16.msra.mxu0 %v4556_v41  ;;  %2557 = vmatprep.subr.bf16.mxu1 %v4561_v48  ;;  %v138_v41 = vld [vmem:[%s6431_s0 + $0x3c8] sm:$0xff]  ;;  %v4609_v48 = vld [vmem:[%s6430_s1 + $0x2d4] ss:$8 sps:$4 sm:$0xff]  }
  0x95   :  { %3009 = vmatprep.subr.bf16.mxu0 %v4564_v49  ;;  %2496 = vmatprep.mubr.bf16.mxu1 %v3748_v50  ;;  %v134_v44 = vld [vmem:[%s6431_s0 + $0x3a8] sm:$0xff]  ;;  %v4612_v49 = vld [vmem:[%s6430_s1 + $0x6d4] ss:$8 sps:$4 sm:$0xff]   ;;  %v3812_v50 = vcombine.high %v130_v40, %v138_v41  ;;  %v3811_v59 = vcombine.low %v130_v40, %v138_v41 }
  0x96   :  { %2948 = vmatprep.mubr.bf16.mxu0 %v3756_v51  ;;  %v3820_v51 = vcombine.high %v134_v44, %v142_v45  ;;  %v67_v40 = vld [vmem:[%s6431_s0 + $0x190] sm:$0xff] }
  0x97   :  { %2558 = vmatpush1.bf16.msra.mxu1 %v4559_v52  ;;  %v4607_v52 = vld [vmem:[%s6430_s1 + $0x2d0] ss:$8 sps:$4 sm:$0xff]  }
  0x98   :  { %3010 = vmatpush1.bf16.msra.mxu0 %v4562_v53  ;;  %2559 = vmatprep.subr.bf16.mxu1 %v4567_v54  ;;  %v4610_v53 = vld [vmem:[%s6430_s1 + $0x6d0] ss:$8 sps:$4 sm:$0xff]   ;;  %v4615_v54 = vld [vmem:[%s6430_s1 + $0x2e4] ss:$8 sps:$4 sm:$0xff]  }
  0x99   :  { %3011 = vmatprep.subr.bf16.mxu0 %v4570_v55  ;;  %v4618_v55 = vld [vmem:[%s6430_s1 + $0x6e4] ss:$8 sps:$4 sm:$0xff]  }
  0x9a   :  { %2497 = vmatmul.mubr.bf16.gmra.mrb[12].mxu1 %v3747_v60  ;;  %v3819_v60 = vcombine.low %v134_v44, %v142_v45  ;;  %v71_v44 = vld [vmem:[%s6431_s0 + $0x1b0] sm:$0xff] }
  0x9b   :  { %2949 = vmatmul.mubr.bf16.gmra.mrb[12].mxu0 %v3755_v61  ;;  %2560 = vmatpush1.bf16.msra.mxu1 %v4565_v56  ;;  %v4613_v56 = vld [vmem:[%s6430_s1 + $0x2e0] ss:$8 sps:$4 sm:$0xff]   ;;  %v27_v61 = vld [vmem:[%s6431_s0 + $0x50] sm:$0xff] }
  0x9c   :  { %3012 = vmatpush1.bf16.msra.mxu0 %v4568_v57  ;;  %2561 = vmatprep.subr.bf16.mxu1 %v4573_v0  ;;  %v4616_v57 = vld [vmem:[%s6430_s1 + $0x6e0] ss:$8 sps:$4 sm:$0xff]   ;;  %v4621_v0 = vld [vmem:[%s6430_s1 + $0x2f4] ss:$8 sps:$4 sm:$0xff]  }
  0x9d   :  { %3013 = vmatprep.subr.bf16.mxu0 %v4576_v1  ;;  %2506 = vmatprep.mubr.bf16.mxu1 %v3764_v2  ;;  %v4624_v1 = vld [vmem:[%s6430_s1 + $0x6f4] ss:$8 sps:$4 sm:$0xff]   ;;  %v3702_v2 = vcombine.high %v19_v58, %v27_v61 }
  0x9e   :  { %2958 = vmatprep.mubr.bf16.mxu0 %v3772_v3  ;;  %v3710_v3 = vcombine.high %v23_v62, %v31_v63  ;;  %v79_v45 = vld [vmem:[%s6431_s0 + $0x1f0] sm:$0xff] }
  0x9f   :  { %2562 = vmatpush1.bf16.msra.mxu1 %v4571_v4  ;;  %v4619_v4 = vld [vmem:[%s6430_s1 + $0x2f0] ss:$8 sps:$4 sm:$0xff]  }
  0xa0   :  { %3014 = vmatpush1.bf16.msra.mxu0 %v4574_v5  ;;  %2563 = vmatprep.subr.bf16.mxu1 %v4579_v6  ;;  %v4622_v5 = vld [vmem:[%s6430_s1 + $0x6f0] ss:$8 sps:$4 sm:$0xff]   ;;  %v4627_v6 = vld [vmem:[%s6430_s1 + $0x304] ss:$8 sps:$4 sm:$0xff]  }
  0xa1   :  { %3015 = vmatprep.subr.bf16.mxu0 %v4582_v7  ;;  %v4630_v7 = vld [vmem:[%s6430_s1 + $0x704] ss:$8 sps:$4 sm:$0xff]  }
  0xa2   :  { %2507 = vmatmul.mubr.bf16.gmra.mrb[16].mxu1 %v3763_v12  ;;  %v3701_v12 = vcombine.low %v19_v58, %v27_v61  ;;  %v3757_v58 = vcombine.low %v71_v44, %v79_v45  ;;  %v95_v61 = vld [vmem:[%s6431_s0 + $0x270] sm:$0xff] }
  0xa3   :  { %2959 = vmatmul.mubr.bf16.gmra.mrb[16].mxu0 %v3771_v13  ;;  %2564 = vmatpush1.bf16.msra.mxu1 %v4577_v8  ;;  %v4625_v8 = vld [vmem:[%s6430_s1 + $0x300] ss:$8 sps:$4 sm:$0xff]   ;;  %v3709_v13 = vcombine.low %v23_v62, %v31_v63 }
  0xa4   :  { %3016 = vmatpush1.bf16.msra.mxu0 %v4580_v9  ;;  %2565 = vmatprep.subr.bf16.mxu1 %v4585_v16  ;;  %v4628_v9 = vld [vmem:[%s6430_s1 + $0x700] ss:$8 sps:$4 sm:$0xff]   ;;  %v4633_v16 = vld [vmem:[%s6430_s1 + $0x314] ss:$8 sps:$4 sm:$0xff]  }
  0xa5   :  { %3017 = vmatprep.subr.bf16.mxu0 %v4588_v17  ;;  %2516 = vmatprep.mubr.bf16.mxu1 %v3780_v18  ;;  %v4636_v17 = vld [vmem:[%s6430_s1 + $0x714] ss:$8 sps:$4 sm:$0xff]   ;;  %v3718_v18 = vcombine.high %v35_v10, %v43_v11  ;;  %v4661_v62 = vld [vmem:[%s6430_s1 + $0x360] ss:$8 sps:$4 sm:$0xff]  }
  0xa6   :  { %2968 = vmatprep.mubr.bf16.mxu0 %v3788_v19  ;;  %v3726_v19 = vcombine.high %v39_v14, %v47_v15  ;;  %v4664_v63 = vld [vmem:[%s6430_s1 + $0x760] ss:$8 sps:$4 sm:$0xff]  }
  0xa7   :  { %2566 = vmatpush1.bf16.msra.mxu1 %v4583_v20  ;;  %v4631_v20 = vld [vmem:[%s6430_s1 + $0x310] ss:$8 sps:$4 sm:$0xff]   ;;  %v4673_v14 = vld [vmem:[%s6430_s1 + $0x380] ss:$8 sps:$4 sm:$0xff]  }
  0xa8   :  { %3018 = vmatpush1.bf16.msra.mxu0 %v4586_v21  ;;  %2567 = vmatprep.subr.bf16.mxu1 %v4591_v22  ;;  %v4634_v21 = vld [vmem:[%s6430_s1 + $0x710] ss:$8 sps:$4 sm:$0xff]   ;;  %v4639_v22 = vld [vmem:[%s6430_s1 + $0x324] ss:$8 sps:$4 sm:$0xff]   ;;  %v4676_v15 = vld [vmem:[%s6430_s1 + $0x780] ss:$8 sps:$4 sm:$0xff]  }
  0xa9   :  { %3019 = vmatprep.subr.bf16.mxu0 %v4594_v23  ;;  %v4642_v23 = vld [vmem:[%s6430_s1 + $0x724] ss:$8 sps:$4 sm:$0xff]  }
  0xaa   :  { %2517 = vmatmul.mubr.bf16.gmra.mrb[20].mxu1 %v3779_v27  ;;  %v59_v27 = vld [vmem:[%s6431_s0 + $0x150] sm:$0xff] }
  0xab   :  { %2969 = vmatmul.mubr.bf16.gmra.mrb[20].mxu0 %v3787_v28  ;;  %2568 = vmatpush1.bf16.msra.mxu1 %v4589_v24  ;;  %v4637_v24 = vld [vmem:[%s6430_s1 + $0x320] ss:$8 sps:$4 sm:$0xff]   ;;  %v3717_v28 = vcombine.low %v35_v10, %v43_v11  ;;  %v3733_v41 = vcombine.low %v51_v26, %v59_v27  ;;  %v107_v11 = vld [vmem:[%s6431_s0 + $0x2d0] sm:$0xff] }
  0xac   :  { %3020 = vmatpush1.bf16.msra.mxu0 %v4592_v31  ;;  %2569 = vmatprep.subr.bf16.mxu1 %v4597_v32  ;;  %v63_v31 = vld [vmem:[%s6431_s0 + $0x170] sm:$0xff] }
  0xad   :  { %3021 = vmatprep.subr.bf16.mxu0 %v4600_v33  ;;  %2526 = vmatprep.mubr.bf16.mxu1 %v3796_v34  ;;  %v4645_v32 = vld [vmem:[%s6430_s1 + $0x334] ss:$8 sps:$4 sm:$0xff]   ;;  %v3734_v34 = vcombine.high %v51_v26, %v59_v27 }
  0xae   :  { %2978 = vmatprep.mubr.bf16.mxu0 %v3804_v35  ;;  %v4648_v33 = vld [vmem:[%s6430_s1 + $0x734] ss:$8 sps:$4 sm:$0xff]   ;;  %v3742_v35 = vcombine.high %v55_v30, %v63_v31 }
  0xaf   :  { %2570 = vmatpush1.bf16.msra.mxu1 %v4595_v36  ;;  %v4643_v36 = vld [vmem:[%s6430_s1 + $0x330] ss:$8 sps:$4 sm:$0xff]  }
  0xb0   :  { %3022 = vmatpush1.bf16.msra.mxu0 %v4598_v37  ;;  %2571 = vmatprep.subr.bf16.mxu1 %v4603_v38  ;;  %v4646_v37 = vld [vmem:[%s6430_s1 + $0x730] ss:$8 sps:$4 sm:$0xff]   ;;  %v4651_v38 = vld [vmem:[%s6430_s1 + $0x344] ss:$8 sps:$4 sm:$0xff]  }
  0xb1   :  { %3023 = vmatprep.subr.bf16.mxu0 %v4606_v39  ;;  %v4654_v39 = vld [vmem:[%s6430_s1 + $0x744] ss:$8 sps:$4 sm:$0xff]   ;;  %v123_v27 = vld [vmem:[%s6431_s0 + $0x350] sm:$0xff] }
  0xb2   :  { %2527 = vmatmul.mubr.bf16.gmra.mrb[24].mxu1 %v3795_v42  ;;  %v3741_v42 = vcombine.low %v55_v30, %v63_v31  ;;  %v4685_v30 = vld [vmem:[%s6430_s1 + $0x3a0] ss:$8 sps:$4 sm:$0xff]  }
  0xb3   :  { %2979 = vmatmul.mubr.bf16.gmra.mrb[24].mxu0 %v3803_v43  ;;  %2572 = vmatpush1.bf16.msra.mxu1 %v4601_v46  ;;  %v75_v43 = vld [vmem:[%s6431_s0 + $0x1d0] sm:$0xff]  ;;  %v4649_v46 = vld [vmem:[%s6430_s1 + $0x340] ss:$8 sps:$4 sm:$0xff]  }
  0xb4   :  { %3024 = vmatpush1.bf16.msra.mxu0 %v4604_v47  ;;  %2573 = vmatprep.subr.bf16.mxu1 %v4609_v48  ;;  %v4652_v47 = vld [vmem:[%s6430_s1 + $0x740] ss:$8 sps:$4 sm:$0xff]   ;;  %v4657_v48 = vld [vmem:[%s6430_s1 + $0x354] ss:$8 sps:$4 sm:$0xff]  }
  0xb5   :  { %3025 = vmatprep.subr.bf16.mxu0 %v4612_v49  ;;  %2536 = vmatprep.mubr.bf16.mxu1 %v3812_v50  ;;  %v4660_v49 = vld [vmem:[%s6430_s1 + $0x754] ss:$8 sps:$4 sm:$0xff]   ;;  %v3750_v50 = vcombine.high %v67_v40, %v75_v43  ;;  %v4688_v31 = vld [vmem:[%s6430_s1 + $0x7a0] ss:$8 sps:$4 sm:$0xff]  }
  0xb6   :  { %2988 = vmatprep.mubr.bf16.mxu0 %v3820_v51  ;;  %v3758_v51 = vcombine.high %v71_v44, %v79_v45  ;;  %v135_v44 = vld [vmem:[%s6431_s0 + $0x3b0] sm:$0xff] }
  0xb7   :  { %2574 = vmatpush1.bf16.msra.mxu1 %v4607_v52  ;;  %v4655_v52 = vld [vmem:[%s6430_s1 + $0x350] ss:$8 sps:$4 sm:$0xff]  }
  0xb8   :  { %3026 = vmatpush1.bf16.msra.mxu0 %v4610_v53  ;;  %2575 = vmatprep.subr.bf16.mxu1 %v4615_v54  ;;  %v4658_v53 = vld [vmem:[%s6430_s1 + $0x750] ss:$8 sps:$4 sm:$0xff]   ;;  %v4663_v54 = vld [vmem:[%s6430_s1 + $0x364] ss:$8 sps:$4 sm:$0xff]  }
  0xb9   :  { %3027 = vmatprep.subr.bf16.mxu0 %v4618_v55  ;;  %v4666_v55 = vld [vmem:[%s6430_s1 + $0x764] ss:$8 sps:$4 sm:$0xff]   ;;  %v143_v45 = vld [vmem:[%s6431_s0 + $0x3f0] sm:$0xff] }
  0xba   :  { %2537 = vmatmul.mubr.bf16.gmra.mrb[28].mxu1 %v3811_v59  ;;  %v91_v59 = vld [vmem:[%s6431_s0 + $0x250] sm:$0xff] }
  0xbb   :  { %2989 = vmatmul.mubr.bf16.gmra.mrb[28].mxu0 %v3819_v60  ;;  %2576 = vmatpush1.bf16.msra.mxu1 %v4613_v56  ;;  %v83_v56 = vld [vmem:[%s6431_s0 + $0x210] sm:$0xff] }
  0xbc   :  { %3028 = vmatpush1.bf16.msra.mxu0 %v4616_v57  ;;  %2577 = vmatprep.subr.bf16.mxu1 %v4621_v0  ;;  %v3749_v57 = vcombine.low %v67_v40, %v75_v43  ;;  %v87_v60 = vld [vmem:[%s6431_s0 + $0x230] sm:$0xff] }
  0xbd   :  { %3029 = vmatprep.subr.bf16.mxu0 %v4624_v1  ;;  %2579 = vmatprep.mubr.bf16.mxu1 %v3702_v2  ;;  %v4669_v0 = vld [vmem:[%s6430_s1 + $0x374] ss:$8 sps:$4 sm:$0xff]   ;;  %v3766_v2 = vcombine.high %v83_v56, %v91_v59  ;;  %v3773_v10 = vcombine.low %v87_v60, %v95_v61 }
  0xbe   :  { %3031 = vmatprep.mubr.bf16.mxu0 %v3710_v3  ;;  %v4672_v1 = vld [vmem:[%s6430_s1 + $0x774] ss:$8 sps:$4 sm:$0xff]   ;;  %v3774_v3 = vcombine.high %v87_v60, %v95_v61 }
  0xbf   :  { %2578 = vmatpush1.bf16.msra.mxu1 %v4619_v4  ;;  %v4667_v4 = vld [vmem:[%s6430_s1 + $0x370] ss:$8 sps:$4 sm:$0xff]  }
  0xc0   :  { %3030 = vmatpush1.bf16.msra.mxu0 %v4622_v5  ;;  %2660 = vmatprep.subr.bf16.mxu1 %v4627_v6  ;;  %v4670_v5 = vld [vmem:[%s6430_s1 + $0x770] ss:$8 sps:$4 sm:$0xff]   ;;  %v4675_v6 = vld [vmem:[%s6430_s1 + $0x384] ss:$8 sps:$4 sm:$0xff]  }
  0xc1   :  { %3112 = vmatprep.subr.bf16.mxu0 %v4630_v7  ;;  %v4678_v7 = vld [vmem:[%s6430_s1 + $0x784] ss:$8 sps:$4 sm:$0xff]   ;;  %v131_v40 = vld [vmem:[%s6431_s0 + $0x390] sm:$0xff]  ;;  %v24_v60 = vld [vmem:[%s6431_s0 + $0x38] sm:$0xff] }
  0xc2   :  { %2580 = vmatmul.mubr.bf16.vlgmr.msra.gmra.mrb[0].mxu1 %v3701_v12  ;;  %v103_v12 = vld [vmem:[%s6431_s0 + $0x2b0] sm:$0xff]  ;;  %v32_v61 = vld [vmem:[%s6431_s0 + $0x78] sm:$0xff] }
  0xc3   :  { %3032 = vmatmul.mubr.bf16.vlgmr.msra.gmra.mrb[0].mxu0 %v3709_v13  ;;  %2661 = vmatpush1.bf16.msra.mxu1 %v4625_v8  ;;  %v99_v8 = vld [vmem:[%s6431_s0 + $0x290] sm:$0xff] }
  0xc4   :  { %3113 = vmatpush1.bf16.msra.mxu0 %v4628_v9  ;;  %2662 = vmatprep.subr.bf16.mxu1 %v4633_v16  ;;  %v3765_v9 = vcombine.low %v83_v56, %v91_v59  ;;  %v111_v13 = vld [vmem:[%s6431_s0 + $0x2f0] sm:$0xff]  ;;  %v20_v56 = vld [vmem:[%s6431_s0 + $0x18] sm:$0xff] }
  0xc5   :  { %3114 = vmatprep.subr.bf16.mxu0 %v4636_v17  ;;  %2589 = vmatprep.mubr.bf16.mxu1 %v3718_v18  ;;  %v4681_v16 = vld [vmem:[%s6430_s1 + $0x394] ss:$8 sps:$4 sm:$0xff]   ;;  %v3782_v18 = vcombine.high %v99_v8, %v107_v11  ;;  %v3789_v26 = vcombine.low %v103_v12, %v111_v13 }
  0xc6   :  { %3041 = vmatprep.mubr.bf16.mxu0 %v3726_v19  ;;  %v4684_v17 = vld [vmem:[%s6430_s1 + $0x794] ss:$8 sps:$4 sm:$0xff]   ;;  %v3790_v19 = vcombine.high %v103_v12, %v111_v13 }
  0xc7   :  { %2663 = vmatpush1.bf16.msra.mxu1 %v4631_v20  ;;  %v4679_v20 = vld [vmem:[%s6430_s1 + $0x390] ss:$8 sps:$4 sm:$0xff]  }
  0xc8   :  { %3115 = vmatpush1.bf16.msra.mxu0 %v4634_v21  ;;  %2664 = vmatprep.subr.bf16.mxu1 %v4639_v22  ;;  %v4682_v21 = vld [vmem:[%s6430_s1 + $0x790] ss:$8 sps:$4 sm:$0xff]   ;;  %v4687_v22 = vld [vmem:[%s6430_s1 + $0x3a4] ss:$8 sps:$4 sm:$0xff]  }
  0xc9   :  { %3116 = vmatprep.subr.bf16.mxu0 %v4642_v23  ;;  %v4690_v23 = vld [vmem:[%s6430_s1 + $0x7a4] ss:$8 sps:$4 sm:$0xff]   ;;  %v139_v43 = vld [vmem:[%s6431_s0 + $0x3d0] sm:$0xff]  ;;  %v28_v59 = vld [vmem:[%s6431_s0 + $0x58] sm:$0xff] }
  0xca   :  { %2590 = vmatmul.mubr.bf16.gmra.mrb[4].mxu1 %v3717_v28  ;;  %v119_v28 = vld [vmem:[%s6431_s0 + $0x330] sm:$0xff] }
  0xcb   :  { %3042 = vmatmul.mubr.bf16.gmra.mrb[4].mxu0 %v3725_v29  ;;  %2665 = vmatpush1.bf16.msra.mxu1 %v4637_v24  ;;  %v115_v24 = vld [vmem:[%s6431_s0 + $0x310] sm:$0xff] }
  0xcc   :  { %3117 = vmatpush1.bf16.msra.mxu0 %v4640_v25  ;;  %2666 = vmatprep.subr.bf16.mxu1 %v4645_v32  ;;  %v3781_v25 = vcombine.low %v99_v8, %v107_v11  ;;  %v127_v29 = vld [vmem:[%s6431_s0 + $0x370] sm:$0xff]  ;;  %v40_v8 = vld [vmem:[%s6431_s0 + $0xb8] sm:$0xff]  ;;  %v3711_v11 = vcombine.low %v24_v60, %v32_v61 }
  0xcd   :  { %3118 = vmatprep.subr.bf16.mxu0 %v4648_v33  ;;  %2599 = vmatprep.mubr.bf16.mxu1 %v3734_v34  ;;  %v4693_v32 = vld [vmem:[%s6430_s1 + $0x3b4] ss:$8 sps:$4 sm:$0xff]   ;;  %v3798_v34 = vcombine.high %v115_v24, %v123_v27 }
  0xce   :  { %3051 = vmatprep.mubr.bf16.mxu0 %v3742_v35  ;;  %v4696_v33 = vld [vmem:[%s6430_s1 + $0x7b4] ss:$8 sps:$4 sm:$0xff]   ;;  %v3806_v35 = vcombine.high %v119_v28, %v127_v29 }
  0xcf   :  { %2667 = vmatpush1.bf16.msra.mxu1 %v4643_v36  ;;  %v4691_v36 = vld [vmem:[%s6430_s1 + $0x3b0] ss:$8 sps:$4 sm:$0xff]  }
  0xd0   :  { %3119 = vmatpush1.bf16.msra.mxu0 %v4646_v37  ;;  %2668 = vmatprep.subr.bf16.mxu1 %v4651_v38  ;;  %v4694_v37 = vld [vmem:[%s6430_s1 + $0x7b0] ss:$8 sps:$4 sm:$0xff]   ;;  %v4699_v38 = vld [vmem:[%s6430_s1 + $0x3c4] ss:$8 sps:$4 sm:$0xff]  }
  0xd1   :  { %3120 = vmatprep.subr.bf16.mxu0 %v4654_v39  ;;  %v4702_v39 = vld [vmem:[%s6430_s1 + $0x7c4] ss:$8 sps:$4 sm:$0xff]  }
  0xd2   :  { %2600 = vmatmul.mubr.bf16.gmra.mrb[8].mxu1 %v3733_v41  ;;  %v3797_v41 = vcombine.low %v115_v24, %v123_v27  ;;  %v72_v24 = vld [vmem:[%s6431_s0 + $0x1b8] sm:$0xff] }
  0xd3   :  { %3052 = vmatmul.mubr.bf16.gmra.mrb[8].mxu0 %v3741_v42  ;;  %2669 = vmatpush1.bf16.msra.mxu1 %v4649_v46  ;;  %v3805_v42 = vcombine.low %v119_v28, %v127_v29  ;;  %v4697_v46 = vld [vmem:[%s6430_s1 + $0x3c0] ss:$8 sps:$4 sm:$0xff]  }
  0xd4   :  { %3121 = vmatpush1.bf16.msra.mxu0 %v4652_v47  ;;  %2670 = vmatprep.subr.bf16.mxu1 %v4657_v48  ;;  %v4700_v47 = vld [vmem:[%s6430_s1 + $0x7c0] ss:$8 sps:$4 sm:$0xff]   ;;  %v4705_v48 = vld [vmem:[%s6430_s1 + $0x3d4] ss:$8 sps:$4 sm:$0xff]  }
  0xd5   :  { %3122 = vmatprep.subr.bf16.mxu0 %v4660_v49  ;;  %2609 = vmatprep.mubr.bf16.mxu1 %v3750_v50  ;;  %v4708_v49 = vld [vmem:[%s6430_s1 + $0x7d4] ss:$8 sps:$4 sm:$0xff]   ;;  %v3814_v50 = vcombine.high %v131_v40, %v139_v43 }
  0xd6   :  { %3061 = vmatprep.mubr.bf16.mxu0 %v3758_v51  ;;  %v3822_v51 = vcombine.high %v135_v44, %v143_v45 }
  0xd7   :  { %2671 = vmatpush1.bf16.msra.mxu1 %v4655_v52  ;;  %v4703_v52 = vld [vmem:[%s6430_s1 + $0x3d0] ss:$8 sps:$4 sm:$0xff]  }
  0xd8   :  { %3123 = vmatpush1.bf16.msra.mxu0 %v4658_v53  ;;  %2672 = vmatprep.subr.bf16.mxu1 %v4663_v54  ;;  %v4706_v53 = vld [vmem:[%s6430_s1 + $0x7d0] ss:$8 sps:$4 sm:$0xff]   ;;  %v4711_v54 = vld [vmem:[%s6430_s1 + $0x3e4] ss:$8 sps:$4 sm:$0xff]  }
  0xd9   :  { %3124 = vmatprep.subr.bf16.mxu0 %v4666_v55  ;;  %v4714_v55 = vld [vmem:[%s6430_s1 + $0x7e4] ss:$8 sps:$4 sm:$0xff]  }
  0xda   :  { %2610 = vmatmul.mubr.bf16.gmra.mrb[12].mxu1 %v3749_v57  ;;  %v3813_v57 = vcombine.low %v131_v40, %v139_v43  ;;  %v104_v40 = vld [vmem:[%s6431_s0 + $0x2b8] sm:$0xff] }
  0xdb   :  { %3062 = vmatmul.mubr.bf16.gmra.mrb[12].mxu0 %v3757_v58  ;;  %2673 = vmatpush1.bf16.msra.mxu1 %v4661_v62  ;;  %v3821_v58 = vcombine.low %v135_v44, %v143_v45  ;;  %v4709_v62 = vld [vmem:[%s6430_s1 + $0x3e0] ss:$8 sps:$4 sm:$0xff]  }
  0xdc   :  { %3125 = vmatpush1.bf16.msra.mxu0 %v4664_v63  ;;  %2674 = vmatprep.subr.bf16.mxu1 %v4669_v0  ;;  %v4712_v63 = vld [vmem:[%s6430_s1 + $0x7e0] ss:$8 sps:$4 sm:$0xff]   ;;  %v4717_v0 = vld [vmem:[%s6430_s1 + $0x3f4] ss:$8 sps:$4 sm:$0xff]  }
  0xdd   :  { %3126 = vmatprep.subr.bf16.mxu0 %v4672_v1  ;;  %2619 = vmatprep.mubr.bf16.mxu1 %v3766_v2  ;;  %v4720_v1 = vld [vmem:[%s6430_s1 + $0x7f4] ss:$8 sps:$4 sm:$0xff]   ;;  %v3704_v2 = vcombine.high %v20_v56, %v28_v59 }
  0xde   :  { %3071 = vmatprep.mubr.bf16.mxu0 %v3774_v3  ;;  %v3712_v3 = vcombine.high %v24_v60, %v32_v61 }
  0xdf   :  { %2675 = vmatpush1.bf16.msra.mxu1 %v4667_v4  ;;  %v4715_v4 = vld [vmem:[%s6430_s1 + $0x3f0] ss:$8 sps:$4 sm:$0xff]  }
  0xe0   :  { %3127 = vmatpush1.bf16.msra.mxu0 %v4670_v5  ;;  %2676 = vmatprep.subr.bf16.mxu1 %v4675_v6  ;;  %v4718_v5 = vld [vmem:[%s6430_s1 + $0x7f0] ss:$8 sps:$4 sm:$0xff]  }
  0xe1   :  { %3128 = vmatprep.subr.bf16.mxu0 %v4678_v7  ;;  %v36_v6 = vld [vmem:[%s6431_s0 + $0x98] sm:$0xff] }
  0xe2   :  { %2620 = vmatmul.mubr.bf16.gmra.mrb[16].mxu1 %v3765_v9  ;;  %v44_v7 = vld [vmem:[%s6431_s0 + $0xd8] sm:$0xff] }
  0xe3   :  { %3072 = vmatmul.mubr.bf16.gmra.mrb[16].mxu0 %v3773_v10  ;;  %2677 = vmatpush1.bf16.msra.mxu1 %v4673_v14  ;;  %v48_v9 = vld [vmem:[%s6431_s0 + $0xf8] sm:$0xff]  ;;  %v3703_v10 = vcombine.low %v20_v56, %v28_v59  ;;  %v3720_v12 = vcombine.high %v36_v6, %v44_v7 }
  0xe4   :  { %3129 = vmatpush1.bf16.msra.mxu0 %v4676_v15  ;;  %2678 = vmatprep.subr.bf16.mxu1 %v4681_v16  ;;  %v3728_v13 = vcombine.high %v40_v8, %v48_v9  ;;  %v52_v14 = vld [vmem:[%s6431_s0 + $0x118] sm:$0xff] }
  0xe5   :  { %3130 = vmatprep.subr.bf16.mxu0 %v4684_v17  ;;  %2629 = vmatprep.mubr.bf16.mxu1 %v3782_v18  ;;  %v60_v15 = vld [vmem:[%s6431_s0 + $0x158] sm:$0xff]  ;;  %v3719_v18 = vcombine.low %v36_v6, %v44_v7 }
  0xe6   :  { %3081 = vmatprep.mubr.bf16.mxu0 %v3790_v19  ;;  %v56_v16 = vld [vmem:[%s6431_s0 + $0x138] sm:$0xff]  ;;  %v3727_v19 = vcombine.low %v40_v8, %v48_v9 }
  0xe7   :  { %2679 = vmatpush1.bf16.msra.mxu1 %v4679_v20  ;;  %v64_v17 = vld [vmem:[%s6431_s0 + $0x178] sm:$0xff]  ;;  %v3736_v20 = vcombine.high %v52_v14, %v60_v15 }
  0xe8   :  { %3131 = vmatpush1.bf16.msra.mxu0 %v4682_v21  ;;  %2680 = vmatprep.subr.bf16.mxu1 %v4687_v22  ;;  %v3744_v21 = vcombine.high %v56_v16, %v64_v17  ;;  %v68_v22 = vld [vmem:[%s6431_s0 + $0x198] sm:$0xff]  ;;  %v3743_v27 = vcombine.low %v56_v16, %v64_v17 }
  0xe9   :  { %3132 = vmatprep.subr.bf16.mxu0 %v4690_v23  ;;  %v76_v23 = vld [vmem:[%s6431_s0 + $0x1d8] sm:$0xff] }
  0xea   :  { %2630 = vmatmul.mubr.bf16.gmra.mrb[20].mxu1 %v3781_v25  ;;  %v80_v25 = vld [vmem:[%s6431_s0 + $0x1f8] sm:$0xff]  ;;  %v3752_v28 = vcombine.high %v68_v22, %v76_v23 }
  0xeb   :  { %3082 = vmatmul.mubr.bf16.gmra.mrb[20].mxu0 %v3789_v26  ;;  %2681 = vmatpush1.bf16.msra.mxu1 %v4685_v30  ;;  %v3735_v26 = vcombine.low %v52_v14, %v60_v15  ;;  %v3760_v29 = vcombine.high %v72_v24, %v80_v25  ;;  %v84_v30 = vld [vmem:[%s6431_s0 + $0x218] sm:$0xff] }
  0xec   :  { %3133 = vmatpush1.bf16.msra.mxu0 %v4688_v31  ;;  %2682 = vmatprep.subr.bf16.mxu1 %v4693_v32  ;;  %v92_v31 = vld [vmem:[%s6431_s0 + $0x258] sm:$0xff] }
  0xed   :  { %3134 = vmatprep.subr.bf16.mxu0 %v4696_v33  ;;  %2639 = vmatprep.mubr.bf16.mxu1 %v3798_v34  ;;  %v88_v32 = vld [vmem:[%s6431_s0 + $0x238] sm:$0xff]  ;;  %v3751_v34 = vcombine.low %v68_v22, %v76_v23 }
  0xee   :  { %3091 = vmatprep.mubr.bf16.mxu0 %v3806_v35  ;;  %v96_v33 = vld [vmem:[%s6431_s0 + $0x278] sm:$0xff]  ;;  %v3759_v35 = vcombine.low %v72_v24, %v80_v25 }
  0xef   :  { %2683 = vmatpush1.bf16.msra.mxu1 %v4691_v36  ;;  %v3768_v36 = vcombine.high %v84_v30, %v92_v31  ;;  %v3775_v43 = vcombine.low %v88_v32, %v96_v33  ;;  %v136_v56 = vld [vmem:[%s6431_s0 + $0x3b8] sm:$0xff] }
  0xf0   :  { %3135 = vmatpush1.bf16.msra.mxu0 %v4694_v37  ;;  %2684 = vmatprep.subr.bf16.mxu1 %v4699_v38  ;;  %v3776_v37 = vcombine.high %v88_v32, %v96_v33  ;;  %v100_v38 = vld [vmem:[%s6431_s0 + $0x298] sm:$0xff] }
  0xf1   :  { %3136 = vmatprep.subr.bf16.mxu0 %v4702_v39  ;;  %v108_v39 = vld [vmem:[%s6431_s0 + $0x2d8] sm:$0xff] }
  0xf2   :  { %2640 = vmatmul.mubr.bf16.gmra.mrb[24].mxu1 %v3797_v41  ;;  %v112_v41 = vld [vmem:[%s6431_s0 + $0x2f8] sm:$0xff]  ;;  %v3784_v44 = vcombine.high %v100_v38, %v108_v39 }
  0xf3   :  { %3092 = vmatmul.mubr.bf16.gmra.mrb[24].mxu0 %v3805_v42  ;;  %2685 = vmatpush1.bf16.msra.mxu1 %v4697_v46  ;;  %v3767_v42 = vcombine.low %v84_v30, %v92_v31  ;;  %v3792_v45 = vcombine.high %v104_v40, %v112_v41  ;;  %v116_v46 = vld [vmem:[%s6431_s0 + $0x318] sm:$0xff] }
  0xf4   :  { %3137 = vmatpush1.bf16.msra.mxu0 %v4700_v47  ;;  %2686 = vmatprep.subr.bf16.mxu1 %v4705_v48  ;;  %v124_v47 = vld [vmem:[%s6431_s0 + $0x358] sm:$0xff] }
  0xf5   :  { %3138 = vmatprep.subr.bf16.mxu0 %v4708_v49  ;;  %2649 = vmatprep.mubr.bf16.mxu1 %v3814_v50  ;;  %v120_v48 = vld [vmem:[%s6431_s0 + $0x338] sm:$0xff]  ;;  %v3783_v50 = vcombine.low %v100_v38, %v108_v39 }
  0xf6   :  { %3101 = vmatprep.mubr.bf16.mxu0 %v3822_v51  ;;  %v128_v49 = vld [vmem:[%s6431_s0 + $0x378] sm:$0xff]  ;;  %v3791_v51 = vcombine.low %v104_v40, %v112_v41 }
  0xf7   :  { %2687 = vmatpush1.bf16.msra.mxu1 %v4703_v52  ;;  %v3800_v52 = vcombine.high %v116_v46, %v124_v47  ;;  %v3807_v59 = vcombine.low %v120_v48, %v128_v49 }
  0xf8   :  { %3139 = vmatpush1.bf16.msra.mxu0 %v4706_v53  ;;  %2688 = vmatprep.subr.bf16.mxu1 %v4711_v54  ;;  %v3808_v53 = vcombine.high %v120_v48, %v128_v49  ;;  %v132_v54 = vld [vmem:[%s6431_s0 + $0x398] sm:$0xff] }
  0xf9   :  { %3140 = vmatprep.subr.bf16.mxu0 %v4714_v55  ;;  %v140_v55 = vld [vmem:[%s6431_s0 + $0x3d8] sm:$0xff] }
  0xfa   :  { %2650 = vmatmul.mubr.bf16.gmra.mrb[28].mxu1 %v3813_v57  ;;  %v144_v57 = vld [vmem:[%s6431_s0 + $0x3f8] sm:$0xff]  ;;  %v3816_v60 = vcombine.high %v132_v54, %v140_v55 }
  0xfb   :  { %3102 = vmatmul.mubr.bf16.gmra.mrb[28].mxu0 %v3821_v58  ;;  %2689 = vmatpush1.bf16.msra.mxu1 %v4709_v62  ;;  %v3799_v58 = vcombine.low %v116_v46, %v124_v47  ;;  %v3824_v61 = vcombine.high %v136_v56, %v144_v57  ;;  %v3815_v62 = vcombine.low %v132_v54, %v140_v55 }
  0xfc   :  { %3141 = vmatpush1.bf16.msra.mxu0 %v4712_v63  ;;  %2690 = vmatprep.subr.bf16.mxu1 %v4717_v0  ;;  %v3823_v63 = vcombine.low %v136_v56, %v144_v57 }
  0xfd   :  { %3142 = vmatprep.subr.bf16.mxu0 %v4720_v1  ;;  %2692 = vmatprep.mubr.bf16.mxu1 %v3704_v2 }
  0xfe   :  { %3144 = vmatprep.mubr.bf16.mxu0 %v3712_v3 }
  0xff   :  { %2691 = vmatpush1.bf16.msra.mxu1 %v4715_v4 }
 0x100   :  { %3143 = vmatpush1.bf16.msra.mxu0 %v4718_v5 }
 0x102   :  { %2693 = vmatmul.mubr.bf16.vlgmr.msra.gmra.mrb[0].mxu1 %v3703_v10 }
 0x103   :  { %3145 = vmatmul.mubr.bf16.vlgmr.msra.gmra.mrb[0].mxu0 %v3711_v11  ;;  %2702 = vmatprep.mubr.bf16.mxu1 %v3720_v12 }
 0x104   :  { %3154 = vmatprep.mubr.bf16.mxu0 %v3728_v13 }
 0x10a   :  { %2703 = vmatmul.mubr.bf16.gmra.mrb[4].mxu1 %v3719_v18 }
 0x10b   :  { %3155 = vmatmul.mubr.bf16.gmra.mrb[4].mxu0 %v3727_v19  ;;  %2712 = vmatprep.mubr.bf16.mxu1 %v3736_v20 }
 0x10c   :  { %3164 = vmatprep.mubr.bf16.mxu0 %v3744_v21 }
 0x112   :  { %2713 = vmatmul.mubr.bf16.gmra.mrb[8].mxu1 %v3735_v26 }
 0x113   :  { %3165 = vmatmul.mubr.bf16.gmra.mrb[8].mxu0 %v3743_v27  ;;  %2722 = vmatprep.mubr.bf16.mxu1 %v3752_v28 }
 0x114   :  { %3174 = vmatprep.mubr.bf16.mxu0 %v3760_v29 }
 0x11a   :  { %2723 = vmatmul.mubr.bf16.gmra.mrb[12].mxu1 %v3751_v34 }
 0x11b   :  { %3175 = vmatmul.mubr.bf16.gmra.mrb[12].mxu0 %v3759_v35  ;;  %2732 = vmatprep.mubr.bf16.mxu1 %v3768_v36 }
 0x11c   :  { %3184 = vmatprep.mubr.bf16.mxu0 %v3776_v37 }
 0x122   :  { %2733 = vmatmul.mubr.bf16.gmra.mrb[16].mxu1 %v3767_v42 }
 0x123   :  { %3185 = vmatmul.mubr.bf16.gmra.mrb[16].mxu0 %v3775_v43  ;;  %2742 = vmatprep.mubr.bf16.mxu1 %v3784_v44 }
 0x124   :  { %3194 = vmatprep.mubr.bf16.mxu0 %v3792_v45 }
 0x12a   :  { %2743 = vmatmul.mubr.bf16.gmra.mrb[20].mxu1 %v3783_v50 }
 0x12b   :  { %3195 = vmatmul.mubr.bf16.gmra.mrb[20].mxu0 %v3791_v51  ;;  %2752 = vmatprep.mubr.bf16.mxu1 %v3800_v52 }
 0x12c   :  { %3204 = vmatprep.mubr.bf16.mxu0 %v3808_v53 }
 0x132   :  { %2753 = vmatmul.mubr.bf16.gmra.mrb[24].mxu1 %v3799_v58 }
 0x133   :  { %3205 = vmatmul.mubr.bf16.gmra.mrb[24].mxu0 %v3807_v59  ;;  %2762 = vmatprep.mubr.bf16.mxu1 %v3816_v60 }
 0x134   :  { %3214 = vmatprep.mubr.bf16.mxu0 %v3824_v61 }
 0x13a   :  { %2763 = vmatmul.mubr.bf16.gmra.mrb[28].mxu1 %v3815_v62 }
 0x13b   :  { %3215 = vmatmul.mubr.bf16.gmra.mrb[28].mxu0 %v3823_v63 }
 0x1d5   :  { %v2694_v0 = vpop.f32.mrb[0].mxu1 }
 0x1d6   :  { %v3146_v1 = vpop.f32.mrb[0].mxu0  ;;  %v2696_v3 = vpop.f32.mrb[1].mxu1 }
 0x1d7   :  { %v5902_v2 = vadd.f32 %v3146_v1, %v2694_v0  ;;  %v3148_v4 = vpop.f32.mrb[1].mxu0  ;;  %v2698_v6 = vpop.f32.mrb[2].mxu1 }
 0x1d8   :  { %v5904_v5 = vadd.f32 %v3148_v4, %v2696_v3  ;;  %v3150_v7 = vpop.f32.mrb[2].mxu0  ;;  %v2700_v9 = vpop.f32.mrb[3].mxu1 }
 0x1d9   :  { %v5906_v8 = vadd.f32 %v3150_v7, %v2698_v6  ;;  %v3152_v10 = vpop.f32.mrb[3].mxu0  ;;  %v3267_v16 = vmul.f32 %v5902_v2, %v5902_v2 }
 0x1da   :  { %v5908_v11 = vadd.f32 %v3152_v10, %v2700_v9  ;;  %v3268_v21 = vmul.f32 %v5904_v5, %v5904_v5 }
 0x1db   :  { %v3269_v12 = vmul.f32 %v5906_v8, %v5906_v8  ;;  %v3225_v17 = vadd.f32 %v5906_v8, %v5902_v2 }
 0x1dc   :  { %v3270_v13 = vmul.f32 %v5908_v11, %v5908_v11  ;;  %v3246_v22 = vadd.f32 %v5908_v11, %v5904_v5 }
 0x1dd   :  { %v2704_v14 = vpop.f32.mrb[4].mxu1  ;;  %v3299_v26 = vadd.f32 %v3269_v12, %v3267_v16 }
 0x1de   :  { %v3156_v15 = vpop.f32.mrb[4].mxu0  ;;  %v2706_v19 = vpop.f32.mrb[5].mxu1  ;;  %v3320_v32 = vadd.f32 %v3270_v13, %v3268_v21 }
 0x1df   :  { %v5918_v18 = vadd.f32 %v3156_v15, %v2704_v14  ;;  %v3158_v20 = vpop.f32.mrb[5].mxu0  ;;  %v2708_v24 = vpop.f32.mrb[6].mxu1 }
 0x1e0   :  { %v5924_v23 = vadd.f32 %v3158_v20, %v2706_v19  ;;  %v3160_v25 = vpop.f32.mrb[6].mxu0  ;;  %v2710_v30 = vpop.f32.mrb[7].mxu1 }
 0x1e1   :  { %v3226_v27 = vadd.f32 %v5918_v18, %v3225_v17  ;;  %v3271_v28 = vmul.f32 %v5918_v18, %v5918_v18  ;;  %v5929_v29 = vadd.f32 %v3160_v25, %v2708_v24  ;;  %v3162_v31 = vpop.f32.mrb[7].mxu0 }
 0x1e2   :  { %v3247_v33 = vadd.f32 %v5924_v23, %v3246_v22  ;;  %v3272_v34 = vmul.f32 %v5924_v23, %v5924_v23  ;;  %v5934_v35 = vadd.f32 %v3162_v31, %v2710_v30 }
 0x1e3   :  { %v3300_v36 = vadd.f32 %v3299_v26, %v3271_v28  ;;  %v3227_v37 = vadd.f32 %v5929_v29, %v3226_v27  ;;  %v3273_v38 = vmul.f32 %v5929_v29, %v5929_v29 }
 0x1e4   :  { %v3321_v39 = vadd.f32 %v3320_v32, %v3272_v34  ;;  %v3248_v40 = vadd.f32 %v5934_v35, %v3247_v33  ;;  %v3274_v41 = vmul.f32 %v5934_v35, %v5934_v35 }
 0x1e5   :  { %v3301_v42 = vadd.f32 %v3300_v36, %v3273_v38  ;;  %v2714_v44 = vpop.f32.mrb[8].mxu1 }
 0x1e6   :  { %v3322_v43 = vadd.f32 %v3321_v39, %v3274_v41  ;;  %v3166_v45 = vpop.f32.mrb[8].mxu0  ;;  %v2716_v47 = vpop.f32.mrb[9].mxu1 }
 0x1e7   :  { %v5942_v46 = vadd.f32 %v3166_v45, %v2714_v44  ;;  %v3168_v48 = vpop.f32.mrb[9].mxu0  ;;  %v2718_v50 = vpop.f32.mrb[10].mxu1 }
 0x1e8   :  { %v5944_v49 = vadd.f32 %v3168_v48, %v2716_v47  ;;  %v3170_v51 = vpop.f32.mrb[10].mxu0  ;;  %v2720_v55 = vpop.f32.mrb[11].mxu1 }
 0x1e9   :  { %v3228_v52 = vadd.f32 %v5942_v46, %v3227_v37  ;;  %v3275_v53 = vmul.f32 %v5942_v46, %v5942_v46  ;;  %v5949_v54 = vadd.f32 %v3170_v51, %v2718_v50  ;;  %v3172_v56 = vpop.f32.mrb[11].mxu0 }
 0x1ea   :  { %v3249_v57 = vadd.f32 %v5944_v49, %v3248_v40  ;;  %v3276_v58 = vmul.f32 %v5944_v49, %v5944_v49  ;;  %v5954_v59 = vadd.f32 %v3172_v56, %v2720_v55 }
 0x1eb   :  { %v3302_v60 = vadd.f32 %v3301_v42, %v3275_v53  ;;  %v3229_v61 = vadd.f32 %v5949_v54, %v3228_v52  ;;  %v3277_v62 = vmul.f32 %v5949_v54, %v5949_v54 }
 0x1ec   :  { %v3323_v63 = vadd.f32 %v3322_v43, %v3276_v58  ;;  %v3250_v0 = vadd.f32 %v5954_v59, %v3249_v57  ;;  %v3278_v1 = vmul.f32 %v5954_v59, %v5954_v59 }
 0x1ed   :  { %v3303_v3 = vadd.f32 %v3302_v60, %v3277_v62  ;;  %v2724_v6 = vpop.f32.mrb[12].mxu1 }
 0x1ee   :  { %v3324_v4 = vadd.f32 %v3323_v63, %v3278_v1  ;;  %v3176_v7 = vpop.f32.mrb[12].mxu0  ;;  %v2726_v10 = vpop.f32.mrb[13].mxu1 }
 0x1ef   :  { %v5962_v9 = vadd.f32 %v3176_v7, %v2724_v6  ;;  %v3178_v12 = vpop.f32.mrb[13].mxu0  ;;  %v2728_v14 = vpop.f32.mrb[14].mxu1 }
 0x1f0   :  { %v5964_v13 = vadd.f32 %v3178_v12, %v2726_v10  ;;  %v3180_v15 = vpop.f32.mrb[14].mxu0  ;;  %v2730_v20 = vpop.f32.mrb[15].mxu1 }
 0x1f1   :  { %v3230_v16 = vadd.f32 %v5962_v9, %v3229_v61  ;;  %v3279_v17 = vmul.f32 %v5962_v9, %v5962_v9  ;;  %v5969_v19 = vadd.f32 %v3180_v15, %v2728_v14  ;;  %v3182_v21 = vpop.f32.mrb[15].mxu0 }
 0x1f2   :  { %v3251_v22 = vadd.f32 %v5964_v13, %v3250_v0  ;;  %v3280_v24 = vmul.f32 %v5964_v13, %v5964_v13  ;;  %v5974_v25 = vadd.f32 %v3182_v21, %v2730_v20 }
 0x1f3   :  { %v3304_v26 = vadd.f32 %v3303_v3, %v3279_v17  ;;  %v3231_v27 = vadd.f32 %v5969_v19, %v3230_v16  ;;  %v3281_v28 = vmul.f32 %v5969_v19, %v5969_v19 }
 0x1f4   :  { %v3325_v30 = vadd.f32 %v3324_v4, %v3280_v24  ;;  %v3252_v31 = vadd.f32 %v5974_v25, %v3251_v22  ;;  %v3282_v32 = vmul.f32 %v5974_v25, %v5974_v25 }
 0x1f5   :  { %v3305_v33 = vadd.f32 %v3304_v26, %v3281_v28  ;;  %v2734_v36 = vpop.f32.mrb[16].mxu1 }
 0x1f6   :  { %v3326_v34 = vadd.f32 %v3325_v30, %v3282_v32  ;;  %v3186_v37 = vpop.f32.mrb[16].mxu0  ;;  %v2736_v39 = vpop.f32.mrb[17].mxu1 }
 0x1f7   :  { %v5982_v38 = vadd.f32 %v3186_v37, %v2734_v36  ;;  %v3188_v40 = vpop.f32.mrb[17].mxu0  ;;  %v2738_v42 = vpop.f32.mrb[18].mxu1 }
 0x1f8   :  { %v5984_v41 = vadd.f32 %v3188_v40, %v2736_v39  ;;  %v3190_v43 = vpop.f32.mrb[18].mxu0  ;;  %v2740_v48 = vpop.f32.mrb[19].mxu1 }
 0x1f9   :  { %v3232_v44 = vadd.f32 %v5982_v38, %v3231_v27  ;;  %v3283_v45 = vmul.f32 %v5982_v38, %v5982_v38  ;;  %v5989_v47 = vadd.f32 %v3190_v43, %v2738_v42  ;;  %v3192_v50 = vpop.f32.mrb[19].mxu0 }
 0x1fa   :  { %v3253_v51 = vadd.f32 %v5984_v41, %v3252_v31  ;;  %v3284_v52 = vmul.f32 %v5984_v41, %v5984_v41  ;;  %v5994_v53 = vadd.f32 %v3192_v50, %v2740_v48 }
 0x1fb   :  { %v3306_v55 = vadd.f32 %v3305_v33, %v3283_v45  ;;  %v3233_v56 = vadd.f32 %v5989_v47, %v3232_v44  ;;  %v3285_v57 = vmul.f32 %v5989_v47, %v5989_v47 }
 0x1fc   :  { %v3327_v58 = vadd.f32 %v3326_v34, %v3284_v52  ;;  %v3254_v60 = vadd.f32 %v5994_v53, %v3253_v51  ;;  %v3286_v61 = vmul.f32 %v5994_v53, %v5994_v53 }
 0x1fd   :  { %v3307_v62 = vadd.f32 %v3306_v55, %v3285_v57  ;;  %v2744_v0 = vpop.f32.mrb[20].mxu1 }
 0x1fe   :  { %v3328_v63 = vadd.f32 %v3327_v58, %v3286_v61  ;;  %v3196_v1 = vpop.f32.mrb[20].mxu0  ;;  %v2746_v4 = vpop.f32.mrb[21].mxu1 }
 0x1ff   :  { %v6002_v3 = vadd.f32 %v3196_v1, %v2744_v0  ;;  %v3198_v6 = vpop.f32.mrb[21].mxu0  ;;  %v2748_v10 = vpop.f32.mrb[22].mxu1 }
 0x200   :  { %v6004_v7 = vadd.f32 %v3198_v6, %v2746_v4  ;;  %v3200_v12 = vpop.f32.mrb[22].mxu0  ;;  %v2750_v17 = vpop.f32.mrb[23].mxu1 }
 0x201   :  { %v3234_v14 = vadd.f32 %v6002_v3, %v3233_v56  ;;  %v3287_v15 = vmul.f32 %v6002_v3, %v6002_v3  ;;  %v6009_v16 = vadd.f32 %v3200_v12, %v2748_v10  ;;  %v3202_v20 = vpop.f32.mrb[23].mxu0 }
 0x202   :  { %v3255_v21 = vadd.f32 %v6004_v7, %v3254_v60  ;;  %v3288_v22 = vmul.f32 %v6004_v7, %v6004_v7  ;;  %v6014_v24 = vadd.f32 %v3202_v20, %v2750_v17 }
 0x203   :  { %v3308_v26 = vadd.f32 %v3307_v62, %v3287_v15  ;;  %v3235_v27 = vadd.f32 %v6009_v16, %v3234_v14  ;;  %v3289_v28 = vmul.f32 %v6009_v16, %v6009_v16 }
 0x204   :  { %v3329_v30 = vadd.f32 %v3328_v63, %v3288_v22  ;;  %v3256_v31 = vadd.f32 %v6014_v24, %v3255_v21  ;;  %v3290_v32 = vmul.f32 %v6014_v24, %v6014_v24 }
 0x205   :  { %v3309_v33 = vadd.f32 %v3308_v26, %v3289_v28  ;;  %v2754_v36 = vpop.f32.mrb[24].mxu1 }
 0x206   :  { %v3330_v34 = vadd.f32 %v3329_v30, %v3290_v32  ;;  %v3206_v37 = vpop.f32.mrb[24].mxu0  ;;  %v2756_v40 = vpop.f32.mrb[25].mxu1 }
 0x207   :  { %v6022_v39 = vadd.f32 %v3206_v37, %v2754_v36  ;;  %v3208_v42 = vpop.f32.mrb[25].mxu0  ;;  %v2758_v44 = vpop.f32.mrb[26].mxu1 }
 0x208   :  { %v6024_v43 = vadd.f32 %v3208_v42, %v2756_v40  ;;  %v3210_v45 = vpop.f32.mrb[26].mxu0  ;;  %v2760_v52 = vpop.f32.mrb[27].mxu1 }
 0x209   :  { %v3236_v48 = vadd.f32 %v6022_v39, %v3235_v27  ;;  %v3291_v50 = vmul.f32 %v6022_v39, %v6022_v39  ;;  %v6029_v51 = vadd.f32 %v3210_v45, %v2758_v44  ;;  %v3212_v55 = vpop.f32.mrb[27].mxu0 }
 0x20a   :  { %v3257_v56 = vadd.f32 %v6024_v43, %v3256_v31  ;;  %v3292_v57 = vmul.f32 %v6024_v43, %v6024_v43  ;;  %v6034_v58 = vadd.f32 %v3212_v55, %v2760_v52 }
 0x20b   :  { %v3310_v60 = vadd.f32 %v3309_v33, %v3291_v50  ;;  %v3237_v61 = vadd.f32 %v6029_v51, %v3236_v48  ;;  %v3293_v62 = vmul.f32 %v6029_v51, %v6029_v51 }
 0x20c   :  { %v3331_v63 = vadd.f32 %v3330_v34, %v3292_v57  ;;  %v3258_v0 = vadd.f32 %v6034_v58, %v3257_v56  ;;  %v3294_v1 = vmul.f32 %v6034_v58, %v6034_v58 }
 0x20d   :  { %v3311_v4 = vadd.f32 %v3310_v60, %v3293_v62  ;;  %v2764_v10 = vpop.f32.mrb[28].mxu1 }
 0x20e   :  { %v3332_v6 = vadd.f32 %v3331_v63, %v3294_v1  ;;  %v3216_v12 = vpop.f32.mrb[28].mxu0  ;;  %v2766_v15 = vpop.f32.mrb[29].mxu1 }
 0x20f   :  { %v6042_v14 = vadd.f32 %v3216_v12, %v2764_v10  ;;  %v3218_v17 = vpop.f32.mrb[29].mxu0  ;;  %v2768_v21 = vpop.f32.mrb[30].mxu1 }
 0x210   :  { %v6044_v20 = vadd.f32 %v3218_v17, %v2766_v15  ;;  %v3220_v22 = vpop.f32.mrb[30].mxu0  ;;  %v2770_v30 = vpop.f32.mrb[31].mxu1 }
 0x211   :  { %v3238_v26 = vadd.f32 %v6042_v14, %v3237_v61  ;;  %v3295_v27 = vmul.f32 %v6042_v14, %v6042_v14  ;;  %v6049_v28 = vadd.f32 %v3220_v22, %v2768_v21  ;;  %v3222_v31 = vpop.f32.mrb[31].mxu0 }
 0x212   :  { %v3259_v32 = vadd.f32 %v6044_v20, %v3258_v0  ;;  %v3296_v33 = vmul.f32 %v6044_v20, %v6044_v20  ;;  %v6054_v34 = vadd.f32 %v3222_v31, %v2770_v30 }
 0x213   :  { %v3312_v36 = vadd.f32 %v3311_v4, %v3295_v27  ;;  %v3239_v37 = vadd.f32 %v6049_v28, %v3238_v26  ;;  %v3297_v40 = vmul.f32 %v6049_v28, %v6049_v28 }
 0x214   :  { %v3333_v42 = vadd.f32 %v3332_v6, %v3296_v33  ;;  %v3260_v44 = vadd.f32 %v6054_v34, %v3259_v32  ;;  %v3298_v45 = vmul.f32 %v6054_v34, %v6054_v34 }
 0x215   :  { %v3240_v48 = vrot.slane %v3239_v37, 4  ;;  %v3313_v50 = vadd.f32 %v3312_v36, %v3297_v40  ;;  %v3357_v36 = vlaneseq }
 0x216   :  { %v3261_v52 = vrot.slane %v3260_v44, 4  ;;  %v3334_v55 = vadd.f32 %v3333_v42, %v3298_v45 }
 0x217   :  { %v3241_v56 = vadd.f32 %v3240_v48, %v3239_v37  ;;  %v3314_v57 = vrot.slane %v3313_v50, 4 }
 0x218   :  { %v3262_v60 = vadd.f32 %v3261_v52, %v3260_v44  ;;  %v3335_v61 = vrot.slane %v3334_v55, 4 }
 0x219   :  { %v3242_v62 = vrot.slane %v3241_v56, 2  ;;  %v3315_v63 = vadd.f32 %v3314_v57, %v3313_v50 }
 0x21a   :  { %v3263_v0 = vrot.slane %v3262_v60, 2  ;;  %v3336_v1 = vadd.f32 %v3335_v61, %v3334_v55  ;;  %v6072_v55 = vshrl.u32 %v3357_v36, 7 }
 0x21b   :  { %v3243_v4 = vadd.f32 %v3242_v62, %v3241_v56  ;;  %v3316_v10 = vrot.slane %v3315_v63, 2 }
 0x21c   :  { %v3264_v6 = vadd.f32 %v3263_v0, %v3262_v60  ;;  %v3337_v12 = vrot.slane %v3336_v1, 2 }
 0x21d   :  { %v3244_v15 = vrot.slane %v3243_v4, 1  ;;  %v3317_v17 = vadd.f32 %v3316_v10, %v3315_v63 }
 0x21e   :  { %v3265_v21 = vrot.slane %v3264_v6, 1  ;;  %v3338_v22 = vadd.f32 %v3337_v12, %v3336_v1 }
 0x21f   :  { %v3245_v26 = vadd.f32 %v3244_v15, %v3243_v4  ;;  %v3318_v27 = vrot.slane %v3317_v17, 1 }
 0x220   :  { %v3266_v30 = vadd.f32 %v3265_v21, %v3264_v6  ;;  %v3339_v31 = vrot.slane %v3338_v22, 1 }
 0x221   :  { %v3319_v32 = vadd.f32 %v3318_v27, %v3317_v17  ;;  %v6062_v33 = vmul.f32 0.0078125, %v3245_v26 }
 0x222   :  { %v3340_v37 = vadd.f32 %v3339_v31, %v3338_v22  ;;  %v6064_v40 = vmul.f32 0.0078125, %v3266_v30 }
 0x223   :  { %v3343_v42 = vmul.f32 0.0078125, %v3319_v32  ;;  %v3345_v44 = vmul.f32 %v6062_v33, %v6062_v33  ;;  %v3399_v45 = vsub.f32 %v6049_v28, %v6062_v33  ;;  %v3373_v56 = vsub.f32 %v5918_v18, %v6062_v33 }
 0x224   :  { %v3344_v48 = vmul.f32 0.0078125, %v3340_v37  ;;  %v3346_v50 = vmul.f32 %v6064_v40, %v6064_v40  ;;  %v3374_v57 = vsub.f32 %v5924_v23, %v6064_v40  ;;  %v3375_v61 = vsub.f32 %v5929_v29, %v6062_v33 }
 0x225   :  { %v3347_v52 = vsub.f32 %v3343_v42, %v3345_v44  ;;  %v3376_v28 = vsub.f32 %v5934_v35, %v6064_v40  ;;  %v3377_v62 = vsub.f32 %v5942_v46, %v6062_v33  ;;  %v3378_v0 = vsub.f32 %v5944_v49, %v6064_v40 }
 0x226   :  { %v3348_v60 = vsub.f32 %v3344_v48, %v3346_v50  ;;  %v3379_v18 = vsub.f32 %v5949_v54, %v6062_v33  ;;  %v3380_v23 = vsub.f32 %v5954_v59, %v6064_v40  ;;  %v3381_v29 = vsub.f32 %v5962_v9, %v6062_v33 }
 0x227   :  { %v3349_v63 = vmax.f32 %v3347_v52, 0.0  ;;  %v3382_v35 = vsub.f32 %v5964_v13, %v6064_v40  ;;  %v3383_v46 = vsub.f32 %v5969_v19, %v6062_v33  ;;  %v3384_v49 = vsub.f32 %v5974_v25, %v6064_v40 }
 0x228   :  { %v3350_v1 = vmax.f32 %v3348_v60, 0.0  ;;  %v3385_v54 = vsub.f32 %v5982_v38, %v6062_v33  ;;  %v3386_v59 = vsub.f32 %v5984_v41, %v6064_v40  ;;  %v3387_v9 = vsub.f32 %v5989_v47, %v6062_v33 }
 0x229   :  { %v3351_v4 = vadd.f32 1e-05, %v3349_v63  ;;  %v3388_v13 = vsub.f32 %v5994_v53, %v6064_v40  ;;  %v3389_v19 = vsub.f32 %v6002_v3, %v6062_v33  ;;  %v3390_v25 = vsub.f32 %v6004_v7, %v6064_v40 }
 0x22a   :  { %v3352_v10 = vadd.f32 1e-05, %v3350_v1  ;;  %v3391_v38 = vsub.f32 %v6009_v16, %v6062_v33  ;;  %v3392_v41 = vsub.f32 %v6014_v24, %v6064_v40  ;;  %v3393_v47 = vsub.f32 %v6022_v39, %v6062_v33 }
 0x22b   :  { %4721 = vrsqrt.f32 %v3351_v4  ;;  %v3394_v53 = vsub.f32 %v6024_v43, %v6064_v40  ;;  %v3395_v3 = vsub.f32 %v6029_v51, %v6062_v33  ;;  %v3396_v6 = vsub.f32 %v6034_v58, %v6064_v40  ;;  %v3355_v43 = vld [vmem:[%s6432_s2] sm:$0x3] }
 0x22c   :  { %4723 = vrsqrt.f32 %v3352_v10  ;;  %v3397_v7 = vsub.f32 %v6042_v14, %v6062_v33  ;;  %v3398_v16 = vsub.f32 %v6044_v20, %v6064_v40  ;;  %v3400_v24 = vsub.f32 %v6054_v34, %v6064_v40  ;;  %v3441_v14 = vld [vmem:[%s6433_s3] sm:$0x3] }
 0x22d   :  { %v3359_v39 = vsub.s32 0, %v6072_v55  ;;  %v3363_v51 = vsub.s32 1, %v6072_v55  ;;  %v3369_v34 = vsub.f32 %v5902_v2, %v6062_v33  ;;  %v3371_v26 = vsub.f32 %v5906_v8, %v6062_v33 }
 0x22e   :  { %v3370_v30 = vsub.f32 %v5904_v5, %v6064_v40  ;;  %v3372_v31 = vsub.f32 %v5908_v11, %v6064_v40 }
 0x22f   :  { %v3360_v12 = vrot.slane %v3355_v43, %v3359_v39  ;;  %v3364_v15 = vrot.slane %v3355_v43, %v3363_v51  ;;  %v6140_v27 = vrot.slane %v3441_v14, %v3359_v39 }
 0x235   :  { %v4722_v58 = vpop.eup %4721 }
 0x236   :  { %v4724_v17 = vpop.eup %4723  ;;  %v3367_v21 = vmul.f32 %v4722_v58, %v3360_v12  ;;  %v3450_v58 = vrot.slane %v3441_v14, %v3363_v51 }
 0x237   :  { %v3368_v20 = vmul.f32 %v4724_v17, %v3364_v15 }
 0x238   :  { %v3404_v22 = vrot.slane %v3367_v21, %v3359_v39 }
 0x239   :  { %v3408_v32 = vrot.slane %v3368_v20, %v3359_v39 }
 0x23a   :  { %v3439_v36 = vmul.f32 %v3404_v22, %v3399_v45  ;;  %v3409_v37 = vmul.f32 %v3404_v22, %v3369_v34  ;;  %v3411_v42 = vmul.f32 %v3404_v22, %v3371_v26  ;;  %v3413_v44 = vmul.f32 %v3404_v22, %v3373_v56 }
 0x23b   :  { %v3410_v48 = vmul.f32 %v3408_v32, %v3370_v30  ;;  %v3412_v50 = vmul.f32 %v3408_v32, %v3372_v31  ;;  %v3414_v52 = vmul.f32 %v3408_v32, %v3374_v57  ;;  %v3415_v2 = vmul.f32 %v3404_v22, %v3375_v61 }
 0x23c   :  { %v3416_v55 = vmul.f32 %v3408_v32, %v3376_v28  ;;  %v3417_v60 = vmul.f32 %v3404_v22, %v3377_v62  ;;  %v3418_v8 = vmul.f32 %v3408_v32, %v3378_v0  ;;  %v3419_v33 = vmul.f32 %v3404_v22, %v3379_v18 }
 0x23d   :  { %v3420_v63 = vmul.f32 %v3408_v32, %v3380_v23  ;;  %v3421_v1 = vmul.f32 %v3404_v22, %v3381_v29  ;;  %v3422_v4 = vmul.f32 %v3408_v32, %v3382_v35  ;;  %v3483_v5 = vadd.f32 %v6140_v27, %v3439_v36 }
 0x23e   :  { %v3423_v10 = vmul.f32 %v3404_v22, %v3383_v46  ;;  %v3424_v11 = vmul.f32 %v3408_v32, %v3384_v49  ;;  %v3425_v40 = vmul.f32 %v3404_v22, %v3385_v54  ;;  %v3426_v45 = vmul.f32 %v3408_v32, %v3386_v59 }
 0x23f   :  { %v3427_v39 = vmul.f32 %v3404_v22, %v3387_v9  ;;  %v3428_v43 = vmul.f32 %v3408_v32, %v3388_v13  ;;  %v3429_v56 = vmul.f32 %v3404_v22, %v3389_v19  ;;  %v3430_v12 = vmul.f32 %v3408_v32, %v3390_v25 }
 0x240   :  { %v3431_v15 = vmul.f32 %v3404_v22, %v3391_v38  ;;  %v3432_v57 = vmul.f32 %v3408_v32, %v3392_v41  ;;  %v3433_v61 = vmul.f32 %v3404_v22, %v3393_v47  ;;  %v3434_v28 = vmul.f32 %v3408_v32, %v3394_v53 }
 0x241   :  { %v3435_v62 = vmul.f32 %v3404_v22, %v3395_v3  ;;  %v3436_v0 = vmul.f32 %v3408_v32, %v3396_v6  ;;  %v3437_v18 = vmul.f32 %v3404_v22, %v3397_v7  ;;  %v3438_v23 = vmul.f32 %v3408_v32, %v3398_v16 }
 0x242   :  { %v3440_v29 = vmul.f32 %v3408_v32, %v3400_v24  ;;  %v3547_v35 = vmul.f32 0.2, %v3483_v5  ;;  %vm3515_vm0 = vcmp.gt.f32.partialorder %v3483_v5, 0.0  ;;  %v3453_v49 = vadd.f32 %v6140_v27, %v3409_v37 }
 0x243   :  { %v6150_v54 = vadd.f32 %v3450_v58, %v3410_v48  ;;  %v6153_v59 = vadd.f32 %v6140_v27, %v3411_v42  ;;  %v6155_v9 = vadd.f32 %v3450_v58, %v3412_v50  ;;  %v6158_v13 = vadd.f32 %v6140_v27, %v3413_v44 }
 0x244   :  { %v6147_v46 = vsel %vm3515_vm0, %v3483_v5, %v3547_v35  ;;  %v6160_v19 = vadd.f32 %v3450_v58, %v3414_v52  ;;  %v6163_v25 = vadd.f32 %v6140_v27, %v3415_v2  ;;  %v6165_v38 = vadd.f32 %v3450_v58, %v3416_v55 }
 0x245   :  { %v6168_v41 = vadd.f32 %v6140_v27, %v3417_v60  ;;  %v6170_v47 = vadd.f32 %v3450_v58, %v3418_v8  ;;  %v6173_v53 = vadd.f32 %v6140_v27, %v3419_v33  ;;  %v6175_v3 = vadd.f32 %v3450_v58, %v3420_v63 }
 0x246   :  { %v6178_v6 = vadd.f32 %v6140_v27, %v3421_v1  ;;  %v6180_v7 = vadd.f32 %v3450_v58, %v3422_v4  ;;  %v6183_v16 = vadd.f32 %v6140_v27, %v3423_v10  ;;  %v6185_v24 = vadd.f32 %v3450_v58, %v3424_v11 }
 0x247   :  { %v6188_v51 = vadd.f32 %v6140_v27, %v3425_v40  ;;  %v6190_v17 = vadd.f32 %v3450_v58, %v3426_v45  ;;  %v6193_v21 = vadd.f32 %v6140_v27, %v3427_v39  ;;  %v6195_v14 = vadd.f32 %v3450_v58, %v3428_v43 }
 0x248   :  { %v6198_v20 = vadd.f32 %v6140_v27, %v3429_v56  ;;  %v6200_v22 = vadd.f32 %v3450_v58, %v3430_v12  ;;  %v6203_v34 = vadd.f32 %v6140_v27, %v3431_v15  ;;  %v6205_v26 = vadd.f32 %v3450_v58, %v3432_v57 }
 0x249   :  { %v6208_v30 = vadd.f32 %v6140_v27, %v3433_v61  ;;  %v6210_v31 = vadd.f32 %v3450_v58, %v3434_v28  ;;  %v6213_v32 = vadd.f32 %v6140_v27, %v3435_v62  ;;  %v6215_v36 = vadd.f32 %v3450_v58, %v3436_v0 }
 0x24a   :  { %v6218_v37 = vadd.f32 %v6140_v27, %v3437_v18  ;;  %v6220_v42 = vadd.f32 %v3450_v58, %v3438_v23  ;;  %vm3485_vm1 = vcmp.gt.f32.partialorder %v3453_v49, 0.0  ;;  %vm3486_vm2 = vcmp.gt.f32.partialorder %v6150_v54, 0.0 }
 0x24b   :  { %vm3487_vm3 = vcmp.gt.f32.partialorder %v6153_v59, 0.0  ;;  %vm3488_vm4 = vcmp.gt.f32.partialorder %v6155_v9, 0.0  ;;  %vm3489_vm5 = vcmp.gt.f32.partialorder %v6158_v13, 0.0  ;;  %vm3490_vm6 = vcmp.gt.f32.partialorder %v6160_v19, 0.0 }
 0x24c   :  { %vm3491_vm7 = vcmp.gt.f32.partialorder %v6163_v25, 0.0  ;;  %vm3492_vm8 = vcmp.gt.f32.partialorder %v6165_v38, 0.0  ;;  %vm3495_vm11 = vcmp.gt.f32.partialorder %v6173_v53, 0.0  ;;  %v3517_v27 = vmul.f32 0.2, %v3453_v49 }
 0x24d   :  { %v3518_v44 = vmul.f32 0.2, %v6150_v54  ;;  %v6236_v48 = vadd.f32 %v3450_v58, %v3440_v29  ;;  %vm3500_vm0 = vcmp.gt.f32.partialorder %v6185_v24, 0.0  ;;  %v3519_v50 = vmul.f32 0.2, %v6153_v59 }
 0x24e   :  { %v3520_v52 = vmul.f32 0.2, %v6155_v9  ;;  %v3521_v2 = vmul.f32 0.2, %v6158_v13  ;;  %vm3505_vm12 = vcmp.gt.f32.partialorder %v6198_v20, 0.0  ;;  %vm3506_vm15 = vcmp.gt.f32.partialorder %v6200_v22, 0.0 }
 0x24f   :  { %v3522_v55 = vmul.f32 0.2, %v6160_v19  ;;  %v3523_v60 = vmul.f32 0.2, %v6163_v25  ;;  %v3524_v8 = vmul.f32 0.2, %v6165_v38  ;;  %v6253_v33 = vsel %vm3485_vm1, %v3453_v49, %v3517_v27 }
 0x250   :  { %vm3510_vm13 = vcmp.gt.f32.partialorder %v6210_v31, 0.0  ;;  %v3525_v63 = vmul.f32 0.2, %v6168_v41  ;;  %v3526_v1 = vmul.f32 0.2, %v6170_v47  ;;  %v6265_v5 = vsel %vm3486_vm2, %v6150_v54, %v3518_v44 }
 0x251   :  { %v3527_v4 = vmul.f32 0.2, %v6173_v53  ;;  %vm3511_vm1 = vcmp.gt.f32.partialorder %v6213_v32, 0.0  ;;  %vm3512_vm10 = vcmp.gt.f32.partialorder %v6215_v36, 0.0  ;;  %vm3513_vm9 = vcmp.gt.f32.partialorder %v6218_v37, 0.0 }
 0x252   :  { %vm3514_vm14 = vcmp.gt.f32.partialorder %v6220_v42, 0.0  ;;  %v3528_v10 = vmul.f32 0.2, %v6175_v3  ;;  %v3529_v11 = vmul.f32 0.2, %v6178_v6  ;;  %v3551_v45 = vsel %vm3487_vm3, %v6153_v59, %v3519_v50 }
 0x253   :  { %v3530_v40 = vmul.f32 0.2, %v6180_v7  ;;  %vm3516_vm2 = vcmp.gt.f32.partialorder %v6236_v48, 0.0  ;;  %v3531_v39 = vmul.f32 0.2, %v6183_v16  ;;  %v3552_v12 = vsel %vm3488_vm4, %v6155_v9, %v3520_v52 }
 0x254   :  { %v3532_v43 = vmul.f32 0.2, %v6185_v24  ;;  %v3533_v56 = vmul.f32 0.2, %v6188_v51  ;;  %v3534_v15 = vmul.f32 0.2, %v6190_v17  ;;  %v3553_v28 = vsel %vm3489_vm5, %v6158_v13, %v3521_v2 }
 0x255   :  { %v3535_v57 = vmul.f32 0.2, %v6193_v21  ;;  %v3536_v61 = vmul.f32 0.2, %v6195_v14  ;;  %v3537_v62 = vmul.f32 0.2, %v6198_v20  ;;  %v3554_v23 = vsel %vm3490_vm6, %v6160_v19, %v3522_v55 }
 0x256   :  { %v3538_v0 = vmul.f32 0.2, %v6200_v22  ;;  %v3539_v18 = vmul.f32 0.2, %v6203_v34  ;;  %v3540_v29 = vmul.f32 0.2, %v6205_v26  ;;  %v3555_v49 = vsel %vm3491_vm7, %v6163_v25, %v3523_v60 }
 0x257   :  { %v3541_v35 = vmul.f32 0.2, %v6208_v30  ;;  %v3542_v58 = vmul.f32 0.2, %v6210_v31  ;;  %v3543_v54 = vmul.f32 0.2, %v6213_v32  ;;  %v3556_v13 = vsel %vm3492_vm8, %v6165_v38, %v3524_v8 }
 0x258   :  { %v3544_v59 = vmul.f32 0.2, %v6215_v36  ;;  %v3545_v9 = vmul.f32 0.2, %v6218_v37  ;;  %v3546_v19 = vmul.f32 0.2, %v6220_v42  ;;  %v3559_v50 = vsel %vm3495_vm11, %v6173_v53, %v3527_v4 }
 0x259   :  { %v3548_v27 = vmul.f32 0.2, %v6236_v48  ;;  %vm6435_vm3 = vcmp.gt.f32.partialorder %v6168_v41, 0.0  ;;  %vm6436_vm4 = vcmp.gt.f32.partialorder %v6170_v47, 0.0  ;;  %vm6437_vm5 = vcmp.gt.f32.partialorder %v6175_v3, 0.0 }
 0x25a   :  { %v3557_v44 = vsel %vm6435_vm3, %v6168_v41, %v3525_v63  ;;  %v3558_v25 = vsel %vm6436_vm4, %v6170_v47, %v3526_v1  ;;  %v3560_v38 = vsel %vm6437_vm5, %v6175_v3, %v3528_v10  ;;  %vm6438_vm6 = vcmp.gt.f32.partialorder %v6178_v6, 0.0 }
 0x25b   :  { %v3561_v52 = vsel %vm6438_vm6, %v6178_v6, %v3529_v11  ;;  %vm6439_vm7 = vcmp.gt.f32.partialorder %v6180_v7, 0.0  ;;  %vm6440_vm8 = vcmp.gt.f32.partialorder %v6183_v16, 0.0  ;;  %v3564_v53 = vsel %vm3500_vm0, %v6185_v24, %v3532_v43 }
 0x25c   :  { %v3562_v41 = vsel %vm6439_vm7, %v6180_v7, %v3530_v40  ;;  %v3563_v47 = vsel %vm6440_vm8, %v6183_v16, %v3531_v39  ;;  %vm6441_vm11 = vcmp.gt.f32.partialorder %v6188_v51, 0.0  ;;  %vm6442_vm3 = vcmp.gt.f32.partialorder %v6190_v17, 0.0 }
 0x25d   :  { %v3565_v3 = vsel %vm6441_vm11, %v6188_v51, %v3533_v56  ;;  %v3566_v6 = vsel %vm6442_vm3, %v6190_v17, %v3534_v15  ;;  %vm6443_vm4 = vcmp.gt.f32.partialorder %v6193_v21, 0.0  ;;  %vm6444_vm5 = vcmp.gt.f32.partialorder %v6195_v14, 0.0 }
 0x25e   :  { %v3567_v7 = vsel %vm6443_vm4, %v6193_v21, %v3535_v57  ;;  %v3568_v16 = vsel %vm6444_vm5, %v6195_v14, %v3536_v61  ;;  %v3569_v24 = vsel %vm3505_vm12, %v6198_v20, %v3537_v62  ;;  %v3570_v51 = vsel %vm3506_vm15, %v6200_v22, %v3538_v0 }
 0x25f   :  { %vm6445_vm0 = vcmp.gt.f32.partialorder %v6203_v34, 0.0  ;;  %vm6446_vm6 = vcmp.gt.f32.partialorder %v6205_v26, 0.0  ;;  %vm6447_vm7 = vcmp.gt.f32.partialorder %v6208_v30, 0.0  ;;  %v3574_v20 = vsel %vm3510_vm13, %v6210_v31, %v3542_v58 }
 0x260   :  { %v3571_v17 = vsel %vm6445_vm0, %v6203_v34, %v3539_v18  ;;  %v3572_v21 = vsel %vm6446_vm6, %v6205_v26, %v3540_v29  ;;  %v3573_v14 = vsel %vm6447_vm7, %v6208_v30, %v3541_v35  ;;  %v3575_v22 = vsel %vm3511_vm1, %v6213_v32, %v3543_v54 }
 0x261   :  { %v3576_v34 = vsel %vm3512_vm10, %v6215_v36, %v3544_v59  ;;  %v3577_v26 = vsel %vm3513_vm9, %v6218_v37, %v3545_v9  ;;  %v3578_v30 = vsel %vm3514_vm14, %v6220_v42, %v3546_v19  ;;  %v3580_v31 = vsel %vm3516_vm2, %v6236_v48, %v3548_v27 }
 0x262   :  { %v4097_v2 = vpack.c.bf16 %v6265_v5, %v6253_v33  ;;  %v4098_v32 = vpack.c.bf16 %v3552_v12, %v3551_v45  ;;  %v4099_v55 = vpack.c.bf16 %v3554_v23, %v3553_v28  ;;  %v4100_v60 = vpack.c.bf16 %v3556_v13, %v3555_v49 }
 0x263   :  { %v4101_v8 = vpack.c.bf16 %v3558_v25, %v3557_v44  ;;  %v4102_v36 = vpack.c.bf16 %v3560_v38, %v3559_v50  ;;  %v4103_v63 = vpack.c.bf16 %v3562_v41, %v3561_v52  ;;  %v4104_v1 = vpack.c.bf16 %v3564_v53, %v3563_v47 }
 0x264   :  { %v4105_v4 = vpack.c.bf16 %v3566_v6, %v3565_v3  ;;  %v4106_v37 = vpack.c.bf16 %v3568_v16, %v3567_v7  ;;  %v4107_v10 = vpack.c.bf16 %v3570_v51, %v3569_v24  ;;  %3677 = vst [vmem:[%s6434_s4] sm:$0xff] %v4097_v2  ;;  %3678 = vst [vmem:[%s6434_s4 + $0x8] sm:$0xff] %v4098_v32 }
 0x265   :  { %3679 = vst [vmem:[%s6434_s4 + $0x10] sm:$0xff] %v4099_v55  ;;  %v4108_v42 = vpack.c.bf16 %v3572_v21, %v3571_v17  ;;  %v4109_v48 = vpack.c.bf16 %v3574_v20, %v3573_v14  ;;  %v4110_v33 = vpack.c.bf16 %v3576_v34, %v3575_v22  ;;  %v4111_v5 = vpack.c.bf16 %v3578_v30, %v3577_v26 }
 0x266   :  { %3680 = vst [vmem:[%s6434_s4 + $0x18] sm:$0xff] %v4100_v60  ;;  %3681 = vst [vmem:[%s6434_s4 + $0x20] sm:$0xff] %v4101_v8  ;;  %v4112_v11 = vpack.c.bf16 %v3580_v31, %v6147_v46 }
 0x267   :  { %3682 = vst [vmem:[%s6434_s4 + $0x28] sm:$0xff] %v4102_v36  ;;  %3683 = vst [vmem:[%s6434_s4 + $0x30] sm:$0xff] %v4103_v63 }
 0x268   :  { %3684 = vst [vmem:[%s6434_s4 + $0x38] sm:$0xff] %v4104_v1  ;;  %3685 = vst [vmem:[%s6434_s4 + $0x40] sm:$0xff] %v4105_v4 }
 0x269   :  { %3686 = vst [vmem:[%s6434_s4 + $0x48] sm:$0xff] %v4106_v37  ;;  %3687 = vst [vmem:[%s6434_s4 + $0x50] sm:$0xff] %v4107_v10 }
 0x26a   :  { %3688 = vst [vmem:[%s6434_s4 + $0x58] sm:$0xff] %v4108_v42  ;;  %3689 = vst [vmem:[%s6434_s4 + $0x60] sm:$0xff] %v4109_v48 }
 0x26b   :  { %3690 = vst [vmem:[%s6434_s4 + $0x68] sm:$0xff] %v4110_v33  ;;  %3691 = vst [vmem:[%s6434_s4 + $0x70] sm:$0xff] %v4111_v5 }
 0x26c   :  { %3692 = vst [vmem:[%s6434_s4 + $0x78] sm:$0xff] %v4112_v11 }

// kernel: _lambda_.9
= control target key start
LH: loop header
LB: loop body
LE: loop exit
PB: predicated region body
PF: predicated region fallthrough
CT: control target
= control target key end

     0   :  { %v75_v0 = vlaneseq  ;;  %v1518_v10 = vmov 1983009808   ;;  %vm1371_vm0 = vcmask 1041408   ;;  %vm1507_vm1 = vcmask 1024   ;;  %s2499_s1 = inlined_call_operand.vmem [shape: bf16[1,8192], index: 1, kind: input, shape index: {}]   ;;  %s2500_s0 = inlined_call_operand.vmem [shape: bf16[2,8192], index: 0, kind: input, shape index: {}]   ;;  %s2501_s2 = inlined_call_operand.vmem [shape: f32[2,1], index: 2, kind: output, shape index: {}]  }
   0x1   :  { %v39_v1 = vld [vmem:[%s2499_s1 + $0x20] sm:$0xff]  ;;  %v40_v2 = vld [vmem:[%s2499_s1 + $0x28] sm:$0xff]  ;;  %v41_v4 = vld [vmem:[%s2499_s1 + $0x30] sm:$0xff]  ;;  %v1556_v11 = vunpack.c.l.s4 %v1518_v10 }
   0x2   :  { %v1540_v3 = vshrl.u32 %v75_v0, 7  ;;  %v42_v5 = vld [vmem:[%s2499_s1 + $0x38] sm:$0xff]  ;;  %v1548_v6 = vunpack.c.l.bf16 %v39_v1  ;;  %v1550_v7 = vunpack.c.h.bf16 %v39_v1  ;;  %v1552_v8 = vunpack.c.l.bf16 %v40_v2  ;;  %v1637_v48 = vld [vmem:[%s2500_s0] sm:$0xff]  ;;  %v1642_v49 = vld [vmem:[%s2500_s0 + $0x8] sm:$0xff] }
   0x3   :  { %v1554_v9 = vunpack.c.h.bf16 %v40_v2  ;;  %v1570_v16 = vunpack.c.l.bf16 %v41_v4  ;;  %v1572_v17 = vunpack.c.h.bf16 %v41_v4  ;;  %v1574_v18 = vunpack.c.l.bf16 %v42_v5  ;;  %2522 = vst [vmem:[#allocation4_spill] sm:$0xff] %v1637_v48  ;;  %2523 = vst [vmem:[#allocation5_spill] sm:$0xff] %v1642_v49  ;;  %v1655_v54 = vld [vmem:[%s2500_s0 + $0x20] sm:$0xff]  ;;  %v1663_v56 = vld [vmem:[%s2500_s0 + $0x28] sm:$0xff] }
   0x4   :  { %v1559_v12 = vsub.s32 0, %v1540_v3  ;;  %v1562_v13 = vsub.s32 2, %v1540_v3  ;;  %v1565_v14 = vsub.s32 4, %v1540_v3  ;;  %v1568_v15 = vsub.s32 6, %v1540_v3  ;;  %v35_v55 = vld [vmem:[%s2499_s1] sm:$0xff]  ;;  %v1668_v57 = vld [vmem:[%s2500_s0 + $0x30] sm:$0xff] }
   0x5   :  { %v1576_v19 = vunpack.c.h.bf16 %v42_v5  ;;  %2524 = vst [vmem:[#allocation6_spill] sm:$0xff] %v1668_v57  ;;  %v1673_v58 = vld [vmem:[%s2500_s0 + $0x38] sm:$0xff]  ;;  %v36_v0 = vld [vmem:[%s2499_s1 + $0x8] sm:$0xff]  ;;  %v37_v1 = vld [vmem:[%s2499_s1 + $0x10] sm:$0xff]  ;;  %v1686_v2 = vunpack.c.l.bf16 %v35_v55  ;;  %v719_v4 = vunpack.c.0.s8 %v1556_v11  ;;  %v1701_v11 = vunpack.c.h.bf16 %v35_v55 }
   0x6   :  { %2520 = vst [vmem:[#allocation2_spill] sm:$0xff] %v1562_v13  ;;  %2521 = vst [vmem:[#allocation3_spill] sm:$0xff] %v1565_v14  ;;  %v206_v20 = vrot.slane %v1548_v6, %v1559_v12  ;;  %v210_v21 = vrot.slane %v1548_v6, %v1562_v13  ;;  %v214_v22 = vrot.slane %v1548_v6, %v1565_v14  ;;  %v1696_v60 = vld [vmem:[%s2499_s1 + $0x18] sm:$0xff]  ;;  %v1703_v5 = vunpack.c.l.bf16 %v36_v0 }
   0x7   :  { %v218_v23 = vrot.slane %v1548_v6, %v1568_v15  ;;  %v222_v24 = vrot.slane %v1550_v7, %v1559_v12  ;;  %v226_v25 = vrot.slane %v1550_v7, %v1562_v13  ;;  %v230_v26 = vrot.slane %v1550_v7, %v1565_v14  ;;  %2525 = vst [vmem:[#allocation7_spill] sm:$0xff] %v1673_v58 }
   0x8   :  { %v234_v27 = vrot.slane %v1550_v7, %v1568_v15  ;;  %v238_v28 = vrot.slane %v1552_v8, %v1559_v12  ;;  %v242_v29 = vrot.slane %v1552_v8, %v1562_v13  ;;  %v246_v30 = vrot.slane %v1552_v8, %v1565_v14  ;;  %2526 = vst [vmem:[#allocation8_spill] sm:$0xff] %v1696_v60 }
   0x9   :  { %v250_v31 = vrot.slane %v1552_v8, %v1568_v15  ;;  %v254_v32 = vrot.slane %v1554_v9, %v1559_v12  ;;  %v258_v33 = vrot.slane %v1554_v9, %v1562_v13  ;;  %v262_v34 = vrot.slane %v1554_v9, %v1565_v14 }
   0xa   :  { %v266_v35 = vrot.slane %v1554_v9, %v1568_v15  ;;  %v270_v36 = vrot.slane %v1570_v16, %v1559_v12  ;;  %v274_v37 = vrot.slane %v1570_v16, %v1562_v13  ;;  %v278_v38 = vrot.slane %v1570_v16, %v1565_v14 }
   0xb   :  { %v282_v39 = vrot.slane %v1570_v16, %v1568_v15  ;;  %v286_v40 = vrot.slane %v1572_v17, %v1559_v12  ;;  %v290_v41 = vrot.slane %v1572_v17, %v1562_v13  ;;  %v294_v42 = vrot.slane %v1572_v17, %v1565_v14 }
   0xc   :  { %v298_v43 = vrot.slane %v1572_v17, %v1568_v15  ;;  %v302_v44 = vrot.slane %v1574_v18, %v1559_v12  ;;  %v306_v45 = vrot.slane %v1574_v18, %v1562_v13  ;;  %v310_v46 = vrot.slane %v1574_v18, %v1565_v14 }
   0xd   :  { %v314_v47 = vrot.slane %v1574_v18, %v1568_v15  ;;  %v318_v50 = vrot.slane %v1576_v19, %v1559_v12  ;;  %v322_v51 = vrot.slane %v1576_v19, %v1562_v13  ;;  %v1705_v10 = vunpack.c.h.bf16 %v36_v0 }
   0xe   :  { %v1707_v62 = vunpack.c.l.bf16 %v37_v1  ;;  %v1709_v61 = vunpack.c.h.bf16 %v37_v1  ;;  %v1712_v52 = vunpack.c.l.bf16 %v1696_v60  ;;  %v78_v59 = vrot.slane %v1686_v2, %v1559_v12 }
   0xf   :  { %v82_v63 = vrot.slane %v1686_v2, %v1562_v13  ;;  %v1719_v55 = vsub.s32 %v719_v4, %v1540_v3  ;;  %v1725_v0 = vrot.slane %v206_v20, %v1559_v12  ;;  %v1731_v1 = vrot.slane %v210_v21, %v1559_v12 }
  0x10   :  { %2527 = vst [vmem:[#allocation9_spill] sm:$0xff] %v1709_v61  ;;  %2528 = vst [vmem:[#allocation10_spill] sm:$0xff] %v1712_v52  ;;  %v1737_v53 = vrot.slane %v214_v22, %v1559_v12  ;;  %v1743_v3 = vrot.slane %v218_v23, %v1559_v12  ;;  %v1749_v20 = vrot.slane %v222_v24, %v1559_v12 }
  0x11   :  { %2529 = vst [vmem:[#allocation11_spill] sm:$0xff] %v1719_v55  ;;  %v1755_v21 = vrot.slane %v226_v25, %v1559_v12  ;;  %v1761_v22 = vrot.slane %v230_v26, %v1559_v12  ;;  %v1767_v6 = vrot.slane %v234_v27, %v1559_v12  ;;  %v1773_v23 = vrot.slane %v238_v28, %v1559_v12 }
  0x12   :  { %v1779_v24 = vrot.slane %v242_v29, %v1559_v12  ;;  %v1785_v25 = vrot.slane %v246_v30, %v1559_v12  ;;  %v1791_v7 = vrot.slane %v250_v31, %v1559_v12  ;;  %v1797_v26 = vrot.slane %v254_v32, %v1559_v12 }
  0x13   :  { %v1803_v27 = vrot.slane %v258_v33, %v1559_v12  ;;  %v1809_v28 = vrot.slane %v262_v34, %v1559_v12  ;;  %v1815_v8 = vrot.slane %v266_v35, %v1559_v12  ;;  %v1821_v29 = vrot.slane %v270_v36, %v1559_v12 }
  0x14   :  { %v1827_v30 = vrot.slane %v274_v37, %v1559_v12  ;;  %v1833_v31 = vrot.slane %v278_v38, %v1559_v12  ;;  %v1839_v9 = vrot.slane %v282_v39, %v1559_v12  ;;  %v1845_v32 = vrot.slane %v286_v40, %v1559_v12 }
  0x15   :  { %v1851_v33 = vrot.slane %v290_v41, %v1559_v12  ;;  %v1857_v34 = vrot.slane %v294_v42, %v1559_v12  ;;  %v1863_v16 = vrot.slane %v298_v43, %v1559_v12  ;;  %v1869_v35 = vrot.slane %v302_v44, %v1559_v12 }
  0x16   :  { %v1875_v36 = vrot.slane %v306_v45, %v1559_v12  ;;  %v1881_v37 = vrot.slane %v310_v46, %v1559_v12  ;;  %v1887_v17 = vrot.slane %v314_v47, %v1559_v12  ;;  %v1893_v38 = vrot.slane %v318_v50, %v1559_v12 }
  0x17   :  { %v1899_v39 = vrot.slane %v322_v51, %v1559_v12  ;;  %v2530_v40 = vrot.slane %v1576_v19, %v1565_v14  ;;  %v2531_v18 = vrot.slane %v1576_v19, %v1568_v15  ;;  %v86_v43 = vrot.slane %v1686_v2, %v1565_v14 }
  0x18   :  { %v90_v44 = vrot.slane %v1686_v2, %v1568_v15  ;;  %v94_v45 = vrot.slane %v1701_v11, %v1559_v12  ;;  %v98_v46 = vrot.slane %v1701_v11, %v1562_v13  ;;  %v102_v47 = vrot.slane %v1701_v11, %v1565_v14 }
  0x19   :  { %v1905_v41 = vrot.slane %v2530_v40, %v1559_v12  ;;  %v1911_v42 = vrot.slane %v2531_v18, %v1559_v12  ;;  %v106_v19 = vrot.slane %v1701_v11, %v1568_v15  ;;  %v110_v50 = vrot.slane %v1703_v5, %v1559_v12 }
  0x1a   :  { %v114_v51 = vrot.slane %v1703_v5, %v1562_v13  ;;  %v118_v2 = vrot.slane %v1703_v5, %v1565_v14  ;;  %v122_v4 = vrot.slane %v1703_v5, %v1568_v15  ;;  %v126_v40 = vrot.slane %v1705_v10, %v1559_v12 }
  0x1b   :  { %v130_v18 = vrot.slane %v1705_v10, %v1562_v13  ;;  %v134_v11 = vrot.slane %v1705_v10, %v1565_v14  ;;  %v138_v49 = vrot.slane %v1705_v10, %v1568_v15  ;;  %v142_v48 = vrot.slane %v1707_v62, %v1559_v12 }
  0x1c   :  { %v146_v60 = vrot.slane %v1707_v62, %v1562_v13  ;;  %v150_v5 = vrot.slane %v1707_v62, %v1565_v14  ;;  %v154_v52 = vrot.slane %v1707_v62, %v1568_v15  ;;  %v1950_v61 = vrot.slane %v78_v59, %v1559_v12 }
  0x1d   :  { %v1953_v58 = vrot.slane %v82_v63, %v1559_v12  ;;  %v1956_v10 = vrot.slane %v86_v43, %v1559_v12  ;;  %v1959_v57 = vrot.slane %v90_v44, %v1559_v12  ;;  %v1962_v13 = vrot.slane %v94_v45, %v1559_v12 }
  0x1e   :  { %v1965_v14 = vrot.slane %v98_v46, %v1559_v12  ;;  %v1968_v62 = vrot.slane %v102_v47, %v1559_v12  ;;  %v1971_v59 = vrot.slane %v106_v19, %v1559_v12  ;;  %v1974_v63 = vrot.slane %v110_v50, %v1559_v12 }
  0x1f   :  { %v1977_v43 = vrot.slane %v114_v51, %v1559_v12  ;;  %v1980_v44 = vrot.slane %v118_v2, %v1559_v12  ;;  %v1983_v45 = vrot.slane %v122_v4, %v1559_v12  ;;  %v1986_v46 = vrot.slane %v126_v40, %v1559_v12 }
  0x20   :  { %v1989_v47 = vrot.slane %v130_v18, %v1559_v12  ;;  %v1992_v19 = vrot.slane %v134_v11, %v1559_v12  ;;  %v1995_v50 = vrot.slane %v138_v49, %v1559_v12  ;;  %v1998_v51 = vrot.slane %v142_v48, %v1559_v12 }
  0x21   :  { %v851_v2 = vcombine.low %v1725_v0, %v1731_v1  ;;  %v2003_v4 = vrot.slane %v146_v60, %v1559_v12  ;;  %v2006_v40 = vrot.slane %v150_v5, %v1559_v12  ;;  %v2009_v18 = vrot.slane %v154_v52, %v1559_v12 }
  0x22   :  { %v852_v11 = vcombine.low %v1737_v53, %v1743_v3  ;;  %v715_v49 = vcombine.low %v1950_v61, %v1953_v58  ;;  %v868_v0 = vcombine.low %v1749_v20, %v1755_v21  ;;  %v869_v60 = vcombine.low %v1761_v22, %v1767_v6 }
  0x23   :  { %v859_v48 = vrot.slane %v851_v2, %v1719_v55  ;;  %v716_v1 = vcombine.low %v1956_v10, %v1959_v57  ;;  %v885_v5 = vcombine.low %v1773_v23, %v1779_v24  ;;  %v886_v53 = vcombine.low %v1785_v25, %v1791_v7 }
  0x24   :  { %v866_v52 = vrot.slane %v852_v11, %v1719_v55  ;;  %v876_v58 = vrot.slane %v868_v0, %v1719_v55  ;;  %v883_v61 = vrot.slane %v869_v60, %v1719_v55  ;;  %v902_v3 = vcombine.low %v1797_v26, %v1803_v27 }
  0x25   :  { %v903_v20 = vcombine.low %v1809_v28, %v1815_v8  ;;  %v893_v57 = vrot.slane %v885_v5, %v1719_v55  ;;  %v900_v22 = vrot.slane %v886_v53, %v1719_v55  ;;  %v919_v6 = vcombine.low %v1821_v29, %v1827_v30  ;;  %v2539_v5 = vld [vmem:[#allocation7_spill] sm:$0xff] }
  0x26   :  { %v867_v21 = vcombine.low %v859_v48, %v866_v52  ;;  %v884_v23 = vcombine.low %v876_v58, %v883_v61  ;;  %v910_v24 = vrot.slane %v902_v3, %v1719_v55  ;;  %v920_v7 = vcombine.low %v1833_v31, %v1839_v9 }
  0x27   :  { %v917_v25 = vrot.slane %v903_v20, %v1719_v55  ;;  %v901_v26 = vcombine.low %v893_v57, %v900_v22  ;;  %v927_v27 = vrot.slane %v919_v6, %v1719_v55  ;;  %v936_v28 = vcombine.low %v1845_v32, %v1851_v33  ;;  %v2543_v20 = vld [vmem:[#allocation2_spill] sm:$0xff]  ;;  %v2544_v6 = vld [vmem:[#allocation3_spill] sm:$0xff] }
  0x28   :  { %v937_v8 = vcombine.low %v1857_v34, %v1863_v16  ;;  %v934_v29 = vrot.slane %v920_v7, %v1719_v55  ;;  %v953_v30 = vcombine.low %v1869_v35, %v1875_v36  ;;  %v954_v2 = vcombine.low %v1881_v37, %v1887_v17 }
  0x29   :  { %v918_v10 = vcombine.low %v910_v24, %v917_v25  ;;  %v944_v31 = vrot.slane %v936_v28, %v1719_v55  ;;  %v970_v11 = vcombine.low %v1893_v38, %v1899_v39  ;;  %v971_v32 = vcombine.low %v1905_v41, %v1911_v42 }
  0x2a   :  { %v951_v9 = vrot.slane %v937_v8, %v1719_v55  ;;  %v732_v33 = vcombine.low %v1962_v13, %v1965_v14  ;;  %v935_v34 = vcombine.low %v927_v27, %v934_v29  ;;  %v961_v16 = vrot.slane %v953_v30, %v1719_v55  ;;  %v2124_v29 = vld [vmem:[%s2500_s0 + $0x10] sm:$0xff] }
  0x2b   :  { %v968_v35 = vrot.slane %v954_v2, %v1719_v55  ;;  %v733_v36 = vcombine.low %v1968_v62, %v1971_v59  ;;  %v978_v17 = vrot.slane %v970_v11, %v1719_v55  ;;  %v985_v48 = vrot.slane %v971_v32, %v1719_v55 }
  0x2c   :  { %v952_v37 = vcombine.low %v944_v31, %v951_v9  ;;  %v749_v38 = vcombine.low %v1974_v63, %v1977_v43  ;;  %v750_v39 = vcombine.low %v1980_v44, %v1983_v45  ;;  %v766_v13 = vcombine.low %v1986_v46, %v1989_v47 }
  0x2d   :  { %v969_v14 = vcombine.low %v961_v16, %v968_v35  ;;  %v723_v41 = vrot.slane %v715_v49, %v1719_v55  ;;  %v730_v42 = vrot.slane %v716_v1, %v1719_v55  ;;  %v767_v62 = vcombine.low %v1992_v19, %v1995_v50  ;;  %v2536_v49 = vld [vmem:[#allocation6_spill] sm:$0xff]  ;;  %v2546_v35 = vld [vmem:[#allocation8_spill] sm:$0xff] }
  0x2e   :  { %v986_v59 = vcombine.low %v978_v17, %v985_v48  ;;  %v2532_v0 = vunpack.c.l.bf16 %v1655_v54  ;;  %v2533_v63 = vunpack.c.h.bf16 %v1655_v54  ;;  %v2534_v44 = vunpack.c.l.bf16 %v1663_v56 }
  0x2f   :  { %v2535_v46 = vunpack.c.h.bf16 %v1663_v56  ;;  %v2537_v52 = vunpack.c.l.bf16 %v2536_v49  ;;  %v2538_v19 = vunpack.c.h.bf16 %v2536_v49  ;;  %v2540_v53 = vunpack.c.l.bf16 %v2539_v5  ;;  %v2542_v56 = vld [vmem:[#allocation9_spill] sm:$0xff] }
  0x30   :  { %v1011_v60 = vmul.f32 %v867_v21, %v2532_v0  ;;  %v1012_v43 = vmul.f32 %v884_v23, %v2533_v63  ;;  %v1013_v45 = vmul.f32 %v901_v26, %v2534_v44  ;;  %v2541_v54 = vunpack.c.h.bf16 %v2539_v5  ;;  %v2545_v26 = vld [vmem:[#allocation10_spill] sm:$0xff] }
  0x31   :  { %v2083_v47 = vmul.f32 %v918_v10, %v2535_v46  ;;  %v2087_v1 = vmul.f32 %v935_v34, %v2537_v52  ;;  %v2091_v50 = vmul.f32 %v952_v37, %v2538_v19  ;;  %v2095_v58 = vmul.f32 %v969_v14, %v2540_v53  ;;  %v2551_v19 = vld [vmem:[#allocation5_spill] sm:$0xff] }
  0x32   :  { %v2099_v61 = vmul.f32 %v986_v59, %v2541_v54  ;;  %v158_v3 = vrot.slane %v2542_v56, %v1559_v12  ;;  %v162_v21 = vrot.slane %v2542_v56, %v2543_v20  ;;  %v740_v57 = vrot.slane %v732_v33, %v1719_v55 }
  0x33   :  { %v747_v22 = vrot.slane %v733_v36, %v1719_v55  ;;  %v166_v23 = vrot.slane %v2542_v56, %v2544_v6  ;;  %v170_v24 = vrot.slane %v2542_v56, %v1568_v15  ;;  %v783_v25 = vcombine.low %v1998_v51, %v2003_v4 }
  0x34   :  { %v784_v7 = vcombine.low %v2006_v40, %v2009_v18  ;;  %v174_v27 = vrot.slane %v2545_v26, %v1559_v12  ;;  %v178_v28 = vrot.slane %v2545_v26, %v2543_v20  ;;  %v757_v8 = vrot.slane %v749_v38, %v1719_v55 }
  0x35   :  { %v764_v10 = vrot.slane %v750_v39, %v1719_v55  ;;  %v182_v51 = vrot.slane %v2545_v26, %v2544_v6  ;;  %v731_v4 = vcombine.low %v723_v41, %v730_v42  ;;  %v774_v40 = vrot.slane %v766_v13, %v1719_v55  ;;  %v2547_v13 = vld [vmem:[#allocation4_spill] sm:$0xff] }
  0x36   :  { %v781_v18 = vrot.slane %v767_v62, %v1719_v55  ;;  %v186_v30 = vrot.slane %v2545_v26, %v1568_v15  ;;  %v478_v2 = vrot.slane %v158_v3, %v1559_v12  ;;  %v482_v31 = vrot.slane %v162_v21, %v1559_v12 }
  0x37   :  { %v748_v9 = vcombine.low %v740_v57, %v747_v22  ;;  %v486_v11 = vrot.slane %v166_v23, %v1559_v12  ;;  %v490_v32 = vrot.slane %v170_v24, %v1559_v12  ;;  %v791_v33 = vrot.slane %v783_v25, %v1719_v55 }
  0x38   :  { %v798_v34 = vrot.slane %v784_v7, %v1719_v55  ;;  %v23_v16 = vunpack.c.l.bf16 %v2124_v29  ;;  %v2140_v36 = vunpack.c.h.bf16 %v2546_v35  ;;  %v2143_v37 = vrot.slane %v174_v27, %v1559_v12 }
  0x39   :  { %v765_v17 = vcombine.low %v757_v8, %v764_v10  ;;  %v2146_v48 = vrot.slane %v178_v28, %v1559_v12  ;;  %v2149_v38 = vrot.slane %v182_v51, %v1559_v12  ;;  %v782_v39 = vcombine.low %v774_v40, %v781_v18 }
  0x3a   :  { %v2548_v14 = vunpack.c.l.bf16 %v2547_v13  ;;  %v2154_v42 = vrot.slane %v186_v30, %v1559_v12  ;;  %v800_v62 = vcombine.low %v478_v2, %v482_v31  ;;  %v2549_v59 = vunpack.c.h.bf16 %v2547_v13 }
  0x3b   :  { %v1171_v63 = vcombine.high %v1011_v60, %v1011_v60  ;;  %v799_v44 = vcombine.low %v791_v33, %v798_v34  ;;  %v801_v46 = vcombine.low %v486_v11, %v490_v32  ;;  %v2159_v52 = vrot.slane %v1011_v60, %v1719_v55 }
  0x3c   :  { %v1003_v41 = vmul.f32 %v731_v4, %v2548_v14  ;;  %v1004_v0 = vmul.f32 %v748_v9, %v2549_v59  ;;  %v2552_v5 = vunpack.c.l.bf16 %v2551_v19  ;;  %v1188_v56 = vcombine.high %v1012_v43, %v1012_v43 }
  0x3d   :  { %2550 = vst [vmem:[#allocation6_spill] sm:$0xff] %v2159_v52  ;;  %v2164_v54 = vrot.slane %v1171_v63, %v1719_v55  ;;  %v2167_v3 = vrot.slane %v1012_v43, %v1719_v55  ;;  %v2553_v21 = vunpack.c.h.bf16 %v2551_v19  ;;  %v1205_v23 = vcombine.high %v1013_v45, %v1013_v45 }
  0x3e   :  { %v1035_v49 = vcombine.high %v1003_v41, %v1003_v41  ;;  %v1005_v53 = vmul.f32 %v765_v17, %v2552_v5  ;;  %v1042_v22 = vrot.slane %v1003_v41, %v1719_v55  ;;  %v2173_v24 = vrot.slane %v1013_v45, %v1719_v55 }
  0x3f   :  { %v1006_v57 = vmul.f32 %v782_v39, %v2553_v21  ;;  %v1052_v60 = vcombine.high %v1004_v0, %v1004_v0  ;;  %v1059_v25 = vrot.slane %v1004_v0, %v1719_v55  ;;  %v2177_v7 = vrot.slane %v1188_v56, %v1719_v55 }
  0x40   :  { %v1222_v26 = vcombine.high %v2083_v47, %v2083_v47  ;;  %v1049_v43 = vrot.slane %v1035_v49, %v1719_v55  ;;  %v2183_v27 = vrot.slane %v1205_v23, %v1719_v55  ;;  %v2187_v28 = vrot.slane %v2083_v47, %v1719_v55 }
  0x41   :  { %v1239_v45 = vcombine.high %v2087_v1, %v2087_v1  ;;  %v1069_v8 = vcombine.high %v1005_v53, %v1005_v53  ;;  %v2196_v51 = vrot.slane %v2087_v1, %v1719_v55  ;;  %v1256_v4 = vcombine.high %v2091_v50, %v2091_v50 }
  0x42   :  { %v2192_v10 = vrot.slane %v1222_v26, %v1719_v55  ;;  %v1050_v40 = vcombine.high %v1042_v22, %v1042_v22  ;;  %v1076_v18 = vrot.slane %v1005_v53, %v1719_v55  ;;  %v2206_v30 = vrot.slane %v2091_v50, %v1719_v55 }
  0x43   :  { %v2202_v47 = vrot.slane %v1239_v45, %v1719_v55  ;;  %v1086_v2 = vcombine.high %v1006_v57, %v1006_v57  ;;  %v2209_v31 = vrot.slane %v1006_v57, %v1719_v55  ;;  %v2212_v1 = vrot.slane %v1256_v4, %v1719_v55 }
  0x44   :  { %v1273_v9 = vcombine.high %v2095_v58, %v2095_v58  ;;  %v1051_v11 = vcombine.high %v1049_v43, %v1049_v43  ;;  %v1066_v32 = vrot.slane %v1052_v60, %v1719_v55  ;;  %v2219_v33 = vrot.slane %v2095_v58, %v1719_v55 }
  0x45   :  { %v1290_v50 = vcombine.high %v2099_v61, %v2099_v61  ;;  %v1083_v34 = vrot.slane %v1069_v8, %v1719_v55  ;;  %v2229_v17 = vrot.slane %v2099_v61, %v1719_v55  ;;  %v1372_v39 = vsel %vm1371_vm0, %v1042_v22, 0.0 }
  0x46   :  { %v2225_v35 = vrot.slane %v1273_v9, %v1719_v55  ;;  %v2233_v13 = vrot.slane %v800_v62, %v1719_v55  ;;  %v1373_v14 = vsel %vm1371_vm0, %v1050_v40, 0.0  ;;  %v1375_v41 = vsel %vm1371_vm0, %v1049_v43, 0.0 }
  0x47   :  { %v2236_v58 = vrot.slane %v1290_v50, %v1719_v55  ;;  %v2241_v59 = vrot.slane %v801_v46, %v1719_v55  ;;  %v2243_v0 = vmul.f32 %v799_v44, %v23_v16  ;;  %v1067_v63 = vcombine.high %v1059_v25, %v1059_v25 }
  0x48   :  { %v1374_v61 = vadd.f32 %v1373_v14, %v1372_v39  ;;  %v1084_v49 = vcombine.high %v1076_v18, %v1076_v18  ;;  %v2246_v19 = vrot.slane %v1086_v2, %v1719_v55  ;;  %v1377_v5 = vsel %vm1371_vm0, %v1051_v11, 0.0 }
  0x49   :  { %v1068_v53 = vcombine.high %v1066_v32, %v1066_v32  ;;  %v1085_v56 = vcombine.high %v1083_v34, %v1083_v34  ;;  %v1186_v21 = vcombine.high %v2159_v52, %v2159_v52  ;;  %v1187_v16 = vcombine.high %v2164_v54, %v2164_v54 }
  0x4a   :  { %v1376_v46 = vadd.f32 %v1375_v41, %v1374_v61  ;;  %v1203_v44 = vcombine.high %v2167_v3, %v2167_v3  ;;  %v1220_v57 = vcombine.high %v2173_v24, %v2173_v24  ;;  %v1379_v22 = vsel %vm1371_vm0, %v1059_v25, 0.0 }
  0x4b   :  { %v1204_v23 = vcombine.high %v2177_v7, %v2177_v7  ;;  %v1221_v60 = vcombine.high %v2183_v27, %v2183_v27  ;;  %v1237_v26 = vcombine.high %v2187_v28, %v2187_v28  ;;  %v1238_v45 = vcombine.high %v2192_v10, %v2192_v10 }
  0x4c   :  { %v1378_v43 = vadd.f32 %v1377_v5, %v1376_v46  ;;  %v1254_v8 = vcombine.high %v2196_v51, %v2196_v51  ;;  %v1255_v4 = vcombine.high %v2202_v47, %v2202_v47  ;;  %v1381_v25 = vsel %vm1371_vm0, %v1067_v63, 0.0 }
  0x4d   :  { %v1271_v40 = vcombine.high %v2206_v30, %v2206_v30  ;;  %v1272_v2 = vcombine.high %v2212_v1, %v2212_v1  ;;  %v1288_v9 = vcombine.high %v2219_v33, %v2219_v33  ;;  %v1289_v50 = vcombine.high %v2225_v35, %v2225_v35 }
  0x4e   :  { %v1380_v11 = vadd.f32 %v1379_v22, %v1378_v43  ;;  %v1305_v39 = vcombine.high %v2229_v17, %v2229_v17  ;;  %v1306_v14 = vcombine.high %v2236_v58, %v2236_v58  ;;  %v1383_v41 = vsel %vm1371_vm0, %v1066_v32, 0.0 }
  0x4f   :  { %v1385_v61 = vsel %vm1371_vm0, %v1068_v53, 0.0  ;;  %v1387_v5 = vsel %vm1371_vm0, %v1076_v18, 0.0  ;;  %v1389_v46 = vsel %vm1371_vm0, %v1084_v49, 0.0  ;;  %v1391_v22 = vsel %vm1371_vm0, %v1083_v34, 0.0 }
  0x50   :  { %v1382_v63 = vadd.f32 %v1381_v25, %v1380_v11  ;;  %v1393_v43 = vsel %vm1371_vm0, %v1085_v56, 0.0  ;;  %v2292_v62 = vsel %vm1371_vm0, %v1186_v21, 0.0  ;;  %v2296_v52 = vsel %vm1371_vm0, %v2164_v54, 0.0 }
  0x51   :  { %v2299_v32 = vsel %vm1371_vm0, %v1187_v16, 0.0  ;;  %v2303_v18 = vsel %vm1371_vm0, %v2167_v3, 0.0  ;;  %v2306_v49 = vsel %vm1371_vm0, %v1203_v44, 0.0  ;;  %v2310_v34 = vsel %vm1371_vm0, %v2177_v7, 0.0 }
  0x52   :  { %v1384_v55 = vadd.f32 %v1383_v41, %v1382_v63  ;;  %v2313_v53 = vsel %vm1371_vm0, %v1204_v23, 0.0  ;;  %v2317_v54 = vsel %vm1371_vm0, %v2173_v24, 0.0  ;;  %v2320_v56 = vsel %vm1371_vm0, %v1220_v57, 0.0 }
  0x53   :  { %v2324_v3 = vsel %vm1371_vm0, %v2183_v27, 0.0  ;;  %v2327_v16 = vsel %vm1371_vm0, %v1221_v60, 0.0  ;;  %v2331_v7 = vsel %vm1371_vm0, %v2187_v28, 0.0  ;;  %v2334_v44 = vsel %vm1371_vm0, %v1237_v26, 0.0 }
  0x54   :  { %v1386_v21 = vadd.f32 %v1385_v61, %v1384_v55  ;;  %v2338_v24 = vsel %vm1371_vm0, %v2192_v10, 0.0  ;;  %v2341_v55 = vsel %vm1371_vm0, %v1238_v45, 0.0  ;;  %v2345_v27 = vsel %vm1371_vm0, %v2196_v51, 0.0 }
  0x55   :  { %v2348_v23 = vsel %vm1371_vm0, %v1254_v8, 0.0  ;;  %v2352_v28 = vsel %vm1371_vm0, %v2202_v47, 0.0  ;;  %v2355_v60 = vsel %vm1371_vm0, %v1255_v4, 0.0  ;;  %v2359_v10 = vsel %vm1371_vm0, %v2206_v30, 0.0 }
  0x56   :  { %v1388_v57 = vadd.f32 %v1387_v5, %v1386_v21  ;;  %v2362_v26 = vsel %vm1371_vm0, %v1271_v40, 0.0  ;;  %v2366_v51 = vsel %vm1371_vm0, %v2212_v1, 0.0  ;;  %v2369_v45 = vsel %vm1371_vm0, %v1272_v2, 0.0  ;;  %v14_v5 = vld [vmem:[%s2500_s0 + $0x18] sm:$0xff] }
  0x57   :  { %v2373_v47 = vsel %vm1371_vm0, %v2219_v33, 0.0  ;;  %v2376_v4 = vsel %vm1371_vm0, %v1288_v9, 0.0  ;;  %v2380_v30 = vsel %vm1371_vm0, %v2225_v35, 0.0  ;;  %v2383_v25 = vsel %vm1371_vm0, %v1289_v50, 0.0 }
  0x58   :  { %v1390_v8 = vadd.f32 %v1389_v46, %v1388_v57  ;;  %v2387_v1 = vsel %vm1371_vm0, %v2229_v17, 0.0  ;;  %v2390_v40 = vsel %vm1371_vm0, %v1305_v39, 0.0  ;;  %v2394_v33 = vsel %vm1371_vm0, %v2236_v58, 0.0 }
  0x59   :  { %v24_v2 = vunpack.c.h.bf16 %v2124_v29  ;;  %v190_v35 = vrot.slane %v2140_v36, %v1559_v12  ;;  %v2400_v11 = vsel %vm1371_vm0, %v1306_v14, 0.0  ;;  %v194_v17 = vrot.slane %v2140_v36, %v2543_v20 }
  0x5a   :  { %v1392_v9 = vadd.f32 %v1391_v22, %v1390_v8  ;;  %v198_v50 = vrot.slane %v2140_v36, %v2544_v6  ;;  %v202_v39 = vrot.slane %v2140_v36, %v1568_v15  ;;  %v1395_v58 = vsel %vm1371_vm0, %v2209_v31, 0.0  ;;  %v2554_v15 = vld [vmem:[#allocation11_spill] sm:$0xff] }
  0x5b   :  { %v816_v29 = vcombine.low %v2233_v13, %v2241_v59  ;;  %v817_v41 = vcombine.low %v2143_v37, %v2146_v48  ;;  %v818_v14 = vcombine.low %v2149_v38, %v2154_v42  ;;  %v1102_v20 = vcombine.high %v2246_v19, %v2246_v19 }
  0x5c   :  { %v1394_v63 = vadd.f32 %v1393_v43, %v1392_v9  ;;  %v1103_v6 = vcombine.high %v2243_v0, %v2243_v0  ;;  %v1110_v36 = vrot.slane %v2243_v0, %v2554_v15  ;;  %v2555_v61 = vcombine.high %v2209_v31, %v2209_v31 }
  0x5d   :  { %v510_v37 = vrot.slane %v190_v35, %v1559_v12  ;;  %v514_v48 = vrot.slane %v194_v17, %v1559_v12  ;;  %v518_v38 = vrot.slane %v198_v50, %v1559_v12  ;;  %v1399_v42 = vsel %vm1371_vm0, %v2246_v19, 0.0 }
  0x5e   :  { %v1397_v13 = vsel %vm1371_vm0, %v2555_v61, 0.0  ;;  %v1396_v59 = vadd.f32 %v1395_v58, %v1394_v63  ;;  %v522_v0 = vrot.slane %v202_v39, %v1559_v12  ;;  %v825_v31 = vrot.slane %v817_v41, %v2554_v15 }
  0x5f   :  { %v832_v46 = vrot.slane %v818_v14, %v2554_v15  ;;  %v1008_v43 = vmul.f32 %v816_v29, %v24_v2  ;;  %v1117_v21 = vrot.slane %v1103_v6, %v2554_v15  ;;  %v1118_v57 = vcombine.high %v1110_v36, %v1110_v36 }
  0x60   :  { %v1398_v22 = vadd.f32 %v1397_v13, %v1396_v59  ;;  %v1401_v8 = vsel %vm1371_vm0, %v1102_v20, 0.0  ;;  %v25_v9 = vunpack.c.l.bf16 %v14_v5  ;;  %v1403_v19 = vsel %vm1371_vm0, %v1110_v36, 0.0 }
  0x61   :  { %v833_v17 = vcombine.low %v825_v31, %v832_v46  ;;  %v834_v50 = vcombine.low %v510_v37, %v514_v48  ;;  %v835_v58 = vcombine.low %v518_v38, %v522_v0  ;;  %v1119_v12 = vcombine.high %v1117_v21, %v1117_v21 }
  0x62   :  { %v1400_v35 = vadd.f32 %v1399_v42, %v1398_v22  ;;  %v1120_v39 = vcombine.high %v1008_v43, %v1008_v43  ;;  %v1127_v41 = vrot.slane %v1008_v43, %v2554_v15  ;;  %v1405_v14 = vsel %vm1371_vm0, %v1118_v57, 0.0 }
  0x63   :  { %v1407_v29 = vsel %vm1371_vm0, %v1117_v21, 0.0  ;;  %v842_v6 = vrot.slane %v834_v50, %v2554_v15  ;;  %v849_v20 = vrot.slane %v835_v58, %v2554_v15  ;;  %v1009_v13 = vmul.f32 %v833_v17, %v25_v9 }
  0x64   :  { %v1402_v63 = vadd.f32 %v1401_v8, %v1400_v35  ;;  %v1134_v36 = vrot.slane %v1120_v39, %v2554_v15  ;;  %v1135_v59 = vcombine.high %v1127_v41, %v1127_v41  ;;  %v1409_v37 = vsel %vm1371_vm0, %v1119_v12, 0.0 }
  0x65   :  { %v1411_v38 = vsel %vm1371_vm0, %v1127_v41, 0.0  ;;  %v26_v42 = vunpack.c.h.bf16 %v14_v5  ;;  %v850_v0 = vcombine.low %v842_v6, %v849_v20  ;;  %v1137_v22 = vcombine.high %v1009_v13, %v1009_v13 }
  0x66   :  { %v1404_v2 = vadd.f32 %v1403_v19, %v1402_v63  ;;  %v1136_v46 = vcombine.high %v1134_v36, %v1134_v36  ;;  %v1144_v43 = vrot.slane %v1009_v13, %v2554_v15  ;;  %v1413_v21 = vsel %vm1371_vm0, %v1135_v59, 0.0 }
  0x67   :  { %v1415_v8 = vsel %vm1371_vm0, %v1134_v36, 0.0  ;;  %v1010_v9 = vmul.f32 %v850_v0, %v26_v42  ;;  %v1151_v19 = vrot.slane %v1137_v22, %v2554_v15 }
  0x68   :  { %v1406_v61 = vadd.f32 %v1405_v14, %v1404_v2  ;;  %v1152_v17 = vcombine.high %v1144_v43, %v1144_v43  ;;  %v1417_v50 = vsel %vm1371_vm0, %v1136_v46, 0.0  ;;  %v1419_v5 = vsel %vm1371_vm0, %v1144_v43, 0.0  ;;  %v2556_v43 = vld [vmem:[#allocation6_spill] sm:$0xff] }
  0x69   :  { %v1153_v12 = vcombine.high %v1151_v19, %v1151_v19  ;;  %v1154_v39 = vcombine.high %v1010_v9, %v1010_v9  ;;  %v1161_v41 = vrot.slane %v1010_v9, %v2554_v15 }
  0x6a   :  { %v1408_v48 = vadd.f32 %v1407_v29, %v1406_v61  ;;  %v1421_v14 = vsel %vm1371_vm0, %v1152_v17, 0.0  ;;  %v1423_v29 = vsel %vm1371_vm0, %v1151_v19, 0.0 }
  0x6b   :  { %v1168_v20 = vrot.slane %v1154_v39, %v2554_v15  ;;  %v1169_v61 = vcombine.high %v1161_v41, %v1161_v41  ;;  %v1425_v13 = vsel %vm1371_vm0, %v1153_v12, 0.0  ;;  %v1427_v59 = vsel %vm1371_vm0, %v1161_v41, 0.0 }
  0x6c   :  { %v1410_v31 = vadd.f32 %v1409_v37, %v1408_v48  ;;  %v1435_v15 = vsel %vm1371_vm0, %v2556_v43, 0.0 }
  0x6d   :  { %v1170_v48 = vcombine.high %v1168_v20, %v1168_v20  ;;  %v1431_v0 = vsel %vm1371_vm0, %v1168_v20, 0.0 }
  0x6e   :  { %v1412_v57 = vadd.f32 %v1411_v38, %v1410_v31  ;;  %v1429_v38 = vsel %vm1371_vm0, %v1169_v61, 0.0 }
  0x6f   :  { %v1433_v46 = vsel %vm1371_vm0, %v1170_v48, 0.0 }
  0x70   :  { %v1414_v35 = vadd.f32 %v1413_v21, %v1412_v57 }
  0x72   :  { %v1416_v58 = vadd.f32 %v1415_v8, %v1414_v35 }
  0x74   :  { %v1418_v63 = vadd.f32 %v1417_v50, %v1416_v58 }
  0x76   :  { %v1420_v2 = vadd.f32 %v1419_v5, %v1418_v63 }
  0x78   :  { %v1422_v6 = vadd.f32 %v1421_v14, %v1420_v2 }
  0x7a   :  { %v1424_v36 = vadd.f32 %v1423_v29, %v1422_v6 }
  0x7c   :  { %v1426_v37 = vadd.f32 %v1425_v13, %v1424_v36 }
  0x7e   :  { %v1428_v42 = vadd.f32 %v1427_v59, %v1426_v37 }
  0x80   :  { %v1430_v31 = vadd.f32 %v1429_v38, %v1428_v42 }
  0x82   :  { %v1432_v22 = vadd.f32 %v1431_v0, %v1430_v31 }
  0x84   :  { %v1434_v21 = vadd.f32 %v1433_v46, %v1432_v22 }
  0x86   :  { %v1436_v57 = vadd.f32 %v1435_v15, %v1434_v21 }
  0x88   :  { %v1438_v8 = vadd.f32 %v2292_v62, %v1436_v57 }
  0x8a   :  { %v1440_v35 = vadd.f32 %v2296_v52, %v1438_v8 }
  0x8c   :  { %v1442_v9 = vadd.f32 %v2299_v32, %v1440_v35 }
  0x8e   :  { %v1444_v19 = vadd.f32 %v2303_v18, %v1442_v9 }
  0x90   :  { %v1446_v17 = vadd.f32 %v2306_v49, %v1444_v19 }
  0x92   :  { %v1448_v50 = vadd.f32 %v2310_v34, %v1446_v17 }
  0x94   :  { %v1450_v58 = vadd.f32 %v2313_v53, %v1448_v50 }
  0x96   :  { %v1452_v5 = vadd.f32 %v2317_v54, %v1450_v58 }
  0x98   :  { %v1454_v63 = vadd.f32 %v2320_v56, %v1452_v5 }
  0x9a   :  { %v1456_v12 = vadd.f32 %v2324_v3, %v1454_v63 }
  0x9c   :  { %v1458_v62 = vadd.f32 %v2327_v16, %v1456_v12 }
  0x9e   :  { %v1460_v52 = vadd.f32 %v2331_v7, %v1458_v62 }
  0xa0   :  { %v1462_v32 = vadd.f32 %v2334_v44, %v1460_v52 }
  0xa2   :  { %v1464_v18 = vadd.f32 %v2338_v24, %v1462_v32 }
  0xa4   :  { %v1466_v49 = vadd.f32 %v2341_v55, %v1464_v18 }
  0xa6   :  { %v1468_v34 = vadd.f32 %v2345_v27, %v1466_v49 }
  0xa8   :  { %v1470_v53 = vadd.f32 %v2348_v23, %v1468_v34 }
  0xaa   :  { %v1472_v54 = vadd.f32 %v2352_v28, %v1470_v53 }
  0xac   :  { %v1474_v56 = vadd.f32 %v2355_v60, %v1472_v54 }
  0xae   :  { %v1476_v3 = vadd.f32 %v2359_v10, %v1474_v56 }
  0xb0   :  { %v1478_v16 = vadd.f32 %v2362_v26, %v1476_v3 }
  0xb2   :  { %v1480_v7 = vadd.f32 %v2366_v51, %v1478_v16 }
  0xb4   :  { %v1482_v44 = vadd.f32 %v2369_v45, %v1480_v7 }
  0xb6   :  { %v1484_v24 = vadd.f32 %v2373_v47, %v1482_v44 }
  0xb8   :  { %v1486_v55 = vadd.f32 %v2376_v4, %v1484_v24 }
  0xba   :  { %v1488_v27 = vadd.f32 %v2380_v30, %v1486_v55 }
  0xbc   :  { %v1490_v23 = vadd.f32 %v2383_v25, %v1488_v27 }
  0xbe   :  { %v1492_v28 = vadd.f32 %v2387_v1, %v1490_v23 }
  0xc0   :  { %v1494_v60 = vadd.f32 %v2390_v40, %v1492_v28 }
  0xc2   :  { %v1496_v10 = vadd.f32 %v2394_v33, %v1494_v60 }
  0xc4   :  { %v1498_v26 = vadd.f32 %v2400_v11, %v1496_v10 }
  0xc6   :  { %1499 = vadd.xlane.f32.xlu0 %v1498_v26 }
 0x153   :  { %v1500_v51 = vpop.xlane.xlu0 %1499 }
 0x154   :  { %v1501_v39 = vsub.f32 0.0, %v1500_v51 }
 0x156   :  { %v1502_v45 = vmul.f32 1.442695, %v1501_v39 }
 0x158   :  { %1514 = vpow2.f32 %v1502_v45 }
 0x162   :  { %v1515_v47 = vpop.eup %1514 }
 0x163   :  { %v1504_v41 = vadd.f32 1.0, %v1515_v47 }
 0x165   :  { %1516 = vrcp.f32 %v1504_v41 }
 0x16f   :  { %v1517_v4 = vpop.eup %1516 }
 0x170   :  { %1508 = vst.msk [vmem:[%s2501_s2] sm:$0x3] %vm1507_vm1, %v1517_v4 }

// kernel: _lambda_.8
= control target key start
LH: loop header
LB: loop body
LE: loop exit
PB: predicated region body
PF: predicated region fallthrough
CT: control target
= control target key end

     0   :  { %s15093_s1 = inlined_call_operand.vmem [shape: bf16[4096,512], index: 1, kind: input, shape index: {}]   ;;  %s15094_s0 = inlined_call_operand.vmem [shape: bf16[32,4096], index: 0, kind: input, shape index: {}]   ;;  %s15095_s2 = inlined_call_operand.vmem [shape: f32[1,512], index: 2, kind: input, shape index: {}]   ;;  %s15096_s3 = inlined_call_operand.vmem [shape: f32[1,512], index: 3, kind: input, shape index: {}]   ;;  %s15097_s4 = inlined_call_operand.vmem [shape: bf16[32,512], index: 4, kind: output, shape index: {}]  }
   0x1   :  { %v9921_v0 = vld [vmem:[%s15093_s1 + $0x4] ss:$16 sps:$4 sm:$0xff]   ;;  %v9923_v1 = vld [vmem:[%s15093_s1 + $0xc] ss:$16 sps:$4 sm:$0xff]   ;;  %v9925_v2 = vld [vmem:[%s15093_s1] ss:$16 sps:$4 sm:$0xff]  }
   0x2   :  { %6545 = vmatprep.subr.bf16.mxu0 %v9921_v0  ;;  %v9926_v3 = vld [vmem:[%s15093_s1 + $0x8] ss:$16 sps:$4 sm:$0xff]   ;;  %7393 = vmatprep.subr.bf16.mxu1 %v9923_v1  ;;  %v9927_v4 = vld [vmem:[%s15093_s1 + $0x24] ss:$16 sps:$4 sm:$0xff]   ;;  %v9929_v5 = vld [vmem:[%s15093_s1 + $0x2c] ss:$16 sps:$4 sm:$0xff]  }
   0x3   :  { %6546 = vmatpush1.bf16.msra.mxu0 %v9925_v2  ;;  %7394 = vmatpush1.bf16.msra.mxu1 %v9926_v3  ;;  %v9931_v6 = vld [vmem:[%s15093_s1 + $0x20] ss:$16 sps:$4 sm:$0xff]   ;;  %v9932_v7 = vld [vmem:[%s15093_s1 + $0x28] ss:$16 sps:$4 sm:$0xff]   ;;  %v9933_v8 = vld [vmem:[%s15093_s1 + $0x44] ss:$16 sps:$4 sm:$0xff]  }
   0x4   :  { %6547 = vmatprep.subr.bf16.mxu0 %v9927_v4  ;;  %7395 = vmatprep.subr.bf16.mxu1 %v9929_v5  ;;  %v9935_v9 = vld [vmem:[%s15093_s1 + $0x4c] ss:$16 sps:$4 sm:$0xff]   ;;  %v9937_v10 = vld [vmem:[%s15093_s1 + $0x40] ss:$16 sps:$4 sm:$0xff]   ;;  %v9938_v11 = vld [vmem:[%s15093_s1 + $0x48] ss:$16 sps:$4 sm:$0xff]  }
   0x5   :  { %v9939_v12 = vld [vmem:[%s15093_s1 + $0x64] ss:$16 sps:$4 sm:$0xff]   ;;  %v9941_v13 = vld [vmem:[%s15093_s1 + $0x6c] ss:$16 sps:$4 sm:$0xff]   ;;  %v9943_v14 = vld [vmem:[%s15093_s1 + $0x60] ss:$16 sps:$4 sm:$0xff]  }
   0x6   :  { %v9944_v15 = vld [vmem:[%s15093_s1 + $0x68] ss:$16 sps:$4 sm:$0xff]   ;;  %v9945_v16 = vld [vmem:[%s15093_s1 + $0x84] ss:$16 sps:$4 sm:$0xff]   ;;  %v9947_v17 = vld [vmem:[%s15093_s1 + $0x8c] ss:$16 sps:$4 sm:$0xff]  }
   0x7   :  { %6548 = vmatpush1.bf16.msra.mxu0 %v9931_v6  ;;  %7396 = vmatpush1.bf16.msra.mxu1 %v9932_v7  ;;  %v9949_v18 = vld [vmem:[%s15093_s1 + $0x80] ss:$16 sps:$4 sm:$0xff]   ;;  %v9950_v19 = vld [vmem:[%s15093_s1 + $0x88] ss:$16 sps:$4 sm:$0xff]   ;;  %v9951_v20 = vld [vmem:[%s15093_s1 + $0xa4] ss:$16 sps:$4 sm:$0xff]  }
   0x8   :  { %6549 = vmatprep.subr.bf16.mxu0 %v9933_v8  ;;  %7397 = vmatprep.subr.bf16.mxu1 %v9935_v9  ;;  %v9953_v21 = vld [vmem:[%s15093_s1 + $0xac] ss:$16 sps:$4 sm:$0xff]   ;;  %v9955_v22 = vld [vmem:[%s15093_s1 + $0xa0] ss:$16 sps:$4 sm:$0xff]   ;;  %v9956_v23 = vld [vmem:[%s15093_s1 + $0xa8] ss:$16 sps:$4 sm:$0xff]  }
   0x9   :  { %v9957_v24 = vld [vmem:[%s15093_s1 + $0xc4] ss:$16 sps:$4 sm:$0xff]   ;;  %v9959_v25 = vld [vmem:[%s15093_s1 + $0xcc] ss:$16 sps:$4 sm:$0xff]   ;;  %v9961_v26 = vld [vmem:[%s15093_s1 + $0xc0] ss:$16 sps:$4 sm:$0xff]  }
   0xa   :  { %v9962_v27 = vld [vmem:[%s15093_s1 + $0xc8] ss:$16 sps:$4 sm:$0xff]   ;;  %v9963_v28 = vld [vmem:[%s15093_s1 + $0xe4] ss:$16 sps:$4 sm:$0xff]   ;;  %v9965_v29 = vld [vmem:[%s15093_s1 + $0xec] ss:$16 sps:$4 sm:$0xff]  }
   0xb   :  { %6550 = vmatpush1.bf16.msra.mxu0 %v9937_v10  ;;  %7398 = vmatpush1.bf16.msra.mxu1 %v9938_v11  ;;  %v9967_v30 = vld [vmem:[%s15093_s1 + $0xe0] ss:$16 sps:$4 sm:$0xff]   ;;  %v9968_v31 = vld [vmem:[%s15093_s1 + $0xe8] ss:$16 sps:$4 sm:$0xff]   ;;  %v9969_v32 = vld [vmem:[%s15093_s1 + $0x104] ss:$16 sps:$4 sm:$0xff]  }
   0xc   :  { %6551 = vmatprep.subr.bf16.mxu0 %v9939_v12  ;;  %7399 = vmatprep.subr.bf16.mxu1 %v9941_v13  ;;  %v9971_v33 = vld [vmem:[%s15093_s1 + $0x10c] ss:$16 sps:$4 sm:$0xff]   ;;  %v9973_v34 = vld [vmem:[%s15093_s1 + $0x100] ss:$16 sps:$4 sm:$0xff]   ;;  %v9974_v35 = vld [vmem:[%s15093_s1 + $0x108] ss:$16 sps:$4 sm:$0xff]  }
   0xd   :  { %v9975_v36 = vld [vmem:[%s15093_s1 + $0x124] ss:$16 sps:$4 sm:$0xff]   ;;  %v9977_v37 = vld [vmem:[%s15093_s1 + $0x12c] ss:$16 sps:$4 sm:$0xff]   ;;  %v9979_v38 = vld [vmem:[%s15093_s1 + $0x120] ss:$16 sps:$4 sm:$0xff]  }
   0xe   :  { %v9980_v39 = vld [vmem:[%s15093_s1 + $0x128] ss:$16 sps:$4 sm:$0xff]   ;;  %v9981_v40 = vld [vmem:[%s15093_s1 + $0x144] ss:$16 sps:$4 sm:$0xff]   ;;  %v9983_v41 = vld [vmem:[%s15093_s1 + $0x14c] ss:$16 sps:$4 sm:$0xff]  }
   0xf   :  { %6552 = vmatpush1.bf16.msra.mxu0 %v9943_v14  ;;  %7400 = vmatpush1.bf16.msra.mxu1 %v9944_v15  ;;  %v9985_v42 = vld [vmem:[%s15093_s1 + $0x140] ss:$16 sps:$4 sm:$0xff]   ;;  %v9986_v43 = vld [vmem:[%s15093_s1 + $0x148] ss:$16 sps:$4 sm:$0xff]   ;;  %v9987_v44 = vld [vmem:[%s15093_s1 + $0x164] ss:$16 sps:$4 sm:$0xff]  }
  0x10   :  { %6553 = vmatprep.subr.bf16.mxu0 %v9945_v16  ;;  %7401 = vmatprep.subr.bf16.mxu1 %v9947_v17  ;;  %v9989_v45 = vld [vmem:[%s15093_s1 + $0x16c] ss:$16 sps:$4 sm:$0xff]   ;;  %v17_v46 = vld [vmem:[%s15094_s0] sm:$0xff]  ;;  %v9992_v49 = vld [vmem:[%s15093_s1 + $0x168] ss:$16 sps:$4 sm:$0xff]  }
  0x11   :  { %v33_v47 = vld [vmem:[%s15094_s0 + $0x80] sm:$0xff]  ;;  %v9995_v52 = vld [vmem:[%s15093_s1 + $0x18c] ss:$16 sps:$4 sm:$0xff]   ;;  %v9998_v54 = vld [vmem:[%s15093_s1 + $0x188] ss:$16 sps:$4 sm:$0xff]  }
  0x12   :  { %v9991_v48 = vld [vmem:[%s15093_s1 + $0x160] ss:$16 sps:$4 sm:$0xff]   ;;  %v8578_v50 = vcombine.high %v17_v46, %v33_v47  ;;  %v9993_v51 = vld [vmem:[%s15093_s1 + $0x184] ss:$16 sps:$4 sm:$0xff]   ;;  %v10001_v56 = vld [vmem:[%s15093_s1 + $0x1ac] ss:$16 sps:$4 sm:$0xff]   ;;  %v8577_v5 = vcombine.low %v17_v46, %v33_v47 }
  0x13   :  { %6554 = vmatpush1.bf16.msra.mxu0 %v9949_v18  ;;  %7402 = vmatpush1.bf16.msra.mxu1 %v9950_v19  ;;  %v9997_v53 = vld [vmem:[%s15093_s1 + $0x180] ss:$16 sps:$4 sm:$0xff]   ;;  %v9999_v55 = vld [vmem:[%s15093_s1 + $0x1a4] ss:$16 sps:$4 sm:$0xff]   ;;  %v10004_v58 = vld [vmem:[%s15093_s1 + $0x1a8] ss:$16 sps:$4 sm:$0xff]  }
  0x14   :  { %6555 = vmatprep.subr.bf16.mxu0 %v9951_v20  ;;  %7403 = vmatprep.subr.bf16.mxu1 %v9953_v21  ;;  %v10003_v57 = vld [vmem:[%s15093_s1 + $0x1a0] ss:$16 sps:$4 sm:$0xff]   ;;  %v10005_v59 = vld [vmem:[%s15093_s1 + $0x1c4] ss:$16 sps:$4 sm:$0xff]   ;;  %v10007_v60 = vld [vmem:[%s15093_s1 + $0x1cc] ss:$16 sps:$4 sm:$0xff]  }
  0x15   :  { %6577 = vmatprep.mubr.bf16.mxu0 %v8578_v50  ;;  %7425 = vmatprep.mubr.bf16.mxu1 %v8578_v50  ;;  %v10009_v61 = vld [vmem:[%s15093_s1 + $0x1c0] ss:$16 sps:$4 sm:$0xff]   ;;  %v10010_v62 = vld [vmem:[%s15093_s1 + $0x1c8] ss:$16 sps:$4 sm:$0xff]   ;;  %v10011_v63 = vld [vmem:[%s15093_s1 + $0x1e4] ss:$16 sps:$4 sm:$0xff]  }
  0x16   :  { %v10013_v0 = vld [vmem:[%s15093_s1 + $0x1ec] ss:$16 sps:$4 sm:$0xff]   ;;  %v10015_v1 = vld [vmem:[%s15093_s1 + $0x1e0] ss:$16 sps:$4 sm:$0xff]   ;;  %v10016_v2 = vld [vmem:[%s15093_s1 + $0x1e8] ss:$16 sps:$4 sm:$0xff]  }
  0x17   :  { %6556 = vmatpush1.bf16.msra.mxu0 %v9955_v22  ;;  %7404 = vmatpush1.bf16.msra.mxu1 %v9956_v23  ;;  %v10019_v3 = vld [vmem:[%s15093_s1 + $0x204] ss:$16 sps:$4 sm:$0xff]   ;;  %v10022_v4 = vld [vmem:[%s15093_s1 + $0x20c] ss:$16 sps:$4 sm:$0xff]   ;;  %v10017_v6 = vld [vmem:[%s15093_s1 + $0x200] ss:$16 sps:$4 sm:$0xff]  }
  0x18   :  { %6557 = vmatprep.subr.bf16.mxu0 %v9957_v24  ;;  %7405 = vmatprep.subr.bf16.mxu1 %v9959_v25  ;;  %v10020_v7 = vld [vmem:[%s15093_s1 + $0x208] ss:$16 sps:$4 sm:$0xff]   ;;  %v10025_v8 = vld [vmem:[%s15093_s1 + $0x224] ss:$16 sps:$4 sm:$0xff]   ;;  %v10028_v9 = vld [vmem:[%s15093_s1 + $0x22c] ss:$16 sps:$4 sm:$0xff]  }
  0x19   :  { %v10023_v10 = vld [vmem:[%s15093_s1 + $0x220] ss:$16 sps:$4 sm:$0xff]   ;;  %v10026_v11 = vld [vmem:[%s15093_s1 + $0x228] ss:$16 sps:$4 sm:$0xff]   ;;  %v10031_v12 = vld [vmem:[%s15093_s1 + $0x244] ss:$16 sps:$4 sm:$0xff]  }
  0x1a   :  { %v10034_v13 = vld [vmem:[%s15093_s1 + $0x24c] ss:$16 sps:$4 sm:$0xff]   ;;  %v10029_v14 = vld [vmem:[%s15093_s1 + $0x240] ss:$16 sps:$4 sm:$0xff]   ;;  %v10032_v15 = vld [vmem:[%s15093_s1 + $0x248] ss:$16 sps:$4 sm:$0xff]  }
  0x1b   :  { %6558 = vmatpush1.bf16.msra.mxu0 %v9961_v26  ;;  %7406 = vmatpush1.bf16.msra.mxu1 %v9962_v27  ;;  %v10037_v16 = vld [vmem:[%s15093_s1 + $0x264] ss:$16 sps:$4 sm:$0xff]   ;;  %v10040_v17 = vld [vmem:[%s15093_s1 + $0x26c] ss:$16 sps:$4 sm:$0xff]   ;;  %v10035_v18 = vld [vmem:[%s15093_s1 + $0x260] ss:$16 sps:$4 sm:$0xff]  }
  0x1c   :  { %6559 = vmatprep.subr.bf16.mxu0 %v9963_v28  ;;  %7407 = vmatprep.subr.bf16.mxu1 %v9965_v29  ;;  %v10038_v19 = vld [vmem:[%s15093_s1 + $0x268] ss:$16 sps:$4 sm:$0xff]   ;;  %v10043_v20 = vld [vmem:[%s15093_s1 + $0x284] ss:$16 sps:$4 sm:$0xff]   ;;  %v10046_v21 = vld [vmem:[%s15093_s1 + $0x28c] ss:$16 sps:$4 sm:$0xff]  }
  0x1d   :  { %v10041_v22 = vld [vmem:[%s15093_s1 + $0x280] ss:$16 sps:$4 sm:$0xff]   ;;  %v10044_v23 = vld [vmem:[%s15093_s1 + $0x288] ss:$16 sps:$4 sm:$0xff]   ;;  %v10049_v24 = vld [vmem:[%s15093_s1 + $0x2a4] ss:$16 sps:$4 sm:$0xff]  }
  0x1e   :  { %v10052_v25 = vld [vmem:[%s15093_s1 + $0x2ac] ss:$16 sps:$4 sm:$0xff]   ;;  %v49_v26 = vld [vmem:[%s15094_s0 + $0x100] sm:$0xff]  ;;  %v10068_v46 = vld [vmem:[%s15093_s1 + $0x308] ss:$16 sps:$4 sm:$0xff]  }
  0x1f   :  { %6560 = vmatpush1.bf16.msra.mxu0 %v9967_v30  ;;  %7408 = vmatpush1.bf16.msra.mxu1 %v9968_v31  ;;  %v65_v27 = vld [vmem:[%s15094_s0 + $0x180] sm:$0xff]  ;;  %v10050_v30 = vld [vmem:[%s15093_s1 + $0x2a8] ss:$16 sps:$4 sm:$0xff]  }
  0x20   :  { %6561 = vmatprep.subr.bf16.mxu0 %v9969_v32  ;;  %7409 = vmatprep.subr.bf16.mxu1 %v9971_v33  ;;  %v8610_v28 = vcombine.high %v49_v26, %v65_v27  ;;  %v10047_v29 = vld [vmem:[%s15093_s1 + $0x2a0] ss:$16 sps:$4 sm:$0xff]   ;;  %v8609_v31 = vcombine.low %v49_v26, %v65_v27  ;;  %v10055_v32 = vld [vmem:[%s15093_s1 + $0x2c4] ss:$16 sps:$4 sm:$0xff]   ;;  %v10058_v33 = vld [vmem:[%s15093_s1 + $0x2cc] ss:$16 sps:$4 sm:$0xff]  }
  0x21   :  { %v10073_v47 = vld [vmem:[%s15093_s1 + $0x324] ss:$16 sps:$4 sm:$0xff]   ;;  %v10074_v50 = vld [vmem:[%s15093_s1 + $0x328] ss:$16 sps:$4 sm:$0xff]  }
  0x22   :  { %v11944_v27 = vld [vmem:[%s15094_s0 + $0x90] sm:$0xff] }
  0x23   :  { %6562 = vmatpush1.bf16.msra.mxu0 %v9973_v34  ;;  %7410 = vmatpush1.bf16.msra.mxu1 %v9974_v35  ;;  %v11775_v34 = vld [vmem:[%s15094_s0 + $0x8] sm:$0xff] }
  0x24   :  { %6563 = vmatprep.subr.bf16.mxu0 %v9975_v36  ;;  %7411 = vmatprep.subr.bf16.mxu1 %v9977_v37  ;;  %v11780_v35 = vld [vmem:[%s15094_s0 + $0x88] sm:$0xff]  ;;  %v10053_v36 = vld [vmem:[%s15093_s1 + $0x2c0] ss:$16 sps:$4 sm:$0xff]  }
  0x25   :  { %v10056_v37 = vld [vmem:[%s15093_s1 + $0x2c8] ss:$16 sps:$4 sm:$0xff]  }
  0x27   :  { %6564 = vmatpush1.bf16.msra.mxu0 %v9979_v38  ;;  %7412 = vmatpush1.bf16.msra.mxu1 %v9980_v39  ;;  %v8580_v38 = vcombine.high %v11775_v34, %v11780_v35  ;;  %v10061_v39 = vld [vmem:[%s15093_s1 + $0x2e4] ss:$16 sps:$4 sm:$0xff]  }
  0x28   :  { %6565 = vmatprep.subr.bf16.mxu0 %v9981_v40  ;;  %7413 = vmatprep.subr.bf16.mxu1 %v9983_v41  ;;  %v10064_v40 = vld [vmem:[%s15093_s1 + $0x2ec] ss:$16 sps:$4 sm:$0xff]   ;;  %v10059_v41 = vld [vmem:[%s15093_s1 + $0x2e0] ss:$16 sps:$4 sm:$0xff]  }
  0x2b   :  { %6566 = vmatpush1.bf16.msra.mxu0 %v9985_v42  ;;  %7414 = vmatpush1.bf16.msra.mxu1 %v9986_v43  ;;  %v10062_v42 = vld [vmem:[%s15093_s1 + $0x2e8] ss:$16 sps:$4 sm:$0xff]   ;;  %v10067_v43 = vld [vmem:[%s15093_s1 + $0x304] ss:$16 sps:$4 sm:$0xff]  }
  0x2c   :  { %6567 = vmatprep.subr.bf16.mxu0 %v9987_v44  ;;  %7415 = vmatprep.subr.bf16.mxu1 %v9989_v45  ;;  %v10070_v44 = vld [vmem:[%s15093_s1 + $0x30c] ss:$16 sps:$4 sm:$0xff]   ;;  %v10065_v45 = vld [vmem:[%s15093_s1 + $0x300] ss:$16 sps:$4 sm:$0xff]  }
  0x2f   :  { %6568 = vmatpush1.bf16.msra.mxu0 %v9991_v48  ;;  %7416 = vmatpush1.bf16.msra.mxu1 %v9992_v49  ;;  %v10076_v48 = vld [vmem:[%s15093_s1 + $0x32c] ss:$16 sps:$4 sm:$0xff]   ;;  %v10071_v49 = vld [vmem:[%s15093_s1 + $0x320] ss:$16 sps:$4 sm:$0xff]  }
  0x30   :  { %6569 = vmatprep.subr.bf16.mxu0 %v9993_v51  ;;  %7417 = vmatprep.subr.bf16.mxu1 %v9995_v52  ;;  %v10079_v51 = vld [vmem:[%s15093_s1 + $0x344] ss:$16 sps:$4 sm:$0xff]   ;;  %v10082_v52 = vld [vmem:[%s15093_s1 + $0x34c] ss:$16 sps:$4 sm:$0xff]  }
  0x33   :  { %6570 = vmatpush1.bf16.msra.mxu0 %v9997_v53  ;;  %7418 = vmatpush1.bf16.msra.mxu1 %v9998_v54  ;;  %v10077_v53 = vld [vmem:[%s15093_s1 + $0x340] ss:$16 sps:$4 sm:$0xff]   ;;  %v10080_v54 = vld [vmem:[%s15093_s1 + $0x348] ss:$16 sps:$4 sm:$0xff]  }
  0x34   :  { %6571 = vmatprep.subr.bf16.mxu0 %v9999_v55  ;;  %7419 = vmatprep.subr.bf16.mxu1 %v10001_v56  ;;  %v10085_v55 = vld [vmem:[%s15093_s1 + $0x364] ss:$16 sps:$4 sm:$0xff]   ;;  %v10088_v56 = vld [vmem:[%s15093_s1 + $0x36c] ss:$16 sps:$4 sm:$0xff]  }
  0x37   :  { %6572 = vmatpush1.bf16.msra.mxu0 %v10003_v57  ;;  %7420 = vmatpush1.bf16.msra.mxu1 %v10004_v58  ;;  %v10083_v57 = vld [vmem:[%s15093_s1 + $0x360] ss:$16 sps:$4 sm:$0xff]   ;;  %v10086_v58 = vld [vmem:[%s15093_s1 + $0x368] ss:$16 sps:$4 sm:$0xff]  }
  0x38   :  { %6573 = vmatprep.subr.bf16.mxu0 %v10005_v59  ;;  %7421 = vmatprep.subr.bf16.mxu1 %v10007_v60  ;;  %v10091_v59 = vld [vmem:[%s15093_s1 + $0x384] ss:$16 sps:$4 sm:$0xff]   ;;  %v10094_v60 = vld [vmem:[%s15093_s1 + $0x38c] ss:$16 sps:$4 sm:$0xff]  }
  0x3b   :  { %6574 = vmatpush1.bf16.msra.mxu0 %v10009_v61  ;;  %7422 = vmatpush1.bf16.msra.mxu1 %v10010_v62  ;;  %v10089_v61 = vld [vmem:[%s15093_s1 + $0x380] ss:$16 sps:$4 sm:$0xff]   ;;  %v10092_v62 = vld [vmem:[%s15093_s1 + $0x388] ss:$16 sps:$4 sm:$0xff]  }
  0x3c   :  { %6575 = vmatprep.subr.bf16.mxu0 %v10011_v63  ;;  %7423 = vmatprep.subr.bf16.mxu1 %v10013_v0  ;;  %v10097_v63 = vld [vmem:[%s15093_s1 + $0x3a4] ss:$16 sps:$4 sm:$0xff]   ;;  %v10100_v0 = vld [vmem:[%s15093_s1 + $0x3ac] ss:$16 sps:$4 sm:$0xff]  }
  0x3f   :  { %6576 = vmatpush1.bf16.msra.mxu0 %v10015_v1  ;;  %7424 = vmatpush1.bf16.msra.mxu1 %v10016_v2  ;;  %v10095_v1 = vld [vmem:[%s15093_s1 + $0x3a0] ss:$16 sps:$4 sm:$0xff]   ;;  %v10098_v2 = vld [vmem:[%s15093_s1 + $0x3a8] ss:$16 sps:$4 sm:$0xff]  }
  0x40   :  { %6598 = vmatprep.subr.bf16.mxu0 %v10019_v3  ;;  %7446 = vmatprep.subr.bf16.mxu1 %v10022_v4  ;;  %v10103_v3 = vld [vmem:[%s15093_s1 + $0x3c4] ss:$16 sps:$4 sm:$0xff]   ;;  %v10106_v4 = vld [vmem:[%s15093_s1 + $0x3cc] ss:$16 sps:$4 sm:$0xff]  }
  0x42   :  { %6578 = vmatmul.mubr.bf16.vlgmr.msra.gmra.mrb[0].mxu0 %v8577_v5  ;;  %7426 = vmatmul.mubr.bf16.vlgmr.msra.gmra.mrb[0].mxu1 %v8577_v5  ;;  %v10101_v5 = vld [vmem:[%s15093_s1 + $0x3c0] ss:$16 sps:$4 sm:$0xff]  }
  0x43   :  { %6599 = vmatpush1.bf16.msra.mxu0 %v10017_v6  ;;  %7447 = vmatpush1.bf16.msra.mxu1 %v10020_v7  ;;  %v10104_v6 = vld [vmem:[%s15093_s1 + $0x3c8] ss:$16 sps:$4 sm:$0xff]   ;;  %v10109_v7 = vld [vmem:[%s15093_s1 + $0x3e4] ss:$16 sps:$4 sm:$0xff]  }
  0x44   :  { %6600 = vmatprep.subr.bf16.mxu0 %v10025_v8  ;;  %7448 = vmatprep.subr.bf16.mxu1 %v10028_v9  ;;  %v10112_v8 = vld [vmem:[%s15093_s1 + $0x3ec] ss:$16 sps:$4 sm:$0xff]   ;;  %v10107_v9 = vld [vmem:[%s15093_s1 + $0x3e0] ss:$16 sps:$4 sm:$0xff]  }
  0x45   :  { %6587 = vmatprep.mubr.bf16.mxu0 %v8610_v28  ;;  %7435 = vmatprep.mubr.bf16.mxu1 %v8610_v28  ;;  %v10125_v28 = vld [vmem:[%s15093_s1 + $0x440] ss:$16 sps:$4 sm:$0xff]  }
  0x47   :  { %6601 = vmatpush1.bf16.msra.mxu0 %v10023_v10  ;;  %7449 = vmatpush1.bf16.msra.mxu1 %v10026_v11  ;;  %v10110_v10 = vld [vmem:[%s15093_s1 + $0x3e8] ss:$16 sps:$4 sm:$0xff]   ;;  %v10115_v11 = vld [vmem:[%s15093_s1 + $0x404] ss:$16 sps:$4 sm:$0xff]  }
  0x48   :  { %6602 = vmatprep.subr.bf16.mxu0 %v10031_v12  ;;  %7450 = vmatprep.subr.bf16.mxu1 %v10034_v13  ;;  %v10118_v12 = vld [vmem:[%s15093_s1 + $0x40c] ss:$16 sps:$4 sm:$0xff]   ;;  %v10113_v13 = vld [vmem:[%s15093_s1 + $0x400] ss:$16 sps:$4 sm:$0xff]  }
  0x4a   :  { %6588 = vmatmul.mubr.bf16.gmra.mrb[4].mxu0 %v8609_v31  ;;  %7436 = vmatmul.mubr.bf16.gmra.mrb[4].mxu1 %v8609_v31  ;;  %v10136_v31 = vld [vmem:[%s15093_s1 + $0x46c] ss:$16 sps:$4 sm:$0xff]  }
  0x4b   :  { %6603 = vmatpush1.bf16.msra.mxu0 %v10029_v14  ;;  %7451 = vmatpush1.bf16.msra.mxu1 %v10032_v15  ;;  %v10116_v14 = vld [vmem:[%s15093_s1 + $0x408] ss:$16 sps:$4 sm:$0xff]   ;;  %v8579_v15 = vcombine.low %v11775_v34, %v11780_v35  ;;  %v10139_v35 = vld [vmem:[%s15093_s1 + $0x484] ss:$16 sps:$4 sm:$0xff]  }
  0x4c   :  { %6604 = vmatprep.subr.bf16.mxu0 %v10037_v16  ;;  %7452 = vmatprep.subr.bf16.mxu1 %v10040_v17  ;;  %v50_v16 = vld [vmem:[%s15094_s0 + $0x108] sm:$0xff] }
  0x4d   :  { %6630 = vmatprep.mubr.bf16.mxu0 %v8580_v38  ;;  %7478 = vmatprep.mubr.bf16.mxu1 %v8580_v38  ;;  %v66_v17 = vld [vmem:[%s15094_s0 + $0x188] sm:$0xff] }
  0x4e   :  { %v8611_v26 = vcombine.low %v50_v16, %v66_v17  ;;  %v10134_v34 = vld [vmem:[%s15093_s1 + $0x468] ss:$16 sps:$4 sm:$0xff]  }
  0x4f   :  { %6605 = vmatpush1.bf16.msra.mxu0 %v10035_v18  ;;  %7453 = vmatpush1.bf16.msra.mxu1 %v10038_v19  ;;  %v10121_v18 = vld [vmem:[%s15093_s1 + $0x424] ss:$16 sps:$4 sm:$0xff]   ;;  %v10124_v19 = vld [vmem:[%s15093_s1 + $0x42c] ss:$16 sps:$4 sm:$0xff]   ;;  %v10140_v38 = vld [vmem:[%s15093_s1 + $0x488] ss:$16 sps:$4 sm:$0xff]  }
  0x50   :  { %6606 = vmatprep.subr.bf16.mxu0 %v10043_v20  ;;  %7454 = vmatprep.subr.bf16.mxu1 %v10046_v21  ;;  %v8612_v20 = vcombine.high %v50_v16, %v66_v17  ;;  %v10119_v21 = vld [vmem:[%s15093_s1 + $0x420] ss:$16 sps:$4 sm:$0xff]   ;;  %v10208_v16 = vld [vmem:[%s15093_s1 + $0x5ec] ss:$16 sps:$4 sm:$0xff]  }
  0x51   :  { %v10203_v17 = vld [vmem:[%s15093_s1 + $0x5e0] ss:$16 sps:$4 sm:$0xff]  }
  0x53   :  { %6607 = vmatpush1.bf16.msra.mxu0 %v10041_v22  ;;  %7455 = vmatpush1.bf16.msra.mxu1 %v10044_v23  ;;  %v10122_v22 = vld [vmem:[%s15093_s1 + $0x428] ss:$16 sps:$4 sm:$0xff]   ;;  %v10127_v23 = vld [vmem:[%s15093_s1 + $0x444] ss:$16 sps:$4 sm:$0xff]  }
  0x54   :  { %6608 = vmatprep.subr.bf16.mxu0 %v10049_v24  ;;  %7456 = vmatprep.subr.bf16.mxu1 %v10052_v25  ;;  %v10130_v24 = vld [vmem:[%s15093_s1 + $0x44c] ss:$16 sps:$4 sm:$0xff]   ;;  %v11939_v25 = vld [vmem:[%s15094_s0 + $0x10] sm:$0xff] }
  0x57   :  { %6609 = vmatpush1.bf16.msra.mxu0 %v10047_v29  ;;  %7457 = vmatpush1.bf16.msra.mxu1 %v10050_v30  ;;  %v10128_v29 = vld [vmem:[%s15093_s1 + $0x448] ss:$16 sps:$4 sm:$0xff]   ;;  %v10133_v30 = vld [vmem:[%s15093_s1 + $0x464] ss:$16 sps:$4 sm:$0xff]  }
  0x58   :  { %6610 = vmatprep.subr.bf16.mxu0 %v10055_v32  ;;  %7458 = vmatprep.subr.bf16.mxu1 %v10058_v33  ;;  %v8582_v32 = vcombine.high %v11939_v25, %v11944_v27  ;;  %v10131_v33 = vld [vmem:[%s15093_s1 + $0x460] ss:$16 sps:$4 sm:$0xff]  }
  0x5b   :  { %6611 = vmatpush1.bf16.msra.mxu0 %v10053_v36  ;;  %7459 = vmatpush1.bf16.msra.mxu1 %v10056_v37  ;;  %v10142_v36 = vld [vmem:[%s15093_s1 + $0x48c] ss:$16 sps:$4 sm:$0xff]   ;;  %v10137_v37 = vld [vmem:[%s15093_s1 + $0x480] ss:$16 sps:$4 sm:$0xff]  }
  0x5c   :  { %6612 = vmatprep.subr.bf16.mxu0 %v10061_v39  ;;  %7460 = vmatprep.subr.bf16.mxu1 %v10064_v40  ;;  %v10145_v39 = vld [vmem:[%s15093_s1 + $0x4a4] ss:$16 sps:$4 sm:$0xff]   ;;  %v10148_v40 = vld [vmem:[%s15093_s1 + $0x4ac] ss:$16 sps:$4 sm:$0xff]  }
  0x5f   :  { %6613 = vmatpush1.bf16.msra.mxu0 %v10059_v41  ;;  %7461 = vmatpush1.bf16.msra.mxu1 %v10062_v42  ;;  %v10143_v41 = vld [vmem:[%s15093_s1 + $0x4a0] ss:$16 sps:$4 sm:$0xff]   ;;  %v10146_v42 = vld [vmem:[%s15093_s1 + $0x4a8] ss:$16 sps:$4 sm:$0xff]  }
  0x60   :  { %6614 = vmatprep.subr.bf16.mxu0 %v10067_v43  ;;  %7462 = vmatprep.subr.bf16.mxu1 %v10070_v44  ;;  %v10151_v43 = vld [vmem:[%s15093_s1 + $0x4c4] ss:$16 sps:$4 sm:$0xff]   ;;  %v10154_v44 = vld [vmem:[%s15093_s1 + $0x4cc] ss:$16 sps:$4 sm:$0xff]  }
  0x63   :  { %6615 = vmatpush1.bf16.msra.mxu0 %v10065_v45  ;;  %7463 = vmatpush1.bf16.msra.mxu1 %v10068_v46  ;;  %v10149_v45 = vld [vmem:[%s15093_s1 + $0x4c0] ss:$16 sps:$4 sm:$0xff]   ;;  %v10152_v46 = vld [vmem:[%s15093_s1 + $0x4c8] ss:$16 sps:$4 sm:$0xff]  }
  0x64   :  { %6616 = vmatprep.subr.bf16.mxu0 %v10073_v47  ;;  %7464 = vmatprep.subr.bf16.mxu1 %v10076_v48  ;;  %v10157_v47 = vld [vmem:[%s15093_s1 + $0x4e4] ss:$16 sps:$4 sm:$0xff]   ;;  %v10160_v48 = vld [vmem:[%s15093_s1 + $0x4ec] ss:$16 sps:$4 sm:$0xff]  }
  0x67   :  { %6617 = vmatpush1.bf16.msra.mxu0 %v10071_v49  ;;  %7465 = vmatpush1.bf16.msra.mxu1 %v10074_v50  ;;  %v10155_v49 = vld [vmem:[%s15093_s1 + $0x4e0] ss:$16 sps:$4 sm:$0xff]   ;;  %v10158_v50 = vld [vmem:[%s15093_s1 + $0x4e8] ss:$16 sps:$4 sm:$0xff]  }
  0x68   :  { %6618 = vmatprep.subr.bf16.mxu0 %v10079_v51  ;;  %7466 = vmatprep.subr.bf16.mxu1 %v10082_v52  ;;  %v10163_v51 = vld [vmem:[%s15093_s1 + $0x504] ss:$16 sps:$4 sm:$0xff]   ;;  %v10166_v52 = vld [vmem:[%s15093_s1 + $0x50c] ss:$16 sps:$4 sm:$0xff]  }
  0x6b   :  { %6619 = vmatpush1.bf16.msra.mxu0 %v10077_v53  ;;  %7467 = vmatpush1.bf16.msra.mxu1 %v10080_v54  ;;  %v10161_v53 = vld [vmem:[%s15093_s1 + $0x500] ss:$16 sps:$4 sm:$0xff]   ;;  %v10164_v54 = vld [vmem:[%s15093_s1 + $0x508] ss:$16 sps:$4 sm:$0xff]  }
  0x6c   :  { %6620 = vmatprep.subr.bf16.mxu0 %v10085_v55  ;;  %7468 = vmatprep.subr.bf16.mxu1 %v10088_v56  ;;  %v10169_v55 = vld [vmem:[%s15093_s1 + $0x524] ss:$16 sps:$4 sm:$0xff]   ;;  %v10172_v56 = vld [vmem:[%s15093_s1 + $0x52c] ss:$16 sps:$4 sm:$0xff]  }
  0x6f   :  { %6621 = vmatpush1.bf16.msra.mxu0 %v10083_v57  ;;  %7469 = vmatpush1.bf16.msra.mxu1 %v10086_v58  ;;  %v10167_v57 = vld [vmem:[%s15093_s1 + $0x520] ss:$16 sps:$4 sm:$0xff]   ;;  %v10170_v58 = vld [vmem:[%s15093_s1 + $0x528] ss:$16 sps:$4 sm:$0xff]  }
  0x70   :  { %6622 = vmatprep.subr.bf16.mxu0 %v10091_v59  ;;  %7470 = vmatprep.subr.bf16.mxu1 %v10094_v60  ;;  %v10175_v59 = vld [vmem:[%s15093_s1 + $0x544] ss:$16 sps:$4 sm:$0xff]   ;;  %v10178_v60 = vld [vmem:[%s15093_s1 + $0x54c] ss:$16 sps:$4 sm:$0xff]  }
  0x73   :  { %6623 = vmatpush1.bf16.msra.mxu0 %v10089_v61  ;;  %7471 = vmatpush1.bf16.msra.mxu1 %v10092_v62  ;;  %v10173_v61 = vld [vmem:[%s15093_s1 + $0x540] ss:$16 sps:$4 sm:$0xff]   ;;  %v10176_v62 = vld [vmem:[%s15093_s1 + $0x548] ss:$16 sps:$4 sm:$0xff]  }
  0x74   :  { %6624 = vmatprep.subr.bf16.mxu0 %v10097_v63  ;;  %7472 = vmatprep.subr.bf16.mxu1 %v10100_v0  ;;  %v10181_v63 = vld [vmem:[%s15093_s1 + $0x564] ss:$16 sps:$4 sm:$0xff]   ;;  %v10184_v0 = vld [vmem:[%s15093_s1 + $0x56c] ss:$16 sps:$4 sm:$0xff]  }
  0x77   :  { %6625 = vmatpush1.bf16.msra.mxu0 %v10095_v1  ;;  %7473 = vmatpush1.bf16.msra.mxu1 %v10098_v2  ;;  %v10179_v1 = vld [vmem:[%s15093_s1 + $0x560] ss:$16 sps:$4 sm:$0xff]   ;;  %v10182_v2 = vld [vmem:[%s15093_s1 + $0x568] ss:$16 sps:$4 sm:$0xff]  }
  0x78   :  { %6626 = vmatprep.subr.bf16.mxu0 %v10103_v3  ;;  %7474 = vmatprep.subr.bf16.mxu1 %v10106_v4  ;;  %v10187_v3 = vld [vmem:[%s15093_s1 + $0x584] ss:$16 sps:$4 sm:$0xff]   ;;  %v10190_v4 = vld [vmem:[%s15093_s1 + $0x58c] ss:$16 sps:$4 sm:$0xff]  }
  0x7b   :  { %6627 = vmatpush1.bf16.msra.mxu0 %v10101_v5  ;;  %7475 = vmatpush1.bf16.msra.mxu1 %v10104_v6  ;;  %v10185_v5 = vld [vmem:[%s15093_s1 + $0x580] ss:$16 sps:$4 sm:$0xff]   ;;  %v10188_v6 = vld [vmem:[%s15093_s1 + $0x588] ss:$16 sps:$4 sm:$0xff]  }
  0x7c   :  { %6628 = vmatprep.subr.bf16.mxu0 %v10109_v7  ;;  %7476 = vmatprep.subr.bf16.mxu1 %v10112_v8  ;;  %v10193_v7 = vld [vmem:[%s15093_s1 + $0x5a4] ss:$16 sps:$4 sm:$0xff]   ;;  %v10196_v8 = vld [vmem:[%s15093_s1 + $0x5ac] ss:$16 sps:$4 sm:$0xff]  }
  0x7f   :  { %6629 = vmatpush1.bf16.msra.mxu0 %v10107_v9  ;;  %7477 = vmatpush1.bf16.msra.mxu1 %v10110_v10  ;;  %v10191_v9 = vld [vmem:[%s15093_s1 + $0x5a0] ss:$16 sps:$4 sm:$0xff]   ;;  %v10194_v10 = vld [vmem:[%s15093_s1 + $0x5a8] ss:$16 sps:$4 sm:$0xff]  }
  0x80   :  { %6651 = vmatprep.subr.bf16.mxu0 %v10115_v11  ;;  %7499 = vmatprep.subr.bf16.mxu1 %v10118_v12  ;;  %v10199_v11 = vld [vmem:[%s15093_s1 + $0x5c4] ss:$16 sps:$4 sm:$0xff]   ;;  %v10202_v12 = vld [vmem:[%s15093_s1 + $0x5cc] ss:$16 sps:$4 sm:$0xff]  }
  0x82   :  { %6631 = vmatmul.mubr.bf16.vlgmr.msra.gmra.mrb[0].mxu0 %v8579_v15  ;;  %7479 = vmatmul.mubr.bf16.vlgmr.msra.gmra.mrb[0].mxu1 %v8579_v15  ;;  %v10205_v15 = vld [vmem:[%s15093_s1 + $0x5e4] ss:$16 sps:$4 sm:$0xff]  }
  0x83   :  { %6652 = vmatpush1.bf16.msra.mxu0 %v10113_v13  ;;  %7500 = vmatpush1.bf16.msra.mxu1 %v10116_v14  ;;  %v10197_v13 = vld [vmem:[%s15093_s1 + $0x5c0] ss:$16 sps:$4 sm:$0xff]   ;;  %v10200_v14 = vld [vmem:[%s15093_s1 + $0x5c8] ss:$16 sps:$4 sm:$0xff]  }
  0x84   :  { %6653 = vmatprep.subr.bf16.mxu0 %v10121_v18  ;;  %7501 = vmatprep.subr.bf16.mxu1 %v10124_v19  ;;  %v10206_v18 = vld [vmem:[%s15093_s1 + $0x5e8] ss:$16 sps:$4 sm:$0xff]   ;;  %v10211_v19 = vld [vmem:[%s15093_s1 + $0x604] ss:$16 sps:$4 sm:$0xff]  }
  0x85   :  { %6640 = vmatprep.mubr.bf16.mxu0 %v8612_v20  ;;  %7488 = vmatprep.mubr.bf16.mxu1 %v8612_v20  ;;  %v10214_v20 = vld [vmem:[%s15093_s1 + $0x60c] ss:$16 sps:$4 sm:$0xff]  }
  0x87   :  { %6654 = vmatpush1.bf16.msra.mxu0 %v10119_v21  ;;  %7502 = vmatpush1.bf16.msra.mxu1 %v10122_v22  ;;  %v51_v21 = vld [vmem:[%s15094_s0 + $0x110] sm:$0xff]  ;;  %v8581_v22 = vcombine.low %v11939_v25, %v11944_v27  ;;  %v10220_v27 = vld [vmem:[%s15093_s1 + $0x62c] ss:$16 sps:$4 sm:$0xff]  }
  0x88   :  { %6655 = vmatprep.subr.bf16.mxu0 %v10127_v23  ;;  %7503 = vmatprep.subr.bf16.mxu1 %v10130_v24  ;;  %v67_v23 = vld [vmem:[%s15094_s0 + $0x190] sm:$0xff] }
  0x89   :  { %v10209_v24 = vld [vmem:[%s15093_s1 + $0x600] ss:$16 sps:$4 sm:$0xff]   ;;  %v10217_v25 = vld [vmem:[%s15093_s1 + $0x624] ss:$16 sps:$4 sm:$0xff]  }
  0x8a   :  { %6641 = vmatmul.mubr.bf16.gmra.mrb[4].mxu0 %v8611_v26  ;;  %7489 = vmatmul.mubr.bf16.gmra.mrb[4].mxu1 %v8611_v26  ;;  %v10212_v26 = vld [vmem:[%s15093_s1 + $0x608] ss:$16 sps:$4 sm:$0xff]  }
  0x8b   :  { %6656 = vmatpush1.bf16.msra.mxu0 %v10125_v28  ;;  %7504 = vmatpush1.bf16.msra.mxu1 %v10128_v29  ;;  %v8614_v28 = vcombine.high %v51_v21, %v67_v23  ;;  %v10215_v29 = vld [vmem:[%s15093_s1 + $0x620] ss:$16 sps:$4 sm:$0xff]  }
  0x8c   :  { %6657 = vmatprep.subr.bf16.mxu0 %v10133_v30  ;;  %7505 = vmatprep.subr.bf16.mxu1 %v10136_v31  ;;  %v10218_v30 = vld [vmem:[%s15093_s1 + $0x628] ss:$16 sps:$4 sm:$0xff]   ;;  %v10223_v31 = vld [vmem:[%s15093_s1 + $0x644] ss:$16 sps:$4 sm:$0xff]  }
  0x8d   :  { %6683 = vmatprep.mubr.bf16.mxu0 %v8582_v32  ;;  %7531 = vmatprep.mubr.bf16.mxu1 %v8582_v32  ;;  %v10226_v32 = vld [vmem:[%s15093_s1 + $0x64c] ss:$16 sps:$4 sm:$0xff]  }
  0x8f   :  { %6658 = vmatpush1.bf16.msra.mxu0 %v10131_v33  ;;  %7506 = vmatpush1.bf16.msra.mxu1 %v10134_v34  ;;  %v12151_v33 = vld [vmem:[%s15094_s0 + $0x18] sm:$0xff]  ;;  %v8613_v34 = vcombine.low %v51_v21, %v67_v23  ;;  %v10293_v21 = vld [vmem:[%s15093_s1 + $0x7c0] ss:$16 sps:$4 sm:$0xff]   ;;  %v10301_v23 = vld [vmem:[%s15093_s1 + $0x7e4] ss:$16 sps:$4 sm:$0xff]  }
  0x90   :  { %6659 = vmatprep.subr.bf16.mxu0 %v10139_v35  ;;  %7507 = vmatprep.subr.bf16.mxu1 %v10142_v36  ;;  %v12156_v35 = vld [vmem:[%s15094_s0 + $0x98] sm:$0xff]  ;;  %v10221_v36 = vld [vmem:[%s15093_s1 + $0x640] ss:$16 sps:$4 sm:$0xff]  }
  0x93   :  { %6660 = vmatpush1.bf16.msra.mxu0 %v10137_v37  ;;  %7508 = vmatpush1.bf16.msra.mxu1 %v10140_v38  ;;  %v10224_v37 = vld [vmem:[%s15093_s1 + $0x648] ss:$16 sps:$4 sm:$0xff]   ;;  %v10229_v38 = vld [vmem:[%s15093_s1 + $0x664] ss:$16 sps:$4 sm:$0xff]  }
  0x94   :  { %6661 = vmatprep.subr.bf16.mxu0 %v10145_v39  ;;  %7509 = vmatprep.subr.bf16.mxu1 %v10148_v40  ;;  %v10232_v39 = vld [vmem:[%s15093_s1 + $0x66c] ss:$16 sps:$4 sm:$0xff]   ;;  %v8584_v40 = vcombine.high %v12151_v33, %v12156_v35 }
  0x97   :  { %6662 = vmatpush1.bf16.msra.mxu0 %v10143_v41  ;;  %7510 = vmatpush1.bf16.msra.mxu1 %v10146_v42  ;;  %v10227_v41 = vld [vmem:[%s15093_s1 + $0x660] ss:$16 sps:$4 sm:$0xff]   ;;  %v10230_v42 = vld [vmem:[%s15093_s1 + $0x668] ss:$16 sps:$4 sm:$0xff]  }
  0x98   :  { %6663 = vmatprep.subr.bf16.mxu0 %v10151_v43  ;;  %7511 = vmatprep.subr.bf16.mxu1 %v10154_v44  ;;  %v10235_v43 = vld [vmem:[%s15093_s1 + $0x684] ss:$16 sps:$4 sm:$0xff]   ;;  %v10238_v44 = vld [vmem:[%s15093_s1 + $0x68c] ss:$16 sps:$4 sm:$0xff]  }
  0x9b   :  { %6664 = vmatpush1.bf16.msra.mxu0 %v10149_v45  ;;  %7512 = vmatpush1.bf16.msra.mxu1 %v10152_v46  ;;  %v10233_v45 = vld [vmem:[%s15093_s1 + $0x680] ss:$16 sps:$4 sm:$0xff]   ;;  %v10236_v46 = vld [vmem:[%s15093_s1 + $0x688] ss:$16 sps:$4 sm:$0xff]  }
  0x9c   :  { %6665 = vmatprep.subr.bf16.mxu0 %v10157_v47  ;;  %7513 = vmatprep.subr.bf16.mxu1 %v10160_v48  ;;  %v10241_v47 = vld [vmem:[%s15093_s1 + $0x6a4] ss:$16 sps:$4 sm:$0xff]   ;;  %v10244_v48 = vld [vmem:[%s15093_s1 + $0x6ac] ss:$16 sps:$4 sm:$0xff]  }
  0x9f   :  { %6666 = vmatpush1.bf16.msra.mxu0 %v10155_v49  ;;  %7514 = vmatpush1.bf16.msra.mxu1 %v10158_v50  ;;  %v10239_v49 = vld [vmem:[%s15093_s1 + $0x6a0] ss:$16 sps:$4 sm:$0xff]   ;;  %v10242_v50 = vld [vmem:[%s15093_s1 + $0x6a8] ss:$16 sps:$4 sm:$0xff]  }
  0xa0   :  { %6667 = vmatprep.subr.bf16.mxu0 %v10163_v51  ;;  %7515 = vmatprep.subr.bf16.mxu1 %v10166_v52  ;;  %v10247_v51 = vld [vmem:[%s15093_s1 + $0x6c4] ss:$16 sps:$4 sm:$0xff]   ;;  %v10250_v52 = vld [vmem:[%s15093_s1 + $0x6cc] ss:$16 sps:$4 sm:$0xff]  }
  0xa3   :  { %6668 = vmatpush1.bf16.msra.mxu0 %v10161_v53  ;;  %7516 = vmatpush1.bf16.msra.mxu1 %v10164_v54  ;;  %v10245_v53 = vld [vmem:[%s15093_s1 + $0x6c0] ss:$16 sps:$4 sm:$0xff]   ;;  %v10248_v54 = vld [vmem:[%s15093_s1 + $0x6c8] ss:$16 sps:$4 sm:$0xff]  }
  0xa4   :  { %6669 = vmatprep.subr.bf16.mxu0 %v10169_v55  ;;  %7517 = vmatprep.subr.bf16.mxu1 %v10172_v56  ;;  %v10253_v55 = vld [vmem:[%s15093_s1 + $0x6e4] ss:$16 sps:$4 sm:$0xff]   ;;  %v10256_v56 = vld [vmem:[%s15093_s1 + $0x6ec] ss:$16 sps:$4 sm:$0xff]  }
  0xa7   :  { %6670 = vmatpush1.bf16.msra.mxu0 %v10167_v57  ;;  %7518 = vmatpush1.bf16.msra.mxu1 %v10170_v58  ;;  %v10251_v57 = vld [vmem:[%s15093_s1 + $0x6e0] ss:$16 sps:$4 sm:$0xff]   ;;  %v10254_v58 = vld [vmem:[%s15093_s1 + $0x6e8] ss:$16 sps:$4 sm:$0xff]  }
  0xa8   :  { %6671 = vmatprep.subr.bf16.mxu0 %v10175_v59  ;;  %7519 = vmatprep.subr.bf16.mxu1 %v10178_v60  ;;  %v10259_v59 = vld [vmem:[%s15093_s1 + $0x704] ss:$16 sps:$4 sm:$0xff]   ;;  %v10262_v60 = vld [vmem:[%s15093_s1 + $0x70c] ss:$16 sps:$4 sm:$0xff]  }
  0xab   :  { %6672 = vmatpush1.bf16.msra.mxu0 %v10173_v61  ;;  %7520 = vmatpush1.bf16.msra.mxu1 %v10176_v62  ;;  %v10257_v61 = vld [vmem:[%s15093_s1 + $0x700] ss:$16 sps:$4 sm:$0xff]   ;;  %v10260_v62 = vld [vmem:[%s15093_s1 + $0x708] ss:$16 sps:$4 sm:$0xff]  }
  0xac   :  { %6673 = vmatprep.subr.bf16.mxu0 %v10181_v63  ;;  %7521 = vmatprep.subr.bf16.mxu1 %v10184_v0  ;;  %v10265_v63 = vld [vmem:[%s15093_s1 + $0x724] ss:$16 sps:$4 sm:$0xff]   ;;  %v10268_v0 = vld [vmem:[%s15093_s1 + $0x72c] ss:$16 sps:$4 sm:$0xff]  }
  0xaf   :  { %6674 = vmatpush1.bf16.msra.mxu0 %v10179_v1  ;;  %7522 = vmatpush1.bf16.msra.mxu1 %v10182_v2  ;;  %v10263_v1 = vld [vmem:[%s15093_s1 + $0x720] ss:$16 sps:$4 sm:$0xff]   ;;  %v10266_v2 = vld [vmem:[%s15093_s1 + $0x728] ss:$16 sps:$4 sm:$0xff]  }
  0xb0   :  { %6675 = vmatprep.subr.bf16.mxu0 %v10187_v3  ;;  %7523 = vmatprep.subr.bf16.mxu1 %v10190_v4  ;;  %v10271_v3 = vld [vmem:[%s15093_s1 + $0x744] ss:$16 sps:$4 sm:$0xff]   ;;  %v10274_v4 = vld [vmem:[%s15093_s1 + $0x74c] ss:$16 sps:$4 sm:$0xff]  }
  0xb3   :  { %6676 = vmatpush1.bf16.msra.mxu0 %v10185_v5  ;;  %7524 = vmatpush1.bf16.msra.mxu1 %v10188_v6  ;;  %v10269_v5 = vld [vmem:[%s15093_s1 + $0x740] ss:$16 sps:$4 sm:$0xff]   ;;  %v10272_v6 = vld [vmem:[%s15093_s1 + $0x748] ss:$16 sps:$4 sm:$0xff]  }
  0xb4   :  { %6677 = vmatprep.subr.bf16.mxu0 %v10193_v7  ;;  %7525 = vmatprep.subr.bf16.mxu1 %v10196_v8  ;;  %v10277_v7 = vld [vmem:[%s15093_s1 + $0x764] ss:$16 sps:$4 sm:$0xff]   ;;  %v10280_v8 = vld [vmem:[%s15093_s1 + $0x76c] ss:$16 sps:$4 sm:$0xff]  }
  0xb7   :  { %6678 = vmatpush1.bf16.msra.mxu0 %v10191_v9  ;;  %7526 = vmatpush1.bf16.msra.mxu1 %v10194_v10  ;;  %v10275_v9 = vld [vmem:[%s15093_s1 + $0x760] ss:$16 sps:$4 sm:$0xff]   ;;  %v10278_v10 = vld [vmem:[%s15093_s1 + $0x768] ss:$16 sps:$4 sm:$0xff]  }
  0xb8   :  { %6679 = vmatprep.subr.bf16.mxu0 %v10199_v11  ;;  %7527 = vmatprep.subr.bf16.mxu1 %v10202_v12  ;;  %v10283_v11 = vld [vmem:[%s15093_s1 + $0x784] ss:$16 sps:$4 sm:$0xff]   ;;  %v10286_v12 = vld [vmem:[%s15093_s1 + $0x78c] ss:$16 sps:$4 sm:$0xff]  }
  0xbb   :  { %6680 = vmatpush1.bf16.msra.mxu0 %v10197_v13  ;;  %7528 = vmatpush1.bf16.msra.mxu1 %v10200_v14  ;;  %v10281_v13 = vld [vmem:[%s15093_s1 + $0x780] ss:$16 sps:$4 sm:$0xff]   ;;  %v10284_v14 = vld [vmem:[%s15093_s1 + $0x788] ss:$16 sps:$4 sm:$0xff]  }
  0xbc   :  { %6681 = vmatprep.subr.bf16.mxu0 %v10205_v15  ;;  %7529 = vmatprep.subr.bf16.mxu1 %v10208_v16  ;;  %v10289_v15 = vld [vmem:[%s15093_s1 + $0x7a4] ss:$16 sps:$4 sm:$0xff]   ;;  %v10292_v16 = vld [vmem:[%s15093_s1 + $0x7ac] ss:$16 sps:$4 sm:$0xff]  }
  0xbf   :  { %6682 = vmatpush1.bf16.msra.mxu0 %v10203_v17  ;;  %7530 = vmatpush1.bf16.msra.mxu1 %v10206_v18  ;;  %v10287_v17 = vld [vmem:[%s15093_s1 + $0x7a0] ss:$16 sps:$4 sm:$0xff]   ;;  %v10290_v18 = vld [vmem:[%s15093_s1 + $0x7a8] ss:$16 sps:$4 sm:$0xff]  }
  0xc0   :  { %6704 = vmatprep.subr.bf16.mxu0 %v10211_v19  ;;  %7552 = vmatprep.subr.bf16.mxu1 %v10214_v20  ;;  %v10295_v19 = vld [vmem:[%s15093_s1 + $0x7c4] ss:$16 sps:$4 sm:$0xff]   ;;  %v10298_v20 = vld [vmem:[%s15093_s1 + $0x7cc] ss:$16 sps:$4 sm:$0xff]  }
  0xc2   :  { %6684 = vmatmul.mubr.bf16.vlgmr.msra.gmra.mrb[0].mxu0 %v8581_v22  ;;  %7532 = vmatmul.mubr.bf16.vlgmr.msra.gmra.mrb[0].mxu1 %v8581_v22  ;;  %v10296_v22 = vld [vmem:[%s15093_s1 + $0x7c8] ss:$16 sps:$4 sm:$0xff]  }
  0xc3   :  { %6705 = vmatpush1.bf16.msra.mxu0 %v10209_v24  ;;  %7553 = vmatpush1.bf16.msra.mxu1 %v10212_v26  ;;  %v10304_v24 = vld [vmem:[%s15093_s1 + $0x7ec] ss:$16 sps:$4 sm:$0xff]   ;;  %v10299_v26 = vld [vmem:[%s15093_s1 + $0x7e0] ss:$16 sps:$4 sm:$0xff]  }
  0xc4   :  { %6706 = vmatprep.subr.bf16.mxu0 %v10217_v25  ;;  %7554 = vmatprep.subr.bf16.mxu1 %v10220_v27  ;;  %v10302_v25 = vld [vmem:[%s15093_s1 + $0x7e8] ss:$16 sps:$4 sm:$0xff]   ;;  %v10307_v27 = vld [vmem:[%s15093_s1 + $0x804] ss:$16 sps:$4 sm:$0xff]  }
  0xc5   :  { %6693 = vmatprep.mubr.bf16.mxu0 %v8614_v28  ;;  %7541 = vmatprep.mubr.bf16.mxu1 %v8614_v28  ;;  %v10310_v28 = vld [vmem:[%s15093_s1 + $0x80c] ss:$16 sps:$4 sm:$0xff]  }
  0xc7   :  { %6707 = vmatpush1.bf16.msra.mxu0 %v10215_v29  ;;  %7555 = vmatpush1.bf16.msra.mxu1 %v10218_v30  ;;  %v52_v29 = vld [vmem:[%s15094_s0 + $0x118] sm:$0xff]  ;;  %v8583_v30 = vcombine.low %v12151_v33, %v12156_v35 }
  0xc8   :  { %6708 = vmatprep.subr.bf16.mxu0 %v10223_v31  ;;  %7556 = vmatprep.subr.bf16.mxu1 %v10226_v32  ;;  %v68_v31 = vld [vmem:[%s15094_s0 + $0x198] sm:$0xff]  ;;  %v10305_v32 = vld [vmem:[%s15093_s1 + $0x800] ss:$16 sps:$4 sm:$0xff]  }
  0xc9   :  { %v10316_v33 = vld [vmem:[%s15093_s1 + $0x82c] ss:$16 sps:$4 sm:$0xff]   ;;  %v8616_v35 = vcombine.high %v52_v29, %v68_v31 }
  0xca   :  { %6694 = vmatmul.mubr.bf16.gmra.mrb[4].mxu0 %v8613_v34  ;;  %7542 = vmatmul.mubr.bf16.gmra.mrb[4].mxu1 %v8613_v34  ;;  %v10308_v34 = vld [vmem:[%s15093_s1 + $0x808] ss:$16 sps:$4 sm:$0xff]  }
  0xcb   :  { %6709 = vmatpush1.bf16.msra.mxu0 %v10221_v36  ;;  %7557 = vmatpush1.bf16.msra.mxu1 %v10224_v37  ;;  %v10313_v36 = vld [vmem:[%s15093_s1 + $0x824] ss:$16 sps:$4 sm:$0xff]   ;;  %v10311_v37 = vld [vmem:[%s15093_s1 + $0x820] ss:$16 sps:$4 sm:$0xff]  }
  0xcc   :  { %6710 = vmatprep.subr.bf16.mxu0 %v10229_v38  ;;  %7558 = vmatprep.subr.bf16.mxu1 %v10232_v39  ;;  %v10314_v38 = vld [vmem:[%s15093_s1 + $0x828] ss:$16 sps:$4 sm:$0xff]   ;;  %v10319_v39 = vld [vmem:[%s15093_s1 + $0x844] ss:$16 sps:$4 sm:$0xff]  }
  0xcd   :  { %6736 = vmatprep.mubr.bf16.mxu0 %v8584_v40  ;;  %7584 = vmatprep.mubr.bf16.mxu1 %v8584_v40  ;;  %v10322_v40 = vld [vmem:[%s15093_s1 + $0x84c] ss:$16 sps:$4 sm:$0xff]  }
  0xcf   :  { %6711 = vmatpush1.bf16.msra.mxu0 %v10227_v41  ;;  %7559 = vmatpush1.bf16.msra.mxu1 %v10230_v42  ;;  %v12363_v41 = vld [vmem:[%s15094_s0 + $0x20] sm:$0xff]  ;;  %v8615_v42 = vcombine.low %v52_v29, %v68_v31 }
  0xd0   :  { %6712 = vmatprep.subr.bf16.mxu0 %v10235_v43  ;;  %7560 = vmatprep.subr.bf16.mxu1 %v10238_v44  ;;  %v12368_v43 = vld [vmem:[%s15094_s0 + $0xa0] sm:$0xff] }
  0xd1   :  { %v10317_v44 = vld [vmem:[%s15093_s1 + $0x840] ss:$16 sps:$4 sm:$0xff]   ;;  %v10397_v31 = vld [vmem:[%s15093_s1 + $0x9e4] ss:$16 sps:$4 sm:$0xff]  }
  0xd2   :  { %v10389_v29 = vld [vmem:[%s15093_s1 + $0x9c0] ss:$16 sps:$4 sm:$0xff]  }
  0xd3   :  { %6713 = vmatpush1.bf16.msra.mxu0 %v10233_v45  ;;  %7561 = vmatpush1.bf16.msra.mxu1 %v10236_v46  ;;  %v10320_v45 = vld [vmem:[%s15093_s1 + $0x848] ss:$16 sps:$4 sm:$0xff]   ;;  %v10325_v46 = vld [vmem:[%s15093_s1 + $0x864] ss:$16 sps:$4 sm:$0xff]  }
  0xd4   :  { %6714 = vmatprep.subr.bf16.mxu0 %v10241_v47  ;;  %7562 = vmatprep.subr.bf16.mxu1 %v10244_v48  ;;  %v10328_v47 = vld [vmem:[%s15093_s1 + $0x86c] ss:$16 sps:$4 sm:$0xff]   ;;  %v8586_v48 = vcombine.high %v12363_v41, %v12368_v43 }
  0xd7   :  { %6715 = vmatpush1.bf16.msra.mxu0 %v10239_v49  ;;  %7563 = vmatpush1.bf16.msra.mxu1 %v10242_v50  ;;  %v10323_v49 = vld [vmem:[%s15093_s1 + $0x860] ss:$16 sps:$4 sm:$0xff]   ;;  %v10326_v50 = vld [vmem:[%s15093_s1 + $0x868] ss:$16 sps:$4 sm:$0xff]  }
  0xd8   :  { %6716 = vmatprep.subr.bf16.mxu0 %v10247_v51  ;;  %7564 = vmatprep.subr.bf16.mxu1 %v10250_v52  ;;  %v10331_v51 = vld [vmem:[%s15093_s1 + $0x884] ss:$16 sps:$4 sm:$0xff]   ;;  %v10334_v52 = vld [vmem:[%s15093_s1 + $0x88c] ss:$16 sps:$4 sm:$0xff]  }
  0xdb   :  { %6717 = vmatpush1.bf16.msra.mxu0 %v10245_v53  ;;  %7565 = vmatpush1.bf16.msra.mxu1 %v10248_v54  ;;  %v10329_v53 = vld [vmem:[%s15093_s1 + $0x880] ss:$16 sps:$4 sm:$0xff]   ;;  %v10332_v54 = vld [vmem:[%s15093_s1 + $0x888] ss:$16 sps:$4 sm:$0xff]  }
  0xdc   :  { %6718 = vmatprep.subr.bf16.mxu0 %v10253_v55  ;;  %7566 = vmatprep.subr.bf16.mxu1 %v10256_v56  ;;  %v10337_v55 = vld [vmem:[%s15093_s1 + $0x8a4] ss:$16 sps:$4 sm:$0xff]   ;;  %v10340_v56 = vld [vmem:[%s15093_s1 + $0x8ac] ss:$16 sps:$4 sm:$0xff]  }
  0xdf   :  { %6719 = vmatpush1.bf16.msra.mxu0 %v10251_v57  ;;  %7567 = vmatpush1.bf16.msra.mxu1 %v10254_v58  ;;  %v10335_v57 = vld [vmem:[%s15093_s1 + $0x8a0] ss:$16 sps:$4 sm:$0xff]   ;;  %v10338_v58 = vld [vmem:[%s15093_s1 + $0x8a8] ss:$16 sps:$4 sm:$0xff]  }
  0xe0   :  { %6720 = vmatprep.subr.bf16.mxu0 %v10259_v59  ;;  %7568 = vmatprep.subr.bf16.mxu1 %v10262_v60  ;;  %v10343_v59 = vld [vmem:[%s15093_s1 + $0x8c4] ss:$16 sps:$4 sm:$0xff]   ;;  %v10346_v60 = vld [vmem:[%s15093_s1 + $0x8cc] ss:$16 sps:$4 sm:$0xff]  }
  0xe3   :  { %6721 = vmatpush1.bf16.msra.mxu0 %v10257_v61  ;;  %7569 = vmatpush1.bf16.msra.mxu1 %v10260_v62  ;;  %v10341_v61 = vld [vmem:[%s15093_s1 + $0x8c0] ss:$16 sps:$4 sm:$0xff]   ;;  %v10344_v62 = vld [vmem:[%s15093_s1 + $0x8c8] ss:$16 sps:$4 sm:$0xff]  }
  0xe4   :  { %6722 = vmatprep.subr.bf16.mxu0 %v10265_v63  ;;  %7570 = vmatprep.subr.bf16.mxu1 %v10268_v0  ;;  %v10349_v63 = vld [vmem:[%s15093_s1 + $0x8e4] ss:$16 sps:$4 sm:$0xff]   ;;  %v10352_v0 = vld [vmem:[%s15093_s1 + $0x8ec] ss:$16 sps:$4 sm:$0xff]  }
  0xe7   :  { %6723 = vmatpush1.bf16.msra.mxu0 %v10263_v1  ;;  %7571 = vmatpush1.bf16.msra.mxu1 %v10266_v2  ;;  %v10347_v1 = vld [vmem:[%s15093_s1 + $0x8e0] ss:$16 sps:$4 sm:$0xff]   ;;  %v10350_v2 = vld [vmem:[%s15093_s1 + $0x8e8] ss:$16 sps:$4 sm:$0xff]  }
  0xe8   :  { %6724 = vmatprep.subr.bf16.mxu0 %v10271_v3  ;;  %7572 = vmatprep.subr.bf16.mxu1 %v10274_v4  ;;  %v10355_v3 = vld [vmem:[%s15093_s1 + $0x904] ss:$16 sps:$4 sm:$0xff]   ;;  %v10358_v4 = vld [vmem:[%s15093_s1 + $0x90c] ss:$16 sps:$4 sm:$0xff]  }
  0xeb   :  { %6725 = vmatpush1.bf16.msra.mxu0 %v10269_v5  ;;  %7573 = vmatpush1.bf16.msra.mxu1 %v10272_v6  ;;  %v10353_v5 = vld [vmem:[%s15093_s1 + $0x900] ss:$16 sps:$4 sm:$0xff]   ;;  %v10356_v6 = vld [vmem:[%s15093_s1 + $0x908] ss:$16 sps:$4 sm:$0xff]  }
  0xec   :  { %6726 = vmatprep.subr.bf16.mxu0 %v10277_v7  ;;  %7574 = vmatprep.subr.bf16.mxu1 %v10280_v8  ;;  %v10361_v7 = vld [vmem:[%s15093_s1 + $0x924] ss:$16 sps:$4 sm:$0xff]   ;;  %v10364_v8 = vld [vmem:[%s15093_s1 + $0x92c] ss:$16 sps:$4 sm:$0xff]  }
  0xef   :  { %6727 = vmatpush1.bf16.msra.mxu0 %v10275_v9  ;;  %7575 = vmatpush1.bf16.msra.mxu1 %v10278_v10  ;;  %v10359_v9 = vld [vmem:[%s15093_s1 + $0x920] ss:$16 sps:$4 sm:$0xff]   ;;  %v10362_v10 = vld [vmem:[%s15093_s1 + $0x928] ss:$16 sps:$4 sm:$0xff]  }
  0xf0   :  { %6728 = vmatprep.subr.bf16.mxu0 %v10283_v11  ;;  %7576 = vmatprep.subr.bf16.mxu1 %v10286_v12  ;;  %v10367_v11 = vld [vmem:[%s15093_s1 + $0x944] ss:$16 sps:$4 sm:$0xff]   ;;  %v10370_v12 = vld [vmem:[%s15093_s1 + $0x94c] ss:$16 sps:$4 sm:$0xff]  }
  0xf3   :  { %6729 = vmatpush1.bf16.msra.mxu0 %v10281_v13  ;;  %7577 = vmatpush1.bf16.msra.mxu1 %v10284_v14  ;;  %v10365_v13 = vld [vmem:[%s15093_s1 + $0x940] ss:$16 sps:$4 sm:$0xff]   ;;  %v10368_v14 = vld [vmem:[%s15093_s1 + $0x948] ss:$16 sps:$4 sm:$0xff]  }
  0xf4   :  { %6730 = vmatprep.subr.bf16.mxu0 %v10289_v15  ;;  %7578 = vmatprep.subr.bf16.mxu1 %v10292_v16  ;;  %v10373_v15 = vld [vmem:[%s15093_s1 + $0x964] ss:$16 sps:$4 sm:$0xff]   ;;  %v10376_v16 = vld [vmem:[%s15093_s1 + $0x96c] ss:$16 sps:$4 sm:$0xff]  }
  0xf7   :  { %6731 = vmatpush1.bf16.msra.mxu0 %v10287_v17  ;;  %7579 = vmatpush1.bf16.msra.mxu1 %v10290_v18  ;;  %v10371_v17 = vld [vmem:[%s15093_s1 + $0x960] ss:$16 sps:$4 sm:$0xff]   ;;  %v10374_v18 = vld [vmem:[%s15093_s1 + $0x968] ss:$16 sps:$4 sm:$0xff]  }
  0xf8   :  { %6732 = vmatprep.subr.bf16.mxu0 %v10295_v19  ;;  %7580 = vmatprep.subr.bf16.mxu1 %v10298_v20  ;;  %v10379_v19 = vld [vmem:[%s15093_s1 + $0x984] ss:$16 sps:$4 sm:$0xff]   ;;  %v10382_v20 = vld [vmem:[%s15093_s1 + $0x98c] ss:$16 sps:$4 sm:$0xff]  }
  0xfb   :  { %6733 = vmatpush1.bf16.msra.mxu0 %v10293_v21  ;;  %7581 = vmatpush1.bf16.msra.mxu1 %v10296_v22  ;;  %v10377_v21 = vld [vmem:[%s15093_s1 + $0x980] ss:$16 sps:$4 sm:$0xff]   ;;  %v10380_v22 = vld [vmem:[%s15093_s1 + $0x988] ss:$16 sps:$4 sm:$0xff]  }
  0xfc   :  { %6734 = vmatprep.subr.bf16.mxu0 %v10301_v23  ;;  %7582 = vmatprep.subr.bf16.mxu1 %v10304_v24  ;;  %v10385_v23 = vld [vmem:[%s15093_s1 + $0x9a4] ss:$16 sps:$4 sm:$0xff]   ;;  %v10388_v24 = vld [vmem:[%s15093_s1 + $0x9ac] ss:$16 sps:$4 sm:$0xff]  }
  0xff   :  { %6735 = vmatpush1.bf16.msra.mxu0 %v10299_v26  ;;  %7583 = vmatpush1.bf16.msra.mxu1 %v10302_v25  ;;  %v10383_v26 = vld [vmem:[%s15093_s1 + $0x9a0] ss:$16 sps:$4 sm:$0xff]   ;;  %v10386_v25 = vld [vmem:[%s15093_s1 + $0x9a8] ss:$16 sps:$4 sm:$0xff]  }
 0x100   :  { %6757 = vmatprep.subr.bf16.mxu0 %v10307_v27  ;;  %7605 = vmatprep.subr.bf16.mxu1 %v10310_v28  ;;  %v10391_v27 = vld [vmem:[%s15093_s1 + $0x9c4] ss:$16 sps:$4 sm:$0xff]   ;;  %v10394_v28 = vld [vmem:[%s15093_s1 + $0x9cc] ss:$16 sps:$4 sm:$0xff]  }
 0x102   :  { %6737 = vmatmul.mubr.bf16.vlgmr.msra.gmra.mrb[0].mxu0 %v8583_v30  ;;  %7585 = vmatmul.mubr.bf16.vlgmr.msra.gmra.mrb[0].mxu1 %v8583_v30  ;;  %v10392_v30 = vld [vmem:[%s15093_s1 + $0x9c8] ss:$16 sps:$4 sm:$0xff]  }
 0x103   :  { %6758 = vmatpush1.bf16.msra.mxu0 %v10305_v32  ;;  %7606 = vmatpush1.bf16.msra.mxu1 %v10308_v34  ;;  %v10400_v32 = vld [vmem:[%s15093_s1 + $0x9ec] ss:$16 sps:$4 sm:$0xff]   ;;  %v10395_v34 = vld [vmem:[%s15093_s1 + $0x9e0] ss:$16 sps:$4 sm:$0xff]  }
 0x104   :  { %6759 = vmatprep.subr.bf16.mxu0 %v10313_v36  ;;  %7607 = vmatprep.subr.bf16.mxu1 %v10316_v33  ;;  %v10398_v36 = vld [vmem:[%s15093_s1 + $0x9e8] ss:$16 sps:$4 sm:$0xff]   ;;  %v10403_v33 = vld [vmem:[%s15093_s1 + $0xa04] ss:$16 sps:$4 sm:$0xff]  }
 0x105   :  { %6746 = vmatprep.mubr.bf16.mxu0 %v8616_v35  ;;  %7594 = vmatprep.mubr.bf16.mxu1 %v8616_v35  ;;  %v10406_v35 = vld [vmem:[%s15093_s1 + $0xa0c] ss:$16 sps:$4 sm:$0xff]  }
 0x107   :  { %6760 = vmatpush1.bf16.msra.mxu0 %v10311_v37  ;;  %7608 = vmatpush1.bf16.msra.mxu1 %v10314_v38  ;;  %v53_v37 = vld [vmem:[%s15094_s0 + $0x120] sm:$0xff] }
 0x108   :  { %6761 = vmatprep.subr.bf16.mxu0 %v10319_v39  ;;  %7609 = vmatprep.subr.bf16.mxu1 %v10322_v40  ;;  %v69_v38 = vld [vmem:[%s15094_s0 + $0x1a0] sm:$0xff]  ;;  %v8585_v39 = vcombine.low %v12363_v41, %v12368_v43  ;;  %v10412_v41 = vld [vmem:[%s15093_s1 + $0xa2c] ss:$16 sps:$4 sm:$0xff]  }
 0x109   :  { %v10401_v40 = vld [vmem:[%s15093_s1 + $0xa00] ss:$16 sps:$4 sm:$0xff]  }
 0x10a   :  { %6747 = vmatmul.mubr.bf16.gmra.mrb[4].mxu0 %v8615_v42  ;;  %7595 = vmatmul.mubr.bf16.gmra.mrb[4].mxu1 %v8615_v42  ;;  %v10404_v42 = vld [vmem:[%s15093_s1 + $0xa08] ss:$16 sps:$4 sm:$0xff]   ;;  %v10407_v43 = vld [vmem:[%s15093_s1 + $0xa20] ss:$16 sps:$4 sm:$0xff]  }
 0x10b   :  { %6762 = vmatpush1.bf16.msra.mxu0 %v10317_v44  ;;  %7610 = vmatpush1.bf16.msra.mxu1 %v10320_v45  ;;  %v10409_v44 = vld [vmem:[%s15093_s1 + $0xa24] ss:$16 sps:$4 sm:$0xff]   ;;  %v10410_v45 = vld [vmem:[%s15093_s1 + $0xa28] ss:$16 sps:$4 sm:$0xff]  }
 0x10c   :  { %6763 = vmatprep.subr.bf16.mxu0 %v10325_v46  ;;  %7611 = vmatprep.subr.bf16.mxu1 %v10328_v47  ;;  %v8618_v46 = vcombine.high %v53_v37, %v69_v38  ;;  %v10415_v47 = vld [vmem:[%s15093_s1 + $0xa44] ss:$16 sps:$4 sm:$0xff]  }
 0x10d   :  { %6789 = vmatprep.mubr.bf16.mxu0 %v8586_v48  ;;  %7637 = vmatprep.mubr.bf16.mxu1 %v8586_v48  ;;  %v10418_v48 = vld [vmem:[%s15093_s1 + $0xa4c] ss:$16 sps:$4 sm:$0xff]  }
 0x10f   :  { %6764 = vmatpush1.bf16.msra.mxu0 %v10323_v49  ;;  %7612 = vmatpush1.bf16.msra.mxu1 %v10326_v50  ;;  %v12575_v49 = vld [vmem:[%s15094_s0 + $0x28] sm:$0xff] }
 0x110   :  { %6765 = vmatprep.subr.bf16.mxu0 %v10331_v51  ;;  %7613 = vmatprep.subr.bf16.mxu1 %v10334_v52  ;;  %v12580_v50 = vld [vmem:[%s15094_s0 + $0xa8] sm:$0xff]  ;;  %v8617_v51 = vcombine.low %v53_v37, %v69_v38  ;;  %v10413_v52 = vld [vmem:[%s15093_s1 + $0xa40] ss:$16 sps:$4 sm:$0xff]  }
 0x111   :  { %v10485_v37 = vld [vmem:[%s15093_s1 + $0xbc0] ss:$16 sps:$4 sm:$0xff]   ;;  %v10488_v38 = vld [vmem:[%s15093_s1 + $0xbc8] ss:$16 sps:$4 sm:$0xff]  }
 0x113   :  { %6766 = vmatpush1.bf16.msra.mxu0 %v10329_v53  ;;  %7614 = vmatpush1.bf16.msra.mxu1 %v10332_v54  ;;  %v10416_v53 = vld [vmem:[%s15093_s1 + $0xa48] ss:$16 sps:$4 sm:$0xff]   ;;  %v10421_v54 = vld [vmem:[%s15093_s1 + $0xa64] ss:$16 sps:$4 sm:$0xff]  }
 0x114   :  { %6767 = vmatprep.subr.bf16.mxu0 %v10337_v55  ;;  %7615 = vmatprep.subr.bf16.mxu1 %v10340_v56  ;;  %v10424_v55 = vld [vmem:[%s15093_s1 + $0xa6c] ss:$16 sps:$4 sm:$0xff]   ;;  %v8588_v56 = vcombine.high %v12575_v49, %v12580_v50 }
 0x117   :  { %6768 = vmatpush1.bf16.msra.mxu0 %v10335_v57  ;;  %7616 = vmatpush1.bf16.msra.mxu1 %v10338_v58  ;;  %v10419_v57 = vld [vmem:[%s15093_s1 + $0xa60] ss:$16 sps:$4 sm:$0xff]   ;;  %v10422_v58 = vld [vmem:[%s15093_s1 + $0xa68] ss:$16 sps:$4 sm:$0xff]  }
 0x118   :  { %6769 = vmatprep.subr.bf16.mxu0 %v10343_v59  ;;  %7617 = vmatprep.subr.bf16.mxu1 %v10346_v60  ;;  %v10427_v59 = vld [vmem:[%s15093_s1 + $0xa84] ss:$16 sps:$4 sm:$0xff]   ;;  %v10430_v60 = vld [vmem:[%s15093_s1 + $0xa8c] ss:$16 sps:$4 sm:$0xff]  }
 0x11b   :  { %6770 = vmatpush1.bf16.msra.mxu0 %v10341_v61  ;;  %7618 = vmatpush1.bf16.msra.mxu1 %v10344_v62  ;;  %v10425_v61 = vld [vmem:[%s15093_s1 + $0xa80] ss:$16 sps:$4 sm:$0xff]   ;;  %v10428_v62 = vld [vmem:[%s15093_s1 + $0xa88] ss:$16 sps:$4 sm:$0xff]  }
 0x11c   :  { %6771 = vmatprep.subr.bf16.mxu0 %v10349_v63  ;;  %7619 = vmatprep.subr.bf16.mxu1 %v10352_v0  ;;  %v10433_v63 = vld [vmem:[%s15093_s1 + $0xaa4] ss:$16 sps:$4 sm:$0xff]   ;;  %v10436_v0 = vld [vmem:[%s15093_s1 + $0xaac] ss:$16 sps:$4 sm:$0xff]  }
 0x11f   :  { %6772 = vmatpush1.bf16.msra.mxu0 %v10347_v1  ;;  %7620 = vmatpush1.bf16.msra.mxu1 %v10350_v2  ;;  %v10431_v1 = vld [vmem:[%s15093_s1 + $0xaa0] ss:$16 sps:$4 sm:$0xff]   ;;  %v10434_v2 = vld [vmem:[%s15093_s1 + $0xaa8] ss:$16 sps:$4 sm:$0xff]  }
 0x120   :  { %6773 = vmatprep.subr.bf16.mxu0 %v10355_v3  ;;  %7621 = vmatprep.subr.bf16.mxu1 %v10358_v4  ;;  %v10439_v3 = vld [vmem:[%s15093_s1 + $0xac4] ss:$16 sps:$4 sm:$0xff]   ;;  %v10442_v4 = vld [vmem:[%s15093_s1 + $0xacc] ss:$16 sps:$4 sm:$0xff]  }
 0x123   :  { %6774 = vmatpush1.bf16.msra.mxu0 %v10353_v5  ;;  %7622 = vmatpush1.bf16.msra.mxu1 %v10356_v6  ;;  %v10437_v5 = vld [vmem:[%s15093_s1 + $0xac0] ss:$16 sps:$4 sm:$0xff]   ;;  %v10440_v6 = vld [vmem:[%s15093_s1 + $0xac8] ss:$16 sps:$4 sm:$0xff]  }
 0x124   :  { %6775 = vmatprep.subr.bf16.mxu0 %v10361_v7  ;;  %7623 = vmatprep.subr.bf16.mxu1 %v10364_v8  ;;  %v10445_v7 = vld [vmem:[%s15093_s1 + $0xae4] ss:$16 sps:$4 sm:$0xff]   ;;  %v10448_v8 = vld [vmem:[%s15093_s1 + $0xaec] ss:$16 sps:$4 sm:$0xff]  }
 0x127   :  { %6776 = vmatpush1.bf16.msra.mxu0 %v10359_v9  ;;  %7624 = vmatpush1.bf16.msra.mxu1 %v10362_v10  ;;  %v10443_v9 = vld [vmem:[%s15093_s1 + $0xae0] ss:$16 sps:$4 sm:$0xff]   ;;  %v10446_v10 = vld [vmem:[%s15093_s1 + $0xae8] ss:$16 sps:$4 sm:$0xff]  }
 0x128   :  { %6777 = vmatprep.subr.bf16.mxu0 %v10367_v11  ;;  %7625 = vmatprep.subr.bf16.mxu1 %v10370_v12  ;;  %v10451_v11 = vld [vmem:[%s15093_s1 + $0xb04] ss:$16 sps:$4 sm:$0xff]   ;;  %v10454_v12 = vld [vmem:[%s15093_s1 + $0xb0c] ss:$16 sps:$4 sm:$0xff]  }
 0x12b   :  { %6778 = vmatpush1.bf16.msra.mxu0 %v10365_v13  ;;  %7626 = vmatpush1.bf16.msra.mxu1 %v10368_v14  ;;  %v10449_v13 = vld [vmem:[%s15093_s1 + $0xb00] ss:$16 sps:$4 sm:$0xff]   ;;  %v10452_v14 = vld [vmem:[%s15093_s1 + $0xb08] ss:$16 sps:$4 sm:$0xff]  }
 0x12c   :  { %6779 = vmatprep.subr.bf16.mxu0 %v10373_v15  ;;  %7627 = vmatprep.subr.bf16.mxu1 %v10376_v16  ;;  %v10457_v15 = vld [vmem:[%s15093_s1 + $0xb24] ss:$16 sps:$4 sm:$0xff]   ;;  %v10460_v16 = vld [vmem:[%s15093_s1 + $0xb2c] ss:$16 sps:$4 sm:$0xff]  }
 0x12f   :  { %6780 = vmatpush1.bf16.msra.mxu0 %v10371_v17  ;;  %7628 = vmatpush1.bf16.msra.mxu1 %v10374_v18  ;;  %v10455_v17 = vld [vmem:[%s15093_s1 + $0xb20] ss:$16 sps:$4 sm:$0xff]   ;;  %v10458_v18 = vld [vmem:[%s15093_s1 + $0xb28] ss:$16 sps:$4 sm:$0xff]  }
 0x130   :  { %6781 = vmatprep.subr.bf16.mxu0 %v10379_v19  ;;  %7629 = vmatprep.subr.bf16.mxu1 %v10382_v20  ;;  %v10463_v19 = vld [vmem:[%s15093_s1 + $0xb44] ss:$16 sps:$4 sm:$0xff]   ;;  %v10466_v20 = vld [vmem:[%s15093_s1 + $0xb4c] ss:$16 sps:$4 sm:$0xff]  }
 0x133   :  { %6782 = vmatpush1.bf16.msra.mxu0 %v10377_v21  ;;  %7630 = vmatpush1.bf16.msra.mxu1 %v10380_v22  ;;  %v10461_v21 = vld [vmem:[%s15093_s1 + $0xb40] ss:$16 sps:$4 sm:$0xff]   ;;  %v10464_v22 = vld [vmem:[%s15093_s1 + $0xb48] ss:$16 sps:$4 sm:$0xff]  }
 0x134   :  { %6783 = vmatprep.subr.bf16.mxu0 %v10385_v23  ;;  %7631 = vmatprep.subr.bf16.mxu1 %v10388_v24  ;;  %v10469_v23 = vld [vmem:[%s15093_s1 + $0xb64] ss:$16 sps:$4 sm:$0xff]   ;;  %v10472_v24 = vld [vmem:[%s15093_s1 + $0xb6c] ss:$16 sps:$4 sm:$0xff]  }
 0x137   :  { %6784 = vmatpush1.bf16.msra.mxu0 %v10383_v26  ;;  %7632 = vmatpush1.bf16.msra.mxu1 %v10386_v25  ;;  %v10467_v26 = vld [vmem:[%s15093_s1 + $0xb60] ss:$16 sps:$4 sm:$0xff]   ;;  %v10470_v25 = vld [vmem:[%s15093_s1 + $0xb68] ss:$16 sps:$4 sm:$0xff]  }
 0x138   :  { %6785 = vmatprep.subr.bf16.mxu0 %v10391_v27  ;;  %7633 = vmatprep.subr.bf16.mxu1 %v10394_v28  ;;  %v10475_v27 = vld [vmem:[%s15093_s1 + $0xb84] ss:$16 sps:$4 sm:$0xff]   ;;  %v10478_v28 = vld [vmem:[%s15093_s1 + $0xb8c] ss:$16 sps:$4 sm:$0xff]  }
 0x13b   :  { %6786 = vmatpush1.bf16.msra.mxu0 %v10389_v29  ;;  %7634 = vmatpush1.bf16.msra.mxu1 %v10392_v30  ;;  %v10473_v29 = vld [vmem:[%s15093_s1 + $0xb80] ss:$16 sps:$4 sm:$0xff]   ;;  %v10476_v30 = vld [vmem:[%s15093_s1 + $0xb88] ss:$16 sps:$4 sm:$0xff]  }
 0x13c   :  { %6787 = vmatprep.subr.bf16.mxu0 %v10397_v31  ;;  %7635 = vmatprep.subr.bf16.mxu1 %v10400_v32  ;;  %v10481_v31 = vld [vmem:[%s15093_s1 + $0xba4] ss:$16 sps:$4 sm:$0xff]   ;;  %v10484_v32 = vld [vmem:[%s15093_s1 + $0xbac] ss:$16 sps:$4 sm:$0xff]  }
 0x13f   :  { %6788 = vmatpush1.bf16.msra.mxu0 %v10395_v34  ;;  %7636 = vmatpush1.bf16.msra.mxu1 %v10398_v36  ;;  %v10479_v34 = vld [vmem:[%s15093_s1 + $0xba0] ss:$16 sps:$4 sm:$0xff]   ;;  %v10482_v36 = vld [vmem:[%s15093_s1 + $0xba8] ss:$16 sps:$4 sm:$0xff]  }
 0x140   :  { %6810 = vmatprep.subr.bf16.mxu0 %v10403_v33  ;;  %7658 = vmatprep.subr.bf16.mxu1 %v10406_v35  ;;  %v10487_v33 = vld [vmem:[%s15093_s1 + $0xbc4] ss:$16 sps:$4 sm:$0xff]   ;;  %v10490_v35 = vld [vmem:[%s15093_s1 + $0xbcc] ss:$16 sps:$4 sm:$0xff]  }
 0x142   :  { %6790 = vmatmul.mubr.bf16.vlgmr.msra.gmra.mrb[0].mxu0 %v8585_v39  ;;  %7638 = vmatmul.mubr.bf16.vlgmr.msra.gmra.mrb[0].mxu1 %v8585_v39  ;;  %v10493_v39 = vld [vmem:[%s15093_s1 + $0xbe4] ss:$16 sps:$4 sm:$0xff]  }
 0x143   :  { %6811 = vmatpush1.bf16.msra.mxu0 %v10401_v40  ;;  %7659 = vmatpush1.bf16.msra.mxu1 %v10404_v42  ;;  %v10496_v40 = vld [vmem:[%s15093_s1 + $0xbec] ss:$16 sps:$4 sm:$0xff]   ;;  %v10491_v42 = vld [vmem:[%s15093_s1 + $0xbe0] ss:$16 sps:$4 sm:$0xff]  }
 0x144   :  { %6812 = vmatprep.subr.bf16.mxu0 %v10409_v44  ;;  %7660 = vmatprep.subr.bf16.mxu1 %v10412_v41  ;;  %v10494_v44 = vld [vmem:[%s15093_s1 + $0xbe8] ss:$16 sps:$4 sm:$0xff]   ;;  %v10499_v41 = vld [vmem:[%s15093_s1 + $0xc04] ss:$16 sps:$4 sm:$0xff]  }
 0x145   :  { %6799 = vmatprep.mubr.bf16.mxu0 %v8618_v46  ;;  %7647 = vmatprep.mubr.bf16.mxu1 %v8618_v46  ;;  %v70_v46 = vld [vmem:[%s15094_s0 + $0x1a8] sm:$0xff] }
 0x147   :  { %6813 = vmatpush1.bf16.msra.mxu0 %v10407_v43  ;;  %7661 = vmatpush1.bf16.msra.mxu1 %v10410_v45  ;;  %v10502_v43 = vld [vmem:[%s15093_s1 + $0xc0c] ss:$16 sps:$4 sm:$0xff]  }
 0x148   :  { %6814 = vmatprep.subr.bf16.mxu0 %v10415_v47  ;;  %7662 = vmatprep.subr.bf16.mxu1 %v10418_v48  ;;  %v54_v45 = vld [vmem:[%s15094_s0 + $0x128] sm:$0xff]  ;;  %v8587_v47 = vcombine.low %v12575_v49, %v12580_v50  ;;  %v10497_v48 = vld [vmem:[%s15093_s1 + $0xc00] ss:$16 sps:$4 sm:$0xff]  }
 0x149   :  { %v10508_v49 = vld [vmem:[%s15093_s1 + $0xc2c] ss:$16 sps:$4 sm:$0xff]   ;;  %v10503_v50 = vld [vmem:[%s15093_s1 + $0xc20] ss:$16 sps:$4 sm:$0xff]  }
 0x14a   :  { %6800 = vmatmul.mubr.bf16.gmra.mrb[4].mxu0 %v8617_v51  ;;  %7648 = vmatmul.mubr.bf16.gmra.mrb[4].mxu1 %v8617_v51  ;;  %v10500_v51 = vld [vmem:[%s15093_s1 + $0xc08] ss:$16 sps:$4 sm:$0xff]  }
 0x14b   :  { %6815 = vmatpush1.bf16.msra.mxu0 %v10413_v52  ;;  %7663 = vmatpush1.bf16.msra.mxu1 %v10416_v53  ;;  %v10505_v52 = vld [vmem:[%s15093_s1 + $0xc24] ss:$16 sps:$4 sm:$0xff]   ;;  %v10506_v53 = vld [vmem:[%s15093_s1 + $0xc28] ss:$16 sps:$4 sm:$0xff]  }
 0x14c   :  { %6816 = vmatprep.subr.bf16.mxu0 %v10421_v54  ;;  %7664 = vmatprep.subr.bf16.mxu1 %v10424_v55  ;;  %v8620_v54 = vcombine.high %v54_v45, %v70_v46  ;;  %v10511_v55 = vld [vmem:[%s15093_s1 + $0xc44] ss:$16 sps:$4 sm:$0xff]  }
 0x14d   :  { %6842 = vmatprep.mubr.bf16.mxu0 %v8588_v56  ;;  %7690 = vmatprep.mubr.bf16.mxu1 %v8588_v56  ;;  %v10514_v56 = vld [vmem:[%s15093_s1 + $0xc4c] ss:$16 sps:$4 sm:$0xff]  }
 0x14f   :  { %6817 = vmatpush1.bf16.msra.mxu0 %v10419_v57  ;;  %7665 = vmatpush1.bf16.msra.mxu1 %v10422_v58  ;;  %v12787_v57 = vld [vmem:[%s15094_s0 + $0x30] sm:$0xff] }
 0x150   :  { %6818 = vmatprep.subr.bf16.mxu0 %v10427_v59  ;;  %7666 = vmatprep.subr.bf16.mxu1 %v10430_v60  ;;  %v12792_v58 = vld [vmem:[%s15094_s0 + $0xb0] sm:$0xff]  ;;  %v8619_v59 = vcombine.low %v54_v45, %v70_v46  ;;  %v10584_v46 = vld [vmem:[%s15093_s1 + $0xdc8] ss:$16 sps:$4 sm:$0xff]  }
 0x151   :  { %v10509_v60 = vld [vmem:[%s15093_s1 + $0xc40] ss:$16 sps:$4 sm:$0xff]  }
 0x152   :  { %v10581_v45 = vld [vmem:[%s15093_s1 + $0xdc0] ss:$16 sps:$4 sm:$0xff]  }
 0x153   :  { %6819 = vmatpush1.bf16.msra.mxu0 %v10425_v61  ;;  %7667 = vmatpush1.bf16.msra.mxu1 %v10428_v62  ;;  %v10512_v61 = vld [vmem:[%s15093_s1 + $0xc48] ss:$16 sps:$4 sm:$0xff]   ;;  %v10517_v62 = vld [vmem:[%s15093_s1 + $0xc64] ss:$16 sps:$4 sm:$0xff]  }
 0x154   :  { %6820 = vmatprep.subr.bf16.mxu0 %v10433_v63  ;;  %7668 = vmatprep.subr.bf16.mxu1 %v10436_v0  ;;  %v10520_v63 = vld [vmem:[%s15093_s1 + $0xc6c] ss:$16 sps:$4 sm:$0xff]   ;;  %v8590_v0 = vcombine.high %v12787_v57, %v12792_v58 }
 0x157   :  { %6821 = vmatpush1.bf16.msra.mxu0 %v10431_v1  ;;  %7669 = vmatpush1.bf16.msra.mxu1 %v10434_v2  ;;  %v10515_v1 = vld [vmem:[%s15093_s1 + $0xc60] ss:$16 sps:$4 sm:$0xff]   ;;  %v10518_v2 = vld [vmem:[%s15093_s1 + $0xc68] ss:$16 sps:$4 sm:$0xff]  }
 0x158   :  { %6822 = vmatprep.subr.bf16.mxu0 %v10439_v3  ;;  %7670 = vmatprep.subr.bf16.mxu1 %v10442_v4  ;;  %v10523_v3 = vld [vmem:[%s15093_s1 + $0xc84] ss:$16 sps:$4 sm:$0xff]   ;;  %v10526_v4 = vld [vmem:[%s15093_s1 + $0xc8c] ss:$16 sps:$4 sm:$0xff]  }
 0x15b   :  { %6823 = vmatpush1.bf16.msra.mxu0 %v10437_v5  ;;  %7671 = vmatpush1.bf16.msra.mxu1 %v10440_v6  ;;  %v10521_v5 = vld [vmem:[%s15093_s1 + $0xc80] ss:$16 sps:$4 sm:$0xff]   ;;  %v10524_v6 = vld [vmem:[%s15093_s1 + $0xc88] ss:$16 sps:$4 sm:$0xff]  }
 0x15c   :  { %6824 = vmatprep.subr.bf16.mxu0 %v10445_v7  ;;  %7672 = vmatprep.subr.bf16.mxu1 %v10448_v8  ;;  %v10529_v7 = vld [vmem:[%s15093_s1 + $0xca4] ss:$16 sps:$4 sm:$0xff]   ;;  %v10532_v8 = vld [vmem:[%s15093_s1 + $0xcac] ss:$16 sps:$4 sm:$0xff]  }
 0x15f   :  { %6825 = vmatpush1.bf16.msra.mxu0 %v10443_v9  ;;  %7673 = vmatpush1.bf16.msra.mxu1 %v10446_v10  ;;  %v10527_v9 = vld [vmem:[%s15093_s1 + $0xca0] ss:$16 sps:$4 sm:$0xff]   ;;  %v10530_v10 = vld [vmem:[%s15093_s1 + $0xca8] ss:$16 sps:$4 sm:$0xff]  }
 0x160   :  { %6826 = vmatprep.subr.bf16.mxu0 %v10451_v11  ;;  %7674 = vmatprep.subr.bf16.mxu1 %v10454_v12  ;;  %v10535_v11 = vld [vmem:[%s15093_s1 + $0xcc4] ss:$16 sps:$4 sm:$0xff]   ;;  %v10538_v12 = vld [vmem:[%s15093_s1 + $0xccc] ss:$16 sps:$4 sm:$0xff]  }
 0x163   :  { %6827 = vmatpush1.bf16.msra.mxu0 %v10449_v13  ;;  %7675 = vmatpush1.bf16.msra.mxu1 %v10452_v14  ;;  %v10533_v13 = vld [vmem:[%s15093_s1 + $0xcc0] ss:$16 sps:$4 sm:$0xff]   ;;  %v10536_v14 = vld [vmem:[%s15093_s1 + $0xcc8] ss:$16 sps:$4 sm:$0xff]  }
 0x164   :  { %6828 = vmatprep.subr.bf16.mxu0 %v10457_v15  ;;  %7676 = vmatprep.subr.bf16.mxu1 %v10460_v16  ;;  %v10541_v15 = vld [vmem:[%s15093_s1 + $0xce4] ss:$16 sps:$4 sm:$0xff]   ;;  %v10544_v16 = vld [vmem:[%s15093_s1 + $0xcec] ss:$16 sps:$4 sm:$0xff]  }
 0x167   :  { %6829 = vmatpush1.bf16.msra.mxu0 %v10455_v17  ;;  %7677 = vmatpush1.bf16.msra.mxu1 %v10458_v18  ;;  %v10539_v17 = vld [vmem:[%s15093_s1 + $0xce0] ss:$16 sps:$4 sm:$0xff]   ;;  %v10542_v18 = vld [vmem:[%s15093_s1 + $0xce8] ss:$16 sps:$4 sm:$0xff]  }
 0x168   :  { %6830 = vmatprep.subr.bf16.mxu0 %v10463_v19  ;;  %7678 = vmatprep.subr.bf16.mxu1 %v10466_v20  ;;  %v10547_v19 = vld [vmem:[%s15093_s1 + $0xd04] ss:$16 sps:$4 sm:$0xff]   ;;  %v10550_v20 = vld [vmem:[%s15093_s1 + $0xd0c] ss:$16 sps:$4 sm:$0xff]  }
 0x16b   :  { %6831 = vmatpush1.bf16.msra.mxu0 %v10461_v21  ;;  %7679 = vmatpush1.bf16.msra.mxu1 %v10464_v22  ;;  %v10545_v21 = vld [vmem:[%s15093_s1 + $0xd00] ss:$16 sps:$4 sm:$0xff]   ;;  %v10548_v22 = vld [vmem:[%s15093_s1 + $0xd08] ss:$16 sps:$4 sm:$0xff]  }
 0x16c   :  { %6832 = vmatprep.subr.bf16.mxu0 %v10469_v23  ;;  %7680 = vmatprep.subr.bf16.mxu1 %v10472_v24  ;;  %v10553_v23 = vld [vmem:[%s15093_s1 + $0xd24] ss:$16 sps:$4 sm:$0xff]   ;;  %v10556_v24 = vld [vmem:[%s15093_s1 + $0xd2c] ss:$16 sps:$4 sm:$0xff]  }
 0x16f   :  { %6833 = vmatpush1.bf16.msra.mxu0 %v10467_v26  ;;  %7681 = vmatpush1.bf16.msra.mxu1 %v10470_v25  ;;  %v10551_v26 = vld [vmem:[%s15093_s1 + $0xd20] ss:$16 sps:$4 sm:$0xff]   ;;  %v10554_v25 = vld [vmem:[%s15093_s1 + $0xd28] ss:$16 sps:$4 sm:$0xff]  }
 0x170   :  { %6834 = vmatprep.subr.bf16.mxu0 %v10475_v27  ;;  %7682 = vmatprep.subr.bf16.mxu1 %v10478_v28  ;;  %v10559_v27 = vld [vmem:[%s15093_s1 + $0xd44] ss:$16 sps:$4 sm:$0xff]   ;;  %v10562_v28 = vld [vmem:[%s15093_s1 + $0xd4c] ss:$16 sps:$4 sm:$0xff]  }
 0x173   :  { %6835 = vmatpush1.bf16.msra.mxu0 %v10473_v29  ;;  %7683 = vmatpush1.bf16.msra.mxu1 %v10476_v30  ;;  %v10557_v29 = vld [vmem:[%s15093_s1 + $0xd40] ss:$16 sps:$4 sm:$0xff]   ;;  %v10560_v30 = vld [vmem:[%s15093_s1 + $0xd48] ss:$16 sps:$4 sm:$0xff]  }
 0x174   :  { %6836 = vmatprep.subr.bf16.mxu0 %v10481_v31  ;;  %7684 = vmatprep.subr.bf16.mxu1 %v10484_v32  ;;  %v10565_v31 = vld [vmem:[%s15093_s1 + $0xd64] ss:$16 sps:$4 sm:$0xff]   ;;  %v10568_v32 = vld [vmem:[%s15093_s1 + $0xd6c] ss:$16 sps:$4 sm:$0xff]  }
 0x177   :  { %6837 = vmatpush1.bf16.msra.mxu0 %v10479_v34  ;;  %7685 = vmatpush1.bf16.msra.mxu1 %v10482_v36  ;;  %v10563_v34 = vld [vmem:[%s15093_s1 + $0xd60] ss:$16 sps:$4 sm:$0xff]   ;;  %v10566_v36 = vld [vmem:[%s15093_s1 + $0xd68] ss:$16 sps:$4 sm:$0xff]  }
 0x178   :  { %6838 = vmatprep.subr.bf16.mxu0 %v10487_v33  ;;  %7686 = vmatprep.subr.bf16.mxu1 %v10490_v35  ;;  %v10571_v33 = vld [vmem:[%s15093_s1 + $0xd84] ss:$16 sps:$4 sm:$0xff]   ;;  %v10574_v35 = vld [vmem:[%s15093_s1 + $0xd8c] ss:$16 sps:$4 sm:$0xff]  }
 0x17b   :  { %6839 = vmatpush1.bf16.msra.mxu0 %v10485_v37  ;;  %7687 = vmatpush1.bf16.msra.mxu1 %v10488_v38  ;;  %v10569_v37 = vld [vmem:[%s15093_s1 + $0xd80] ss:$16 sps:$4 sm:$0xff]   ;;  %v10572_v38 = vld [vmem:[%s15093_s1 + $0xd88] ss:$16 sps:$4 sm:$0xff]  }
 0x17c   :  { %6840 = vmatprep.subr.bf16.mxu0 %v10493_v39  ;;  %7688 = vmatprep.subr.bf16.mxu1 %v10496_v40  ;;  %v10577_v39 = vld [vmem:[%s15093_s1 + $0xda4] ss:$16 sps:$4 sm:$0xff]   ;;  %v10580_v40 = vld [vmem:[%s15093_s1 + $0xdac] ss:$16 sps:$4 sm:$0xff]  }
 0x17f   :  { %6841 = vmatpush1.bf16.msra.mxu0 %v10491_v42  ;;  %7689 = vmatpush1.bf16.msra.mxu1 %v10494_v44  ;;  %v10575_v42 = vld [vmem:[%s15093_s1 + $0xda0] ss:$16 sps:$4 sm:$0xff]   ;;  %v10578_v44 = vld [vmem:[%s15093_s1 + $0xda8] ss:$16 sps:$4 sm:$0xff]  }
 0x180   :  { %6863 = vmatprep.subr.bf16.mxu0 %v10499_v41  ;;  %7711 = vmatprep.subr.bf16.mxu1 %v10502_v43  ;;  %v10583_v41 = vld [vmem:[%s15093_s1 + $0xdc4] ss:$16 sps:$4 sm:$0xff]   ;;  %v10586_v43 = vld [vmem:[%s15093_s1 + $0xdcc] ss:$16 sps:$4 sm:$0xff]  }
 0x182   :  { %6843 = vmatmul.mubr.bf16.vlgmr.msra.gmra.mrb[0].mxu0 %v8587_v47  ;;  %7691 = vmatmul.mubr.bf16.vlgmr.msra.gmra.mrb[0].mxu1 %v8587_v47  ;;  %v10589_v47 = vld [vmem:[%s15093_s1 + $0xde4] ss:$16 sps:$4 sm:$0xff]  }
 0x183   :  { %6864 = vmatpush1.bf16.msra.mxu0 %v10497_v48  ;;  %7712 = vmatpush1.bf16.msra.mxu1 %v10500_v51  ;;  %v10592_v48 = vld [vmem:[%s15093_s1 + $0xdec] ss:$16 sps:$4 sm:$0xff]   ;;  %v10587_v51 = vld [vmem:[%s15093_s1 + $0xde0] ss:$16 sps:$4 sm:$0xff]  }
 0x184   :  { %6865 = vmatprep.subr.bf16.mxu0 %v10505_v52  ;;  %7713 = vmatprep.subr.bf16.mxu1 %v10508_v49  ;;  %v10590_v52 = vld [vmem:[%s15093_s1 + $0xde8] ss:$16 sps:$4 sm:$0xff]   ;;  %v10595_v49 = vld [vmem:[%s15093_s1 + $0xe04] ss:$16 sps:$4 sm:$0xff]  }
 0x185   :  { %6852 = vmatprep.mubr.bf16.mxu0 %v8620_v54  ;;  %7700 = vmatprep.mubr.bf16.mxu1 %v8620_v54  ;;  %v71_v54 = vld [vmem:[%s15094_s0 + $0x1b0] sm:$0xff] }
 0x187   :  { %6866 = vmatpush1.bf16.msra.mxu0 %v10503_v50  ;;  %7714 = vmatpush1.bf16.msra.mxu1 %v10506_v53  ;;  %v10598_v50 = vld [vmem:[%s15093_s1 + $0xe0c] ss:$16 sps:$4 sm:$0xff]   ;;  %v55_v53 = vld [vmem:[%s15094_s0 + $0x130] sm:$0xff] }
 0x188   :  { %6867 = vmatprep.subr.bf16.mxu0 %v10511_v55  ;;  %7715 = vmatprep.subr.bf16.mxu1 %v10514_v56  ;;  %v8589_v55 = vcombine.low %v12787_v57, %v12792_v58  ;;  %v10593_v56 = vld [vmem:[%s15093_s1 + $0xe00] ss:$16 sps:$4 sm:$0xff]   ;;  %v10604_v57 = vld [vmem:[%s15093_s1 + $0xe2c] ss:$16 sps:$4 sm:$0xff]  }
 0x189   :  { %v10599_v58 = vld [vmem:[%s15093_s1 + $0xe20] ss:$16 sps:$4 sm:$0xff]  }
 0x18a   :  { %6853 = vmatmul.mubr.bf16.gmra.mrb[4].mxu0 %v8619_v59  ;;  %7701 = vmatmul.mubr.bf16.gmra.mrb[4].mxu1 %v8619_v59  ;;  %v10596_v59 = vld [vmem:[%s15093_s1 + $0xe08] ss:$16 sps:$4 sm:$0xff]  }
 0x18b   :  { %6868 = vmatpush1.bf16.msra.mxu0 %v10509_v60  ;;  %7716 = vmatpush1.bf16.msra.mxu1 %v10512_v61  ;;  %v10601_v60 = vld [vmem:[%s15093_s1 + $0xe24] ss:$16 sps:$4 sm:$0xff]   ;;  %v10602_v61 = vld [vmem:[%s15093_s1 + $0xe28] ss:$16 sps:$4 sm:$0xff]  }
 0x18c   :  { %6869 = vmatprep.subr.bf16.mxu0 %v10517_v62  ;;  %7717 = vmatprep.subr.bf16.mxu1 %v10520_v63  ;;  %v8622_v62 = vcombine.high %v55_v53, %v71_v54  ;;  %v10607_v63 = vld [vmem:[%s15093_s1 + $0xe44] ss:$16 sps:$4 sm:$0xff]  }
 0x18d   :  { %6895 = vmatprep.mubr.bf16.mxu0 %v8590_v0  ;;  %7743 = vmatprep.mubr.bf16.mxu1 %v8590_v0  ;;  %v10610_v0 = vld [vmem:[%s15093_s1 + $0xe4c] ss:$16 sps:$4 sm:$0xff]  }
 0x18f   :  { %6870 = vmatpush1.bf16.msra.mxu0 %v10515_v1  ;;  %7718 = vmatpush1.bf16.msra.mxu1 %v10518_v2  ;;  %v12999_v1 = vld [vmem:[%s15094_s0 + $0x38] sm:$0xff] }
 0x190   :  { %6871 = vmatprep.subr.bf16.mxu0 %v10523_v3  ;;  %7719 = vmatprep.subr.bf16.mxu1 %v10526_v4  ;;  %v13004_v2 = vld [vmem:[%s15094_s0 + $0xb8] sm:$0xff]  ;;  %v8621_v3 = vcombine.low %v55_v53, %v71_v54  ;;  %v10605_v4 = vld [vmem:[%s15093_s1 + $0xe40] ss:$16 sps:$4 sm:$0xff]  }
 0x191   :  { %v10677_v53 = vld [vmem:[%s15093_s1 + $0xfc0] ss:$16 sps:$4 sm:$0xff]   ;;  %v10680_v54 = vld [vmem:[%s15093_s1 + $0xfc8] ss:$16 sps:$4 sm:$0xff]  }
 0x193   :  { %6872 = vmatpush1.bf16.msra.mxu0 %v10521_v5  ;;  %7720 = vmatpush1.bf16.msra.mxu1 %v10524_v6  ;;  %v10608_v5 = vld [vmem:[%s15093_s1 + $0xe48] ss:$16 sps:$4 sm:$0xff]   ;;  %v10613_v6 = vld [vmem:[%s15093_s1 + $0xe64] ss:$16 sps:$4 sm:$0xff]  }
 0x194   :  { %6873 = vmatprep.subr.bf16.mxu0 %v10529_v7  ;;  %7721 = vmatprep.subr.bf16.mxu1 %v10532_v8  ;;  %v10616_v7 = vld [vmem:[%s15093_s1 + $0xe6c] ss:$16 sps:$4 sm:$0xff]   ;;  %v8592_v8 = vcombine.high %v12999_v1, %v13004_v2 }
 0x197   :  { %6874 = vmatpush1.bf16.msra.mxu0 %v10527_v9  ;;  %7722 = vmatpush1.bf16.msra.mxu1 %v10530_v10  ;;  %v10611_v9 = vld [vmem:[%s15093_s1 + $0xe60] ss:$16 sps:$4 sm:$0xff]   ;;  %v10614_v10 = vld [vmem:[%s15093_s1 + $0xe68] ss:$16 sps:$4 sm:$0xff]  }
 0x198   :  { %6875 = vmatprep.subr.bf16.mxu0 %v10535_v11  ;;  %7723 = vmatprep.subr.bf16.mxu1 %v10538_v12  ;;  %v10619_v11 = vld [vmem:[%s15093_s1 + $0xe84] ss:$16 sps:$4 sm:$0xff]   ;;  %v10622_v12 = vld [vmem:[%s15093_s1 + $0xe8c] ss:$16 sps:$4 sm:$0xff]  }
 0x19b   :  { %6876 = vmatpush1.bf16.msra.mxu0 %v10533_v13  ;;  %7724 = vmatpush1.bf16.msra.mxu1 %v10536_v14  ;;  %v10617_v13 = vld [vmem:[%s15093_s1 + $0xe80] ss:$16 sps:$4 sm:$0xff]   ;;  %v10620_v14 = vld [vmem:[%s15093_s1 + $0xe88] ss:$16 sps:$4 sm:$0xff]  }
 0x19c   :  { %6877 = vmatprep.subr.bf16.mxu0 %v10541_v15  ;;  %7725 = vmatprep.subr.bf16.mxu1 %v10544_v16  ;;  %v10625_v15 = vld [vmem:[%s15093_s1 + $0xea4] ss:$16 sps:$4 sm:$0xff]   ;;  %v10628_v16 = vld [vmem:[%s15093_s1 + $0xeac] ss:$16 sps:$4 sm:$0xff]  }
 0x19f   :  { %6878 = vmatpush1.bf16.msra.mxu0 %v10539_v17  ;;  %7726 = vmatpush1.bf16.msra.mxu1 %v10542_v18  ;;  %v10623_v17 = vld [vmem:[%s15093_s1 + $0xea0] ss:$16 sps:$4 sm:$0xff]   ;;  %v10626_v18 = vld [vmem:[%s15093_s1 + $0xea8] ss:$16 sps:$4 sm:$0xff]  }
 0x1a0   :  { %6879 = vmatprep.subr.bf16.mxu0 %v10547_v19  ;;  %7727 = vmatprep.subr.bf16.mxu1 %v10550_v20  ;;  %v10631_v19 = vld [vmem:[%s15093_s1 + $0xec4] ss:$16 sps:$4 sm:$0xff]   ;;  %v10634_v20 = vld [vmem:[%s15093_s1 + $0xecc] ss:$16 sps:$4 sm:$0xff]  }
 0x1a3   :  { %6880 = vmatpush1.bf16.msra.mxu0 %v10545_v21  ;;  %7728 = vmatpush1.bf16.msra.mxu1 %v10548_v22  ;;  %v10629_v21 = vld [vmem:[%s15093_s1 + $0xec0] ss:$16 sps:$4 sm:$0xff]   ;;  %v10632_v22 = vld [vmem:[%s15093_s1 + $0xec8] ss:$16 sps:$4 sm:$0xff]  }
 0x1a4   :  { %6881 = vmatprep.subr.bf16.mxu0 %v10553_v23  ;;  %7729 = vmatprep.subr.bf16.mxu1 %v10556_v24  ;;  %v10637_v23 = vld [vmem:[%s15093_s1 + $0xee4] ss:$16 sps:$4 sm:$0xff]   ;;  %v10640_v24 = vld [vmem:[%s15093_s1 + $0xeec] ss:$16 sps:$4 sm:$0xff]  }
 0x1a7   :  { %6882 = vmatpush1.bf16.msra.mxu0 %v10551_v26  ;;  %7730 = vmatpush1.bf16.msra.mxu1 %v10554_v25  ;;  %v10635_v26 = vld [vmem:[%s15093_s1 + $0xee0] ss:$16 sps:$4 sm:$0xff]   ;;  %v10638_v25 = vld [vmem:[%s15093_s1 + $0xee8] ss:$16 sps:$4 sm:$0xff]  }
 0x1a8   :  { %6883 = vmatprep.subr.bf16.mxu0 %v10559_v27  ;;  %7731 = vmatprep.subr.bf16.mxu1 %v10562_v28  ;;  %v10643_v27 = vld [vmem:[%s15093_s1 + $0xf04] ss:$16 sps:$4 sm:$0xff]   ;;  %v10646_v28 = vld [vmem:[%s15093_s1 + $0xf0c] ss:$16 sps:$4 sm:$0xff]  }
 0x1ab   :  { %6884 = vmatpush1.bf16.msra.mxu0 %v10557_v29  ;;  %7732 = vmatpush1.bf16.msra.mxu1 %v10560_v30  ;;  %v10641_v29 = vld [vmem:[%s15093_s1 + $0xf00] ss:$16 sps:$4 sm:$0xff]   ;;  %v10644_v30 = vld [vmem:[%s15093_s1 + $0xf08] ss:$16 sps:$4 sm:$0xff]  }
 0x1ac   :  { %6885 = vmatprep.subr.bf16.mxu0 %v10565_v31  ;;  %7733 = vmatprep.subr.bf16.mxu1 %v10568_v32  ;;  %v10649_v31 = vld [vmem:[%s15093_s1 + $0xf24] ss:$16 sps:$4 sm:$0xff]   ;;  %v10652_v32 = vld [vmem:[%s15093_s1 + $0xf2c] ss:$16 sps:$4 sm:$0xff]  }
 0x1af   :  { %6886 = vmatpush1.bf16.msra.mxu0 %v10563_v34  ;;  %7734 = vmatpush1.bf16.msra.mxu1 %v10566_v36  ;;  %v10647_v34 = vld [vmem:[%s15093_s1 + $0xf20] ss:$16 sps:$4 sm:$0xff]   ;;  %v10650_v36 = vld [vmem:[%s15093_s1 + $0xf28] ss:$16 sps:$4 sm:$0xff]  }
 0x1b0   :  { %6887 = vmatprep.subr.bf16.mxu0 %v10571_v33  ;;  %7735 = vmatprep.subr.bf16.mxu1 %v10574_v35  ;;  %v10655_v33 = vld [vmem:[%s15093_s1 + $0xf44] ss:$16 sps:$4 sm:$0xff]   ;;  %v10658_v35 = vld [vmem:[%s15093_s1 + $0xf4c] ss:$16 sps:$4 sm:$0xff]  }
 0x1b3   :  { %6888 = vmatpush1.bf16.msra.mxu0 %v10569_v37  ;;  %7736 = vmatpush1.bf16.msra.mxu1 %v10572_v38  ;;  %v10653_v37 = vld [vmem:[%s15093_s1 + $0xf40] ss:$16 sps:$4 sm:$0xff]   ;;  %v10656_v38 = vld [vmem:[%s15093_s1 + $0xf48] ss:$16 sps:$4 sm:$0xff]  }
 0x1b4   :  { %6889 = vmatprep.subr.bf16.mxu0 %v10577_v39  ;;  %7737 = vmatprep.subr.bf16.mxu1 %v10580_v40  ;;  %v10661_v39 = vld [vmem:[%s15093_s1 + $0xf64] ss:$16 sps:$4 sm:$0xff]   ;;  %v10664_v40 = vld [vmem:[%s15093_s1 + $0xf6c] ss:$16 sps:$4 sm:$0xff]  }
 0x1b7   :  { %6890 = vmatpush1.bf16.msra.mxu0 %v10575_v42  ;;  %7738 = vmatpush1.bf16.msra.mxu1 %v10578_v44  ;;  %v10659_v42 = vld [vmem:[%s15093_s1 + $0xf60] ss:$16 sps:$4 sm:$0xff]   ;;  %v10662_v44 = vld [vmem:[%s15093_s1 + $0xf68] ss:$16 sps:$4 sm:$0xff]  }
 0x1b8   :  { %6891 = vmatprep.subr.bf16.mxu0 %v10583_v41  ;;  %7739 = vmatprep.subr.bf16.mxu1 %v10586_v43  ;;  %v10667_v41 = vld [vmem:[%s15093_s1 + $0xf84] ss:$16 sps:$4 sm:$0xff]   ;;  %v10670_v43 = vld [vmem:[%s15093_s1 + $0xf8c] ss:$16 sps:$4 sm:$0xff]  }
 0x1bb   :  { %6892 = vmatpush1.bf16.msra.mxu0 %v10581_v45  ;;  %7740 = vmatpush1.bf16.msra.mxu1 %v10584_v46  ;;  %v10665_v45 = vld [vmem:[%s15093_s1 + $0xf80] ss:$16 sps:$4 sm:$0xff]   ;;  %v10668_v46 = vld [vmem:[%s15093_s1 + $0xf88] ss:$16 sps:$4 sm:$0xff]  }
 0x1bc   :  { %6893 = vmatprep.subr.bf16.mxu0 %v10589_v47  ;;  %7741 = vmatprep.subr.bf16.mxu1 %v10592_v48  ;;  %v10673_v47 = vld [vmem:[%s15093_s1 + $0xfa4] ss:$16 sps:$4 sm:$0xff]   ;;  %v10676_v48 = vld [vmem:[%s15093_s1 + $0xfac] ss:$16 sps:$4 sm:$0xff]  }
 0x1bf   :  { %6894 = vmatpush1.bf16.msra.mxu0 %v10587_v51  ;;  %7742 = vmatpush1.bf16.msra.mxu1 %v10590_v52  ;;  %v10671_v51 = vld [vmem:[%s15093_s1 + $0xfa0] ss:$16 sps:$4 sm:$0xff]   ;;  %v10674_v52 = vld [vmem:[%s15093_s1 + $0xfa8] ss:$16 sps:$4 sm:$0xff]  }
 0x1c0   :  { %6916 = vmatprep.subr.bf16.mxu0 %v10595_v49  ;;  %7764 = vmatprep.subr.bf16.mxu1 %v10598_v50  ;;  %v10679_v49 = vld [vmem:[%s15093_s1 + $0xfc4] ss:$16 sps:$4 sm:$0xff]   ;;  %v10682_v50 = vld [vmem:[%s15093_s1 + $0xfcc] ss:$16 sps:$4 sm:$0xff]  }
 0x1c2   :  { %6896 = vmatmul.mubr.bf16.vlgmr.msra.gmra.mrb[0].mxu0 %v8589_v55  ;;  %7744 = vmatmul.mubr.bf16.vlgmr.msra.gmra.mrb[0].mxu1 %v8589_v55  ;;  %v10685_v55 = vld [vmem:[%s15093_s1 + $0xfe4] ss:$16 sps:$4 sm:$0xff]  }
 0x1c3   :  { %6917 = vmatpush1.bf16.msra.mxu0 %v10593_v56  ;;  %7765 = vmatpush1.bf16.msra.mxu1 %v10596_v59  ;;  %v10688_v56 = vld [vmem:[%s15093_s1 + $0xfec] ss:$16 sps:$4 sm:$0xff]   ;;  %v10683_v59 = vld [vmem:[%s15093_s1 + $0xfe0] ss:$16 sps:$4 sm:$0xff]  }
 0x1c4   :  { %6918 = vmatprep.subr.bf16.mxu0 %v10601_v60  ;;  %7766 = vmatprep.subr.bf16.mxu1 %v10604_v57  ;;  %v10686_v60 = vld [vmem:[%s15093_s1 + $0xfe8] ss:$16 sps:$4 sm:$0xff]   ;;  %v10691_v57 = vld [vmem:[%s15093_s1 + $0x1004] ss:$16 sps:$4 sm:$0xff]  }
 0x1c5   :  { %6905 = vmatprep.mubr.bf16.mxu0 %v8622_v62  ;;  %7753 = vmatprep.mubr.bf16.mxu1 %v8622_v62  ;;  %v72_v62 = vld [vmem:[%s15094_s0 + $0x1b8] sm:$0xff] }
 0x1c7   :  { %6919 = vmatpush1.bf16.msra.mxu0 %v10599_v58  ;;  %7767 = vmatpush1.bf16.msra.mxu1 %v10602_v61  ;;  %v10694_v58 = vld [vmem:[%s15093_s1 + $0x100c] ss:$16 sps:$4 sm:$0xff]  }
 0x1c8   :  { %6920 = vmatprep.subr.bf16.mxu0 %v10607_v63  ;;  %7768 = vmatprep.subr.bf16.mxu1 %v10610_v0  ;;  %v56_v61 = vld [vmem:[%s15094_s0 + $0x138] sm:$0xff]  ;;  %v8591_v63 = vcombine.low %v12999_v1, %v13004_v2  ;;  %v10689_v0 = vld [vmem:[%s15093_s1 + $0x1000] ss:$16 sps:$4 sm:$0xff]  }
 0x1c9   :  { %v10700_v1 = vld [vmem:[%s15093_s1 + $0x102c] ss:$16 sps:$4 sm:$0xff]   ;;  %v10695_v2 = vld [vmem:[%s15093_s1 + $0x1020] ss:$16 sps:$4 sm:$0xff]  }
 0x1ca   :  { %6906 = vmatmul.mubr.bf16.gmra.mrb[4].mxu0 %v8621_v3  ;;  %7754 = vmatmul.mubr.bf16.gmra.mrb[4].mxu1 %v8621_v3  ;;  %v10692_v3 = vld [vmem:[%s15093_s1 + $0x1008] ss:$16 sps:$4 sm:$0xff]  }
 0x1cb   :  { %6921 = vmatpush1.bf16.msra.mxu0 %v10605_v4  ;;  %7769 = vmatpush1.bf16.msra.mxu1 %v10608_v5  ;;  %v10697_v4 = vld [vmem:[%s15093_s1 + $0x1024] ss:$16 sps:$4 sm:$0xff]   ;;  %v10698_v5 = vld [vmem:[%s15093_s1 + $0x1028] ss:$16 sps:$4 sm:$0xff]  }
 0x1cc   :  { %6922 = vmatprep.subr.bf16.mxu0 %v10613_v6  ;;  %7770 = vmatprep.subr.bf16.mxu1 %v10616_v7  ;;  %v8624_v6 = vcombine.high %v56_v61, %v72_v62  ;;  %v10703_v7 = vld [vmem:[%s15093_s1 + $0x1044] ss:$16 sps:$4 sm:$0xff]  }
 0x1cd   :  { %6948 = vmatprep.mubr.bf16.mxu0 %v8592_v8  ;;  %7796 = vmatprep.mubr.bf16.mxu1 %v8592_v8  ;;  %v10706_v8 = vld [vmem:[%s15093_s1 + $0x104c] ss:$16 sps:$4 sm:$0xff]  }
 0x1cf   :  { %6923 = vmatpush1.bf16.msra.mxu0 %v10611_v9  ;;  %7771 = vmatpush1.bf16.msra.mxu1 %v10614_v10  ;;  %v13211_v9 = vld [vmem:[%s15094_s0 + $0x40] sm:$0xff] }
 0x1d0   :  { %6924 = vmatprep.subr.bf16.mxu0 %v10619_v11  ;;  %7772 = vmatprep.subr.bf16.mxu1 %v10622_v12  ;;  %v13216_v10 = vld [vmem:[%s15094_s0 + $0xc0] sm:$0xff]  ;;  %v8623_v11 = vcombine.low %v56_v61, %v72_v62  ;;  %v10776_v62 = vld [vmem:[%s15093_s1 + $0x11c8] ss:$16 sps:$4 sm:$0xff]  }
 0x1d1   :  { %v10701_v12 = vld [vmem:[%s15093_s1 + $0x1040] ss:$16 sps:$4 sm:$0xff]  }
 0x1d2   :  { %v10773_v61 = vld [vmem:[%s15093_s1 + $0x11c0] ss:$16 sps:$4 sm:$0xff]  }
 0x1d3   :  { %6925 = vmatpush1.bf16.msra.mxu0 %v10617_v13  ;;  %7773 = vmatpush1.bf16.msra.mxu1 %v10620_v14  ;;  %v10704_v13 = vld [vmem:[%s15093_s1 + $0x1048] ss:$16 sps:$4 sm:$0xff]   ;;  %v10709_v14 = vld [vmem:[%s15093_s1 + $0x1064] ss:$16 sps:$4 sm:$0xff]  }
 0x1d4   :  { %6926 = vmatprep.subr.bf16.mxu0 %v10625_v15  ;;  %7774 = vmatprep.subr.bf16.mxu1 %v10628_v16  ;;  %v10712_v15 = vld [vmem:[%s15093_s1 + $0x106c] ss:$16 sps:$4 sm:$0xff]   ;;  %v8594_v16 = vcombine.high %v13211_v9, %v13216_v10 }
 0x1d7   :  { %6927 = vmatpush1.bf16.msra.mxu0 %v10623_v17  ;;  %7775 = vmatpush1.bf16.msra.mxu1 %v10626_v18  ;;  %v10707_v17 = vld [vmem:[%s15093_s1 + $0x1060] ss:$16 sps:$4 sm:$0xff]   ;;  %v10710_v18 = vld [vmem:[%s15093_s1 + $0x1068] ss:$16 sps:$4 sm:$0xff]  }
 0x1d8   :  { %6928 = vmatprep.subr.bf16.mxu0 %v10631_v19  ;;  %7776 = vmatprep.subr.bf16.mxu1 %v10634_v20  ;;  %v10715_v19 = vld [vmem:[%s15093_s1 + $0x1084] ss:$16 sps:$4 sm:$0xff]   ;;  %v10718_v20 = vld [vmem:[%s15093_s1 + $0x108c] ss:$16 sps:$4 sm:$0xff]  }
 0x1db   :  { %6929 = vmatpush1.bf16.msra.mxu0 %v10629_v21  ;;  %7777 = vmatpush1.bf16.msra.mxu1 %v10632_v22  ;;  %v10713_v21 = vld [vmem:[%s15093_s1 + $0x1080] ss:$16 sps:$4 sm:$0xff]   ;;  %v10716_v22 = vld [vmem:[%s15093_s1 + $0x1088] ss:$16 sps:$4 sm:$0xff]  }
 0x1dc   :  { %6930 = vmatprep.subr.bf16.mxu0 %v10637_v23  ;;  %7778 = vmatprep.subr.bf16.mxu1 %v10640_v24  ;;  %v10721_v23 = vld [vmem:[%s15093_s1 + $0x10a4] ss:$16 sps:$4 sm:$0xff]   ;;  %v10724_v24 = vld [vmem:[%s15093_s1 + $0x10ac] ss:$16 sps:$4 sm:$0xff]  }
 0x1df   :  { %6931 = vmatpush1.bf16.msra.mxu0 %v10635_v26  ;;  %7779 = vmatpush1.bf16.msra.mxu1 %v10638_v25  ;;  %v10719_v26 = vld [vmem:[%s15093_s1 + $0x10a0] ss:$16 sps:$4 sm:$0xff]   ;;  %v10722_v25 = vld [vmem:[%s15093_s1 + $0x10a8] ss:$16 sps:$4 sm:$0xff]  }
 0x1e0   :  { %6932 = vmatprep.subr.bf16.mxu0 %v10643_v27  ;;  %7780 = vmatprep.subr.bf16.mxu1 %v10646_v28  ;;  %v10727_v27 = vld [vmem:[%s15093_s1 + $0x10c4] ss:$16 sps:$4 sm:$0xff]   ;;  %v10730_v28 = vld [vmem:[%s15093_s1 + $0x10cc] ss:$16 sps:$4 sm:$0xff]  }
 0x1e3   :  { %6933 = vmatpush1.bf16.msra.mxu0 %v10641_v29  ;;  %7781 = vmatpush1.bf16.msra.mxu1 %v10644_v30  ;;  %v10725_v29 = vld [vmem:[%s15093_s1 + $0x10c0] ss:$16 sps:$4 sm:$0xff]   ;;  %v10728_v30 = vld [vmem:[%s15093_s1 + $0x10c8] ss:$16 sps:$4 sm:$0xff]  }
 0x1e4   :  { %6934 = vmatprep.subr.bf16.mxu0 %v10649_v31  ;;  %7782 = vmatprep.subr.bf16.mxu1 %v10652_v32  ;;  %v10733_v31 = vld [vmem:[%s15093_s1 + $0x10e4] ss:$16 sps:$4 sm:$0xff]   ;;  %v10736_v32 = vld [vmem:[%s15093_s1 + $0x10ec] ss:$16 sps:$4 sm:$0xff]  }
 0x1e7   :  { %6935 = vmatpush1.bf16.msra.mxu0 %v10647_v34  ;;  %7783 = vmatpush1.bf16.msra.mxu1 %v10650_v36  ;;  %v10731_v34 = vld [vmem:[%s15093_s1 + $0x10e0] ss:$16 sps:$4 sm:$0xff]   ;;  %v10734_v36 = vld [vmem:[%s15093_s1 + $0x10e8] ss:$16 sps:$4 sm:$0xff]  }
 0x1e8   :  { %6936 = vmatprep.subr.bf16.mxu0 %v10655_v33  ;;  %7784 = vmatprep.subr.bf16.mxu1 %v10658_v35  ;;  %v10739_v33 = vld [vmem:[%s15093_s1 + $0x1104] ss:$16 sps:$4 sm:$0xff]   ;;  %v10742_v35 = vld [vmem:[%s15093_s1 + $0x110c] ss:$16 sps:$4 sm:$0xff]  }
 0x1eb   :  { %6937 = vmatpush1.bf16.msra.mxu0 %v10653_v37  ;;  %7785 = vmatpush1.bf16.msra.mxu1 %v10656_v38  ;;  %v10737_v37 = vld [vmem:[%s15093_s1 + $0x1100] ss:$16 sps:$4 sm:$0xff]   ;;  %v10740_v38 = vld [vmem:[%s15093_s1 + $0x1108] ss:$16 sps:$4 sm:$0xff]  }
 0x1ec   :  { %6938 = vmatprep.subr.bf16.mxu0 %v10661_v39  ;;  %7786 = vmatprep.subr.bf16.mxu1 %v10664_v40  ;;  %v10745_v39 = vld [vmem:[%s15093_s1 + $0x1124] ss:$16 sps:$4 sm:$0xff]   ;;  %v10748_v40 = vld [vmem:[%s15093_s1 + $0x112c] ss:$16 sps:$4 sm:$0xff]  }
 0x1ef   :  { %6939 = vmatpush1.bf16.msra.mxu0 %v10659_v42  ;;  %7787 = vmatpush1.bf16.msra.mxu1 %v10662_v44  ;;  %v10743_v42 = vld [vmem:[%s15093_s1 + $0x1120] ss:$16 sps:$4 sm:$0xff]   ;;  %v10746_v44 = vld [vmem:[%s15093_s1 + $0x1128] ss:$16 sps:$4 sm:$0xff]  }
 0x1f0   :  { %6940 = vmatprep.subr.bf16.mxu0 %v10667_v41  ;;  %7788 = vmatprep.subr.bf16.mxu1 %v10670_v43  ;;  %v10751_v41 = vld [vmem:[%s15093_s1 + $0x1144] ss:$16 sps:$4 sm:$0xff]   ;;  %v10754_v43 = vld [vmem:[%s15093_s1 + $0x114c] ss:$16 sps:$4 sm:$0xff]  }
 0x1f3   :  { %6941 = vmatpush1.bf16.msra.mxu0 %v10665_v45  ;;  %7789 = vmatpush1.bf16.msra.mxu1 %v10668_v46  ;;  %v10749_v45 = vld [vmem:[%s15093_s1 + $0x1140] ss:$16 sps:$4 sm:$0xff]   ;;  %v10752_v46 = vld [vmem:[%s15093_s1 + $0x1148] ss:$16 sps:$4 sm:$0xff]  }
 0x1f4   :  { %6942 = vmatprep.subr.bf16.mxu0 %v10673_v47  ;;  %7790 = vmatprep.subr.bf16.mxu1 %v10676_v48  ;;  %v10757_v47 = vld [vmem:[%s15093_s1 + $0x1164] ss:$16 sps:$4 sm:$0xff]   ;;  %v10760_v48 = vld [vmem:[%s15093_s1 + $0x116c] ss:$16 sps:$4 sm:$0xff]  }
 0x1f7   :  { %6943 = vmatpush1.bf16.msra.mxu0 %v10671_v51  ;;  %7791 = vmatpush1.bf16.msra.mxu1 %v10674_v52  ;;  %v10755_v51 = vld [vmem:[%s15093_s1 + $0x1160] ss:$16 sps:$4 sm:$0xff]   ;;  %v10758_v52 = vld [vmem:[%s15093_s1 + $0x1168] ss:$16 sps:$4 sm:$0xff]  }
 0x1f8   :  { %6944 = vmatprep.subr.bf16.mxu0 %v10679_v49  ;;  %7792 = vmatprep.subr.bf16.mxu1 %v10682_v50  ;;  %v10763_v49 = vld [vmem:[%s15093_s1 + $0x1184] ss:$16 sps:$4 sm:$0xff]   ;;  %v10766_v50 = vld [vmem:[%s15093_s1 + $0x118c] ss:$16 sps:$4 sm:$0xff]  }
 0x1fb   :  { %6945 = vmatpush1.bf16.msra.mxu0 %v10677_v53  ;;  %7793 = vmatpush1.bf16.msra.mxu1 %v10680_v54  ;;  %v10761_v53 = vld [vmem:[%s15093_s1 + $0x1180] ss:$16 sps:$4 sm:$0xff]   ;;  %v10764_v54 = vld [vmem:[%s15093_s1 + $0x1188] ss:$16 sps:$4 sm:$0xff]  }
 0x1fc   :  { %6946 = vmatprep.subr.bf16.mxu0 %v10685_v55  ;;  %7794 = vmatprep.subr.bf16.mxu1 %v10688_v56  ;;  %v10769_v55 = vld [vmem:[%s15093_s1 + $0x11a4] ss:$16 sps:$4 sm:$0xff]   ;;  %v10772_v56 = vld [vmem:[%s15093_s1 + $0x11ac] ss:$16 sps:$4 sm:$0xff]  }
 0x1ff   :  { %6947 = vmatpush1.bf16.msra.mxu0 %v10683_v59  ;;  %7795 = vmatpush1.bf16.msra.mxu1 %v10686_v60  ;;  %v10767_v59 = vld [vmem:[%s15093_s1 + $0x11a0] ss:$16 sps:$4 sm:$0xff]   ;;  %v10770_v60 = vld [vmem:[%s15093_s1 + $0x11a8] ss:$16 sps:$4 sm:$0xff]  }
 0x200   :  { %6969 = vmatprep.subr.bf16.mxu0 %v10691_v57  ;;  %7817 = vmatprep.subr.bf16.mxu1 %v10694_v58  ;;  %v10775_v57 = vld [vmem:[%s15093_s1 + $0x11c4] ss:$16 sps:$4 sm:$0xff]   ;;  %v10778_v58 = vld [vmem:[%s15093_s1 + $0x11cc] ss:$16 sps:$4 sm:$0xff]  }
 0x202   :  { %6949 = vmatmul.mubr.bf16.vlgmr.msra.gmra.mrb[0].mxu0 %v8591_v63  ;;  %7797 = vmatmul.mubr.bf16.vlgmr.msra.gmra.mrb[0].mxu1 %v8591_v63  ;;  %v10781_v63 = vld [vmem:[%s15093_s1 + $0x11e4] ss:$16 sps:$4 sm:$0xff]  }
 0x203   :  { %6970 = vmatpush1.bf16.msra.mxu0 %v10689_v0  ;;  %7818 = vmatpush1.bf16.msra.mxu1 %v10692_v3  ;;  %v10784_v0 = vld [vmem:[%s15093_s1 + $0x11ec] ss:$16 sps:$4 sm:$0xff]   ;;  %v10779_v3 = vld [vmem:[%s15093_s1 + $0x11e0] ss:$16 sps:$4 sm:$0xff]  }
 0x204   :  { %6971 = vmatprep.subr.bf16.mxu0 %v10697_v4  ;;  %7819 = vmatprep.subr.bf16.mxu1 %v10700_v1  ;;  %v10782_v4 = vld [vmem:[%s15093_s1 + $0x11e8] ss:$16 sps:$4 sm:$0xff]   ;;  %v10787_v1 = vld [vmem:[%s15093_s1 + $0x1204] ss:$16 sps:$4 sm:$0xff]  }
 0x205   :  { %6958 = vmatprep.mubr.bf16.mxu0 %v8624_v6  ;;  %7806 = vmatprep.mubr.bf16.mxu1 %v8624_v6  ;;  %v73_v6 = vld [vmem:[%s15094_s0 + $0x1c0] sm:$0xff] }
 0x207   :  { %6972 = vmatpush1.bf16.msra.mxu0 %v10695_v2  ;;  %7820 = vmatpush1.bf16.msra.mxu1 %v10698_v5  ;;  %v10790_v2 = vld [vmem:[%s15093_s1 + $0x120c] ss:$16 sps:$4 sm:$0xff]   ;;  %v57_v5 = vld [vmem:[%s15094_s0 + $0x140] sm:$0xff] }
 0x208   :  { %6973 = vmatprep.subr.bf16.mxu0 %v10703_v7  ;;  %7821 = vmatprep.subr.bf16.mxu1 %v10706_v8  ;;  %v8593_v7 = vcombine.low %v13211_v9, %v13216_v10  ;;  %v10785_v8 = vld [vmem:[%s15093_s1 + $0x1200] ss:$16 sps:$4 sm:$0xff]   ;;  %v10796_v9 = vld [vmem:[%s15093_s1 + $0x122c] ss:$16 sps:$4 sm:$0xff]  }
 0x209   :  { %v10791_v10 = vld [vmem:[%s15093_s1 + $0x1220] ss:$16 sps:$4 sm:$0xff]  }
 0x20a   :  { %6959 = vmatmul.mubr.bf16.gmra.mrb[4].mxu0 %v8623_v11  ;;  %7807 = vmatmul.mubr.bf16.gmra.mrb[4].mxu1 %v8623_v11  ;;  %v10788_v11 = vld [vmem:[%s15093_s1 + $0x1208] ss:$16 sps:$4 sm:$0xff]  }
 0x20b   :  { %6974 = vmatpush1.bf16.msra.mxu0 %v10701_v12  ;;  %7822 = vmatpush1.bf16.msra.mxu1 %v10704_v13  ;;  %v10793_v12 = vld [vmem:[%s15093_s1 + $0x1224] ss:$16 sps:$4 sm:$0xff]   ;;  %v10794_v13 = vld [vmem:[%s15093_s1 + $0x1228] ss:$16 sps:$4 sm:$0xff]  }
 0x20c   :  { %6975 = vmatprep.subr.bf16.mxu0 %v10709_v14  ;;  %7823 = vmatprep.subr.bf16.mxu1 %v10712_v15  ;;  %v8626_v14 = vcombine.high %v57_v5, %v73_v6  ;;  %v10799_v15 = vld [vmem:[%s15093_s1 + $0x1244] ss:$16 sps:$4 sm:$0xff]  }
 0x20d   :  { %7001 = vmatprep.mubr.bf16.mxu0 %v8594_v16  ;;  %7849 = vmatprep.mubr.bf16.mxu1 %v8594_v16  ;;  %v10802_v16 = vld [vmem:[%s15093_s1 + $0x124c] ss:$16 sps:$4 sm:$0xff]  }
 0x20f   :  { %6976 = vmatpush1.bf16.msra.mxu0 %v10707_v17  ;;  %7824 = vmatpush1.bf16.msra.mxu1 %v10710_v18  ;;  %v13423_v17 = vld [vmem:[%s15094_s0 + $0x48] sm:$0xff] }
 0x210   :  { %6977 = vmatprep.subr.bf16.mxu0 %v10715_v19  ;;  %7825 = vmatprep.subr.bf16.mxu1 %v10718_v20  ;;  %v13428_v18 = vld [vmem:[%s15094_s0 + $0xc8] sm:$0xff]  ;;  %v8625_v19 = vcombine.low %v57_v5, %v73_v6  ;;  %v10797_v20 = vld [vmem:[%s15093_s1 + $0x1240] ss:$16 sps:$4 sm:$0xff]  }
 0x211   :  { %v10869_v5 = vld [vmem:[%s15093_s1 + $0x13c0] ss:$16 sps:$4 sm:$0xff]   ;;  %v10872_v6 = vld [vmem:[%s15093_s1 + $0x13c8] ss:$16 sps:$4 sm:$0xff]  }
 0x213   :  { %6978 = vmatpush1.bf16.msra.mxu0 %v10713_v21  ;;  %7826 = vmatpush1.bf16.msra.mxu1 %v10716_v22  ;;  %v10800_v21 = vld [vmem:[%s15093_s1 + $0x1248] ss:$16 sps:$4 sm:$0xff]   ;;  %v10805_v22 = vld [vmem:[%s15093_s1 + $0x1264] ss:$16 sps:$4 sm:$0xff]  }
 0x214   :  { %6979 = vmatprep.subr.bf16.mxu0 %v10721_v23  ;;  %7827 = vmatprep.subr.bf16.mxu1 %v10724_v24  ;;  %v10808_v23 = vld [vmem:[%s15093_s1 + $0x126c] ss:$16 sps:$4 sm:$0xff]   ;;  %v8596_v24 = vcombine.high %v13423_v17, %v13428_v18 }
 0x217   :  { %6980 = vmatpush1.bf16.msra.mxu0 %v10719_v26  ;;  %7828 = vmatpush1.bf16.msra.mxu1 %v10722_v25  ;;  %v10803_v26 = vld [vmem:[%s15093_s1 + $0x1260] ss:$16 sps:$4 sm:$0xff]   ;;  %v10806_v25 = vld [vmem:[%s15093_s1 + $0x1268] ss:$16 sps:$4 sm:$0xff]  }
 0x218   :  { %6981 = vmatprep.subr.bf16.mxu0 %v10727_v27  ;;  %7829 = vmatprep.subr.bf16.mxu1 %v10730_v28  ;;  %v10811_v27 = vld [vmem:[%s15093_s1 + $0x1284] ss:$16 sps:$4 sm:$0xff]   ;;  %v10814_v28 = vld [vmem:[%s15093_s1 + $0x128c] ss:$16 sps:$4 sm:$0xff]  }
 0x21b   :  { %6982 = vmatpush1.bf16.msra.mxu0 %v10725_v29  ;;  %7830 = vmatpush1.bf16.msra.mxu1 %v10728_v30  ;;  %v10809_v29 = vld [vmem:[%s15093_s1 + $0x1280] ss:$16 sps:$4 sm:$0xff]   ;;  %v10812_v30 = vld [vmem:[%s15093_s1 + $0x1288] ss:$16 sps:$4 sm:$0xff]  }
 0x21c   :  { %6983 = vmatprep.subr.bf16.mxu0 %v10733_v31  ;;  %7831 = vmatprep.subr.bf16.mxu1 %v10736_v32  ;;  %v10817_v31 = vld [vmem:[%s15093_s1 + $0x12a4] ss:$16 sps:$4 sm:$0xff]   ;;  %v10820_v32 = vld [vmem:[%s15093_s1 + $0x12ac] ss:$16 sps:$4 sm:$0xff]  }
 0x21f   :  { %6984 = vmatpush1.bf16.msra.mxu0 %v10731_v34  ;;  %7832 = vmatpush1.bf16.msra.mxu1 %v10734_v36  ;;  %v10815_v34 = vld [vmem:[%s15093_s1 + $0x12a0] ss:$16 sps:$4 sm:$0xff]   ;;  %v10818_v36 = vld [vmem:[%s15093_s1 + $0x12a8] ss:$16 sps:$4 sm:$0xff]  }
 0x220   :  { %6985 = vmatprep.subr.bf16.mxu0 %v10739_v33  ;;  %7833 = vmatprep.subr.bf16.mxu1 %v10742_v35  ;;  %v10823_v33 = vld [vmem:[%s15093_s1 + $0x12c4] ss:$16 sps:$4 sm:$0xff]   ;;  %v10826_v35 = vld [vmem:[%s15093_s1 + $0x12cc] ss:$16 sps:$4 sm:$0xff]  }
 0x223   :  { %6986 = vmatpush1.bf16.msra.mxu0 %v10737_v37  ;;  %7834 = vmatpush1.bf16.msra.mxu1 %v10740_v38  ;;  %v10821_v37 = vld [vmem:[%s15093_s1 + $0x12c0] ss:$16 sps:$4 sm:$0xff]   ;;  %v10824_v38 = vld [vmem:[%s15093_s1 + $0x12c8] ss:$16 sps:$4 sm:$0xff]  }
 0x224   :  { %6987 = vmatprep.subr.bf16.mxu0 %v10745_v39  ;;  %7835 = vmatprep.subr.bf16.mxu1 %v10748_v40  ;;  %v10829_v39 = vld [vmem:[%s15093_s1 + $0x12e4] ss:$16 sps:$4 sm:$0xff]   ;;  %v10832_v40 = vld [vmem:[%s15093_s1 + $0x12ec] ss:$16 sps:$4 sm:$0xff]  }
 0x227   :  { %6988 = vmatpush1.bf16.msra.mxu0 %v10743_v42  ;;  %7836 = vmatpush1.bf16.msra.mxu1 %v10746_v44  ;;  %v10827_v42 = vld [vmem:[%s15093_s1 + $0x12e0] ss:$16 sps:$4 sm:$0xff]   ;;  %v10830_v44 = vld [vmem:[%s15093_s1 + $0x12e8] ss:$16 sps:$4 sm:$0xff]  }
 0x228   :  { %6989 = vmatprep.subr.bf16.mxu0 %v10751_v41  ;;  %7837 = vmatprep.subr.bf16.mxu1 %v10754_v43  ;;  %v10835_v41 = vld [vmem:[%s15093_s1 + $0x1304] ss:$16 sps:$4 sm:$0xff]   ;;  %v10838_v43 = vld [vmem:[%s15093_s1 + $0x130c] ss:$16 sps:$4 sm:$0xff]  }
 0x22b   :  { %6990 = vmatpush1.bf16.msra.mxu0 %v10749_v45  ;;  %7838 = vmatpush1.bf16.msra.mxu1 %v10752_v46  ;;  %v10833_v45 = vld [vmem:[%s15093_s1 + $0x1300] ss:$16 sps:$4 sm:$0xff]   ;;  %v10836_v46 = vld [vmem:[%s15093_s1 + $0x1308] ss:$16 sps:$4 sm:$0xff]  }
 0x22c   :  { %6991 = vmatprep.subr.bf16.mxu0 %v10757_v47  ;;  %7839 = vmatprep.subr.bf16.mxu1 %v10760_v48  ;;  %v10841_v47 = vld [vmem:[%s15093_s1 + $0x1324] ss:$16 sps:$4 sm:$0xff]   ;;  %v10844_v48 = vld [vmem:[%s15093_s1 + $0x132c] ss:$16 sps:$4 sm:$0xff]  }
 0x22f   :  { %6992 = vmatpush1.bf16.msra.mxu0 %v10755_v51  ;;  %7840 = vmatpush1.bf16.msra.mxu1 %v10758_v52  ;;  %v10839_v51 = vld [vmem:[%s15093_s1 + $0x1320] ss:$16 sps:$4 sm:$0xff]   ;;  %v10842_v52 = vld [vmem:[%s15093_s1 + $0x1328] ss:$16 sps:$4 sm:$0xff]  }
 0x230   :  { %6993 = vmatprep.subr.bf16.mxu0 %v10763_v49  ;;  %7841 = vmatprep.subr.bf16.mxu1 %v10766_v50  ;;  %v10847_v49 = vld [vmem:[%s15093_s1 + $0x1344] ss:$16 sps:$4 sm:$0xff]   ;;  %v10850_v50 = vld [vmem:[%s15093_s1 + $0x134c] ss:$16 sps:$4 sm:$0xff]  }
 0x233   :  { %6994 = vmatpush1.bf16.msra.mxu0 %v10761_v53  ;;  %7842 = vmatpush1.bf16.msra.mxu1 %v10764_v54  ;;  %v10845_v53 = vld [vmem:[%s15093_s1 + $0x1340] ss:$16 sps:$4 sm:$0xff]   ;;  %v10848_v54 = vld [vmem:[%s15093_s1 + $0x1348] ss:$16 sps:$4 sm:$0xff]  }
 0x234   :  { %6995 = vmatprep.subr.bf16.mxu0 %v10769_v55  ;;  %7843 = vmatprep.subr.bf16.mxu1 %v10772_v56  ;;  %v10853_v55 = vld [vmem:[%s15093_s1 + $0x1364] ss:$16 sps:$4 sm:$0xff]   ;;  %v10856_v56 = vld [vmem:[%s15093_s1 + $0x136c] ss:$16 sps:$4 sm:$0xff]  }
 0x237   :  { %6996 = vmatpush1.bf16.msra.mxu0 %v10767_v59  ;;  %7844 = vmatpush1.bf16.msra.mxu1 %v10770_v60  ;;  %v10851_v59 = vld [vmem:[%s15093_s1 + $0x1360] ss:$16 sps:$4 sm:$0xff]   ;;  %v10854_v60 = vld [vmem:[%s15093_s1 + $0x1368] ss:$16 sps:$4 sm:$0xff]  }
 0x238   :  { %6997 = vmatprep.subr.bf16.mxu0 %v10775_v57  ;;  %7845 = vmatprep.subr.bf16.mxu1 %v10778_v58  ;;  %v10859_v57 = vld [vmem:[%s15093_s1 + $0x1384] ss:$16 sps:$4 sm:$0xff]   ;;  %v10862_v58 = vld [vmem:[%s15093_s1 + $0x138c] ss:$16 sps:$4 sm:$0xff]  }
 0x23b   :  { %6998 = vmatpush1.bf16.msra.mxu0 %v10773_v61  ;;  %7846 = vmatpush1.bf16.msra.mxu1 %v10776_v62  ;;  %v10857_v61 = vld [vmem:[%s15093_s1 + $0x1380] ss:$16 sps:$4 sm:$0xff]   ;;  %v10860_v62 = vld [vmem:[%s15093_s1 + $0x1388] ss:$16 sps:$4 sm:$0xff]  }
 0x23c   :  { %6999 = vmatprep.subr.bf16.mxu0 %v10781_v63  ;;  %7847 = vmatprep.subr.bf16.mxu1 %v10784_v0  ;;  %v10865_v63 = vld [vmem:[%s15093_s1 + $0x13a4] ss:$16 sps:$4 sm:$0xff]   ;;  %v10868_v0 = vld [vmem:[%s15093_s1 + $0x13ac] ss:$16 sps:$4 sm:$0xff]  }
 0x23f   :  { %7000 = vmatpush1.bf16.msra.mxu0 %v10779_v3  ;;  %7848 = vmatpush1.bf16.msra.mxu1 %v10782_v4  ;;  %v10863_v3 = vld [vmem:[%s15093_s1 + $0x13a0] ss:$16 sps:$4 sm:$0xff]   ;;  %v10866_v4 = vld [vmem:[%s15093_s1 + $0x13a8] ss:$16 sps:$4 sm:$0xff]  }
 0x240   :  { %7022 = vmatprep.subr.bf16.mxu0 %v10787_v1  ;;  %7870 = vmatprep.subr.bf16.mxu1 %v10790_v2  ;;  %v10871_v1 = vld [vmem:[%s15093_s1 + $0x13c4] ss:$16 sps:$4 sm:$0xff]   ;;  %v10874_v2 = vld [vmem:[%s15093_s1 + $0x13cc] ss:$16 sps:$4 sm:$0xff]  }
 0x242   :  { %7002 = vmatmul.mubr.bf16.vlgmr.msra.gmra.mrb[0].mxu0 %v8593_v7  ;;  %7850 = vmatmul.mubr.bf16.vlgmr.msra.gmra.mrb[0].mxu1 %v8593_v7  ;;  %v10877_v7 = vld [vmem:[%s15093_s1 + $0x13e4] ss:$16 sps:$4 sm:$0xff]  }
 0x243   :  { %7023 = vmatpush1.bf16.msra.mxu0 %v10785_v8  ;;  %7871 = vmatpush1.bf16.msra.mxu1 %v10788_v11  ;;  %v10880_v8 = vld [vmem:[%s15093_s1 + $0x13ec] ss:$16 sps:$4 sm:$0xff]   ;;  %v10875_v11 = vld [vmem:[%s15093_s1 + $0x13e0] ss:$16 sps:$4 sm:$0xff]  }
 0x244   :  { %7024 = vmatprep.subr.bf16.mxu0 %v10793_v12  ;;  %7872 = vmatprep.subr.bf16.mxu1 %v10796_v9  ;;  %v10878_v12 = vld [vmem:[%s15093_s1 + $0x13e8] ss:$16 sps:$4 sm:$0xff]   ;;  %v10883_v9 = vld [vmem:[%s15093_s1 + $0x1404] ss:$16 sps:$4 sm:$0xff]  }
 0x245   :  { %7011 = vmatprep.mubr.bf16.mxu0 %v8626_v14  ;;  %7859 = vmatprep.mubr.bf16.mxu1 %v8626_v14  ;;  %v58_v14 = vld [vmem:[%s15094_s0 + $0x148] sm:$0xff] }
 0x247   :  { %7025 = vmatpush1.bf16.msra.mxu0 %v10791_v10  ;;  %7873 = vmatpush1.bf16.msra.mxu1 %v10794_v13  ;;  %v10886_v10 = vld [vmem:[%s15093_s1 + $0x140c] ss:$16 sps:$4 sm:$0xff]   ;;  %v8595_v13 = vcombine.low %v13423_v17, %v13428_v18  ;;  %v10889_v17 = vld [vmem:[%s15093_s1 + $0x1424] ss:$16 sps:$4 sm:$0xff]  }
 0x248   :  { %7026 = vmatprep.subr.bf16.mxu0 %v10799_v15  ;;  %7874 = vmatprep.subr.bf16.mxu1 %v10802_v16  ;;  %v74_v15 = vld [vmem:[%s15094_s0 + $0x1c8] sm:$0xff]  ;;  %v10881_v16 = vld [vmem:[%s15093_s1 + $0x1400] ss:$16 sps:$4 sm:$0xff]  }
 0x249   :  { %v10892_v18 = vld [vmem:[%s15093_s1 + $0x142c] ss:$16 sps:$4 sm:$0xff]  }
 0x24a   :  { %7012 = vmatmul.mubr.bf16.gmra.mrb[4].mxu0 %v8625_v19  ;;  %7860 = vmatmul.mubr.bf16.gmra.mrb[4].mxu1 %v8625_v19  ;;  %v10884_v19 = vld [vmem:[%s15093_s1 + $0x1408] ss:$16 sps:$4 sm:$0xff]  }
 0x24b   :  { %7027 = vmatpush1.bf16.msra.mxu0 %v10797_v20  ;;  %7875 = vmatpush1.bf16.msra.mxu1 %v10800_v21  ;;  %v8628_v20 = vcombine.high %v58_v14, %v74_v15  ;;  %v10887_v21 = vld [vmem:[%s15093_s1 + $0x1420] ss:$16 sps:$4 sm:$0xff]  }
 0x24c   :  { %7028 = vmatprep.subr.bf16.mxu0 %v10805_v22  ;;  %7876 = vmatprep.subr.bf16.mxu1 %v10808_v23  ;;  %v10890_v22 = vld [vmem:[%s15093_s1 + $0x1428] ss:$16 sps:$4 sm:$0xff]   ;;  %v10895_v23 = vld [vmem:[%s15093_s1 + $0x1444] ss:$16 sps:$4 sm:$0xff]  }
 0x24d   :  { %7054 = vmatprep.mubr.bf16.mxu0 %v8596_v24  ;;  %7902 = vmatprep.mubr.bf16.mxu1 %v8596_v24  ;;  %v10898_v24 = vld [vmem:[%s15093_s1 + $0x144c] ss:$16 sps:$4 sm:$0xff]  }
 0x24f   :  { %7029 = vmatpush1.bf16.msra.mxu0 %v10803_v26  ;;  %7877 = vmatpush1.bf16.msra.mxu1 %v10806_v25  ;;  %v8627_v26 = vcombine.low %v58_v14, %v74_v15  ;;  %v13635_v25 = vld [vmem:[%s15094_s0 + $0x50] sm:$0xff]  ;;  %v10968_v14 = vld [vmem:[%s15093_s1 + $0x15c8] ss:$16 sps:$4 sm:$0xff]  }
 0x250   :  { %7030 = vmatprep.subr.bf16.mxu0 %v10811_v27  ;;  %7878 = vmatprep.subr.bf16.mxu1 %v10814_v28  ;;  %v13640_v27 = vld [vmem:[%s15094_s0 + $0xd0] sm:$0xff] }
 0x251   :  { %v10893_v28 = vld [vmem:[%s15093_s1 + $0x1440] ss:$16 sps:$4 sm:$0xff]   ;;  %v10973_v15 = vld [vmem:[%s15093_s1 + $0x15e4] ss:$16 sps:$4 sm:$0xff]  }
 0x253   :  { %7031 = vmatpush1.bf16.msra.mxu0 %v10809_v29  ;;  %7879 = vmatpush1.bf16.msra.mxu1 %v10812_v30  ;;  %v10896_v29 = vld [vmem:[%s15093_s1 + $0x1448] ss:$16 sps:$4 sm:$0xff]   ;;  %v10901_v30 = vld [vmem:[%s15093_s1 + $0x1464] ss:$16 sps:$4 sm:$0xff]  }
 0x254   :  { %7032 = vmatprep.subr.bf16.mxu0 %v10817_v31  ;;  %7880 = vmatprep.subr.bf16.mxu1 %v10820_v32  ;;  %v10904_v31 = vld [vmem:[%s15093_s1 + $0x146c] ss:$16 sps:$4 sm:$0xff]   ;;  %v8598_v32 = vcombine.high %v13635_v25, %v13640_v27 }
 0x257   :  { %7033 = vmatpush1.bf16.msra.mxu0 %v10815_v34  ;;  %7881 = vmatpush1.bf16.msra.mxu1 %v10818_v36  ;;  %v10899_v34 = vld [vmem:[%s15093_s1 + $0x1460] ss:$16 sps:$4 sm:$0xff]   ;;  %v10902_v36 = vld [vmem:[%s15093_s1 + $0x1468] ss:$16 sps:$4 sm:$0xff]  }
 0x258   :  { %7034 = vmatprep.subr.bf16.mxu0 %v10823_v33  ;;  %7882 = vmatprep.subr.bf16.mxu1 %v10826_v35  ;;  %v10907_v33 = vld [vmem:[%s15093_s1 + $0x1484] ss:$16 sps:$4 sm:$0xff]   ;;  %v10910_v35 = vld [vmem:[%s15093_s1 + $0x148c] ss:$16 sps:$4 sm:$0xff]  }
 0x25b   :  { %7035 = vmatpush1.bf16.msra.mxu0 %v10821_v37  ;;  %7883 = vmatpush1.bf16.msra.mxu1 %v10824_v38  ;;  %v10905_v37 = vld [vmem:[%s15093_s1 + $0x1480] ss:$16 sps:$4 sm:$0xff]   ;;  %v10908_v38 = vld [vmem:[%s15093_s1 + $0x1488] ss:$16 sps:$4 sm:$0xff]  }
 0x25c   :  { %7036 = vmatprep.subr.bf16.mxu0 %v10829_v39  ;;  %7884 = vmatprep.subr.bf16.mxu1 %v10832_v40  ;;  %v10913_v39 = vld [vmem:[%s15093_s1 + $0x14a4] ss:$16 sps:$4 sm:$0xff]   ;;  %v10916_v40 = vld [vmem:[%s15093_s1 + $0x14ac] ss:$16 sps:$4 sm:$0xff]  }
 0x25f   :  { %7037 = vmatpush1.bf16.msra.mxu0 %v10827_v42  ;;  %7885 = vmatpush1.bf16.msra.mxu1 %v10830_v44  ;;  %v10911_v42 = vld [vmem:[%s15093_s1 + $0x14a0] ss:$16 sps:$4 sm:$0xff]   ;;  %v10914_v44 = vld [vmem:[%s15093_s1 + $0x14a8] ss:$16 sps:$4 sm:$0xff]  }
 0x260   :  { %7038 = vmatprep.subr.bf16.mxu0 %v10835_v41  ;;  %7886 = vmatprep.subr.bf16.mxu1 %v10838_v43  ;;  %v10919_v41 = vld [vmem:[%s15093_s1 + $0x14c4] ss:$16 sps:$4 sm:$0xff]   ;;  %v10922_v43 = vld [vmem:[%s15093_s1 + $0x14cc] ss:$16 sps:$4 sm:$0xff]  }
 0x263   :  { %7039 = vmatpush1.bf16.msra.mxu0 %v10833_v45  ;;  %7887 = vmatpush1.bf16.msra.mxu1 %v10836_v46  ;;  %v10917_v45 = vld [vmem:[%s15093_s1 + $0x14c0] ss:$16 sps:$4 sm:$0xff]   ;;  %v10920_v46 = vld [vmem:[%s15093_s1 + $0x14c8] ss:$16 sps:$4 sm:$0xff]  }
 0x264   :  { %7040 = vmatprep.subr.bf16.mxu0 %v10841_v47  ;;  %7888 = vmatprep.subr.bf16.mxu1 %v10844_v48  ;;  %v10925_v47 = vld [vmem:[%s15093_s1 + $0x14e4] ss:$16 sps:$4 sm:$0xff]   ;;  %v10928_v48 = vld [vmem:[%s15093_s1 + $0x14ec] ss:$16 sps:$4 sm:$0xff]  }
 0x267   :  { %7041 = vmatpush1.bf16.msra.mxu0 %v10839_v51  ;;  %7889 = vmatpush1.bf16.msra.mxu1 %v10842_v52  ;;  %v10923_v51 = vld [vmem:[%s15093_s1 + $0x14e0] ss:$16 sps:$4 sm:$0xff]   ;;  %v10926_v52 = vld [vmem:[%s15093_s1 + $0x14e8] ss:$16 sps:$4 sm:$0xff]  }
 0x268   :  { %7042 = vmatprep.subr.bf16.mxu0 %v10847_v49  ;;  %7890 = vmatprep.subr.bf16.mxu1 %v10850_v50  ;;  %v10931_v49 = vld [vmem:[%s15093_s1 + $0x1504] ss:$16 sps:$4 sm:$0xff]   ;;  %v10934_v50 = vld [vmem:[%s15093_s1 + $0x150c] ss:$16 sps:$4 sm:$0xff]  }
 0x26b   :  { %7043 = vmatpush1.bf16.msra.mxu0 %v10845_v53  ;;  %7891 = vmatpush1.bf16.msra.mxu1 %v10848_v54  ;;  %v10929_v53 = vld [vmem:[%s15093_s1 + $0x1500] ss:$16 sps:$4 sm:$0xff]   ;;  %v10932_v54 = vld [vmem:[%s15093_s1 + $0x1508] ss:$16 sps:$4 sm:$0xff]  }
 0x26c   :  { %7044 = vmatprep.subr.bf16.mxu0 %v10853_v55  ;;  %7892 = vmatprep.subr.bf16.mxu1 %v10856_v56  ;;  %v10937_v55 = vld [vmem:[%s15093_s1 + $0x1524] ss:$16 sps:$4 sm:$0xff]   ;;  %v10940_v56 = vld [vmem:[%s15093_s1 + $0x152c] ss:$16 sps:$4 sm:$0xff]  }
 0x26f   :  { %7045 = vmatpush1.bf16.msra.mxu0 %v10851_v59  ;;  %7893 = vmatpush1.bf16.msra.mxu1 %v10854_v60  ;;  %v10935_v59 = vld [vmem:[%s15093_s1 + $0x1520] ss:$16 sps:$4 sm:$0xff]   ;;  %v10938_v60 = vld [vmem:[%s15093_s1 + $0x1528] ss:$16 sps:$4 sm:$0xff]  }
 0x270   :  { %7046 = vmatprep.subr.bf16.mxu0 %v10859_v57  ;;  %7894 = vmatprep.subr.bf16.mxu1 %v10862_v58  ;;  %v10943_v57 = vld [vmem:[%s15093_s1 + $0x1544] ss:$16 sps:$4 sm:$0xff]   ;;  %v10946_v58 = vld [vmem:[%s15093_s1 + $0x154c] ss:$16 sps:$4 sm:$0xff]  }
 0x273   :  { %7047 = vmatpush1.bf16.msra.mxu0 %v10857_v61  ;;  %7895 = vmatpush1.bf16.msra.mxu1 %v10860_v62  ;;  %v10941_v61 = vld [vmem:[%s15093_s1 + $0x1540] ss:$16 sps:$4 sm:$0xff]   ;;  %v10944_v62 = vld [vmem:[%s15093_s1 + $0x1548] ss:$16 sps:$4 sm:$0xff]  }
 0x274   :  { %7048 = vmatprep.subr.bf16.mxu0 %v10865_v63  ;;  %7896 = vmatprep.subr.bf16.mxu1 %v10868_v0  ;;  %v10949_v63 = vld [vmem:[%s15093_s1 + $0x1564] ss:$16 sps:$4 sm:$0xff]   ;;  %v10952_v0 = vld [vmem:[%s15093_s1 + $0x156c] ss:$16 sps:$4 sm:$0xff]  }
 0x277   :  { %7049 = vmatpush1.bf16.msra.mxu0 %v10863_v3  ;;  %7897 = vmatpush1.bf16.msra.mxu1 %v10866_v4  ;;  %v10947_v3 = vld [vmem:[%s15093_s1 + $0x1560] ss:$16 sps:$4 sm:$0xff]   ;;  %v10950_v4 = vld [vmem:[%s15093_s1 + $0x1568] ss:$16 sps:$4 sm:$0xff]  }
 0x278   :  { %7050 = vmatprep.subr.bf16.mxu0 %v10871_v1  ;;  %7898 = vmatprep.subr.bf16.mxu1 %v10874_v2  ;;  %v10955_v1 = vld [vmem:[%s15093_s1 + $0x1584] ss:$16 sps:$4 sm:$0xff]   ;;  %v10958_v2 = vld [vmem:[%s15093_s1 + $0x158c] ss:$16 sps:$4 sm:$0xff]  }
 0x27b   :  { %7051 = vmatpush1.bf16.msra.mxu0 %v10869_v5  ;;  %7899 = vmatpush1.bf16.msra.mxu1 %v10872_v6  ;;  %v10953_v5 = vld [vmem:[%s15093_s1 + $0x1580] ss:$16 sps:$4 sm:$0xff]   ;;  %v10956_v6 = vld [vmem:[%s15093_s1 + $0x1588] ss:$16 sps:$4 sm:$0xff]  }
 0x27c   :  { %7052 = vmatprep.subr.bf16.mxu0 %v10877_v7  ;;  %7900 = vmatprep.subr.bf16.mxu1 %v10880_v8  ;;  %v10961_v7 = vld [vmem:[%s15093_s1 + $0x15a4] ss:$16 sps:$4 sm:$0xff]   ;;  %v10964_v8 = vld [vmem:[%s15093_s1 + $0x15ac] ss:$16 sps:$4 sm:$0xff]  }
 0x27f   :  { %7053 = vmatpush1.bf16.msra.mxu0 %v10875_v11  ;;  %7901 = vmatpush1.bf16.msra.mxu1 %v10878_v12  ;;  %v10959_v11 = vld [vmem:[%s15093_s1 + $0x15a0] ss:$16 sps:$4 sm:$0xff]   ;;  %v10962_v12 = vld [vmem:[%s15093_s1 + $0x15a8] ss:$16 sps:$4 sm:$0xff]  }
 0x280   :  { %7075 = vmatprep.subr.bf16.mxu0 %v10883_v9  ;;  %7923 = vmatprep.subr.bf16.mxu1 %v10886_v10  ;;  %v10967_v9 = vld [vmem:[%s15093_s1 + $0x15c4] ss:$16 sps:$4 sm:$0xff]   ;;  %v10970_v10 = vld [vmem:[%s15093_s1 + $0x15cc] ss:$16 sps:$4 sm:$0xff]  }
 0x282   :  { %7055 = vmatmul.mubr.bf16.vlgmr.msra.gmra.mrb[0].mxu0 %v8595_v13  ;;  %7903 = vmatmul.mubr.bf16.vlgmr.msra.gmra.mrb[0].mxu1 %v8595_v13  ;;  %v10965_v13 = vld [vmem:[%s15093_s1 + $0x15c0] ss:$16 sps:$4 sm:$0xff]  }
 0x283   :  { %7076 = vmatpush1.bf16.msra.mxu0 %v10881_v16  ;;  %7924 = vmatpush1.bf16.msra.mxu1 %v10884_v19  ;;  %v10976_v16 = vld [vmem:[%s15093_s1 + $0x15ec] ss:$16 sps:$4 sm:$0xff]   ;;  %v10971_v19 = vld [vmem:[%s15093_s1 + $0x15e0] ss:$16 sps:$4 sm:$0xff]  }
 0x284   :  { %7077 = vmatprep.subr.bf16.mxu0 %v10889_v17  ;;  %7925 = vmatprep.subr.bf16.mxu1 %v10892_v18  ;;  %v10974_v17 = vld [vmem:[%s15093_s1 + $0x15e8] ss:$16 sps:$4 sm:$0xff]   ;;  %v10979_v18 = vld [vmem:[%s15093_s1 + $0x1604] ss:$16 sps:$4 sm:$0xff]  }
 0x285   :  { %7064 = vmatprep.mubr.bf16.mxu0 %v8628_v20  ;;  %7912 = vmatprep.mubr.bf16.mxu1 %v8628_v20  ;;  %v10982_v20 = vld [vmem:[%s15093_s1 + $0x160c] ss:$16 sps:$4 sm:$0xff]  }
 0x287   :  { %7078 = vmatpush1.bf16.msra.mxu0 %v10887_v21  ;;  %7926 = vmatpush1.bf16.msra.mxu1 %v10890_v22  ;;  %v8597_v21 = vcombine.low %v13635_v25, %v13640_v27  ;;  %v59_v22 = vld [vmem:[%s15094_s0 + $0x150] sm:$0xff]  ;;  %v10988_v27 = vld [vmem:[%s15093_s1 + $0x162c] ss:$16 sps:$4 sm:$0xff]  }
 0x288   :  { %7079 = vmatprep.subr.bf16.mxu0 %v10895_v23  ;;  %7927 = vmatprep.subr.bf16.mxu1 %v10898_v24  ;;  %v75_v23 = vld [vmem:[%s15094_s0 + $0x1d0] sm:$0xff] }
 0x289   :  { %v10977_v24 = vld [vmem:[%s15093_s1 + $0x1600] ss:$16 sps:$4 sm:$0xff]   ;;  %v10985_v25 = vld [vmem:[%s15093_s1 + $0x1624] ss:$16 sps:$4 sm:$0xff]  }
 0x28a   :  { %7065 = vmatmul.mubr.bf16.gmra.mrb[4].mxu0 %v8627_v26  ;;  %7913 = vmatmul.mubr.bf16.gmra.mrb[4].mxu1 %v8627_v26  ;;  %v10980_v26 = vld [vmem:[%s15093_s1 + $0x1608] ss:$16 sps:$4 sm:$0xff]  }
 0x28b   :  { %7080 = vmatpush1.bf16.msra.mxu0 %v10893_v28  ;;  %7928 = vmatpush1.bf16.msra.mxu1 %v10896_v29  ;;  %v8630_v28 = vcombine.high %v59_v22, %v75_v23  ;;  %v10983_v29 = vld [vmem:[%s15093_s1 + $0x1620] ss:$16 sps:$4 sm:$0xff]  }
 0x28c   :  { %7081 = vmatprep.subr.bf16.mxu0 %v10901_v30  ;;  %7929 = vmatprep.subr.bf16.mxu1 %v10904_v31  ;;  %v10986_v30 = vld [vmem:[%s15093_s1 + $0x1628] ss:$16 sps:$4 sm:$0xff]   ;;  %v10991_v31 = vld [vmem:[%s15093_s1 + $0x1644] ss:$16 sps:$4 sm:$0xff]  }
 0x28d   :  { %7107 = vmatprep.mubr.bf16.mxu0 %v8598_v32  ;;  %7955 = vmatprep.mubr.bf16.mxu1 %v8598_v32  ;;  %v10994_v32 = vld [vmem:[%s15093_s1 + $0x164c] ss:$16 sps:$4 sm:$0xff]  }
 0x28f   :  { %7082 = vmatpush1.bf16.msra.mxu0 %v10899_v34  ;;  %7930 = vmatpush1.bf16.msra.mxu1 %v10902_v36  ;;  %v8629_v34 = vcombine.low %v59_v22, %v75_v23  ;;  %v13847_v36 = vld [vmem:[%s15094_s0 + $0x58] sm:$0xff]  ;;  %v11069_v23 = vld [vmem:[%s15093_s1 + $0x17e4] ss:$16 sps:$4 sm:$0xff]  }
 0x290   :  { %7083 = vmatprep.subr.bf16.mxu0 %v10907_v33  ;;  %7931 = vmatprep.subr.bf16.mxu1 %v10910_v35  ;;  %v13852_v33 = vld [vmem:[%s15094_s0 + $0xd8] sm:$0xff]  ;;  %v10989_v35 = vld [vmem:[%s15093_s1 + $0x1640] ss:$16 sps:$4 sm:$0xff]  }
 0x291   :  { %v11064_v22 = vld [vmem:[%s15093_s1 + $0x17c8] ss:$16 sps:$4 sm:$0xff]  }
 0x293   :  { %7084 = vmatpush1.bf16.msra.mxu0 %v10905_v37  ;;  %7932 = vmatpush1.bf16.msra.mxu1 %v10908_v38  ;;  %v10992_v37 = vld [vmem:[%s15093_s1 + $0x1648] ss:$16 sps:$4 sm:$0xff]   ;;  %v10997_v38 = vld [vmem:[%s15093_s1 + $0x1664] ss:$16 sps:$4 sm:$0xff]  }
 0x294   :  { %7085 = vmatprep.subr.bf16.mxu0 %v10913_v39  ;;  %7933 = vmatprep.subr.bf16.mxu1 %v10916_v40  ;;  %v11000_v39 = vld [vmem:[%s15093_s1 + $0x166c] ss:$16 sps:$4 sm:$0xff]   ;;  %v8600_v40 = vcombine.high %v13847_v36, %v13852_v33 }
 0x297   :  { %7086 = vmatpush1.bf16.msra.mxu0 %v10911_v42  ;;  %7934 = vmatpush1.bf16.msra.mxu1 %v10914_v44  ;;  %v10995_v42 = vld [vmem:[%s15093_s1 + $0x1660] ss:$16 sps:$4 sm:$0xff]   ;;  %v10998_v44 = vld [vmem:[%s15093_s1 + $0x1668] ss:$16 sps:$4 sm:$0xff]  }
 0x298   :  { %7087 = vmatprep.subr.bf16.mxu0 %v10919_v41  ;;  %7935 = vmatprep.subr.bf16.mxu1 %v10922_v43  ;;  %v11003_v41 = vld [vmem:[%s15093_s1 + $0x1684] ss:$16 sps:$4 sm:$0xff]   ;;  %v11006_v43 = vld [vmem:[%s15093_s1 + $0x168c] ss:$16 sps:$4 sm:$0xff]  }
 0x29b   :  { %7088 = vmatpush1.bf16.msra.mxu0 %v10917_v45  ;;  %7936 = vmatpush1.bf16.msra.mxu1 %v10920_v46  ;;  %v11001_v45 = vld [vmem:[%s15093_s1 + $0x1680] ss:$16 sps:$4 sm:$0xff]   ;;  %v11004_v46 = vld [vmem:[%s15093_s1 + $0x1688] ss:$16 sps:$4 sm:$0xff]  }
 0x29c   :  { %7089 = vmatprep.subr.bf16.mxu0 %v10925_v47  ;;  %7937 = vmatprep.subr.bf16.mxu1 %v10928_v48  ;;  %v11009_v47 = vld [vmem:[%s15093_s1 + $0x16a4] ss:$16 sps:$4 sm:$0xff]   ;;  %v11012_v48 = vld [vmem:[%s15093_s1 + $0x16ac] ss:$16 sps:$4 sm:$0xff]  }
 0x29f   :  { %7090 = vmatpush1.bf16.msra.mxu0 %v10923_v51  ;;  %7938 = vmatpush1.bf16.msra.mxu1 %v10926_v52  ;;  %v11007_v51 = vld [vmem:[%s15093_s1 + $0x16a0] ss:$16 sps:$4 sm:$0xff]   ;;  %v11010_v52 = vld [vmem:[%s15093_s1 + $0x16a8] ss:$16 sps:$4 sm:$0xff]  }
 0x2a0   :  { %7091 = vmatprep.subr.bf16.mxu0 %v10931_v49  ;;  %7939 = vmatprep.subr.bf16.mxu1 %v10934_v50  ;;  %v11015_v49 = vld [vmem:[%s15093_s1 + $0x16c4] ss:$16 sps:$4 sm:$0xff]   ;;  %v11018_v50 = vld [vmem:[%s15093_s1 + $0x16cc] ss:$16 sps:$4 sm:$0xff]  }
 0x2a3   :  { %7092 = vmatpush1.bf16.msra.mxu0 %v10929_v53  ;;  %7940 = vmatpush1.bf16.msra.mxu1 %v10932_v54  ;;  %v11013_v53 = vld [vmem:[%s15093_s1 + $0x16c0] ss:$16 sps:$4 sm:$0xff]   ;;  %v11016_v54 = vld [vmem:[%s15093_s1 + $0x16c8] ss:$16 sps:$4 sm:$0xff]  }
 0x2a4   :  { %7093 = vmatprep.subr.bf16.mxu0 %v10937_v55  ;;  %7941 = vmatprep.subr.bf16.mxu1 %v10940_v56  ;;  %v11021_v55 = vld [vmem:[%s15093_s1 + $0x16e4] ss:$16 sps:$4 sm:$0xff]   ;;  %v11024_v56 = vld [vmem:[%s15093_s1 + $0x16ec] ss:$16 sps:$4 sm:$0xff]  }
 0x2a7   :  { %7094 = vmatpush1.bf16.msra.mxu0 %v10935_v59  ;;  %7942 = vmatpush1.bf16.msra.mxu1 %v10938_v60  ;;  %v11019_v59 = vld [vmem:[%s15093_s1 + $0x16e0] ss:$16 sps:$4 sm:$0xff]   ;;  %v11022_v60 = vld [vmem:[%s15093_s1 + $0x16e8] ss:$16 sps:$4 sm:$0xff]  }
 0x2a8   :  { %7095 = vmatprep.subr.bf16.mxu0 %v10943_v57  ;;  %7943 = vmatprep.subr.bf16.mxu1 %v10946_v58  ;;  %v11027_v57 = vld [vmem:[%s15093_s1 + $0x1704] ss:$16 sps:$4 sm:$0xff]   ;;  %v11030_v58 = vld [vmem:[%s15093_s1 + $0x170c] ss:$16 sps:$4 sm:$0xff]  }
 0x2ab   :  { %7096 = vmatpush1.bf16.msra.mxu0 %v10941_v61  ;;  %7944 = vmatpush1.bf16.msra.mxu1 %v10944_v62  ;;  %v11025_v61 = vld [vmem:[%s15093_s1 + $0x1700] ss:$16 sps:$4 sm:$0xff]   ;;  %v11028_v62 = vld [vmem:[%s15093_s1 + $0x1708] ss:$16 sps:$4 sm:$0xff]  }
 0x2ac   :  { %7097 = vmatprep.subr.bf16.mxu0 %v10949_v63  ;;  %7945 = vmatprep.subr.bf16.mxu1 %v10952_v0  ;;  %v11033_v63 = vld [vmem:[%s15093_s1 + $0x1724] ss:$16 sps:$4 sm:$0xff]   ;;  %v11036_v0 = vld [vmem:[%s15093_s1 + $0x172c] ss:$16 sps:$4 sm:$0xff]  }
 0x2af   :  { %7098 = vmatpush1.bf16.msra.mxu0 %v10947_v3  ;;  %7946 = vmatpush1.bf16.msra.mxu1 %v10950_v4  ;;  %v11031_v3 = vld [vmem:[%s15093_s1 + $0x1720] ss:$16 sps:$4 sm:$0xff]   ;;  %v11034_v4 = vld [vmem:[%s15093_s1 + $0x1728] ss:$16 sps:$4 sm:$0xff]  }
 0x2b0   :  { %7099 = vmatprep.subr.bf16.mxu0 %v10955_v1  ;;  %7947 = vmatprep.subr.bf16.mxu1 %v10958_v2  ;;  %v11039_v1 = vld [vmem:[%s15093_s1 + $0x1744] ss:$16 sps:$4 sm:$0xff]   ;;  %v11042_v2 = vld [vmem:[%s15093_s1 + $0x174c] ss:$16 sps:$4 sm:$0xff]  }
 0x2b3   :  { %7100 = vmatpush1.bf16.msra.mxu0 %v10953_v5  ;;  %7948 = vmatpush1.bf16.msra.mxu1 %v10956_v6  ;;  %v11037_v5 = vld [vmem:[%s15093_s1 + $0x1740] ss:$16 sps:$4 sm:$0xff]   ;;  %v11040_v6 = vld [vmem:[%s15093_s1 + $0x1748] ss:$16 sps:$4 sm:$0xff]  }
 0x2b4   :  { %7101 = vmatprep.subr.bf16.mxu0 %v10961_v7  ;;  %7949 = vmatprep.subr.bf16.mxu1 %v10964_v8  ;;  %v11045_v7 = vld [vmem:[%s15093_s1 + $0x1764] ss:$16 sps:$4 sm:$0xff]   ;;  %v11048_v8 = vld [vmem:[%s15093_s1 + $0x176c] ss:$16 sps:$4 sm:$0xff]  }
 0x2b7   :  { %7102 = vmatpush1.bf16.msra.mxu0 %v10959_v11  ;;  %7950 = vmatpush1.bf16.msra.mxu1 %v10962_v12  ;;  %v11043_v11 = vld [vmem:[%s15093_s1 + $0x1760] ss:$16 sps:$4 sm:$0xff]   ;;  %v11046_v12 = vld [vmem:[%s15093_s1 + $0x1768] ss:$16 sps:$4 sm:$0xff]  }
 0x2b8   :  { %7103 = vmatprep.subr.bf16.mxu0 %v10967_v9  ;;  %7951 = vmatprep.subr.bf16.mxu1 %v10970_v10  ;;  %v11051_v9 = vld [vmem:[%s15093_s1 + $0x1784] ss:$16 sps:$4 sm:$0xff]   ;;  %v11054_v10 = vld [vmem:[%s15093_s1 + $0x178c] ss:$16 sps:$4 sm:$0xff]  }
 0x2bb   :  { %7104 = vmatpush1.bf16.msra.mxu0 %v10965_v13  ;;  %7952 = vmatpush1.bf16.msra.mxu1 %v10968_v14  ;;  %v11049_v13 = vld [vmem:[%s15093_s1 + $0x1780] ss:$16 sps:$4 sm:$0xff]   ;;  %v11052_v14 = vld [vmem:[%s15093_s1 + $0x1788] ss:$16 sps:$4 sm:$0xff]  }
 0x2bc   :  { %7105 = vmatprep.subr.bf16.mxu0 %v10973_v15  ;;  %7953 = vmatprep.subr.bf16.mxu1 %v10976_v16  ;;  %v11057_v15 = vld [vmem:[%s15093_s1 + $0x17a4] ss:$16 sps:$4 sm:$0xff]   ;;  %v11060_v16 = vld [vmem:[%s15093_s1 + $0x17ac] ss:$16 sps:$4 sm:$0xff]  }
 0x2bf   :  { %7106 = vmatpush1.bf16.msra.mxu0 %v10971_v19  ;;  %7954 = vmatpush1.bf16.msra.mxu1 %v10974_v17  ;;  %v11055_v19 = vld [vmem:[%s15093_s1 + $0x17a0] ss:$16 sps:$4 sm:$0xff]   ;;  %v11058_v17 = vld [vmem:[%s15093_s1 + $0x17a8] ss:$16 sps:$4 sm:$0xff]  }
 0x2c0   :  { %7128 = vmatprep.subr.bf16.mxu0 %v10979_v18  ;;  %7976 = vmatprep.subr.bf16.mxu1 %v10982_v20  ;;  %v11063_v18 = vld [vmem:[%s15093_s1 + $0x17c4] ss:$16 sps:$4 sm:$0xff]   ;;  %v11066_v20 = vld [vmem:[%s15093_s1 + $0x17cc] ss:$16 sps:$4 sm:$0xff]  }
 0x2c2   :  { %7108 = vmatmul.mubr.bf16.vlgmr.msra.gmra.mrb[0].mxu0 %v8597_v21  ;;  %7956 = vmatmul.mubr.bf16.vlgmr.msra.gmra.mrb[0].mxu1 %v8597_v21  ;;  %v11061_v21 = vld [vmem:[%s15093_s1 + $0x17c0] ss:$16 sps:$4 sm:$0xff]  }
 0x2c3   :  { %7129 = vmatpush1.bf16.msra.mxu0 %v10977_v24  ;;  %7977 = vmatpush1.bf16.msra.mxu1 %v10980_v26  ;;  %v11072_v24 = vld [vmem:[%s15093_s1 + $0x17ec] ss:$16 sps:$4 sm:$0xff]   ;;  %v11067_v26 = vld [vmem:[%s15093_s1 + $0x17e0] ss:$16 sps:$4 sm:$0xff]  }
 0x2c4   :  { %7130 = vmatprep.subr.bf16.mxu0 %v10985_v25  ;;  %7978 = vmatprep.subr.bf16.mxu1 %v10988_v27  ;;  %v11070_v25 = vld [vmem:[%s15093_s1 + $0x17e8] ss:$16 sps:$4 sm:$0xff]   ;;  %v11075_v27 = vld [vmem:[%s15093_s1 + $0x1804] ss:$16 sps:$4 sm:$0xff]  }
 0x2c5   :  { %7117 = vmatprep.mubr.bf16.mxu0 %v8630_v28  ;;  %7965 = vmatprep.mubr.bf16.mxu1 %v8630_v28  ;;  %v11078_v28 = vld [vmem:[%s15093_s1 + $0x180c] ss:$16 sps:$4 sm:$0xff]  }
 0x2c7   :  { %7131 = vmatpush1.bf16.msra.mxu0 %v10983_v29  ;;  %7979 = vmatpush1.bf16.msra.mxu1 %v10986_v30  ;;  %v8599_v29 = vcombine.low %v13847_v36, %v13852_v33  ;;  %v60_v30 = vld [vmem:[%s15094_s0 + $0x158] sm:$0xff]  ;;  %v11081_v36 = vld [vmem:[%s15093_s1 + $0x1824] ss:$16 sps:$4 sm:$0xff]  }
 0x2c8   :  { %7132 = vmatprep.subr.bf16.mxu0 %v10991_v31  ;;  %7980 = vmatprep.subr.bf16.mxu1 %v10994_v32  ;;  %v76_v31 = vld [vmem:[%s15094_s0 + $0x1d8] sm:$0xff]  ;;  %v11073_v32 = vld [vmem:[%s15093_s1 + $0x1800] ss:$16 sps:$4 sm:$0xff]  }
 0x2c9   :  { %v11084_v33 = vld [vmem:[%s15093_s1 + $0x182c] ss:$16 sps:$4 sm:$0xff]  }
 0x2ca   :  { %7118 = vmatmul.mubr.bf16.gmra.mrb[4].mxu0 %v8629_v34  ;;  %7966 = vmatmul.mubr.bf16.gmra.mrb[4].mxu1 %v8629_v34  ;;  %v11076_v34 = vld [vmem:[%s15093_s1 + $0x1808] ss:$16 sps:$4 sm:$0xff]  }
 0x2cb   :  { %7133 = vmatpush1.bf16.msra.mxu0 %v10989_v35  ;;  %7981 = vmatpush1.bf16.msra.mxu1 %v10992_v37  ;;  %v8632_v35 = vcombine.high %v60_v30, %v76_v31  ;;  %v11079_v37 = vld [vmem:[%s15093_s1 + $0x1820] ss:$16 sps:$4 sm:$0xff]  }
 0x2cc   :  { %7134 = vmatprep.subr.bf16.mxu0 %v10997_v38  ;;  %7982 = vmatprep.subr.bf16.mxu1 %v11000_v39  ;;  %v11082_v38 = vld [vmem:[%s15093_s1 + $0x1828] ss:$16 sps:$4 sm:$0xff]   ;;  %v11087_v39 = vld [vmem:[%s15093_s1 + $0x1844] ss:$16 sps:$4 sm:$0xff]  }
 0x2cd   :  { %7160 = vmatprep.mubr.bf16.mxu0 %v8600_v40  ;;  %8008 = vmatprep.mubr.bf16.mxu1 %v8600_v40  ;;  %v11090_v40 = vld [vmem:[%s15093_s1 + $0x184c] ss:$16 sps:$4 sm:$0xff]  }
 0x2cf   :  { %7135 = vmatpush1.bf16.msra.mxu0 %v10995_v42  ;;  %7983 = vmatpush1.bf16.msra.mxu1 %v10998_v44  ;;  %v8631_v42 = vcombine.low %v60_v30, %v76_v31  ;;  %v14059_v44 = vld [vmem:[%s15094_s0 + $0x60] sm:$0xff]  ;;  %v11160_v30 = vld [vmem:[%s15093_s1 + $0x19c8] ss:$16 sps:$4 sm:$0xff]  }
 0x2d0   :  { %7136 = vmatprep.subr.bf16.mxu0 %v11003_v41  ;;  %7984 = vmatprep.subr.bf16.mxu1 %v11006_v43  ;;  %v14064_v41 = vld [vmem:[%s15094_s0 + $0xe0] sm:$0xff] }
 0x2d1   :  { %v11085_v43 = vld [vmem:[%s15093_s1 + $0x1840] ss:$16 sps:$4 sm:$0xff]   ;;  %v11165_v31 = vld [vmem:[%s15093_s1 + $0x19e4] ss:$16 sps:$4 sm:$0xff]  }
 0x2d3   :  { %7137 = vmatpush1.bf16.msra.mxu0 %v11001_v45  ;;  %7985 = vmatpush1.bf16.msra.mxu1 %v11004_v46  ;;  %v11088_v45 = vld [vmem:[%s15093_s1 + $0x1848] ss:$16 sps:$4 sm:$0xff]   ;;  %v11093_v46 = vld [vmem:[%s15093_s1 + $0x1864] ss:$16 sps:$4 sm:$0xff]  }
 0x2d4   :  { %7138 = vmatprep.subr.bf16.mxu0 %v11009_v47  ;;  %7986 = vmatprep.subr.bf16.mxu1 %v11012_v48  ;;  %v11096_v47 = vld [vmem:[%s15093_s1 + $0x186c] ss:$16 sps:$4 sm:$0xff]   ;;  %v8602_v48 = vcombine.high %v14059_v44, %v14064_v41 }
 0x2d7   :  { %7139 = vmatpush1.bf16.msra.mxu0 %v11007_v51  ;;  %7987 = vmatpush1.bf16.msra.mxu1 %v11010_v52  ;;  %v11091_v51 = vld [vmem:[%s15093_s1 + $0x1860] ss:$16 sps:$4 sm:$0xff]   ;;  %v11094_v52 = vld [vmem:[%s15093_s1 + $0x1868] ss:$16 sps:$4 sm:$0xff]  }
 0x2d8   :  { %7140 = vmatprep.subr.bf16.mxu0 %v11015_v49  ;;  %7988 = vmatprep.subr.bf16.mxu1 %v11018_v50  ;;  %v11099_v49 = vld [vmem:[%s15093_s1 + $0x1884] ss:$16 sps:$4 sm:$0xff]   ;;  %v11102_v50 = vld [vmem:[%s15093_s1 + $0x188c] ss:$16 sps:$4 sm:$0xff]  }
 0x2db   :  { %7141 = vmatpush1.bf16.msra.mxu0 %v11013_v53  ;;  %7989 = vmatpush1.bf16.msra.mxu1 %v11016_v54  ;;  %v11097_v53 = vld [vmem:[%s15093_s1 + $0x1880] ss:$16 sps:$4 sm:$0xff]   ;;  %v11100_v54 = vld [vmem:[%s15093_s1 + $0x1888] ss:$16 sps:$4 sm:$0xff]  }
 0x2dc   :  { %7142 = vmatprep.subr.bf16.mxu0 %v11021_v55  ;;  %7990 = vmatprep.subr.bf16.mxu1 %v11024_v56  ;;  %v11105_v55 = vld [vmem:[%s15093_s1 + $0x18a4] ss:$16 sps:$4 sm:$0xff]   ;;  %v11108_v56 = vld [vmem:[%s15093_s1 + $0x18ac] ss:$16 sps:$4 sm:$0xff]  }
 0x2df   :  { %7143 = vmatpush1.bf16.msra.mxu0 %v11019_v59  ;;  %7991 = vmatpush1.bf16.msra.mxu1 %v11022_v60  ;;  %v11103_v59 = vld [vmem:[%s15093_s1 + $0x18a0] ss:$16 sps:$4 sm:$0xff]   ;;  %v11106_v60 = vld [vmem:[%s15093_s1 + $0x18a8] ss:$16 sps:$4 sm:$0xff]  }
 0x2e0   :  { %7144 = vmatprep.subr.bf16.mxu0 %v11027_v57  ;;  %7992 = vmatprep.subr.bf16.mxu1 %v11030_v58  ;;  %v11111_v57 = vld [vmem:[%s15093_s1 + $0x18c4] ss:$16 sps:$4 sm:$0xff]   ;;  %v11114_v58 = vld [vmem:[%s15093_s1 + $0x18cc] ss:$16 sps:$4 sm:$0xff]  }
 0x2e3   :  { %7145 = vmatpush1.bf16.msra.mxu0 %v11025_v61  ;;  %7993 = vmatpush1.bf16.msra.mxu1 %v11028_v62  ;;  %v11109_v61 = vld [vmem:[%s15093_s1 + $0x18c0] ss:$16 sps:$4 sm:$0xff]   ;;  %v11112_v62 = vld [vmem:[%s15093_s1 + $0x18c8] ss:$16 sps:$4 sm:$0xff]  }
 0x2e4   :  { %7146 = vmatprep.subr.bf16.mxu0 %v11033_v63  ;;  %7994 = vmatprep.subr.bf16.mxu1 %v11036_v0  ;;  %v11117_v63 = vld [vmem:[%s15093_s1 + $0x18e4] ss:$16 sps:$4 sm:$0xff]   ;;  %v11120_v0 = vld [vmem:[%s15093_s1 + $0x18ec] ss:$16 sps:$4 sm:$0xff]  }
 0x2e7   :  { %7147 = vmatpush1.bf16.msra.mxu0 %v11031_v3  ;;  %7995 = vmatpush1.bf16.msra.mxu1 %v11034_v4  ;;  %v11115_v3 = vld [vmem:[%s15093_s1 + $0x18e0] ss:$16 sps:$4 sm:$0xff]   ;;  %v11118_v4 = vld [vmem:[%s15093_s1 + $0x18e8] ss:$16 sps:$4 sm:$0xff]  }
 0x2e8   :  { %7148 = vmatprep.subr.bf16.mxu0 %v11039_v1  ;;  %7996 = vmatprep.subr.bf16.mxu1 %v11042_v2  ;;  %v11123_v1 = vld [vmem:[%s15093_s1 + $0x1904] ss:$16 sps:$4 sm:$0xff]   ;;  %v11126_v2 = vld [vmem:[%s15093_s1 + $0x190c] ss:$16 sps:$4 sm:$0xff]  }
 0x2eb   :  { %7149 = vmatpush1.bf16.msra.mxu0 %v11037_v5  ;;  %7997 = vmatpush1.bf16.msra.mxu1 %v11040_v6  ;;  %v11121_v5 = vld [vmem:[%s15093_s1 + $0x1900] ss:$16 sps:$4 sm:$0xff]   ;;  %v11124_v6 = vld [vmem:[%s15093_s1 + $0x1908] ss:$16 sps:$4 sm:$0xff]  }
 0x2ec   :  { %7150 = vmatprep.subr.bf16.mxu0 %v11045_v7  ;;  %7998 = vmatprep.subr.bf16.mxu1 %v11048_v8  ;;  %v11129_v7 = vld [vmem:[%s15093_s1 + $0x1924] ss:$16 sps:$4 sm:$0xff]   ;;  %v11132_v8 = vld [vmem:[%s15093_s1 + $0x192c] ss:$16 sps:$4 sm:$0xff]  }
 0x2ef   :  { %7151 = vmatpush1.bf16.msra.mxu0 %v11043_v11  ;;  %7999 = vmatpush1.bf16.msra.mxu1 %v11046_v12  ;;  %v11127_v11 = vld [vmem:[%s15093_s1 + $0x1920] ss:$16 sps:$4 sm:$0xff]   ;;  %v11130_v12 = vld [vmem:[%s15093_s1 + $0x1928] ss:$16 sps:$4 sm:$0xff]  }
 0x2f0   :  { %7152 = vmatprep.subr.bf16.mxu0 %v11051_v9  ;;  %8000 = vmatprep.subr.bf16.mxu1 %v11054_v10  ;;  %v11135_v9 = vld [vmem:[%s15093_s1 + $0x1944] ss:$16 sps:$4 sm:$0xff]   ;;  %v11138_v10 = vld [vmem:[%s15093_s1 + $0x194c] ss:$16 sps:$4 sm:$0xff]  }
 0x2f3   :  { %7153 = vmatpush1.bf16.msra.mxu0 %v11049_v13  ;;  %8001 = vmatpush1.bf16.msra.mxu1 %v11052_v14  ;;  %v11133_v13 = vld [vmem:[%s15093_s1 + $0x1940] ss:$16 sps:$4 sm:$0xff]   ;;  %v11136_v14 = vld [vmem:[%s15093_s1 + $0x1948] ss:$16 sps:$4 sm:$0xff]  }
 0x2f4   :  { %7154 = vmatprep.subr.bf16.mxu0 %v11057_v15  ;;  %8002 = vmatprep.subr.bf16.mxu1 %v11060_v16  ;;  %v11141_v15 = vld [vmem:[%s15093_s1 + $0x1964] ss:$16 sps:$4 sm:$0xff]   ;;  %v11144_v16 = vld [vmem:[%s15093_s1 + $0x196c] ss:$16 sps:$4 sm:$0xff]  }
 0x2f7   :  { %7155 = vmatpush1.bf16.msra.mxu0 %v11055_v19  ;;  %8003 = vmatpush1.bf16.msra.mxu1 %v11058_v17  ;;  %v11139_v19 = vld [vmem:[%s15093_s1 + $0x1960] ss:$16 sps:$4 sm:$0xff]   ;;  %v11142_v17 = vld [vmem:[%s15093_s1 + $0x1968] ss:$16 sps:$4 sm:$0xff]  }
 0x2f8   :  { %7156 = vmatprep.subr.bf16.mxu0 %v11063_v18  ;;  %8004 = vmatprep.subr.bf16.mxu1 %v11066_v20  ;;  %v11147_v18 = vld [vmem:[%s15093_s1 + $0x1984] ss:$16 sps:$4 sm:$0xff]   ;;  %v11150_v20 = vld [vmem:[%s15093_s1 + $0x198c] ss:$16 sps:$4 sm:$0xff]  }
 0x2fb   :  { %7157 = vmatpush1.bf16.msra.mxu0 %v11061_v21  ;;  %8005 = vmatpush1.bf16.msra.mxu1 %v11064_v22  ;;  %v11145_v21 = vld [vmem:[%s15093_s1 + $0x1980] ss:$16 sps:$4 sm:$0xff]   ;;  %v11148_v22 = vld [vmem:[%s15093_s1 + $0x1988] ss:$16 sps:$4 sm:$0xff]  }
 0x2fc   :  { %7158 = vmatprep.subr.bf16.mxu0 %v11069_v23  ;;  %8006 = vmatprep.subr.bf16.mxu1 %v11072_v24  ;;  %v11153_v23 = vld [vmem:[%s15093_s1 + $0x19a4] ss:$16 sps:$4 sm:$0xff]   ;;  %v11156_v24 = vld [vmem:[%s15093_s1 + $0x19ac] ss:$16 sps:$4 sm:$0xff]  }
 0x2ff   :  { %7159 = vmatpush1.bf16.msra.mxu0 %v11067_v26  ;;  %8007 = vmatpush1.bf16.msra.mxu1 %v11070_v25  ;;  %v11151_v26 = vld [vmem:[%s15093_s1 + $0x19a0] ss:$16 sps:$4 sm:$0xff]   ;;  %v11154_v25 = vld [vmem:[%s15093_s1 + $0x19a8] ss:$16 sps:$4 sm:$0xff]  }
 0x300   :  { %7181 = vmatprep.subr.bf16.mxu0 %v11075_v27  ;;  %8029 = vmatprep.subr.bf16.mxu1 %v11078_v28  ;;  %v11159_v27 = vld [vmem:[%s15093_s1 + $0x19c4] ss:$16 sps:$4 sm:$0xff]   ;;  %v11162_v28 = vld [vmem:[%s15093_s1 + $0x19cc] ss:$16 sps:$4 sm:$0xff]  }
 0x302   :  { %7161 = vmatmul.mubr.bf16.vlgmr.msra.gmra.mrb[0].mxu0 %v8599_v29  ;;  %8009 = vmatmul.mubr.bf16.vlgmr.msra.gmra.mrb[0].mxu1 %v8599_v29  ;;  %v11157_v29 = vld [vmem:[%s15093_s1 + $0x19c0] ss:$16 sps:$4 sm:$0xff]  }
 0x303   :  { %7182 = vmatpush1.bf16.msra.mxu0 %v11073_v32  ;;  %8030 = vmatpush1.bf16.msra.mxu1 %v11076_v34  ;;  %v11168_v32 = vld [vmem:[%s15093_s1 + $0x19ec] ss:$16 sps:$4 sm:$0xff]   ;;  %v11163_v34 = vld [vmem:[%s15093_s1 + $0x19e0] ss:$16 sps:$4 sm:$0xff]  }
 0x304   :  { %7183 = vmatprep.subr.bf16.mxu0 %v11081_v36  ;;  %8031 = vmatprep.subr.bf16.mxu1 %v11084_v33  ;;  %v11166_v36 = vld [vmem:[%s15093_s1 + $0x19e8] ss:$16 sps:$4 sm:$0xff]   ;;  %v11171_v33 = vld [vmem:[%s15093_s1 + $0x1a04] ss:$16 sps:$4 sm:$0xff]  }
 0x305   :  { %7170 = vmatprep.mubr.bf16.mxu0 %v8632_v35  ;;  %8018 = vmatprep.mubr.bf16.mxu1 %v8632_v35  ;;  %v11174_v35 = vld [vmem:[%s15093_s1 + $0x1a0c] ss:$16 sps:$4 sm:$0xff]  }
 0x307   :  { %7184 = vmatpush1.bf16.msra.mxu0 %v11079_v37  ;;  %8032 = vmatpush1.bf16.msra.mxu1 %v11082_v38  ;;  %v8601_v37 = vcombine.low %v14059_v44, %v14064_v41  ;;  %v61_v38 = vld [vmem:[%s15094_s0 + $0x160] sm:$0xff]  ;;  %v11180_v41 = vld [vmem:[%s15093_s1 + $0x1a2c] ss:$16 sps:$4 sm:$0xff]  }
 0x308   :  { %7185 = vmatprep.subr.bf16.mxu0 %v11087_v39  ;;  %8033 = vmatprep.subr.bf16.mxu1 %v11090_v40  ;;  %v77_v39 = vld [vmem:[%s15094_s0 + $0x1e0] sm:$0xff] }
 0x309   :  { %v11169_v40 = vld [vmem:[%s15093_s1 + $0x1a00] ss:$16 sps:$4 sm:$0xff]   ;;  %v11177_v44 = vld [vmem:[%s15093_s1 + $0x1a24] ss:$16 sps:$4 sm:$0xff]  }
 0x30a   :  { %7171 = vmatmul.mubr.bf16.gmra.mrb[4].mxu0 %v8631_v42  ;;  %8019 = vmatmul.mubr.bf16.gmra.mrb[4].mxu1 %v8631_v42  ;;  %v11172_v42 = vld [vmem:[%s15093_s1 + $0x1a08] ss:$16 sps:$4 sm:$0xff]  }
 0x30b   :  { %7186 = vmatpush1.bf16.msra.mxu0 %v11085_v43  ;;  %8034 = vmatpush1.bf16.msra.mxu1 %v11088_v45  ;;  %v8634_v43 = vcombine.high %v61_v38, %v77_v39  ;;  %v11175_v45 = vld [vmem:[%s15093_s1 + $0x1a20] ss:$16 sps:$4 sm:$0xff]  }
 0x30c   :  { %7187 = vmatprep.subr.bf16.mxu0 %v11093_v46  ;;  %8035 = vmatprep.subr.bf16.mxu1 %v11096_v47  ;;  %v11178_v46 = vld [vmem:[%s15093_s1 + $0x1a28] ss:$16 sps:$4 sm:$0xff]   ;;  %v11183_v47 = vld [vmem:[%s15093_s1 + $0x1a44] ss:$16 sps:$4 sm:$0xff]  }
 0x30d   :  { %7213 = vmatprep.mubr.bf16.mxu0 %v8602_v48  ;;  %8061 = vmatprep.mubr.bf16.mxu1 %v8602_v48  ;;  %v11186_v48 = vld [vmem:[%s15093_s1 + $0x1a4c] ss:$16 sps:$4 sm:$0xff]  }
 0x30f   :  { %7188 = vmatpush1.bf16.msra.mxu0 %v11091_v51  ;;  %8036 = vmatpush1.bf16.msra.mxu1 %v11094_v52  ;;  %v8633_v51 = vcombine.low %v61_v38, %v77_v39  ;;  %v14271_v52 = vld [vmem:[%s15094_s0 + $0x68] sm:$0xff]  ;;  %v11261_v39 = vld [vmem:[%s15093_s1 + $0x1be4] ss:$16 sps:$4 sm:$0xff]  }
 0x310   :  { %7189 = vmatprep.subr.bf16.mxu0 %v11099_v49  ;;  %8037 = vmatprep.subr.bf16.mxu1 %v11102_v50  ;;  %v14276_v49 = vld [vmem:[%s15094_s0 + $0xe8] sm:$0xff]  ;;  %v11181_v50 = vld [vmem:[%s15093_s1 + $0x1a40] ss:$16 sps:$4 sm:$0xff]  }
 0x311   :  { %v11256_v38 = vld [vmem:[%s15093_s1 + $0x1bc8] ss:$16 sps:$4 sm:$0xff]  }
 0x313   :  { %7190 = vmatpush1.bf16.msra.mxu0 %v11097_v53  ;;  %8038 = vmatpush1.bf16.msra.mxu1 %v11100_v54  ;;  %v11184_v53 = vld [vmem:[%s15093_s1 + $0x1a48] ss:$16 sps:$4 sm:$0xff]   ;;  %v11189_v54 = vld [vmem:[%s15093_s1 + $0x1a64] ss:$16 sps:$4 sm:$0xff]  }
 0x314   :  { %7191 = vmatprep.subr.bf16.mxu0 %v11105_v55  ;;  %8039 = vmatprep.subr.bf16.mxu1 %v11108_v56  ;;  %v11192_v55 = vld [vmem:[%s15093_s1 + $0x1a6c] ss:$16 sps:$4 sm:$0xff]   ;;  %v8604_v56 = vcombine.high %v14271_v52, %v14276_v49 }
 0x317   :  { %7192 = vmatpush1.bf16.msra.mxu0 %v11103_v59  ;;  %8040 = vmatpush1.bf16.msra.mxu1 %v11106_v60  ;;  %v11187_v59 = vld [vmem:[%s15093_s1 + $0x1a60] ss:$16 sps:$4 sm:$0xff]   ;;  %v11190_v60 = vld [vmem:[%s15093_s1 + $0x1a68] ss:$16 sps:$4 sm:$0xff]  }
 0x318   :  { %7193 = vmatprep.subr.bf16.mxu0 %v11111_v57  ;;  %8041 = vmatprep.subr.bf16.mxu1 %v11114_v58  ;;  %v11195_v57 = vld [vmem:[%s15093_s1 + $0x1a84] ss:$16 sps:$4 sm:$0xff]   ;;  %v11198_v58 = vld [vmem:[%s15093_s1 + $0x1a8c] ss:$16 sps:$4 sm:$0xff]  }
 0x31b   :  { %7194 = vmatpush1.bf16.msra.mxu0 %v11109_v61  ;;  %8042 = vmatpush1.bf16.msra.mxu1 %v11112_v62  ;;  %v11193_v61 = vld [vmem:[%s15093_s1 + $0x1a80] ss:$16 sps:$4 sm:$0xff]   ;;  %v11196_v62 = vld [vmem:[%s15093_s1 + $0x1a88] ss:$16 sps:$4 sm:$0xff]  }
 0x31c   :  { %7195 = vmatprep.subr.bf16.mxu0 %v11117_v63  ;;  %8043 = vmatprep.subr.bf16.mxu1 %v11120_v0  ;;  %v11201_v63 = vld [vmem:[%s15093_s1 + $0x1aa4] ss:$16 sps:$4 sm:$0xff]   ;;  %v11204_v0 = vld [vmem:[%s15093_s1 + $0x1aac] ss:$16 sps:$4 sm:$0xff]  }
 0x31f   :  { %7196 = vmatpush1.bf16.msra.mxu0 %v11115_v3  ;;  %8044 = vmatpush1.bf16.msra.mxu1 %v11118_v4  ;;  %v11199_v3 = vld [vmem:[%s15093_s1 + $0x1aa0] ss:$16 sps:$4 sm:$0xff]   ;;  %v11202_v4 = vld [vmem:[%s15093_s1 + $0x1aa8] ss:$16 sps:$4 sm:$0xff]  }
 0x320   :  { %7197 = vmatprep.subr.bf16.mxu0 %v11123_v1  ;;  %8045 = vmatprep.subr.bf16.mxu1 %v11126_v2  ;;  %v11207_v1 = vld [vmem:[%s15093_s1 + $0x1ac4] ss:$16 sps:$4 sm:$0xff]   ;;  %v11210_v2 = vld [vmem:[%s15093_s1 + $0x1acc] ss:$16 sps:$4 sm:$0xff]  }
 0x323   :  { %7198 = vmatpush1.bf16.msra.mxu0 %v11121_v5  ;;  %8046 = vmatpush1.bf16.msra.mxu1 %v11124_v6  ;;  %v11205_v5 = vld [vmem:[%s15093_s1 + $0x1ac0] ss:$16 sps:$4 sm:$0xff]   ;;  %v11208_v6 = vld [vmem:[%s15093_s1 + $0x1ac8] ss:$16 sps:$4 sm:$0xff]  }
 0x324   :  { %7199 = vmatprep.subr.bf16.mxu0 %v11129_v7  ;;  %8047 = vmatprep.subr.bf16.mxu1 %v11132_v8  ;;  %v11213_v7 = vld [vmem:[%s15093_s1 + $0x1ae4] ss:$16 sps:$4 sm:$0xff]   ;;  %v11216_v8 = vld [vmem:[%s15093_s1 + $0x1aec] ss:$16 sps:$4 sm:$0xff]  }
 0x327   :  { %7200 = vmatpush1.bf16.msra.mxu0 %v11127_v11  ;;  %8048 = vmatpush1.bf16.msra.mxu1 %v11130_v12  ;;  %v11211_v11 = vld [vmem:[%s15093_s1 + $0x1ae0] ss:$16 sps:$4 sm:$0xff]   ;;  %v11214_v12 = vld [vmem:[%s15093_s1 + $0x1ae8] ss:$16 sps:$4 sm:$0xff]  }
 0x328   :  { %7201 = vmatprep.subr.bf16.mxu0 %v11135_v9  ;;  %8049 = vmatprep.subr.bf16.mxu1 %v11138_v10  ;;  %v11219_v9 = vld [vmem:[%s15093_s1 + $0x1b04] ss:$16 sps:$4 sm:$0xff]   ;;  %v11222_v10 = vld [vmem:[%s15093_s1 + $0x1b0c] ss:$16 sps:$4 sm:$0xff]  }
 0x32b   :  { %7202 = vmatpush1.bf16.msra.mxu0 %v11133_v13  ;;  %8050 = vmatpush1.bf16.msra.mxu1 %v11136_v14  ;;  %v11217_v13 = vld [vmem:[%s15093_s1 + $0x1b00] ss:$16 sps:$4 sm:$0xff]   ;;  %v11220_v14 = vld [vmem:[%s15093_s1 + $0x1b08] ss:$16 sps:$4 sm:$0xff]  }
 0x32c   :  { %7203 = vmatprep.subr.bf16.mxu0 %v11141_v15  ;;  %8051 = vmatprep.subr.bf16.mxu1 %v11144_v16  ;;  %v11225_v15 = vld [vmem:[%s15093_s1 + $0x1b24] ss:$16 sps:$4 sm:$0xff]   ;;  %v11228_v16 = vld [vmem:[%s15093_s1 + $0x1b2c] ss:$16 sps:$4 sm:$0xff]  }
 0x32f   :  { %7204 = vmatpush1.bf16.msra.mxu0 %v11139_v19  ;;  %8052 = vmatpush1.bf16.msra.mxu1 %v11142_v17  ;;  %v11223_v19 = vld [vmem:[%s15093_s1 + $0x1b20] ss:$16 sps:$4 sm:$0xff]   ;;  %v11226_v17 = vld [vmem:[%s15093_s1 + $0x1b28] ss:$16 sps:$4 sm:$0xff]  }
 0x330   :  { %7205 = vmatprep.subr.bf16.mxu0 %v11147_v18  ;;  %8053 = vmatprep.subr.bf16.mxu1 %v11150_v20  ;;  %v11231_v18 = vld [vmem:[%s15093_s1 + $0x1b44] ss:$16 sps:$4 sm:$0xff]   ;;  %v11234_v20 = vld [vmem:[%s15093_s1 + $0x1b4c] ss:$16 sps:$4 sm:$0xff]  }
 0x333   :  { %7206 = vmatpush1.bf16.msra.mxu0 %v11145_v21  ;;  %8054 = vmatpush1.bf16.msra.mxu1 %v11148_v22  ;;  %v11229_v21 = vld [vmem:[%s15093_s1 + $0x1b40] ss:$16 sps:$4 sm:$0xff]   ;;  %v11232_v22 = vld [vmem:[%s15093_s1 + $0x1b48] ss:$16 sps:$4 sm:$0xff]  }
 0x334   :  { %7207 = vmatprep.subr.bf16.mxu0 %v11153_v23  ;;  %8055 = vmatprep.subr.bf16.mxu1 %v11156_v24  ;;  %v11237_v23 = vld [vmem:[%s15093_s1 + $0x1b64] ss:$16 sps:$4 sm:$0xff]   ;;  %v11240_v24 = vld [vmem:[%s15093_s1 + $0x1b6c] ss:$16 sps:$4 sm:$0xff]  }
 0x337   :  { %7208 = vmatpush1.bf16.msra.mxu0 %v11151_v26  ;;  %8056 = vmatpush1.bf16.msra.mxu1 %v11154_v25  ;;  %v11235_v26 = vld [vmem:[%s15093_s1 + $0x1b60] ss:$16 sps:$4 sm:$0xff]   ;;  %v11238_v25 = vld [vmem:[%s15093_s1 + $0x1b68] ss:$16 sps:$4 sm:$0xff]  }
 0x338   :  { %7209 = vmatprep.subr.bf16.mxu0 %v11159_v27  ;;  %8057 = vmatprep.subr.bf16.mxu1 %v11162_v28  ;;  %v11243_v27 = vld [vmem:[%s15093_s1 + $0x1b84] ss:$16 sps:$4 sm:$0xff]   ;;  %v11246_v28 = vld [vmem:[%s15093_s1 + $0x1b8c] ss:$16 sps:$4 sm:$0xff]  }
 0x33b   :  { %7210 = vmatpush1.bf16.msra.mxu0 %v11157_v29  ;;  %8058 = vmatpush1.bf16.msra.mxu1 %v11160_v30  ;;  %v11241_v29 = vld [vmem:[%s15093_s1 + $0x1b80] ss:$16 sps:$4 sm:$0xff]   ;;  %v11244_v30 = vld [vmem:[%s15093_s1 + $0x1b88] ss:$16 sps:$4 sm:$0xff]  }
 0x33c   :  { %7211 = vmatprep.subr.bf16.mxu0 %v11165_v31  ;;  %8059 = vmatprep.subr.bf16.mxu1 %v11168_v32  ;;  %v11249_v31 = vld [vmem:[%s15093_s1 + $0x1ba4] ss:$16 sps:$4 sm:$0xff]   ;;  %v11252_v32 = vld [vmem:[%s15093_s1 + $0x1bac] ss:$16 sps:$4 sm:$0xff]  }
 0x33f   :  { %7212 = vmatpush1.bf16.msra.mxu0 %v11163_v34  ;;  %8060 = vmatpush1.bf16.msra.mxu1 %v11166_v36  ;;  %v11247_v34 = vld [vmem:[%s15093_s1 + $0x1ba0] ss:$16 sps:$4 sm:$0xff]   ;;  %v11250_v36 = vld [vmem:[%s15093_s1 + $0x1ba8] ss:$16 sps:$4 sm:$0xff]  }
 0x340   :  { %7234 = vmatprep.subr.bf16.mxu0 %v11171_v33  ;;  %8082 = vmatprep.subr.bf16.mxu1 %v11174_v35  ;;  %v11255_v33 = vld [vmem:[%s15093_s1 + $0x1bc4] ss:$16 sps:$4 sm:$0xff]   ;;  %v11258_v35 = vld [vmem:[%s15093_s1 + $0x1bcc] ss:$16 sps:$4 sm:$0xff]  }
 0x342   :  { %7214 = vmatmul.mubr.bf16.vlgmr.msra.gmra.mrb[0].mxu0 %v8601_v37  ;;  %8062 = vmatmul.mubr.bf16.vlgmr.msra.gmra.mrb[0].mxu1 %v8601_v37  ;;  %v11253_v37 = vld [vmem:[%s15093_s1 + $0x1bc0] ss:$16 sps:$4 sm:$0xff]  }
 0x343   :  { %7235 = vmatpush1.bf16.msra.mxu0 %v11169_v40  ;;  %8083 = vmatpush1.bf16.msra.mxu1 %v11172_v42  ;;  %v11264_v40 = vld [vmem:[%s15093_s1 + $0x1bec] ss:$16 sps:$4 sm:$0xff]   ;;  %v11259_v42 = vld [vmem:[%s15093_s1 + $0x1be0] ss:$16 sps:$4 sm:$0xff]  }
 0x344   :  { %7236 = vmatprep.subr.bf16.mxu0 %v11177_v44  ;;  %8084 = vmatprep.subr.bf16.mxu1 %v11180_v41  ;;  %v11262_v44 = vld [vmem:[%s15093_s1 + $0x1be8] ss:$16 sps:$4 sm:$0xff]   ;;  %v11267_v41 = vld [vmem:[%s15093_s1 + $0x1c04] ss:$16 sps:$4 sm:$0xff]  }
 0x345   :  { %7223 = vmatprep.mubr.bf16.mxu0 %v8634_v43  ;;  %8071 = vmatprep.mubr.bf16.mxu1 %v8634_v43  ;;  %v11270_v43 = vld [vmem:[%s15093_s1 + $0x1c0c] ss:$16 sps:$4 sm:$0xff]  }
 0x347   :  { %7237 = vmatpush1.bf16.msra.mxu0 %v11175_v45  ;;  %8085 = vmatpush1.bf16.msra.mxu1 %v11178_v46  ;;  %v8603_v45 = vcombine.low %v14271_v52, %v14276_v49  ;;  %v62_v46 = vld [vmem:[%s15094_s0 + $0x168] sm:$0xff]  ;;  %v11273_v52 = vld [vmem:[%s15093_s1 + $0x1c24] ss:$16 sps:$4 sm:$0xff]  }
 0x348   :  { %7238 = vmatprep.subr.bf16.mxu0 %v11183_v47  ;;  %8086 = vmatprep.subr.bf16.mxu1 %v11186_v48  ;;  %v78_v47 = vld [vmem:[%s15094_s0 + $0x1e8] sm:$0xff]  ;;  %v11265_v48 = vld [vmem:[%s15093_s1 + $0x1c00] ss:$16 sps:$4 sm:$0xff]  }
 0x349   :  { %v11276_v49 = vld [vmem:[%s15093_s1 + $0x1c2c] ss:$16 sps:$4 sm:$0xff]  }
 0x34a   :  { %7224 = vmatmul.mubr.bf16.gmra.mrb[4].mxu0 %v8633_v51  ;;  %8072 = vmatmul.mubr.bf16.gmra.mrb[4].mxu1 %v8633_v51  ;;  %v11268_v51 = vld [vmem:[%s15093_s1 + $0x1c08] ss:$16 sps:$4 sm:$0xff]  }
 0x34b   :  { %7239 = vmatpush1.bf16.msra.mxu0 %v11181_v50  ;;  %8087 = vmatpush1.bf16.msra.mxu1 %v11184_v53  ;;  %v8636_v50 = vcombine.high %v62_v46, %v78_v47  ;;  %v11271_v53 = vld [vmem:[%s15093_s1 + $0x1c20] ss:$16 sps:$4 sm:$0xff]  }
 0x34c   :  { %7240 = vmatprep.subr.bf16.mxu0 %v11189_v54  ;;  %8088 = vmatprep.subr.bf16.mxu1 %v11192_v55  ;;  %v11274_v54 = vld [vmem:[%s15093_s1 + $0x1c28] ss:$16 sps:$4 sm:$0xff]   ;;  %v11279_v55 = vld [vmem:[%s15093_s1 + $0x1c44] ss:$16 sps:$4 sm:$0xff]  }
 0x34d   :  { %7266 = vmatprep.mubr.bf16.mxu0 %v8604_v56  ;;  %8114 = vmatprep.mubr.bf16.mxu1 %v8604_v56  ;;  %v11282_v56 = vld [vmem:[%s15093_s1 + $0x1c4c] ss:$16 sps:$4 sm:$0xff]  }
 0x34f   :  { %7241 = vmatpush1.bf16.msra.mxu0 %v11187_v59  ;;  %8089 = vmatpush1.bf16.msra.mxu1 %v11190_v60  ;;  %v8635_v59 = vcombine.low %v62_v46, %v78_v47  ;;  %v14483_v60 = vld [vmem:[%s15094_s0 + $0x70] sm:$0xff]  ;;  %v11352_v46 = vld [vmem:[%s15093_s1 + $0x1dc8] ss:$16 sps:$4 sm:$0xff]  }
 0x350   :  { %7242 = vmatprep.subr.bf16.mxu0 %v11195_v57  ;;  %8090 = vmatprep.subr.bf16.mxu1 %v11198_v58  ;;  %v14488_v57 = vld [vmem:[%s15094_s0 + $0xf0] sm:$0xff] }
 0x351   :  { %v11277_v58 = vld [vmem:[%s15093_s1 + $0x1c40] ss:$16 sps:$4 sm:$0xff]   ;;  %v11357_v47 = vld [vmem:[%s15093_s1 + $0x1de4] ss:$16 sps:$4 sm:$0xff]  }
 0x353   :  { %7243 = vmatpush1.bf16.msra.mxu0 %v11193_v61  ;;  %8091 = vmatpush1.bf16.msra.mxu1 %v11196_v62  ;;  %v11280_v61 = vld [vmem:[%s15093_s1 + $0x1c48] ss:$16 sps:$4 sm:$0xff]   ;;  %v11285_v62 = vld [vmem:[%s15093_s1 + $0x1c64] ss:$16 sps:$4 sm:$0xff]  }
 0x354   :  { %7244 = vmatprep.subr.bf16.mxu0 %v11201_v63  ;;  %8092 = vmatprep.subr.bf16.mxu1 %v11204_v0  ;;  %v11288_v63 = vld [vmem:[%s15093_s1 + $0x1c6c] ss:$16 sps:$4 sm:$0xff]   ;;  %v8606_v0 = vcombine.high %v14483_v60, %v14488_v57 }
 0x357   :  { %7245 = vmatpush1.bf16.msra.mxu0 %v11199_v3  ;;  %8093 = vmatpush1.bf16.msra.mxu1 %v11202_v4  ;;  %v11283_v3 = vld [vmem:[%s15093_s1 + $0x1c60] ss:$16 sps:$4 sm:$0xff]   ;;  %v11286_v4 = vld [vmem:[%s15093_s1 + $0x1c68] ss:$16 sps:$4 sm:$0xff]  }
 0x358   :  { %7246 = vmatprep.subr.bf16.mxu0 %v11207_v1  ;;  %8094 = vmatprep.subr.bf16.mxu1 %v11210_v2  ;;  %v11291_v1 = vld [vmem:[%s15093_s1 + $0x1c84] ss:$16 sps:$4 sm:$0xff]   ;;  %v11294_v2 = vld [vmem:[%s15093_s1 + $0x1c8c] ss:$16 sps:$4 sm:$0xff]  }
 0x35b   :  { %7247 = vmatpush1.bf16.msra.mxu0 %v11205_v5  ;;  %8095 = vmatpush1.bf16.msra.mxu1 %v11208_v6  ;;  %v11289_v5 = vld [vmem:[%s15093_s1 + $0x1c80] ss:$16 sps:$4 sm:$0xff]   ;;  %v11292_v6 = vld [vmem:[%s15093_s1 + $0x1c88] ss:$16 sps:$4 sm:$0xff]  }
 0x35c   :  { %7248 = vmatprep.subr.bf16.mxu0 %v11213_v7  ;;  %8096 = vmatprep.subr.bf16.mxu1 %v11216_v8  ;;  %v11297_v7 = vld [vmem:[%s15093_s1 + $0x1ca4] ss:$16 sps:$4 sm:$0xff]   ;;  %v11300_v8 = vld [vmem:[%s15093_s1 + $0x1cac] ss:$16 sps:$4 sm:$0xff]  }
 0x35f   :  { %7249 = vmatpush1.bf16.msra.mxu0 %v11211_v11  ;;  %8097 = vmatpush1.bf16.msra.mxu1 %v11214_v12  ;;  %v11295_v11 = vld [vmem:[%s15093_s1 + $0x1ca0] ss:$16 sps:$4 sm:$0xff]   ;;  %v11298_v12 = vld [vmem:[%s15093_s1 + $0x1ca8] ss:$16 sps:$4 sm:$0xff]  }
 0x360   :  { %7250 = vmatprep.subr.bf16.mxu0 %v11219_v9  ;;  %8098 = vmatprep.subr.bf16.mxu1 %v11222_v10  ;;  %v11303_v9 = vld [vmem:[%s15093_s1 + $0x1cc4] ss:$16 sps:$4 sm:$0xff]   ;;  %v11306_v10 = vld [vmem:[%s15093_s1 + $0x1ccc] ss:$16 sps:$4 sm:$0xff]  }
 0x363   :  { %7251 = vmatpush1.bf16.msra.mxu0 %v11217_v13  ;;  %8099 = vmatpush1.bf16.msra.mxu1 %v11220_v14  ;;  %v11301_v13 = vld [vmem:[%s15093_s1 + $0x1cc0] ss:$16 sps:$4 sm:$0xff]   ;;  %v11304_v14 = vld [vmem:[%s15093_s1 + $0x1cc8] ss:$16 sps:$4 sm:$0xff]  }
 0x364   :  { %7252 = vmatprep.subr.bf16.mxu0 %v11225_v15  ;;  %8100 = vmatprep.subr.bf16.mxu1 %v11228_v16  ;;  %v11309_v15 = vld [vmem:[%s15093_s1 + $0x1ce4] ss:$16 sps:$4 sm:$0xff]   ;;  %v11312_v16 = vld [vmem:[%s15093_s1 + $0x1cec] ss:$16 sps:$4 sm:$0xff]  }
 0x367   :  { %7253 = vmatpush1.bf16.msra.mxu0 %v11223_v19  ;;  %8101 = vmatpush1.bf16.msra.mxu1 %v11226_v17  ;;  %v11307_v19 = vld [vmem:[%s15093_s1 + $0x1ce0] ss:$16 sps:$4 sm:$0xff]   ;;  %v11310_v17 = vld [vmem:[%s15093_s1 + $0x1ce8] ss:$16 sps:$4 sm:$0xff]  }
 0x368   :  { %7254 = vmatprep.subr.bf16.mxu0 %v11231_v18  ;;  %8102 = vmatprep.subr.bf16.mxu1 %v11234_v20  ;;  %v11315_v18 = vld [vmem:[%s15093_s1 + $0x1d04] ss:$16 sps:$4 sm:$0xff]   ;;  %v11318_v20 = vld [vmem:[%s15093_s1 + $0x1d0c] ss:$16 sps:$4 sm:$0xff]  }
 0x36b   :  { %7255 = vmatpush1.bf16.msra.mxu0 %v11229_v21  ;;  %8103 = vmatpush1.bf16.msra.mxu1 %v11232_v22  ;;  %v11313_v21 = vld [vmem:[%s15093_s1 + $0x1d00] ss:$16 sps:$4 sm:$0xff]   ;;  %v11316_v22 = vld [vmem:[%s15093_s1 + $0x1d08] ss:$16 sps:$4 sm:$0xff]  }
 0x36c   :  { %7256 = vmatprep.subr.bf16.mxu0 %v11237_v23  ;;  %8104 = vmatprep.subr.bf16.mxu1 %v11240_v24  ;;  %v11321_v23 = vld [vmem:[%s15093_s1 + $0x1d24] ss:$16 sps:$4 sm:$0xff]   ;;  %v11324_v24 = vld [vmem:[%s15093_s1 + $0x1d2c] ss:$16 sps:$4 sm:$0xff]  }
 0x36f   :  { %7257 = vmatpush1.bf16.msra.mxu0 %v11235_v26  ;;  %8105 = vmatpush1.bf16.msra.mxu1 %v11238_v25  ;;  %v11319_v26 = vld [vmem:[%s15093_s1 + $0x1d20] ss:$16 sps:$4 sm:$0xff]   ;;  %v11322_v25 = vld [vmem:[%s15093_s1 + $0x1d28] ss:$16 sps:$4 sm:$0xff]  }
 0x370   :  { %7258 = vmatprep.subr.bf16.mxu0 %v11243_v27  ;;  %8106 = vmatprep.subr.bf16.mxu1 %v11246_v28  ;;  %v11327_v27 = vld [vmem:[%s15093_s1 + $0x1d44] ss:$16 sps:$4 sm:$0xff]   ;;  %v11330_v28 = vld [vmem:[%s15093_s1 + $0x1d4c] ss:$16 sps:$4 sm:$0xff]  }
 0x373   :  { %7259 = vmatpush1.bf16.msra.mxu0 %v11241_v29  ;;  %8107 = vmatpush1.bf16.msra.mxu1 %v11244_v30  ;;  %v11325_v29 = vld [vmem:[%s15093_s1 + $0x1d40] ss:$16 sps:$4 sm:$0xff]   ;;  %v11328_v30 = vld [vmem:[%s15093_s1 + $0x1d48] ss:$16 sps:$4 sm:$0xff]  }
 0x374   :  { %7260 = vmatprep.subr.bf16.mxu0 %v11249_v31  ;;  %8108 = vmatprep.subr.bf16.mxu1 %v11252_v32  ;;  %v11333_v31 = vld [vmem:[%s15093_s1 + $0x1d64] ss:$16 sps:$4 sm:$0xff]   ;;  %v11336_v32 = vld [vmem:[%s15093_s1 + $0x1d6c] ss:$16 sps:$4 sm:$0xff]  }
 0x377   :  { %7261 = vmatpush1.bf16.msra.mxu0 %v11247_v34  ;;  %8109 = vmatpush1.bf16.msra.mxu1 %v11250_v36  ;;  %v11331_v34 = vld [vmem:[%s15093_s1 + $0x1d60] ss:$16 sps:$4 sm:$0xff]   ;;  %v11334_v36 = vld [vmem:[%s15093_s1 + $0x1d68] ss:$16 sps:$4 sm:$0xff]  }
 0x378   :  { %7262 = vmatprep.subr.bf16.mxu0 %v11255_v33  ;;  %8110 = vmatprep.subr.bf16.mxu1 %v11258_v35  ;;  %v11339_v33 = vld [vmem:[%s15093_s1 + $0x1d84] ss:$16 sps:$4 sm:$0xff]   ;;  %v11342_v35 = vld [vmem:[%s15093_s1 + $0x1d8c] ss:$16 sps:$4 sm:$0xff]  }
 0x37b   :  { %7263 = vmatpush1.bf16.msra.mxu0 %v11253_v37  ;;  %8111 = vmatpush1.bf16.msra.mxu1 %v11256_v38  ;;  %v11337_v37 = vld [vmem:[%s15093_s1 + $0x1d80] ss:$16 sps:$4 sm:$0xff]   ;;  %v11340_v38 = vld [vmem:[%s15093_s1 + $0x1d88] ss:$16 sps:$4 sm:$0xff]  }
 0x37c   :  { %7264 = vmatprep.subr.bf16.mxu0 %v11261_v39  ;;  %8112 = vmatprep.subr.bf16.mxu1 %v11264_v40  ;;  %v11345_v39 = vld [vmem:[%s15093_s1 + $0x1da4] ss:$16 sps:$4 sm:$0xff]   ;;  %v11348_v40 = vld [vmem:[%s15093_s1 + $0x1dac] ss:$16 sps:$4 sm:$0xff]  }
 0x37f   :  { %7265 = vmatpush1.bf16.msra.mxu0 %v11259_v42  ;;  %8113 = vmatpush1.bf16.msra.mxu1 %v11262_v44  ;;  %v11343_v42 = vld [vmem:[%s15093_s1 + $0x1da0] ss:$16 sps:$4 sm:$0xff]   ;;  %v11346_v44 = vld [vmem:[%s15093_s1 + $0x1da8] ss:$16 sps:$4 sm:$0xff]  }
 0x380   :  { %7287 = vmatprep.subr.bf16.mxu0 %v11267_v41  ;;  %8135 = vmatprep.subr.bf16.mxu1 %v11270_v43  ;;  %v11351_v41 = vld [vmem:[%s15093_s1 + $0x1dc4] ss:$16 sps:$4 sm:$0xff]   ;;  %v11354_v43 = vld [vmem:[%s15093_s1 + $0x1dcc] ss:$16 sps:$4 sm:$0xff]  }
 0x382   :  { %7267 = vmatmul.mubr.bf16.vlgmr.msra.gmra.mrb[0].mxu0 %v8603_v45  ;;  %8115 = vmatmul.mubr.bf16.vlgmr.msra.gmra.mrb[0].mxu1 %v8603_v45  ;;  %v11349_v45 = vld [vmem:[%s15093_s1 + $0x1dc0] ss:$16 sps:$4 sm:$0xff]  }
 0x383   :  { %7288 = vmatpush1.bf16.msra.mxu0 %v11265_v48  ;;  %8136 = vmatpush1.bf16.msra.mxu1 %v11268_v51  ;;  %v11360_v48 = vld [vmem:[%s15093_s1 + $0x1dec] ss:$16 sps:$4 sm:$0xff]   ;;  %v11355_v51 = vld [vmem:[%s15093_s1 + $0x1de0] ss:$16 sps:$4 sm:$0xff]  }
 0x384   :  { %7289 = vmatprep.subr.bf16.mxu0 %v11273_v52  ;;  %8137 = vmatprep.subr.bf16.mxu1 %v11276_v49  ;;  %v11358_v52 = vld [vmem:[%s15093_s1 + $0x1de8] ss:$16 sps:$4 sm:$0xff]   ;;  %v11363_v49 = vld [vmem:[%s15093_s1 + $0x1e04] ss:$16 sps:$4 sm:$0xff]  }
 0x385   :  { %7276 = vmatprep.mubr.bf16.mxu0 %v8636_v50  ;;  %8124 = vmatprep.mubr.bf16.mxu1 %v8636_v50  ;;  %v11366_v50 = vld [vmem:[%s15093_s1 + $0x1e0c] ss:$16 sps:$4 sm:$0xff]  }
 0x387   :  { %7290 = vmatpush1.bf16.msra.mxu0 %v11271_v53  ;;  %8138 = vmatpush1.bf16.msra.mxu1 %v11274_v54  ;;  %v8605_v53 = vcombine.low %v14483_v60, %v14488_v57  ;;  %v63_v54 = vld [vmem:[%s15094_s0 + $0x170] sm:$0xff]  ;;  %v11372_v57 = vld [vmem:[%s15093_s1 + $0x1e2c] ss:$16 sps:$4 sm:$0xff]  }
 0x388   :  { %7291 = vmatprep.subr.bf16.mxu0 %v11279_v55  ;;  %8139 = vmatprep.subr.bf16.mxu1 %v11282_v56  ;;  %v79_v55 = vld [vmem:[%s15094_s0 + $0x1f0] sm:$0xff] }
 0x389   :  { %v11361_v56 = vld [vmem:[%s15093_s1 + $0x1e00] ss:$16 sps:$4 sm:$0xff]   ;;  %v11369_v60 = vld [vmem:[%s15093_s1 + $0x1e24] ss:$16 sps:$4 sm:$0xff]  }
 0x38a   :  { %7277 = vmatmul.mubr.bf16.gmra.mrb[4].mxu0 %v8635_v59  ;;  %8125 = vmatmul.mubr.bf16.gmra.mrb[4].mxu1 %v8635_v59  ;;  %v11364_v59 = vld [vmem:[%s15093_s1 + $0x1e08] ss:$16 sps:$4 sm:$0xff]  }
 0x38b   :  { %7292 = vmatpush1.bf16.msra.mxu0 %v11277_v58  ;;  %8140 = vmatpush1.bf16.msra.mxu1 %v11280_v61  ;;  %v8638_v58 = vcombine.high %v63_v54, %v79_v55  ;;  %v11367_v61 = vld [vmem:[%s15093_s1 + $0x1e20] ss:$16 sps:$4 sm:$0xff]  }
 0x38c   :  { %7293 = vmatprep.subr.bf16.mxu0 %v11285_v62  ;;  %8141 = vmatprep.subr.bf16.mxu1 %v11288_v63  ;;  %v11370_v62 = vld [vmem:[%s15093_s1 + $0x1e28] ss:$16 sps:$4 sm:$0xff]   ;;  %v11375_v63 = vld [vmem:[%s15093_s1 + $0x1e44] ss:$16 sps:$4 sm:$0xff]  }
 0x38d   :  { %7319 = vmatprep.mubr.bf16.mxu0 %v8606_v0  ;;  %8167 = vmatprep.mubr.bf16.mxu1 %v8606_v0  ;;  %v11378_v0 = vld [vmem:[%s15093_s1 + $0x1e4c] ss:$16 sps:$4 sm:$0xff]  }
 0x38f   :  { %7294 = vmatpush1.bf16.msra.mxu0 %v11283_v3  ;;  %8142 = vmatpush1.bf16.msra.mxu1 %v11286_v4  ;;  %v8637_v3 = vcombine.low %v63_v54, %v79_v55  ;;  %v14695_v4 = vld [vmem:[%s15094_s0 + $0x78] sm:$0xff]  ;;  %v11453_v55 = vld [vmem:[%s15093_s1 + $0x1fe4] ss:$16 sps:$4 sm:$0xff]  }
 0x390   :  { %7295 = vmatprep.subr.bf16.mxu0 %v11291_v1  ;;  %8143 = vmatprep.subr.bf16.mxu1 %v11294_v2  ;;  %v14700_v1 = vld [vmem:[%s15094_s0 + $0xf8] sm:$0xff]  ;;  %v11373_v2 = vld [vmem:[%s15093_s1 + $0x1e40] ss:$16 sps:$4 sm:$0xff]  }
 0x391   :  { %v11448_v54 = vld [vmem:[%s15093_s1 + $0x1fc8] ss:$16 sps:$4 sm:$0xff]  }
 0x393   :  { %7296 = vmatpush1.bf16.msra.mxu0 %v11289_v5  ;;  %8144 = vmatpush1.bf16.msra.mxu1 %v11292_v6  ;;  %v11376_v5 = vld [vmem:[%s15093_s1 + $0x1e48] ss:$16 sps:$4 sm:$0xff]   ;;  %v11381_v6 = vld [vmem:[%s15093_s1 + $0x1e64] ss:$16 sps:$4 sm:$0xff]  }
 0x394   :  { %7297 = vmatprep.subr.bf16.mxu0 %v11297_v7  ;;  %8145 = vmatprep.subr.bf16.mxu1 %v11300_v8  ;;  %v11384_v7 = vld [vmem:[%s15093_s1 + $0x1e6c] ss:$16 sps:$4 sm:$0xff]   ;;  %v8608_v8 = vcombine.high %v14695_v4, %v14700_v1 }
 0x397   :  { %7298 = vmatpush1.bf16.msra.mxu0 %v11295_v11  ;;  %8146 = vmatpush1.bf16.msra.mxu1 %v11298_v12  ;;  %v11379_v11 = vld [vmem:[%s15093_s1 + $0x1e60] ss:$16 sps:$4 sm:$0xff]   ;;  %v11382_v12 = vld [vmem:[%s15093_s1 + $0x1e68] ss:$16 sps:$4 sm:$0xff]  }
 0x398   :  { %7299 = vmatprep.subr.bf16.mxu0 %v11303_v9  ;;  %8147 = vmatprep.subr.bf16.mxu1 %v11306_v10  ;;  %v11387_v9 = vld [vmem:[%s15093_s1 + $0x1e84] ss:$16 sps:$4 sm:$0xff]   ;;  %v11390_v10 = vld [vmem:[%s15093_s1 + $0x1e8c] ss:$16 sps:$4 sm:$0xff]  }
 0x39b   :  { %7300 = vmatpush1.bf16.msra.mxu0 %v11301_v13  ;;  %8148 = vmatpush1.bf16.msra.mxu1 %v11304_v14  ;;  %v11385_v13 = vld [vmem:[%s15093_s1 + $0x1e80] ss:$16 sps:$4 sm:$0xff]   ;;  %v11388_v14 = vld [vmem:[%s15093_s1 + $0x1e88] ss:$16 sps:$4 sm:$0xff]  }
 0x39c   :  { %7301 = vmatprep.subr.bf16.mxu0 %v11309_v15  ;;  %8149 = vmatprep.subr.bf16.mxu1 %v11312_v16  ;;  %v11393_v15 = vld [vmem:[%s15093_s1 + $0x1ea4] ss:$16 sps:$4 sm:$0xff]   ;;  %v11396_v16 = vld [vmem:[%s15093_s1 + $0x1eac] ss:$16 sps:$4 sm:$0xff]  }
 0x39f   :  { %7302 = vmatpush1.bf16.msra.mxu0 %v11307_v19  ;;  %8150 = vmatpush1.bf16.msra.mxu1 %v11310_v17  ;;  %v11391_v19 = vld [vmem:[%s15093_s1 + $0x1ea0] ss:$16 sps:$4 sm:$0xff]   ;;  %v11394_v17 = vld [vmem:[%s15093_s1 + $0x1ea8] ss:$16 sps:$4 sm:$0xff]  }
 0x3a0   :  { %7303 = vmatprep.subr.bf16.mxu0 %v11315_v18  ;;  %8151 = vmatprep.subr.bf16.mxu1 %v11318_v20  ;;  %v11399_v18 = vld [vmem:[%s15093_s1 + $0x1ec4] ss:$16 sps:$4 sm:$0xff]   ;;  %v11402_v20 = vld [vmem:[%s15093_s1 + $0x1ecc] ss:$16 sps:$4 sm:$0xff]  }
 0x3a3   :  { %7304 = vmatpush1.bf16.msra.mxu0 %v11313_v21  ;;  %8152 = vmatpush1.bf16.msra.mxu1 %v11316_v22  ;;  %v11397_v21 = vld [vmem:[%s15093_s1 + $0x1ec0] ss:$16 sps:$4 sm:$0xff]   ;;  %v11400_v22 = vld [vmem:[%s15093_s1 + $0x1ec8] ss:$16 sps:$4 sm:$0xff]  }
 0x3a4   :  { %7305 = vmatprep.subr.bf16.mxu0 %v11321_v23  ;;  %8153 = vmatprep.subr.bf16.mxu1 %v11324_v24  ;;  %v11405_v23 = vld [vmem:[%s15093_s1 + $0x1ee4] ss:$16 sps:$4 sm:$0xff]   ;;  %v11408_v24 = vld [vmem:[%s15093_s1 + $0x1eec] ss:$16 sps:$4 sm:$0xff]  }
 0x3a7   :  { %7306 = vmatpush1.bf16.msra.mxu0 %v11319_v26  ;;  %8154 = vmatpush1.bf16.msra.mxu1 %v11322_v25  ;;  %v11403_v26 = vld [vmem:[%s15093_s1 + $0x1ee0] ss:$16 sps:$4 sm:$0xff]   ;;  %v11406_v25 = vld [vmem:[%s15093_s1 + $0x1ee8] ss:$16 sps:$4 sm:$0xff]  }
 0x3a8   :  { %7307 = vmatprep.subr.bf16.mxu0 %v11327_v27  ;;  %8155 = vmatprep.subr.bf16.mxu1 %v11330_v28  ;;  %v11411_v27 = vld [vmem:[%s15093_s1 + $0x1f04] ss:$16 sps:$4 sm:$0xff]   ;;  %v11414_v28 = vld [vmem:[%s15093_s1 + $0x1f0c] ss:$16 sps:$4 sm:$0xff]  }
 0x3ab   :  { %7308 = vmatpush1.bf16.msra.mxu0 %v11325_v29  ;;  %8156 = vmatpush1.bf16.msra.mxu1 %v11328_v30  ;;  %v11409_v29 = vld [vmem:[%s15093_s1 + $0x1f00] ss:$16 sps:$4 sm:$0xff]   ;;  %v11412_v30 = vld [vmem:[%s15093_s1 + $0x1f08] ss:$16 sps:$4 sm:$0xff]  }
 0x3ac   :  { %7309 = vmatprep.subr.bf16.mxu0 %v11333_v31  ;;  %8157 = vmatprep.subr.bf16.mxu1 %v11336_v32  ;;  %v11417_v31 = vld [vmem:[%s15093_s1 + $0x1f24] ss:$16 sps:$4 sm:$0xff]   ;;  %v11420_v32 = vld [vmem:[%s15093_s1 + $0x1f2c] ss:$16 sps:$4 sm:$0xff]  }
 0x3af   :  { %7310 = vmatpush1.bf16.msra.mxu0 %v11331_v34  ;;  %8158 = vmatpush1.bf16.msra.mxu1 %v11334_v36  ;;  %v11415_v34 = vld [vmem:[%s15093_s1 + $0x1f20] ss:$16 sps:$4 sm:$0xff]   ;;  %v11418_v36 = vld [vmem:[%s15093_s1 + $0x1f28] ss:$16 sps:$4 sm:$0xff]  }
 0x3b0   :  { %7311 = vmatprep.subr.bf16.mxu0 %v11339_v33  ;;  %8159 = vmatprep.subr.bf16.mxu1 %v11342_v35  ;;  %v11423_v33 = vld [vmem:[%s15093_s1 + $0x1f44] ss:$16 sps:$4 sm:$0xff]   ;;  %v11426_v35 = vld [vmem:[%s15093_s1 + $0x1f4c] ss:$16 sps:$4 sm:$0xff]  }
 0x3b3   :  { %7312 = vmatpush1.bf16.msra.mxu0 %v11337_v37  ;;  %8160 = vmatpush1.bf16.msra.mxu1 %v11340_v38  ;;  %v11421_v37 = vld [vmem:[%s15093_s1 + $0x1f40] ss:$16 sps:$4 sm:$0xff]   ;;  %v11424_v38 = vld [vmem:[%s15093_s1 + $0x1f48] ss:$16 sps:$4 sm:$0xff]  }
 0x3b4   :  { %7313 = vmatprep.subr.bf16.mxu0 %v11345_v39  ;;  %8161 = vmatprep.subr.bf16.mxu1 %v11348_v40  ;;  %v11429_v39 = vld [vmem:[%s15093_s1 + $0x1f64] ss:$16 sps:$4 sm:$0xff]   ;;  %v11432_v40 = vld [vmem:[%s15093_s1 + $0x1f6c] ss:$16 sps:$4 sm:$0xff]  }
 0x3b7   :  { %7314 = vmatpush1.bf16.msra.mxu0 %v11343_v42  ;;  %8162 = vmatpush1.bf16.msra.mxu1 %v11346_v44  ;;  %v11427_v42 = vld [vmem:[%s15093_s1 + $0x1f60] ss:$16 sps:$4 sm:$0xff]   ;;  %v11430_v44 = vld [vmem:[%s15093_s1 + $0x1f68] ss:$16 sps:$4 sm:$0xff]  }
 0x3b8   :  { %7315 = vmatprep.subr.bf16.mxu0 %v11351_v41  ;;  %8163 = vmatprep.subr.bf16.mxu1 %v11354_v43  ;;  %v11435_v41 = vld [vmem:[%s15093_s1 + $0x1f84] ss:$16 sps:$4 sm:$0xff]   ;;  %v11438_v43 = vld [vmem:[%s15093_s1 + $0x1f8c] ss:$16 sps:$4 sm:$0xff]  }
 0x3bb   :  { %7316 = vmatpush1.bf16.msra.mxu0 %v11349_v45  ;;  %8164 = vmatpush1.bf16.msra.mxu1 %v11352_v46  ;;  %v11433_v45 = vld [vmem:[%s15093_s1 + $0x1f80] ss:$16 sps:$4 sm:$0xff]   ;;  %v11436_v46 = vld [vmem:[%s15093_s1 + $0x1f88] ss:$16 sps:$4 sm:$0xff]  }
 0x3bc   :  { %7317 = vmatprep.subr.bf16.mxu0 %v11357_v47  ;;  %8165 = vmatprep.subr.bf16.mxu1 %v11360_v48  ;;  %v11441_v47 = vld [vmem:[%s15093_s1 + $0x1fa4] ss:$16 sps:$4 sm:$0xff]   ;;  %v11444_v48 = vld [vmem:[%s15093_s1 + $0x1fac] ss:$16 sps:$4 sm:$0xff]  }
 0x3bf   :  { %7318 = vmatpush1.bf16.msra.mxu0 %v11355_v51  ;;  %8166 = vmatpush1.bf16.msra.mxu1 %v11358_v52  ;;  %v11439_v51 = vld [vmem:[%s15093_s1 + $0x1fa0] ss:$16 sps:$4 sm:$0xff]   ;;  %v11442_v52 = vld [vmem:[%s15093_s1 + $0x1fa8] ss:$16 sps:$4 sm:$0xff]  }
 0x3c0   :  { %7340 = vmatprep.subr.bf16.mxu0 %v11363_v49  ;;  %8188 = vmatprep.subr.bf16.mxu1 %v11366_v50  ;;  %v11447_v49 = vld [vmem:[%s15093_s1 + $0x1fc4] ss:$16 sps:$4 sm:$0xff]   ;;  %v11450_v50 = vld [vmem:[%s15093_s1 + $0x1fcc] ss:$16 sps:$4 sm:$0xff]  }
 0x3c2   :  { %7320 = vmatmul.mubr.bf16.vlgmr.msra.gmra.mrb[0].mxu0 %v8605_v53  ;;  %8168 = vmatmul.mubr.bf16.vlgmr.msra.gmra.mrb[0].mxu1 %v8605_v53  ;;  %v11445_v53 = vld [vmem:[%s15093_s1 + $0x1fc0] ss:$16 sps:$4 sm:$0xff]  }
 0x3c3   :  { %7341 = vmatpush1.bf16.msra.mxu0 %v11361_v56  ;;  %8189 = vmatpush1.bf16.msra.mxu1 %v11364_v59  ;;  %v11456_v56 = vld [vmem:[%s15093_s1 + $0x1fec] ss:$16 sps:$4 sm:$0xff]   ;;  %v11451_v59 = vld [vmem:[%s15093_s1 + $0x1fe0] ss:$16 sps:$4 sm:$0xff]  }
 0x3c4   :  { %7342 = vmatprep.subr.bf16.mxu0 %v11369_v60  ;;  %8190 = vmatprep.subr.bf16.mxu1 %v11372_v57  ;;  %v11454_v60 = vld [vmem:[%s15093_s1 + $0x1fe8] ss:$16 sps:$4 sm:$0xff]  }
 0x3c5   :  { %7329 = vmatprep.mubr.bf16.mxu0 %v8638_v58  ;;  %8177 = vmatprep.mubr.bf16.mxu1 %v8638_v58  ;;  %v64_v57 = vld [vmem:[%s15094_s0 + $0x178] sm:$0xff] }
 0x3c6   :  { %v80_v58 = vld [vmem:[%s15094_s0 + $0x1f8] sm:$0xff] }
 0x3c7   :  { %7343 = vmatpush1.bf16.msra.mxu0 %v11367_v61  ;;  %8191 = vmatpush1.bf16.msra.mxu1 %v11370_v62  ;;  %v8607_v61 = vcombine.low %v14695_v4, %v14700_v1  ;;  %v8640_v62 = vcombine.high %v64_v57, %v80_v58 }
 0x3c8   :  { %7344 = vmatprep.subr.bf16.mxu0 %v11375_v63  ;;  %8192 = vmatprep.subr.bf16.mxu1 %v11378_v0  ;;  %v8639_v63 = vcombine.low %v64_v57, %v80_v58 }
 0x3ca   :  { %7330 = vmatmul.mubr.bf16.gmra.mrb[4].mxu0 %v8637_v3  ;;  %8178 = vmatmul.mubr.bf16.gmra.mrb[4].mxu1 %v8637_v3 }
 0x3cb   :  { %7345 = vmatpush1.bf16.msra.mxu0 %v11373_v2  ;;  %8193 = vmatpush1.bf16.msra.mxu1 %v11376_v5 }
 0x3cc   :  { %7346 = vmatprep.subr.bf16.mxu0 %v11381_v6  ;;  %8194 = vmatprep.subr.bf16.mxu1 %v11384_v7 }
 0x3cd   :  { %7372 = vmatprep.mubr.bf16.mxu0 %v8608_v8  ;;  %8220 = vmatprep.mubr.bf16.mxu1 %v8608_v8 }
 0x3cf   :  { %7347 = vmatpush1.bf16.msra.mxu0 %v11379_v11  ;;  %8195 = vmatpush1.bf16.msra.mxu1 %v11382_v12 }
 0x3d0   :  { %7348 = vmatprep.subr.bf16.mxu0 %v11387_v9  ;;  %8196 = vmatprep.subr.bf16.mxu1 %v11390_v10 }
 0x3d3   :  { %7349 = vmatpush1.bf16.msra.mxu0 %v11385_v13  ;;  %8197 = vmatpush1.bf16.msra.mxu1 %v11388_v14 }
 0x3d4   :  { %7350 = vmatprep.subr.bf16.mxu0 %v11393_v15  ;;  %8198 = vmatprep.subr.bf16.mxu1 %v11396_v16 }
 0x3d7   :  { %7351 = vmatpush1.bf16.msra.mxu0 %v11391_v19  ;;  %8199 = vmatpush1.bf16.msra.mxu1 %v11394_v17 }
 0x3d8   :  { %7352 = vmatprep.subr.bf16.mxu0 %v11399_v18  ;;  %8200 = vmatprep.subr.bf16.mxu1 %v11402_v20 }
 0x3db   :  { %7353 = vmatpush1.bf16.msra.mxu0 %v11397_v21  ;;  %8201 = vmatpush1.bf16.msra.mxu1 %v11400_v22 }
 0x3dc   :  { %7354 = vmatprep.subr.bf16.mxu0 %v11405_v23  ;;  %8202 = vmatprep.subr.bf16.mxu1 %v11408_v24 }
 0x3df   :  { %7355 = vmatpush1.bf16.msra.mxu0 %v11403_v26  ;;  %8203 = vmatpush1.bf16.msra.mxu1 %v11406_v25  ;;  %v8359_v25 = vlaneseq }
 0x3e0   :  { %7356 = vmatprep.subr.bf16.mxu0 %v11411_v27  ;;  %8204 = vmatprep.subr.bf16.mxu1 %v11414_v28 }
 0x3e3   :  { %7357 = vmatpush1.bf16.msra.mxu0 %v11409_v29  ;;  %8205 = vmatpush1.bf16.msra.mxu1 %v11412_v30 }
 0x3e4   :  { %7358 = vmatprep.subr.bf16.mxu0 %v11417_v31  ;;  %8206 = vmatprep.subr.bf16.mxu1 %v11420_v32 }
 0x3e7   :  { %7359 = vmatpush1.bf16.msra.mxu0 %v11415_v34  ;;  %8207 = vmatpush1.bf16.msra.mxu1 %v11418_v36 }
 0x3e8   :  { %7360 = vmatprep.subr.bf16.mxu0 %v11423_v33  ;;  %8208 = vmatprep.subr.bf16.mxu1 %v11426_v35 }
 0x3eb   :  { %7361 = vmatpush1.bf16.msra.mxu0 %v11421_v37  ;;  %8209 = vmatpush1.bf16.msra.mxu1 %v11424_v38 }
 0x3ec   :  { %7362 = vmatprep.subr.bf16.mxu0 %v11429_v39  ;;  %8210 = vmatprep.subr.bf16.mxu1 %v11432_v40 }
 0x3ef   :  { %7363 = vmatpush1.bf16.msra.mxu0 %v11427_v42  ;;  %8211 = vmatpush1.bf16.msra.mxu1 %v11430_v44 }
 0x3f0   :  { %7364 = vmatprep.subr.bf16.mxu0 %v11435_v41  ;;  %8212 = vmatprep.subr.bf16.mxu1 %v11438_v43 }
 0x3f3   :  { %7365 = vmatpush1.bf16.msra.mxu0 %v11433_v45  ;;  %8213 = vmatpush1.bf16.msra.mxu1 %v11436_v46 }
 0x3f4   :  { %7366 = vmatprep.subr.bf16.mxu0 %v11441_v47  ;;  %8214 = vmatprep.subr.bf16.mxu1 %v11444_v48 }
 0x3f7   :  { %7367 = vmatpush1.bf16.msra.mxu0 %v11439_v51  ;;  %8215 = vmatpush1.bf16.msra.mxu1 %v11442_v52 }
 0x3f8   :  { %7368 = vmatprep.subr.bf16.mxu0 %v11447_v49  ;;  %8216 = vmatprep.subr.bf16.mxu1 %v11450_v50 }
 0x3fb   :  { %7369 = vmatpush1.bf16.msra.mxu0 %v11445_v53  ;;  %8217 = vmatpush1.bf16.msra.mxu1 %v11448_v54 }
 0x3fc   :  { %7370 = vmatprep.subr.bf16.mxu0 %v11453_v55  ;;  %8218 = vmatprep.subr.bf16.mxu1 %v11456_v56 }
 0x3ff   :  { %7371 = vmatpush1.bf16.msra.mxu0 %v11451_v59  ;;  %8219 = vmatpush1.bf16.msra.mxu1 %v11454_v60 }
 0x402   :  { %7373 = vmatmul.mubr.bf16.vlgmr.msra.gmra.mrb[0].mxu0 %v8607_v61  ;;  %8221 = vmatmul.mubr.bf16.vlgmr.msra.gmra.mrb[0].mxu1 %v8607_v61 }
 0x403   :  { %7382 = vmatprep.mubr.bf16.mxu0 %v8640_v62  ;;  %8230 = vmatprep.mubr.bf16.mxu1 %v8640_v62 }
 0x40a   :  { %7383 = vmatmul.mubr.bf16.gmra.mrb[4].mxu0 %v8639_v63  ;;  %8231 = vmatmul.mubr.bf16.gmra.mrb[4].mxu1 %v8639_v63 }
 0x4d5   :  { %v14874_v0 = vpop.f32.mrb[0].mxu0  ;;  %v14876_v3 = vpop.f32.mrb[0].mxu1 }
 0x4d6   :  { %v14878_v2 = vpop.f32.mrb[1].mxu0  ;;  %v14880_v5 = vpop.f32.mrb[1].mxu1  ;;  %v8277_v4 = vmul.f32 %v14874_v0, %v14874_v0  ;;  %v8279_v1 = vmul.f32 %v14876_v3, %v14876_v3 }
 0x4d7   :  { %v8278_v6 = vmul.f32 %v14878_v2, %v14878_v2  ;;  %v8280_v7 = vmul.f32 %v14880_v5, %v14880_v5  ;;  %v14890_v8 = vpop.f32.mrb[2].mxu0  ;;  %v14892_v11 = vpop.f32.mrb[2].mxu1 }
 0x4d8   :  { %v8241_v12 = vadd.f32 %v14890_v8, %v14874_v0  ;;  %v8281_v9 = vmul.f32 %v14890_v8, %v14890_v8  ;;  %v8259_v10 = vadd.f32 %v14892_v11, %v14876_v3  ;;  %v8283_v13 = vmul.f32 %v14892_v11, %v14892_v11  ;;  %v14902_v14 = vpop.f32.mrb[3].mxu0  ;;  %v14904_v15 = vpop.f32.mrb[3].mxu1 }
 0x4d9   :  { %v8250_v16 = vadd.f32 %v14902_v14, %v14878_v2  ;;  %v8282_v19 = vmul.f32 %v14902_v14, %v14902_v14  ;;  %v8268_v17 = vadd.f32 %v14904_v15, %v14880_v5  ;;  %v8284_v18 = vmul.f32 %v14904_v15, %v14904_v15 }
 0x4da   :  { %v8293_v20 = vadd.f32 %v8281_v9, %v8277_v4  ;;  %v8311_v21 = vadd.f32 %v8283_v13, %v8279_v1 }
 0x4db   :  { %v8302_v22 = vadd.f32 %v8282_v19, %v8278_v6  ;;  %v8320_v23 = vadd.f32 %v8284_v18, %v8280_v7 }
 0x4dd   :  { %v14914_v24 = vpop.f32.mrb[4].mxu0  ;;  %v14916_v26 = vpop.f32.mrb[4].mxu1 }
 0x4de   :  { %v8242_v27 = vadd.f32 %v8241_v12, %v14914_v24  ;;  %v8285_v28 = vmul.f32 %v14914_v24, %v14914_v24  ;;  %v8260_v29 = vadd.f32 %v8259_v10, %v14916_v26  ;;  %v8287_v30 = vmul.f32 %v14916_v26, %v14916_v26  ;;  %v14924_v31 = vpop.f32.mrb[5].mxu0  ;;  %v14926_v32 = vpop.f32.mrb[5].mxu1 }
 0x4df   :  { %v8251_v34 = vadd.f32 %v8250_v16, %v14924_v31  ;;  %v8286_v36 = vmul.f32 %v14924_v31, %v14924_v31  ;;  %v8269_v33 = vadd.f32 %v8268_v17, %v14926_v32  ;;  %v8288_v35 = vmul.f32 %v14926_v32, %v14926_v32  ;;  %v14934_v37 = vpop.f32.mrb[6].mxu0  ;;  %v14936_v38 = vpop.f32.mrb[6].mxu1 }
 0x4e0   :  { %v8294_v39 = vadd.f32 %v8293_v20, %v8285_v28  ;;  %v8312_v40 = vadd.f32 %v8311_v21, %v8287_v30  ;;  %v8243_v42 = vadd.f32 %v8242_v27, %v14934_v37  ;;  %v8289_v44 = vmul.f32 %v14934_v37, %v14934_v37  ;;  %v14941_v41 = vpop.f32.mrb[7].mxu0  ;;  %v14943_v43 = vpop.f32.mrb[7].mxu1 }
 0x4e1   :  { %v8303_v45 = vadd.f32 %v8302_v22, %v8286_v36  ;;  %v8321_v46 = vadd.f32 %v8320_v23, %v8288_v35  ;;  %v8261_v47 = vadd.f32 %v8260_v29, %v14936_v38  ;;  %v8291_v48 = vmul.f32 %v14936_v38, %v14936_v38 }
 0x4e2   :  { %v8244_v51 = vrot.slane %v8243_v42, 4  ;;  %v8295_v52 = vadd.f32 %v8294_v39, %v8289_v44  ;;  %v8252_v49 = vadd.f32 %v8251_v34, %v14941_v41  ;;  %v8290_v50 = vmul.f32 %v14941_v41, %v14941_v41 }
 0x4e3   :  { %v8262_v53 = vrot.slane %v8261_v47, 4  ;;  %v8313_v54 = vadd.f32 %v8312_v40, %v8291_v48  ;;  %v8270_v55 = vadd.f32 %v8269_v33, %v14943_v43  ;;  %v8292_v56 = vmul.f32 %v14943_v43, %v14943_v43 }
 0x4e4   :  { %v8245_v59 = vadd.f32 %v8244_v51, %v8243_v42  ;;  %v8296_v60 = vrot.slane %v8295_v52, 4  ;;  %v8253_v57 = vrot.slane %v8252_v49, 4  ;;  %v8304_v58 = vadd.f32 %v8303_v45, %v8290_v50 }
 0x4e5   :  { %v8263_v61 = vadd.f32 %v8262_v53, %v8261_v47  ;;  %v8314_v62 = vrot.slane %v8313_v54, 4  ;;  %v8271_v63 = vrot.slane %v8270_v55, 4  ;;  %v8322_v4 = vadd.f32 %v8321_v46, %v8292_v56 }
 0x4e6   :  { %v8246_v1 = vrot.slane %v8245_v59, 2  ;;  %v8297_v6 = vadd.f32 %v8296_v60, %v8295_v52  ;;  %v8254_v7 = vadd.f32 %v8253_v57, %v8252_v49  ;;  %v8305_v12 = vrot.slane %v8304_v58, 4 }
 0x4e7   :  { %v8264_v9 = vrot.slane %v8263_v61, 2  ;;  %v8315_v10 = vadd.f32 %v8314_v62, %v8313_v54  ;;  %v8272_v13 = vadd.f32 %v8271_v63, %v8270_v55  ;;  %v8323_v16 = vrot.slane %v8322_v4, 4 }
 0x4e8   :  { %v8247_v19 = vadd.f32 %v8246_v1, %v8245_v59  ;;  %v8298_v17 = vrot.slane %v8297_v6, 2  ;;  %v8255_v18 = vrot.slane %v8254_v7, 2  ;;  %v8306_v20 = vadd.f32 %v8305_v12, %v8304_v58 }
 0x4e9   :  { %v8265_v21 = vadd.f32 %v8264_v9, %v8263_v61  ;;  %v8316_v22 = vrot.slane %v8315_v10, 2  ;;  %v8273_v23 = vrot.slane %v8272_v13, 2  ;;  %v8324_v27 = vadd.f32 %v8323_v16, %v8322_v4 }
 0x4ea   :  { %v8248_v28 = vrot.slane %v8247_v19, 1  ;;  %v8299_v29 = vadd.f32 %v8298_v17, %v8297_v6  ;;  %v8256_v30 = vadd.f32 %v8255_v18, %v8254_v7  ;;  %v8307_v34 = vrot.slane %v8306_v20, 2 }
 0x4eb   :  { %v8266_v36 = vrot.slane %v8265_v21, 1  ;;  %v8317_v33 = vadd.f32 %v8316_v22, %v8315_v10  ;;  %v8274_v35 = vadd.f32 %v8273_v23, %v8272_v13  ;;  %v8325_v39 = vrot.slane %v8324_v27, 2 }
 0x4ec   :  { %v8249_v40 = vadd.f32 %v8248_v28, %v8247_v19  ;;  %v8300_v42 = vrot.slane %v8299_v29, 1  ;;  %v8257_v44 = vrot.slane %v8256_v30, 1  ;;  %v8308_v45 = vadd.f32 %v8307_v34, %v8306_v20 }
 0x4ed   :  { %v8267_v46 = vadd.f32 %v8266_v36, %v8265_v21  ;;  %v8318_v47 = vrot.slane %v8317_v33, 1  ;;  %v8275_v48 = vrot.slane %v8274_v35, 1  ;;  %v8326_v51 = vadd.f32 %v8325_v39, %v8324_v27 }
 0x4ee   :  { %v8301_v52 = vadd.f32 %v8300_v42, %v8299_v29  ;;  %v14954_v49 = vmul.f32 0.03125, %v8249_v40  ;;  %v8258_v50 = vadd.f32 %v8257_v44, %v8256_v30  ;;  %v8309_v53 = vrot.slane %v8308_v45, 1  ;;  %v8357_v42 = vld [vmem:[%s15095_s2] sm:$0xf] }
 0x4ef   :  { %v8319_v54 = vadd.f32 %v8318_v47, %v8317_v33  ;;  %v14956_v55 = vmul.f32 0.03125, %v8267_v46  ;;  %v8276_v56 = vadd.f32 %v8275_v48, %v8274_v35  ;;  %v8327_v59 = vrot.slane %v8326_v51, 1 }
 0x4f0   :  { %v8333_v60 = vmul.f32 0.03125, %v8301_v52  ;;  %v8337_v57 = vmul.f32 %v14954_v49, %v14954_v49  ;;  %v8383_v58 = vsub.f32 %v14874_v0, %v14954_v49  ;;  %v8387_v61 = vsub.f32 %v14890_v8, %v14954_v49 }
 0x4f1   :  { %v8391_v62 = vsub.f32 %v14914_v24, %v14954_v49  ;;  %v8395_v63 = vsub.f32 %v14934_v37, %v14954_v49  ;;  %v8335_v4 = vmul.f32 0.03125, %v8319_v54  ;;  %v8339_v1 = vmul.f32 %v14956_v55, %v14956_v55 }
 0x4f2   :  { %v8341_v6 = vsub.f32 %v8333_v60, %v8337_v57  ;;  %v8385_v7 = vsub.f32 %v14876_v3, %v14956_v55  ;;  %v8389_v0 = vsub.f32 %v14892_v11, %v14956_v55  ;;  %v8393_v8 = vsub.f32 %v14916_v26, %v14956_v55 }
 0x4f3   :  { %v8343_v12 = vsub.f32 %v8335_v4, %v8339_v1  ;;  %v8397_v24 = vsub.f32 %v14936_v38, %v14956_v55  ;;  %v8310_v9 = vadd.f32 %v8309_v53, %v8308_v45  ;;  %v14978_v37 = vmul.f32 0.03125, %v8258_v50 }
 0x4f4   :  { %v8345_v10 = vmax.f32 %v8341_v6, 0.0  ;;  %v14981_v13 = vshrl.u32 %v8359_v25, 7  ;;  %v8328_v16 = vadd.f32 %v8327_v59, %v8326_v51  ;;  %v14983_v19 = vmul.f32 0.03125, %v8276_v56  ;;  %v8431_v51 = vld [vmem:[%s15096_s3] sm:$0xf] }
 0x4f5   :  { %v8347_v3 = vmax.f32 %v8343_v12, 0.0  ;;  %v8334_v17 = vmul.f32 0.03125, %v8310_v9  ;;  %v8338_v11 = vmul.f32 %v14978_v37, %v14978_v37  ;;  %v8384_v26 = vsub.f32 %v14878_v2, %v14978_v37 }
 0x4f6   :  { %v8349_v18 = vadd.f32 1e-05, %v8345_v10  ;;  %v8388_v38 = vsub.f32 %v14902_v14, %v14978_v37  ;;  %v8392_v20 = vsub.f32 %v14924_v31, %v14978_v37  ;;  %v8396_v25 = vsub.f32 %v14941_v41, %v14978_v37 }
 0x4f7   :  { %v8351_v21 = vadd.f32 1e-05, %v8347_v3  ;;  %v8342_v22 = vsub.f32 %v8334_v17, %v8338_v11  ;;  %v8336_v23 = vmul.f32 0.03125, %v8328_v16  ;;  %v8340_v27 = vmul.f32 %v14983_v19, %v14983_v19 }
 0x4f8   :  { %11457 = vrsqrt.f32 %v8349_v18  ;;  %v8386_v28 = vsub.f32 %v14880_v5, %v14983_v19  ;;  %v8390_v29 = vsub.f32 %v14904_v15, %v14983_v19  ;;  %v8394_v30 = vsub.f32 %v14926_v32, %v14983_v19 }
 0x4f9   :  { %11459 = vrsqrt.f32 %v8351_v21  ;;  %v8346_v34 = vmax.f32 %v8342_v22, 0.0  ;;  %v8344_v36 = vsub.f32 %v8336_v23, %v8340_v27  ;;  %v8398_v33 = vsub.f32 %v14943_v43, %v14983_v19 }
 0x4fa   :  { %v15006_v35 = vsub.s32 0, %v14981_v13  ;;  %v8369_v44 = vsub.s32 2, %v14981_v13  ;;  %v8365_v52 = vsub.s32 1, %v14981_v13  ;;  %v8373_v57 = vsub.s32 3, %v14981_v13 }
 0x4fb   :  { %v8350_v39 = vadd.f32 1e-05, %v8346_v34  ;;  %v8348_v40 = vmax.f32 %v8344_v36, 0.0 }
 0x4fc   :  { %v8362_v45 = vrot.slane %v8357_v42, %v15006_v35  ;;  %v8370_v47 = vrot.slane %v8357_v42, %v8369_v44  ;;  %v8436_v55 = vrot.slane %v8431_v51, %v15006_v35  ;;  %v8444_v59 = vrot.slane %v8431_v51, %v8369_v44 }
 0x4fd   :  { %11461 = vrsqrt.f32 %v8350_v39  ;;  %v8352_v46 = vadd.f32 1e-05, %v8348_v40  ;;  %v8366_v60 = vrot.slane %v8357_v42, %v8365_v52  ;;  %v8374_v27 = vrot.slane %v8357_v42, %v8373_v57 }
 0x4ff   :  { %11463 = vrsqrt.f32 %v8352_v46 }
 0x502   :  { %v11458_v48 = vpop.eup %11457 }
 0x503   :  { %v11460_v49 = vpop.eup %11459  ;;  %v8379_v50 = vmul.f32 %v11458_v48, %v8362_v45 }
 0x504   :  { %v8381_v53 = vmul.f32 %v11460_v49, %v8370_v47 }
 0x505   :  { %v8402_v54 = vrot.slane %v8379_v50, %v15006_v35 }
 0x506   :  { %v8410_v56 = vrot.slane %v8381_v53, %v15006_v35 }
 0x507   :  { %v8415_v4 = vmul.f32 %v8402_v54, %v8383_v58  ;;  %v8419_v1 = vmul.f32 %v8402_v54, %v8387_v61  ;;  %v8423_v6 = vmul.f32 %v8402_v54, %v8391_v62  ;;  %v8427_v12 = vmul.f32 %v8402_v54, %v8395_v63  ;;  %v11462_v17 = vpop.eup %11461 }
 0x508   :  { %v8417_v9 = vmul.f32 %v8410_v56, %v8385_v7  ;;  %v8421_v10 = vmul.f32 %v8410_v56, %v8389_v0  ;;  %v8425_v16 = vmul.f32 %v8410_v56, %v8393_v8  ;;  %v8429_v3 = vmul.f32 %v8410_v56, %v8397_v24 }
 0x509   :  { %v8453_v11 = vadd.f32 %v8436_v55, %v8415_v4  ;;  %v8457_v18 = vadd.f32 %v8436_v55, %v8419_v1  ;;  %v8461_v21 = vadd.f32 %v8436_v55, %v8423_v6  ;;  %v8465_v22 = vadd.f32 %v8436_v55, %v8427_v12  ;;  %v11464_v61 = vpop.eup %11463 }
 0x50a   :  { %v8455_v23 = vadd.f32 %v8444_v59, %v8417_v9  ;;  %v15021_v36 = vadd.f32 %v8444_v59, %v8421_v10  ;;  %v15023_v39 = vadd.f32 %v8444_v59, %v8425_v16  ;;  %v8380_v58 = vmul.f32 %v11462_v17, %v8366_v60 }
 0x50b   :  { %v8485_v34 = vmul.f32 0.2, %v8453_v11  ;;  %v8489_v62 = vmul.f32 0.2, %v8457_v18  ;;  %v8493_v63 = vmul.f32 0.2, %v8461_v21  ;;  %v15025_v0 = vadd.f32 %v8444_v59, %v8429_v3 }
 0x50c   :  { %v8497_v7 = vmul.f32 0.2, %v8465_v22  ;;  %vm8469_vm0 = vcmp.gt.f32.partialorder %v8453_v11, 0.0  ;;  %vm8473_vm1 = vcmp.gt.f32.partialorder %v8457_v18, 0.0  ;;  %vm8477_vm2 = vcmp.gt.f32.partialorder %v8461_v21, 0.0 }
 0x50d   :  { %vm8481_vm3 = vcmp.gt.f32.partialorder %v8465_v22, 0.0  ;;  %vm8471_vm4 = vcmp.gt.f32.partialorder %v8455_v23, 0.0  ;;  %v8440_v8 = vrot.slane %v8431_v51, %v8365_v52  ;;  %v8448_v24 = vrot.slane %v8431_v51, %v8373_v57 }
 0x50e   :  { %vm8475_vm5 = vcmp.gt.f32.partialorder %v15021_v36, 0.0  ;;  %v8487_v13 = vmul.f32 0.2, %v8455_v23  ;;  %v8406_v40 = vrot.slane %v8380_v58, %v15006_v35  ;;  %v8382_v42 = vmul.f32 %v11464_v61, %v8374_v27 }
 0x50f   :  { %v8501_v44 = vsel %vm8469_vm0, %v8453_v11, %v8485_v34  ;;  %v8505_v45 = vsel %vm8473_vm1, %v8457_v18, %v8489_v62  ;;  %v8509_v46 = vsel %vm8477_vm2, %v8461_v21, %v8493_v63  ;;  %v8513_v47 = vsel %vm8481_vm3, %v8465_v22, %v8497_v7 }
 0x510   :  { %vm8479_vm6 = vcmp.gt.f32.partialorder %v15023_v39, 0.0  ;;  %vm8483_vm7 = vcmp.gt.f32.partialorder %v15025_v0, 0.0  ;;  %v8491_v48 = vmul.f32 0.2, %v15021_v36  ;;  %v8416_v51 = vmul.f32 %v8406_v40, %v8384_v26 }
 0x511   :  { %v8420_v52 = vmul.f32 %v8406_v40, %v8388_v38  ;;  %v8424_v49 = vmul.f32 %v8406_v40, %v8392_v20  ;;  %v8495_v50 = vmul.f32 0.2, %v15023_v39  ;;  %v8499_v53 = vmul.f32 0.2, %v15025_v0 }
 0x512   :  { %v8428_v54 = vmul.f32 %v8406_v40, %v8396_v25  ;;  %v8414_v55 = vrot.slane %v8382_v42, %v15006_v35  ;;  %v8503_v2 = vsel %vm8471_vm4, %v8455_v23, %v8487_v13  ;;  %v8454_v26 = vadd.f32 %v8440_v8, %v8416_v51 }
 0x513   :  { %v8458_v56 = vadd.f32 %v8440_v8, %v8420_v52  ;;  %v8462_v14 = vadd.f32 %v8440_v8, %v8424_v49  ;;  %v8507_v9 = vsel %vm8475_vm5, %v15021_v36, %v8491_v48  ;;  %v8515_v16 = vsel %vm8483_vm7, %v15025_v0, %v8499_v53 }
 0x514   :  { %v8466_v38 = vadd.f32 %v8440_v8, %v8428_v54  ;;  %v8418_v31 = vmul.f32 %v8414_v55, %v8386_v28  ;;  %v8422_v20 = vmul.f32 %v8414_v55, %v8390_v29  ;;  %v8426_v41 = vmul.f32 %v8414_v55, %v8394_v30 }
 0x515   :  { %vm8470_vm8 = vcmp.gt.f32.partialorder %v8454_v26, 0.0  ;;  %vm8474_vm9 = vcmp.gt.f32.partialorder %v8458_v56, 0.0  ;;  %vm8478_vm10 = vcmp.gt.f32.partialorder %v8462_v14, 0.0  ;;  %v8486_v37 = vmul.f32 0.2, %v8454_v26 }
 0x516   :  { %vm8482_vm11 = vcmp.gt.f32.partialorder %v8466_v38, 0.0  ;;  %v8490_v25 = vmul.f32 0.2, %v8458_v56  ;;  %v8494_v35 = vmul.f32 0.2, %v8462_v14  ;;  %v8430_v5 = vmul.f32 %v8414_v55, %v8398_v33 }
 0x517   :  { %v8498_v28 = vmul.f32 0.2, %v8466_v38  ;;  %v8502_v59 = vsel %vm8470_vm8, %v8454_v26, %v8486_v37  ;;  %v8456_v60 = vadd.f32 %v8448_v24, %v8418_v31  ;;  %v8460_v15 = vadd.f32 %v8448_v24, %v8422_v20 }
 0x518   :  { %v8506_v29 = vsel %vm8474_vm9, %v8458_v56, %v8490_v25  ;;  %v8510_v57 = vsel %vm8478_vm10, %v8462_v14, %v8494_v35  ;;  %v9673_v4 = vpack.c.bf16 %v8502_v59, %v8501_v44  ;;  %v8464_v32 = vadd.f32 %v8448_v24, %v8426_v41 }
 0x519   :  { %v8514_v30 = vsel %vm8482_vm11, %v8466_v38, %v8498_v28  ;;  %v9675_v1 = vpack.c.bf16 %v8506_v29, %v8505_v45  ;;  %v9677_v6 = vpack.c.bf16 %v8510_v57, %v8509_v46  ;;  %v8468_v12 = vadd.f32 %v8448_v24, %v8430_v5 }
 0x51a   :  { %v9679_v10 = vpack.c.bf16 %v8514_v30, %v8513_v47  ;;  %8565 = vst [vmem:[%s15097_s4] sm:$0xff] %v9673_v4  ;;  %vm8472_vm12 = vcmp.gt.f32.partialorder %v8456_v60, 0.0  ;;  %vm8476_vm13 = vcmp.gt.f32.partialorder %v8460_v15, 0.0  ;;  %vm8480_vm14 = vcmp.gt.f32.partialorder %v8464_v32, 0.0 }
 0x51b   :  { %8567 = vst [vmem:[%s15097_s4 + $0x10] sm:$0xff] %v9675_v1  ;;  %8569 = vst [vmem:[%s15097_s4 + $0x20] sm:$0xff] %v9677_v6  ;;  %vm8484_vm15 = vcmp.gt.f32.partialorder %v8468_v12, 0.0  ;;  %v8488_v43 = vmul.f32 0.2, %v8456_v60  ;;  %v8511_v33 = vsel %vm8479_vm6, %v15023_v39, %v8495_v50 }
 0x51c   :  { %v8492_v19 = vmul.f32 0.2, %v8460_v15  ;;  %8571 = vst [vmem:[%s15097_s4 + $0x30] sm:$0xff] %v9679_v10  ;;  %v8496_v3 = vmul.f32 0.2, %v8464_v32 }
 0x51d   :  { %v8500_v17 = vmul.f32 0.2, %v8468_v12  ;;  %v8504_v11 = vsel %vm8472_vm12, %v8456_v60, %v8488_v43 }
 0x51e   :  { %v8508_v18 = vsel %vm8476_vm13, %v8460_v15, %v8492_v19  ;;  %v8512_v21 = vsel %vm8480_vm14, %v8464_v32, %v8496_v3  ;;  %v9674_v23 = vpack.c.bf16 %v8504_v11, %v8503_v2 }
 0x51f   :  { %v8516_v22 = vsel %vm8484_vm15, %v8468_v12, %v8500_v17  ;;  %v9676_v27 = vpack.c.bf16 %v8508_v18, %v8507_v9  ;;  %v9678_v34 = vpack.c.bf16 %v8512_v21, %v8511_v33 }
 0x520   :  { %v9680_v36 = vpack.c.bf16 %v8516_v22, %v8515_v16  ;;  %8566 = vst [vmem:[%s15097_s4 + $0x8] sm:$0xff] %v9674_v23 }
 0x521   :  { %8568 = vst [vmem:[%s15097_s4 + $0x18] sm:$0xff] %v9676_v27  ;;  %8570 = vst [vmem:[%s15097_s4 + $0x28] sm:$0xff] %v9678_v34 }
 0x522   :  { %8572 = vst [vmem:[%s15097_s4 + $0x38] sm:$0xff] %v9680_v36 }

</bundles_post_ra>
